<compile_context>
chip_gen: v6e
topology: v6e:2x2x1
jax: 0.10.0
libtpu: 0.0.40
codegen_flags: <defaults>
</compile_context>

<pallas_src>
import jax
import jax.numpy as jnp
from jax.experimental import pallas as pl
from jax.experimental.pallas import tpu as pltpu


def _round_up(x, m):
    return (x + m - 1) // m * m


# ----------------------------------------------------------------------------
# Pallas kernel: full-K matmul with fused BatchNorm-shift + SiLU epilogue
# ----------------------------------------------------------------------------
def _conv_mm_kernel(x_ref, w_ref, shift_ref, o_ref):
    # bf16 @ bf16 -> f32 accumulation on the MXU.
    y = jnp.dot(x_ref[...], w_ref[...], preferred_element_type=jnp.float32)
    y = y + shift_ref[...]                                   # folded BN shift (f32)
    o_ref[...] = (y * jax.nn.sigmoid(y)).astype(o_ref.dtype)  # SiLU -> bf16 store


def _choose_tn(Np):
    """Lane-dense N tile; prefer >=2 N blocks (v7x 2-TC sharding), cap at 512."""
    if Np < 256:
        return Np                                  # already padded to 128
    for cand in (512, 256, 128):
        if cand <= Np // 2 and Np % cand == 0:
            return cand
    return Np


def _choose_tm(Mp, n_blocks_n):
    """bf16-sublane-aligned M tile; if N has a single block, split M instead."""
    if n_blocks_n >= 2 or Mp <= 16:
        tm = min(256, Mp)
    else:
        tm = max(16, min(256, (Mp // 2) // 16 * 16))
    while Mp % tm:
        tm -= 16
    return tm


def _fused_matmul_bn_silu(xc_bf16, wp_bf16, shift_f32, cout):
    """(M,K)bf16 @ (Kp,Np)bf16 + shift -> SiLU -> (M,cout) bf16."""
    M, K = xc_bf16.shape
    Kp, Np = wp_bf16.shape

    Mp = _round_up(M, 16)
    tn = _choose_tn(Np)
    tm = _choose_tm(Mp, Np // tn)

    if (Mp, Kp) != (M, K):
        xc_bf16 = jnp.pad(xc_bf16, ((0, Mp - M), (0, Kp - K)))

    out = pl.pallas_call(
        _conv_mm_kernel,
        out_shape=jax.ShapeDtypeStruct((Mp, Np), jnp.bfloat16),
        grid_spec=pltpu.PrefetchScalarGridSpec(
            num_scalar_prefetch=0,
            grid=(Mp // tm, Np // tn),
            in_specs=[
                pl.BlockSpec((tm, Kp), lambda i, j: (i, 0)),
                pl.BlockSpec((Kp, tn), lambda i, j: (0, j)),
                pl.BlockSpec((1, tn), lambda i, j: (0, j)),
            ],
            out_specs=pl.BlockSpec((tm, tn), lambda i, j: (i, j)),
        ),
        compiler_params=pltpu.CompilerParams(
            dimension_semantics=("parallel", "parallel"),
            # Let XLA fuse the im2col gather / pad into the pallas input so the
            # 9x-inflated patch matrix is not materialized in HBM.
            allow_input_fusion=[True, False, False],
        ),
    )(xc_bf16, wp_bf16, shift_f32)

    if Mp != M or Np != cout:
        out = out[:M, :cout]
    return out


# ----------------------------------------------------------------------------
# Conv3x3(+BN+SiLU) layer: im2col glue in JAX, hot path in the Pallas kernel
# ----------------------------------------------------------------------------
def _im2col(x, stride):
    """x: (B,H,W,C) NHWC bf16, 3x3 kernel, pad=1."""
    B, H, W, C = x.shape
    xp = jnp.pad(x, ((0, 0), (1, 1), (1, 1), (0, 0)))
    Ho = (H + 2 - 3) // stride + 1
    Wo = (W + 2 - 3) // stride + 1
    cols = []
    for kh in range(3):
        for kw in range(3):
            cols.append(xp[:, kh:kh + (Ho - 1) * stride + 1:stride,
                           kw:kw + (Wo - 1) * stride + 1:stride, :])
    p = jnp.stack(cols, axis=3)                   # (B, Ho, Wo, 9, C)
    return p.reshape(B * Ho * Wo, 9 * C), (B, Ho, Wo)


def conv_bn_silu(x, layer):
    """x: NHWC bf16 activation -> NHWC bf16 output."""
    xc, (B, Ho, Wo) = _im2col(x, layer["stride"])
    y = _fused_matmul_bn_silu(xc, layer["wp"], layer["shift"], layer["cout"])
    return y.reshape(B, Ho, Wo, layer["cout"])


def prepare_layer(layer):
    """Fold BN scale into the weights, pad/reshape once, cast to bf16."""
    w = layer["w"]                                # (3, 3, Cin, Cout)
    cin, cout = w.shape[2], w.shape[3]
    K = 9 * cin
    eps = 1e-5
    scale = layer["gamma"] / jnp.sqrt(layer["var"] + eps)
    shift = layer["beta"] + (layer["bias"] - layer["mean"]) * scale
    w2 = w.reshape(K, cout) * scale[None, :]      # fold BN scale (f32)
    Kp = _round_up(K, 16)                         # bf16 sublane multiple only
    Np = _round_up(cout, 128)                     # lane-dense output columns
    wp = jnp.pad(w2, ((0, Kp - K), (0, Np - cout))).astype(jnp.bfloat16)
    shift_p = jnp.pad(shift, (0, Np - cout)).reshape(1, Np).astype(jnp.float32)
    return dict(wp=wp, shift=shift_p, stride=layer["stride"], cout=cout)


# ----------------------------------------------------------------------------
# YeastBackbone
# ----------------------------------------------------------------------------
def init_params(key, in_channels=3):
    cfg = [(in_channels, 32, 1), (32, 64, 2),      # stage1
           (64, 128, 2), (128, 256, 2),            # stage2
           (256, 512, 2), (512, 1024, 2)]          # stage3
    layers = []
    for cin, cout, stride in cfg:
        key, k1, k2, k3, k4, k5, k6 = jax.random.split(key, 7)
        layers.append(dict(
            w=jax.random.normal(k1, (3, 3, cin, cout), jnp.float32) * 0.05,
            bias=jax.random.normal(k2, (cout,), jnp.float32) * 0.01,
            gamma=1.0 + 0.1 * jax.random.normal(k3, (cout,), jnp.float32),
            beta=0.1 * jax.random.normal(k4, (cout,), jnp.float32),
            mean=0.01 * jax.random.normal(k5, (cout,), jnp.float32),
            var=1.0 + 0.1 * jnp.abs(jax.random.normal(k6, (cout,), jnp.float32)),
            stride=stride,
        ))
    return [layers[0:2], layers[2:4], layers[4:6]]


def yeast_backbone_forward(x_nchw, prepared_stages):
    """Returns [p3, p4, p5] feature maps in NCHW f32, matching the PyTorch module."""
    x = jnp.transpose(x_nchw, (0, 2, 3, 1)).astype(jnp.bfloat16)   # NCHW -> NHWC bf16
    outs = []
    for stage in prepared_stages:
        for layer in stage:
            x = conv_bn_silu(x, layer)                             # bf16 in/out
        outs.append(jnp.transpose(x, (0, 3, 1, 2)).astype(jnp.float32))
    return outs


def make_forward(stages_params):
    prepared = [[prepare_layer(l) for l in stage] for stage in stages_params]

    @jax.jit
    def forward(x_nchw):
        return yeast_backbone_forward(x_nchw, prepared)

    return forward


# ----------------------------------------------------------------------------
# Pure-JAX f32 reference (conv + BN(eval) + SiLU) for a loose numeric check
# ----------------------------------------------------------------------------
def reference_forward(x_nchw, stages_params):
    x = jnp.transpose(x_nchw, (0, 2, 3, 1))
    eps = 1e-5
    outs = []
    for stage in stages_params:
        for p in stage:
            y = jax.lax.conv_general_dilated(
                x, p["w"], window_strides=(p["stride"], p["stride"]),
                padding=((1, 1), (1, 1)),
                dimension_numbers=("NHWC", "HWIO", "NHWC"))
            y = y + p["bias"]
            scale = p["gamma"] / jnp.sqrt(p["var"] + eps)
            y = (y - p["mean"]) * scale + p["beta"]
            x = y * jax.nn.sigmoid(y)
        outs.append(jnp.transpose(x, (0, 3, 1, 2)))
    return outs


if __name__ == "__main__":
    key = jax.random.PRNGKey(0)
    kx, kp = jax.random.split(key)
    x = jax.random.normal(kx, (2, 3, 16, 16), jnp.float32)   # [B, 3, H, W]
    stages = init_params(kp, in_channels=3)

    forward = make_forward(stages)
    p3, p4, p5 = forward(x)
    jax.block_until_ready((p3, p4, p5))

    assert p3.shape == (2, 64, 8, 8), p3.shape
    assert p4.shape == (2, 256, 2, 2), p4.shape
    assert p5.shape == (2, 1024, 1, 1), p5.shape
    assert p3.dtype == jnp.float32
    assert all(bool(jnp.all(jnp.isfinite(t))) for t in (p3, p4, p5))

    # Loose numeric check vs f32 reference (bf16 MXU path => expect ~1% drift).
    refs = reference_forward(x, stages)
    for got, ref in zip((p3, p4, p5), refs):
        denom = jnp.max(jnp.abs(ref)) + 1e-6
        rel = jnp.max(jnp.abs(got - ref)) / denom
        assert bool(rel < 0.1), f"max relative-to-max error {rel}"

    print("KERNEL_OK")
</pallas_src>

<mosaic_0001>
module attributes {stable_mosaic.version = 11 : i64} {
  func.func @_conv_mm_kernel(%arg0: i32, %arg1: i32, %arg2: memref<256x32xbf16, #tpu.memory_space<vmem>>, %arg3: memref<32x128xbf16, #tpu.memory_space<vmem>>, %arg4: memref<1x128xf32, #tpu.memory_space<vmem>>, %arg5: memref<256x128xbf16, #tpu.memory_space<vmem>>) attributes {dimension_semantics = [#tpu.dimension_semantics<parallel>, #tpu.dimension_semantics<parallel>], iteration_bounds = array<i64: 2, 1>, scalar_prefetch = 0 : i64, scratch_operands = 0 : i64, tpu.core_type = #tpu.core_type<tc>, window_params = [{transform_indices = @transform_0, window_bounds = array<i64: 256, 32>}, {transform_indices = @transform_1, window_bounds = array<i64: 32, 128>}, {transform_indices = @transform_2, window_bounds = array<i64: 1, 128>}, {transform_indices = @transform_3, window_bounds = array<i64: 256, 128>}]} {
    %c0 = arith.constant 0 : index
    %c0_0 = arith.constant 0 : index
    %0 = vector.load %arg2[%c0, %c0_0] : memref<256x32xbf16, #tpu.memory_space<vmem>>, vector<256x32xbf16>
    %c0_1 = arith.constant 0 : index
    %c0_2 = arith.constant 0 : index
    %1 = vector.load %arg3[%c0_1, %c0_2] : memref<32x128xbf16, #tpu.memory_space<vmem>>, vector<32x128xbf16>
    %cst = arith.constant dense<0.000000e+00> : vector<256x128xf32>
    %2 = tpu.matmul %0, %1, %cst {dimension_numbers = #tpu.dot_dimension_numbers<[1], [0], [0], [1], [0, 0, 1, 1], [], []>} : vector<256x32xbf16>, vector<32x128xbf16>, vector<256x128xf32> -> vector<256x128xf32>
    %c0_3 = arith.constant 0 : index
    %c0_4 = arith.constant 0 : index
    %3 = vector.load %arg4[%c0_3, %c0_4] : memref<1x128xf32, #tpu.memory_space<vmem>>, vector<1x128xf32>
    %4 = vector.broadcast %3 : vector<1x128xf32> to vector<256x128xf32>
    %5 = arith.addf %2, %4 : vector<256x128xf32>
    %6 = arith.negf %5 : vector<256x128xf32>
    %7 = math.exp %6 : vector<256x128xf32>
    %cst_5 = arith.constant 1.000000e+00 : f32
    %8 = vector.broadcast %cst_5 : f32 to vector<256x128xf32>
    %9 = arith.addf %8, %7 : vector<256x128xf32>
    %10 = arith.divf %8, %9 : vector<256x128xf32>
    %11 = arith.mulf %5, %10 : vector<256x128xf32>
    %12 = arith.truncf %11 : vector<256x128xf32> to vector<256x128xbf16>
    %c0_6 = arith.constant 0 : index
    %c0_7 = arith.constant 0 : index
    %13 = vector.load %arg5[%c0_6, %c0_7] : memref<256x128xbf16, #tpu.memory_space<vmem>>, vector<256x128xbf16>
    tpu.vector_store %arg5[%c0_6, %c0_7], %12 {strides = array<i32>} : memref<256x128xbf16, #tpu.memory_space<vmem>>, vector<256x128xbf16>,
    return
  }
  func.func @transform_0(%arg0: i32, %arg1: i32) -> (i32, i32) {
    %c0_i32 = arith.constant 0 : i32
    %c0_i32_0 = arith.constant 0 : i32
    return %arg0, %c0_i32 : i32, i32
  }
  func.func @transform_1(%arg0: i32, %arg1: i32) -> (i32, i32) {
    %c0_i32 = arith.constant 0 : i32
    %c0_i32_0 = arith.constant 0 : i32
    return %c0_i32, %arg1 : i32, i32
  }
  func.func @transform_2(%arg0: i32, %arg1: i32) -> (i32, i32) {
    %c0_i32 = arith.constant 0 : i32
    %c0_i32_0 = arith.constant 0 : i32
    return %c0_i32, %arg1 : i32, i32
  }
  func.func @transform_3(%arg0: i32, %arg1: i32) -> (i32, i32) {
    %c0_i32 = arith.constant 0 : i32
    return %arg0, %arg1 : i32, i32
  }
}

module attributes {stable_mosaic.version = 11 : i64} {
  func.func @_conv_mm_kernel(%arg0: i32, %arg1: i32, %arg2: memref<64x288xbf16, #tpu.memory_space<vmem>>, %arg3: memref<288x128xbf16, #tpu.memory_space<vmem>>, %arg4: memref<1x128xf32, #tpu.memory_space<vmem>>, %arg5: memref<64x128xbf16, #tpu.memory_space<vmem>>) attributes {dimension_semantics = [#tpu.dimension_semantics<parallel>, #tpu.dimension_semantics<parallel>], iteration_bounds = array<i64: 2, 1>, scalar_prefetch = 0 : i64, scratch_operands = 0 : i64, tpu.core_type = #tpu.core_type<tc>, window_params = [{transform_indices = @transform_0, window_bounds = array<i64: 64, 288>}, {transform_indices = @transform_1, window_bounds = array<i64: 288, 128>}, {transform_indices = @transform_2, window_bounds = array<i64: 1, 128>}, {transform_indices = @transform_3, window_bounds = array<i64: 64, 128>}]} {
    %c0 = arith.constant 0 : index
    %c0_0 = arith.constant 0 : index
    %0 = vector.load %arg2[%c0, %c0_0] : memref<64x288xbf16, #tpu.memory_space<vmem>>, vector<64x288xbf16>
    %c0_1 = arith.constant 0 : index
    %c0_2 = arith.constant 0 : index
    %1 = vector.load %arg3[%c0_1, %c0_2] : memref<288x128xbf16, #tpu.memory_space<vmem>>, vector<288x128xbf16>
    %cst = arith.constant dense<0.000000e+00> : vector<64x128xf32>
    %2 = tpu.matmul %0, %1, %cst {dimension_numbers = #tpu.dot_dimension_numbers<[1], [0], [0], [1], [0, 0, 1, 1], [], []>} : vector<64x288xbf16>, vector<288x128xbf16>, vector<64x128xf32> -> vector<64x128xf32>
    %c0_3 = arith.constant 0 : index
    %c0_4 = arith.constant 0 : index
    %3 = vector.load %arg4[%c0_3, %c0_4] : memref<1x128xf32, #tpu.memory_space<vmem>>, vector<1x128xf32>
    %4 = vector.broadcast %3 : vector<1x128xf32> to vector<64x128xf32>
    %5 = arith.addf %2, %4 : vector<64x128xf32>
    %6 = arith.negf %5 : vector<64x128xf32>
    %7 = math.exp %6 : vector<64x128xf32>
    %cst_5 = arith.constant 1.000000e+00 : f32
    %8 = vector.broadcast %cst_5 : f32 to vector<64x128xf32>
    %9 = arith.addf %8, %7 : vector<64x128xf32>
    %10 = arith.divf %8, %9 : vector<64x128xf32>
    %11 = arith.mulf %5, %10 : vector<64x128xf32>
    %12 = arith.truncf %11 : vector<64x128xf32> to vector<64x128xbf16>
    %c0_6 = arith.constant 0 : index
    %c0_7 = arith.constant 0 : index
    %13 = vector.load %arg5[%c0_6, %c0_7] : memref<64x128xbf16, #tpu.memory_space<vmem>>, vector<64x128xbf16>
    tpu.vector_store %arg5[%c0_6, %c0_7], %12 {strides = array<i32>} : memref<64x128xbf16, #tpu.memory_space<vmem>>, vector<64x128xbf16>,
    return
  }
  func.func @transform_0(%arg0: i32, %arg1: i32) -> (i32, i32) {
    %c0_i32 = arith.constant 0 : i32
    %c0_i32_0 = arith.constant 0 : i32
    return %arg0, %c0_i32 : i32, i32
  }
  func.func @transform_1(%arg0: i32, %arg1: i32) -> (i32, i32) {
    %c0_i32 = arith.constant 0 : i32
    %c0_i32_0 = arith.constant 0 : i32
    return %c0_i32, %arg1 : i32, i32
  }
  func.func @transform_2(%arg0: i32, %arg1: i32) -> (i32, i32) {
    %c0_i32 = arith.constant 0 : i32
    %c0_i32_0 = arith.constant 0 : i32
    return %c0_i32, %arg1 : i32, i32
  }
  func.func @transform_3(%arg0: i32, %arg1: i32) -> (i32, i32) {
    %c0_i32 = arith.constant 0 : i32
    return %arg0, %arg1 : i32, i32
  }
}

module attributes {stable_mosaic.version = 11 : i64} {
  func.func @_conv_mm_kernel(%arg0: i32, %arg1: i32, %arg2: memref<16x576xbf16, #tpu.memory_space<vmem>>, %arg3: memref<576x128xbf16, #tpu.memory_space<vmem>>, %arg4: memref<1x128xf32, #tpu.memory_space<vmem>>, %arg5: memref<16x128xbf16, #tpu.memory_space<vmem>>) attributes {dimension_semantics = [#tpu.dimension_semantics<parallel>, #tpu.dimension_semantics<parallel>], iteration_bounds = array<i64: 2, 1>, scalar_prefetch = 0 : i64, scratch_operands = 0 : i64, tpu.core_type = #tpu.core_type<tc>, window_params = [{transform_indices = @transform_0, window_bounds = array<i64: 16, 576>}, {transform_indices = @transform_1, window_bounds = array<i64: 576, 128>}, {transform_indices = @transform_2, window_bounds = array<i64: 1, 128>}, {transform_indices = @transform_3, window_bounds = array<i64: 16, 128>}]} {
    %c0 = arith.constant 0 : index
    %c0_0 = arith.constant 0 : index
    %0 = vector.load %arg2[%c0, %c0_0] : memref<16x576xbf16, #tpu.memory_space<vmem>>, vector<16x576xbf16>
    %c0_1 = arith.constant 0 : index
    %c0_2 = arith.constant 0 : index
    %1 = vector.load %arg3[%c0_1, %c0_2] : memref<576x128xbf16, #tpu.memory_space<vmem>>, vector<576x128xbf16>
    %cst = arith.constant dense<0.000000e+00> : vector<16x128xf32>
    %2 = tpu.matmul %0, %1, %cst {dimension_numbers = #tpu.dot_dimension_numbers<[1], [0], [0], [1], [0, 0, 1, 1], [], []>} : vector<16x576xbf16>, vector<576x128xbf16>, vector<16x128xf32> -> vector<16x128xf32>
    %c0_3 = arith.constant 0 : index
    %c0_4 = arith.constant 0 : index
    %3 = vector.load %arg4[%c0_3, %c0_4] : memref<1x128xf32, #tpu.memory_space<vmem>>, vector<1x128xf32>
    %4 = vector.broadcast %3 : vector<1x128xf32> to vector<16x128xf32>
    %5 = arith.addf %2, %4 : vector<16x128xf32>
    %6 = arith.negf %5 : vector<16x128xf32>
    %7 = math.exp %6 : vector<16x128xf32>
    %cst_5 = arith.constant 1.000000e+00 : f32
    %8 = vector.broadcast %cst_5 : f32 to vector<16x128xf32>
    %9 = arith.addf %8, %7 : vector<16x128xf32>
    %10 = arith.divf %8, %9 : vector<16x128xf32>
    %11 = arith.mulf %5, %10 : vector<16x128xf32>
    %12 = arith.truncf %11 : vector<16x128xf32> to vector<16x128xbf16>
    %c0_6 = arith.constant 0 : index
    %c0_7 = arith.constant 0 : index
    %13 = vector.load %arg5[%c0_6, %c0_7] : memref<16x128xbf16, #tpu.memory_space<vmem>>, vector<16x128xbf16>
    tpu.vector_store %arg5[%c0_6, %c0_7], %12 {strides = array<i32>} : memref<16x128xbf16, #tpu.memory_space<vmem>>, vector<16x128xbf16>,
    return
  }
  func.func @transform_0(%arg0: i32, %arg1: i32) -> (i32, i32) {
    %c0_i32 = arith.constant 0 : i32
    %c0_i32_0 = arith.constant 0 : i32
    return %arg0, %c0_i32 : i32, i32
  }
  func.func @transform_1(%arg0: i32, %arg1: i32) -> (i32, i32) {
    %c0_i32 = arith.constant 0 : i32
    %c0_i32_0 = arith.constant 0 : i32
    return %c0_i32, %arg1 : i32, i32
  }
  func.func @transform_2(%arg0: i32, %arg1: i32) -> (i32, i32) {
    %c0_i32 = arith.constant 0 : i32
    %c0_i32_0 = arith.constant 0 : i32
    return %c0_i32, %arg1 : i32, i32
  }
  func.func @transform_3(%arg0: i32, %arg1: i32) -> (i32, i32) {
    %c0_i32 = arith.constant 0 : i32
    return %arg0, %arg1 : i32, i32
  }
}

module attributes {stable_mosaic.version = 11 : i64} {
  func.func @_conv_mm_kernel(%arg0: i32, %arg1: i32, %arg2: memref<16x1152xbf16, #tpu.memory_space<vmem>>, %arg3: memref<1152x128xbf16, #tpu.memory_space<vmem>>, %arg4: memref<1x128xf32, #tpu.memory_space<vmem>>, %arg5: memref<16x128xbf16, #tpu.memory_space<vmem>>) attributes {dimension_semantics = [#tpu.dimension_semantics<parallel>, #tpu.dimension_semantics<parallel>], iteration_bounds = array<i64: 1, 2>, scalar_prefetch = 0 : i64, scratch_operands = 0 : i64, tpu.core_type = #tpu.core_type<tc>, window_params = [{transform_indices = @transform_0, window_bounds = array<i64: 16, 1152>}, {transform_indices = @transform_1, window_bounds = array<i64: 1152, 128>}, {transform_indices = @transform_2, window_bounds = array<i64: 1, 128>}, {transform_indices = @transform_3, window_bounds = array<i64: 16, 128>}]} {
    %c0 = arith.constant 0 : index
    %c0_0 = arith.constant 0 : index
    %0 = vector.load %arg2[%c0, %c0_0] : memref<16x1152xbf16, #tpu.memory_space<vmem>>, vector<16x1152xbf16>
    %c0_1 = arith.constant 0 : index
    %c0_2 = arith.constant 0 : index
    %1 = vector.load %arg3[%c0_1, %c0_2] : memref<1152x128xbf16, #tpu.memory_space<vmem>>, vector<1152x128xbf16>
    %cst = arith.constant dense<0.000000e+00> : vector<16x128xf32>
    %2 = tpu.matmul %0, %1, %cst {dimension_numbers = #tpu.dot_dimension_numbers<[1], [0], [0], [1], [0, 0, 1, 1], [], []>} : vector<16x1152xbf16>, vector<1152x128xbf16>, vector<16x128xf32> -> vector<16x128xf32>
    %c0_3 = arith.constant 0 : index
    %c0_4 = arith.constant 0 : index
    %3 = vector.load %arg4[%c0_3, %c0_4] : memref<1x128xf32, #tpu.memory_space<vmem>>, vector<1x128xf32>
    %4 = vector.broadcast %3 : vector<1x128xf32> to vector<16x128xf32>
    %5 = arith.addf %2, %4 : vector<16x128xf32>
    %6 = arith.negf %5 : vector<16x128xf32>
    %7 = math.exp %6 : vector<16x128xf32>
    %cst_5 = arith.constant 1.000000e+00 : f32
    %8 = vector.broadcast %cst_5 : f32 to vector<16x128xf32>
    %9 = arith.addf %8, %7 : vector<16x128xf32>
    %10 = arith.divf %8, %9 : vector<16x128xf32>
    %11 = arith.mulf %5, %10 : vector<16x128xf32>
    %12 = arith.truncf %11 : vector<16x128xf32> to vector<16x128xbf16>
    %c0_6 = arith.constant 0 : index
    %c0_7 = arith.constant 0 : index
    %13 = vector.load %arg5[%c0_6, %c0_7] : memref<16x128xbf16, #tpu.memory_space<vmem>>, vector<16x128xbf16>
    tpu.vector_store %arg5[%c0_6, %c0_7], %12 {strides = array<i32>} : memref<16x128xbf16, #tpu.memory_space<vmem>>, vector<16x128xbf16>,
    return
  }
  func.func @transform_0(%arg0: i32, %arg1: i32) -> (i32, i32) {
    %c0_i32 = arith.constant 0 : i32
    %c0_i32_0 = arith.constant 0 : i32
    return %arg0, %c0_i32 : i32, i32
  }
  func.func @transform_1(%arg0: i32, %arg1: i32) -> (i32, i32) {
    %c0_i32 = arith.constant 0 : i32
    %c0_i32_0 = arith.constant 0 : i32
    return %c0_i32, %arg1 : i32, i32
  }
  func.func @transform_2(%arg0: i32, %arg1: i32) -> (i32, i32) {
    %c0_i32 = arith.constant 0 : i32
    %c0_i32_0 = arith.constant 0 : i32
    return %c0_i32, %arg1 : i32, i32
  }
  func.func @transform_3(%arg0: i32, %arg1: i32) -> (i32, i32) {
    %c0_i32 = arith.constant 0 : i32
    return %arg0, %arg1 : i32, i32
  }
}

module attributes {stable_mosaic.version = 11 : i64} {
  func.func @_conv_mm_kernel(%arg0: i32, %arg1: i32, %arg2: memref<16x2304xbf16, #tpu.memory_space<vmem>>, %arg3: memref<2304x256xbf16, #tpu.memory_space<vmem>>, %arg4: memref<1x256xf32, #tpu.memory_space<vmem>>, %arg5: memref<16x256xbf16, #tpu.memory_space<vmem>>) attributes {dimension_semantics = [#tpu.dimension_semantics<parallel>, #tpu.dimension_semantics<parallel>], iteration_bounds = array<i64: 1, 2>, scalar_prefetch = 0 : i64, scratch_operands = 0 : i64, tpu.core_type = #tpu.core_type<tc>, window_params = [{transform_indices = @transform_0, window_bounds = array<i64: 16, 2304>}, {transform_indices = @transform_1, window_bounds = array<i64: 2304, 256>}, {transform_indices = @transform_2, window_bounds = array<i64: 1, 256>}, {transform_indices = @transform_3, window_bounds = array<i64: 16, 256>}]} {
    %c0 = arith.constant 0 : index
    %c0_0 = arith.constant 0 : index
    %0 = vector.load %arg2[%c0, %c0_0] : memref<16x2304xbf16, #tpu.memory_space<vmem>>, vector<16x2304xbf16>
    %c0_1 = arith.constant 0 : index
    %c0_2 = arith.constant 0 : index
    %1 = vector.load %arg3[%c0_1, %c0_2] : memref<2304x256xbf16, #tpu.memory_space<vmem>>, vector<2304x256xbf16>
    %cst = arith.constant dense<0.000000e+00> : vector<16x256xf32>
    %2 = tpu.matmul %0, %1, %cst {dimension_numbers = #tpu.dot_dimension_numbers<[1], [0], [0], [1], [0, 0, 1, 1], [], []>} : vector<16x2304xbf16>, vector<2304x256xbf16>, vector<16x256xf32> -> vector<16x256xf32>
    %c0_3 = arith.constant 0 : index
    %c0_4 = arith.constant 0 : index
    %3 = vector.load %arg4[%c0_3, %c0_4] : memref<1x256xf32, #tpu.memory_space<vmem>>, vector<1x256xf32>
    %4 = vector.broadcast %3 : vector<1x256xf32> to vector<16x256xf32>
    %5 = arith.addf %2, %4 : vector<16x256xf32>
    %6 = arith.negf %5 : vector<16x256xf32>
    %7 = math.exp %6 : vector<16x256xf32>
    %cst_5 = arith.constant 1.000000e+00 : f32
    %8 = vector.broadcast %cst_5 : f32 to vector<16x256xf32>
    %9 = arith.addf %8, %7 : vector<16x256xf32>
    %10 = arith.divf %8, %9 : vector<16x256xf32>
    %11 = arith.mulf %5, %10 : vector<16x256xf32>
    %12 = arith.truncf %11 : vector<16x256xf32> to vector<16x256xbf16>
    %c0_6 = arith.constant 0 : index
    %c0_7 = arith.constant 0 : index
    %13 = vector.load %arg5[%c0_6, %c0_7] : memref<16x256xbf16, #tpu.memory_space<vmem>>, vector<16x256xbf16>
    tpu.vector_store %arg5[%c0_6, %c0_7], %12 {strides = array<i32>} : memref<16x256xbf16, #tpu.memory_space<vmem>>, vector<16x256xbf16>,
    return
  }
  func.func @transform_0(%arg0: i32, %arg1: i32) -> (i32, i32) {
    %c0_i32 = arith.constant 0 : i32
    %c0_i32_0 = arith.constant 0 : i32
    return %arg0, %c0_i32 : i32, i32
  }
  func.func @transform_1(%arg0: i32, %arg1: i32) -> (i32, i32) {
    %c0_i32 = arith.constant 0 : i32
    %c0_i32_0 = arith.constant 0 : i32
    return %c0_i32, %arg1 : i32, i32
  }
  func.func @transform_2(%arg0: i32, %arg1: i32) -> (i32, i32) {
    %c0_i32 = arith.constant 0 : i32
    %c0_i32_0 = arith.constant 0 : i32
    return %c0_i32, %arg1 : i32, i32
  }
  func.func @transform_3(%arg0: i32, %arg1: i32) -> (i32, i32) {
    %c0_i32 = arith.constant 0 : i32
    return %arg0, %arg1 : i32, i32
  }
}

module attributes {stable_mosaic.version = 11 : i64} {
  func.func @_conv_mm_kernel(%arg0: i32, %arg1: i32, %arg2: memref<16x4608xbf16, #tpu.memory_space<vmem>>, %arg3: memref<4608x512xbf16, #tpu.memory_space<vmem>>, %arg4: memref<1x512xf32, #tpu.memory_space<vmem>>, %arg5: memref<16x512xbf16, #tpu.memory_space<vmem>>) attributes {dimension_semantics = [#tpu.dimension_semantics<parallel>, #tpu.dimension_semantics<parallel>], iteration_bounds = array<i64: 1, 2>, scalar_prefetch = 0 : i64, scratch_operands = 0 : i64, tpu.core_type = #tpu.core_type<tc>, window_params = [{transform_indices = @transform_0, window_bounds = array<i64: 16, 4608>}, {transform_indices = @transform_1, window_bounds = array<i64: 4608, 512>}, {transform_indices = @transform_2, window_bounds = array<i64: 1, 512>}, {transform_indices = @transform_3, window_bounds = array<i64: 16, 512>}]} {
    %c0 = arith.constant 0 : index
    %c0_0 = arith.constant 0 : index
    %0 = vector.load %arg2[%c0, %c0_0] : memref<16x4608xbf16, #tpu.memory_space<vmem>>, vector<16x4608xbf16>
    %c0_1 = arith.constant 0 : index
    %c0_2 = arith.constant 0 : index
    %1 = vector.load %arg3[%c0_1, %c0_2] : memref<4608x512xbf16, #tpu.memory_space<vmem>>, vector<4608x512xbf16>
    %cst = arith.constant dense<0.000000e+00> : vector<16x512xf32>
    %2 = tpu.matmul %0, %1, %cst {dimension_numbers = #tpu.dot_dimension_numbers<[1], [0], [0], [1], [0, 0, 1, 1], [], []>} : vector<16x4608xbf16>, vector<4608x512xbf16>, vector<16x512xf32> -> vector<16x512xf32>
    %c0_3 = arith.constant 0 : index
    %c0_4 = arith.constant 0 : index
    %3 = vector.load %arg4[%c0_3, %c0_4] : memref<1x512xf32, #tpu.memory_space<vmem>>, vector<1x512xf32>
    %4 = vector.broadcast %3 : vector<1x512xf32> to vector<16x512xf32>
    %5 = arith.addf %2, %4 : vector<16x512xf32>
    %6 = arith.negf %5 : vector<16x512xf32>
    %7 = math.exp %6 : vector<16x512xf32>
    %cst_5 = arith.constant 1.000000e+00 : f32
    %8 = vector.broadcast %cst_5 : f32 to vector<16x512xf32>
    %9 = arith.addf %8, %7 : vector<16x512xf32>
    %10 = arith.divf %8, %9 : vector<16x512xf32>
    %11 = arith.mulf %5, %10 : vector<16x512xf32>
    %12 = arith.truncf %11 : vector<16x512xf32> to vector<16x512xbf16>
    %c0_6 = arith.constant 0 : index
    %c0_7 = arith.constant 0 : index
    %13 = vector.load %arg5[%c0_6, %c0_7] : memref<16x512xbf16, #tpu.memory_space<vmem>>, vector<16x512xbf16>
    tpu.vector_store %arg5[%c0_6, %c0_7], %12 {strides = array<i32>} : memref<16x512xbf16, #tpu.memory_space<vmem>>, vector<16x512xbf16>,
    return
  }
  func.func @transform_0(%arg0: i32, %arg1: i32) -> (i32, i32) {
    %c0_i32 = arith.constant 0 : i32
    %c0_i32_0 = arith.constant 0 : i32
    return %arg0, %c0_i32 : i32, i32
  }
  func.func @transform_1(%arg0: i32, %arg1: i32) -> (i32, i32) {
    %c0_i32 = arith.constant 0 : i32
    %c0_i32_0 = arith.constant 0 : i32
    return %c0_i32, %arg1 : i32, i32
  }
  func.func @transform_2(%arg0: i32, %arg1: i32) -> (i32, i32) {
    %c0_i32 = arith.constant 0 : i32
    %c0_i32_0 = arith.constant 0 : i32
    return %c0_i32, %arg1 : i32, i32
  }
  func.func @transform_3(%arg0: i32, %arg1: i32) -> (i32, i32) {
    %c0_i32 = arith.constant 0 : i32
    return %arg0, %arg1 : i32, i32
  }
}

</mosaic_0001>

<bundles_post_ra>
// kernel: forward.12
= control target key start
LH: loop header
LB: loop body
LE: loop exit
PB: predicated region body
PF: predicated region fallthrough
CT: control target
= control target key end

     0   :  { %s2883_s0 = inlined_call_operand.hbm [shape: bf16[32,128], index: 0, kind: input, shape index: {}]   ;;  %s2884_s1 = inlined_call_operand.hbm [shape: f32[1,128], index: 1, kind: input, shape index: {}]   ;;  %s2885_s2 = inlined_call_operand.vmem [shape: bf16[512,27], index: 2, kind: input, shape index: {}]   ;;  %s2886_s3 = inlined_call_operand.<no memory space> [shape: bf16[], index: 3, kind: input, shape index: {}]   ;;  %s2887_s4 = inlined_call_operand.vmem [shape: bf16[512,128], index: 4, kind: output, shape index: {}]  }
   0x1   :  { %v9_v0 = vstv %s2886_s3 }
   0x2   :  { %v2448_v1 = vunpack.i.l.bf16 %v9_v0 }
   0x3   :  { %14 = vsyncpa [#allocation8], 0 }
   0x4   :  { %15 = vsyncpa [#allocation10], 0  ;;  %s2450_s17 = smov 0   ;;  %s2452_s18 = smov 0  }
   0x5   :  { %s2454_s19 = smov 0  }
   0x6 LB: > { %s1807_s3 = sadd.s32 4294967295, %s2413_s19   ;;  %s33_s20 = sadd.s32 1, %s2409_s18  ;;  %s2413_s19 = sphi %s2454_s19, %s21_s19   ;;  %s2409_s18 = sphi %s2452_s18, %s2892_s18   ;;  %s2405_s17 = sphi %s2450_s17, %s2891_s17  }
   0x7   : > { %p35_p0 = scmp.ge.s32.totalorder %s33_s20, 2  ;;  %p1809_p1 = scmp.ge.s32.totalorder %s2413_s19, 1 }
   0x8   : > { %p144_p2 = scmp.lt.s32.totalorder %s2413_s19, 3  ;;  %p2475_p4 = scmp.eq.s32.totalorder %s1807_s3, 0 }
   0x9   : > { %s2894_s20 = smov (%p35_p0, %s33_s20), 0  ;;  %s2415_s23 = smov [#allocation7]  }
   0xa   : > { %p2471_p3 = pnand %p1809_p1, %p144_p2  ;;  %s158_s24 = sshll.u32 %s2415_s23, 4  ;;  %s159_s24 = int_to_ptr.vmem [resolvable:$true] %s158_s24 }
   0xb   : > { %s2416_s26 = smov [#allocation9]   ;;  %s2342_s28 = scalar_lea.vmem %s159_s24, 256 }
   0xc   : > { %p2145_p5 = pneg %p2471_p3  ;;  %s174_s27 = sshll.u32 %s2416_s26, 4  ;;  %s175_s27 = int_to_ptr.vmem [resolvable:$true] %s174_s27 }
   0xd   : > { %p2343_p8 = scmp.ne.s32.totalorder %s159_s24, %s2342_s28  ;;  %p2350_p11 = scmp.lt.s32.totalorder %s159_s24, %s159_s24 }
   0xe   : > { %p2483_p6 = pnand %p2475_p4, %p2145_p5  ;;  %p2351_p12 = scmp.lt.s32.totalorder %s2342_s28, %s2342_s28 }
  0x10   : > { %p2333_p7 = pneg %p2483_p6  ;;  %p2352_p13 = por %p2351_p12, %p2350_p11 }
  0x12   : > { %p2345_p9 = pnand %p2343_p8, %p2333_p7 }
  0x14   : > { %p2346_p10 = pneg %p2345_p9 }
  0x16   : > { %p2353_p0 = pnand %p2352_p13, %p2346_p10 }
  0x18   : > { %2356 = shalt.err (!%p2353_p0)
}
  0x19   : > { %s2417_s29 = smov 64   ;;  %s2418_s30 = smov 4  }
  0x1a   : > { %2148 = dma.hbm_to_vmem [thread:$0]  (!%p2483_p6), %s2883_s0, 256, %s159_s24, [#allocation8], %s2417_s29, %s2417_s29, %s2418_s30  }
  0x1b   : > { %s2368_s7 = scalar_lea.vmem %s175_s27, 16  ;;  %s2375_s8 = scalar_lea.vmem %s175_s27, 32 }
  0x1c   : > { %p2369_p1 = scmp.ne.s32.totalorder %s175_s27, %s2368_s7  ;;  %p2376_p8 = scmp.lt.s32.totalorder %s175_s27, %s175_s27 }
  0x1d   : > { %p2377_p9 = scmp.lt.s32.totalorder %s2375_s8, %s2368_s7 }
  0x1e   : > { %p2371_p2 = pnand %p2369_p1, %p2333_p7 }
  0x1f   : > { %p2378_p10 = por %p2377_p9, %p2376_p8 }
  0x20   : > { %p2372_p5 = pneg %p2371_p2 }
  0x22   : > { %p2379_p11 = pnand %p2378_p10, %p2372_p5 }
  0x24   : > { %2382 = shalt.err (!%p2379_p11)
}
  0x25   : > { %2151 = dma.hbm_to_vmem [thread:$0]  (!%p2483_p6), %s2884_s1, 16, %s175_s27, [#allocation10]  }
  0x26   : > { %196 = sbr.rel (%p2471_p3) target bundleno = 348 (0x15c), region = 32 }
  0x2b   : > { %2396 = dma.done.wait (%p2475_p4), [#allocation8], 256  }
  0x2c   : > { %2398 = vsyncadd (%p2475_p4), [#allocation8], 4294967040 }
  0x2d   : > { %2400 = dma.done.wait (%p2475_p4), [#allocation10], 16  }
  0x2e   : > { %2402 = vsyncadd (%p2475_p4), [#allocation10], 4294967280  ;;  %s1816_s11 = sshll.u32 %s2405_s17, 5  ;;  %v254_v2 = vlaneseq  ;;  %v2185_v4 = vld [vmem:[#allocation7 + $0x8] sm:$0xff]   ;;  %v2186_v5 = vld [vmem:[#allocation7] sm:$0xff]   ;;  %v2419_v23 = vmov 0.0  }
  0x2f   : > { %p228_p7 = scmp.lt.s32.totalorder %s1816_s11, 63  ;;  %2097 = vmatprep.subr.bf16.mxu0 %v2185_v4  ;;  %2133 = vmatprep.subr.bf16.mxu1 %v2185_v4  ;;  %vm1112_vm1 = vcmask 261120  }
  0x30   : > { %v2519_v3 = vand.u32 127, %v254_v2  ;;  %2098 = vmatpush3.bf16.msra.mxu0 %v2185_v4  ;;  %2135 = vmatpush3.bf16.msra.mxu1 %v2185_v4 }
  0x31   : > { %s2896_s11 = smov (!%p228_p7, %s1816_s11), 63  ;;  %2099 = vmatprep.subr.bf16.mxu0 %v2186_v5  ;;  %2134 = vmatprep.subr.bf16.mxu1 %v2186_v5 }
  0x32   : > { %s1817_s12 = sshll.u32 %s2896_s11, 2  ;;  %vm257_vm0 = vcmp.lt.s32.totalorder %v2519_v3, 27 }
  0x33   : > { %s2526_s15 = scalar_lea.vmem %s2885_s2, %s1817_s12  ;;  %s2812_s3 = scalar_lea.vmem %s2887_s4, %s1817_s12 }
  0x34   : > { %v251_v6 = vld [vmem:[%s2526_s15] sm:$0xff]   ;;  %v1821_v8 = vld [vmem:[%s2526_s15 + $0x8] sm:$0xff]   ;;  %v1823_v18 = vld [vmem:[%s2526_s15 + $0x10] sm:$0xff]   ;;  %2100 = vmatpush3.bf16.msra.mxu0 %v2186_v5  ;;  %2136 = vmatpush3.bf16.msra.mxu1 %v2186_v5 }
  0x35   : > { %v1835_v7 = vld [vmem:[%s2526_s15 + $0x40] sm:$0xff]   ;;  %v252_v9 = vunpack.c.l.bf16 %v251_v6  ;;  %v274_v10 = vunpack.c.h.bf16 %v251_v6  ;;  %v1837_v13 = vld [vmem:[%s2526_s15 + $0x48] sm:$0xff]   ;;  %v297_v14 = vunpack.c.l.bf16 %v1821_v8  ;;  %v320_v15 = vunpack.c.h.bf16 %v1821_v8  ;;  %v1839_v28 = vld [vmem:[%s2526_s15 + $0x50] sm:$0xff]  }
  0x36   : > { %v619_v11 = vunpack.c.l.bf16 %v1835_v7  ;;  %v642_v12 = vunpack.c.h.bf16 %v1835_v7  ;;  %v665_v16 = vunpack.c.l.bf16 %v1837_v13  ;;  %v688_v17 = vunpack.c.h.bf16 %v1837_v13  ;;  %v1825_v33 = vld [vmem:[%s2526_s15 + $0x18] sm:$0xff]   ;;  %v1827_v51 = vld [vmem:[%s2526_s15 + $0x20] sm:$0xff]   ;;  %v1829_v61 = vld [vmem:[%s2526_s15 + $0x28] sm:$0xff]  }
  0x37   : > { %v258_v19 = vsel %vm257_vm0, %v252_v9, %v2448_v1  ;;  %v280_v20 = vsel %vm257_vm0, %v274_v10, %v2448_v1  ;;  %v303_v29 = vsel %vm257_vm0, %v297_v14, %v2448_v1  ;;  %v326_v30 = vsel %vm257_vm0, %v320_v15, %v2448_v1  ;;  %v1841_v38 = vld [vmem:[%s2526_s15 + $0x58] sm:$0xff]   ;;  %v1843_v56 = vld [vmem:[%s2526_s15 + $0x60] sm:$0xff]   ;;  %v1845_v62 = vld [vmem:[%s2526_s15 + $0x68] sm:$0xff]  }
  0x38   : > { %v625_v21 = vsel %vm257_vm0, %v619_v11, %v2448_v1  ;;  %v648_v22 = vsel %vm257_vm0, %v642_v12, %v2448_v1  ;;  %v259_v24 = vpack.c.bf16 %v2419_v23, %v258_v19  ;;  %v282_v25 = vpack.c.bf16 %v2419_v23, %v280_v20  ;;  %v1831_v10 = vld [vmem:[%s2526_s15 + $0x30] sm:$0xff]  }
  0x39   : > { %v627_v26 = vpack.c.bf16 %v2419_v23, %v625_v21  ;;  %v650_v27 = vpack.c.bf16 %v2419_v23, %v648_v22  ;;  %v671_v31 = vsel %vm257_vm0, %v665_v16, %v2448_v1  ;;  %v343_v32 = vunpack.c.l.bf16 %v1823_v18  ;;  %v1847_v16 = vld [vmem:[%s2526_s15 + $0x70] sm:$0xff]  }
  0x3a   : > { %262 = vst [vmem:[#allocation11] sm:$0xf] %v259_v24  ;;  %285 = vst [vmem:[#allocation11 + $0x4] sm:$0xf] %v282_v25  ;;  %v305_v34 = vpack.c.bf16 %v2419_v23, %v303_v29  ;;  %v328_v35 = vpack.c.bf16 %v2419_v23, %v326_v30  ;;  %v673_v36 = vpack.c.bf16 %v2419_v23, %v671_v31  ;;  %v366_v41 = vunpack.c.h.bf16 %v1823_v18 }
  0x3b   : > { %630 = vst [vmem:[#allocation11 + $0x40] sm:$0xf] %v627_v26  ;;  %653 = vst [vmem:[#allocation11 + $0x44] sm:$0xf] %v650_v27  ;;  %v694_v37 = vsel %vm257_vm0, %v688_v17, %v2448_v1  ;;  %v349_v40 = vsel %vm257_vm0, %v343_v32, %v2448_v1  ;;  %v711_v42 = vunpack.c.l.bf16 %v1839_v28  ;;  %v734_v44 = vunpack.c.h.bf16 %v1839_v28  ;;  %v1833_v17 = vld [vmem:[%s2526_s15 + $0x38] sm:$0xff]  }
  0x3c   : > { %v696_v39 = vpack.c.bf16 %v2419_v23, %v694_v37  ;;  %308 = vst [vmem:[#allocation11 + $0x8] sm:$0xf] %v305_v34  ;;  %331 = vst [vmem:[#allocation11 + $0xc] sm:$0xf] %v328_v35  ;;  %v351_v43 = vpack.c.bf16 %v2419_v23, %v349_v40  ;;  %v389_v45 = vunpack.c.l.bf16 %v1825_v33  ;;  %v412_v46 = vunpack.c.h.bf16 %v1825_v33  ;;  %v1849_v37 = vld [vmem:[%s2526_s15 + $0x78] sm:$0xff]  }
  0x3d   : > { %676 = vst [vmem:[#allocation11 + $0x48] sm:$0xf] %v673_v36  ;;  %v372_v47 = vsel %vm257_vm0, %v366_v41, %v2448_v1  ;;  %v717_v48 = vsel %vm257_vm0, %v711_v42, %v2448_v1  ;;  %v757_v49 = vunpack.c.l.bf16 %v1841_v38  ;;  %v780_v50 = vunpack.c.h.bf16 %v1841_v38 }
  0x3e   : > { %699 = vst [vmem:[#allocation11 + $0x4c] sm:$0xf] %v696_v39  ;;  %354 = vst [vmem:[#allocation11 + $0x10] sm:$0xf] %v351_v43  ;;  %v374_v52 = vpack.c.bf16 %v2419_v23, %v372_v47  ;;  %v719_v53 = vpack.c.bf16 %v2419_v23, %v717_v48  ;;  %v740_v54 = vsel %vm257_vm0, %v734_v44, %v2448_v1  ;;  %v435_v4 = vunpack.c.l.bf16 %v1827_v51 }
  0x3f   : > { %v395_v55 = vsel %vm257_vm0, %v389_v45, %v2448_v1  ;;  %v742_v57 = vpack.c.bf16 %v2419_v23, %v740_v54  ;;  %v418_v59 = vsel %vm257_vm0, %v412_v46, %v2448_v1  ;;  %v763_v60 = vsel %vm257_vm0, %v757_v49, %v2448_v1 }
  0x40   : > { %v397_v58 = vpack.c.bf16 %v2419_v23, %v395_v55  ;;  %377 = vst [vmem:[#allocation11 + $0x14] sm:$0xf] %v374_v52  ;;  %722 = vst [vmem:[#allocation11 + $0x50] sm:$0xf] %v719_v53  ;;  %v420_v63 = vpack.c.bf16 %v2419_v23, %v418_v59  ;;  %v765_v0 = vpack.c.bf16 %v2419_v23, %v763_v60  ;;  %v458_v7 = vunpack.c.h.bf16 %v1827_v51 }
  0x41   : > { %v786_v2 = vsel %vm257_vm0, %v780_v50, %v2448_v1  ;;  %v2187_v5 = vld [vmem:[#allocation11] sm:$0xff]   ;;  %745 = vst [vmem:[#allocation11 + $0x54] sm:$0xf] %v742_v57  ;;  %v803_v8 = vunpack.c.l.bf16 %v1843_v56  ;;  %v826_v9 = vunpack.c.h.bf16 %v1843_v56  ;;  %v441_v12 = vsel %vm257_vm0, %v435_v4, %v2448_v1 }
  0x42   : > { %400 = vst [vmem:[#allocation11 + $0x18] sm:$0xf] %v397_v58  ;;  %v788_v6 = vpack.c.bf16 %v2419_v23, %v786_v2  ;;  %v2188_v11 = vld [vmem:[#allocation11 + $0x40] sm:$0xff]   ;;  %423 = vst [vmem:[#allocation11 + $0x1c] sm:$0xf] %v420_v63  ;;  %v481_v13 = vunpack.c.l.bf16 %v1829_v61  ;;  %v504_v14 = vunpack.c.h.bf16 %v1829_v61  ;;  %v849_v15 = vunpack.c.l.bf16 %v1845_v62  ;;  %2101 = vmatprep.mubr.msk.bf16.mxu0 %vm1112_vm1, %v2187_v5 }
  0x43   : > { %768 = vst [vmem:[#allocation11 + $0x58] sm:$0xf] %v765_v0  ;;  %v2189_v18 = vld [vmem:[#allocation11 + $0x8] sm:$0xff]   ;;  %v443_v19 = vpack.c.bf16 %v2419_v23, %v441_v12  ;;  %v464_v20 = vsel %vm257_vm0, %v458_v7, %v2448_v1  ;;  %v809_v21 = vsel %vm257_vm0, %v803_v8, %v2448_v1  ;;  %v832_v22 = vsel %vm257_vm0, %v826_v9, %v2448_v1 }
  0x44   : > { %791 = vst [vmem:[#allocation11 + $0x5c] sm:$0xf] %v788_v6  ;;  %2117 = vmatprep.mubr.msk.bf16.mxu1 %vm1112_vm1, %v2188_v11  ;;  %v466_v25 = vpack.c.bf16 %v2419_v23, %v464_v20  ;;  %v811_v26 = vpack.c.bf16 %v2419_v23, %v809_v21  ;;  %v834_v27 = vpack.c.bf16 %v2419_v23, %v832_v22  ;;  %v872_v32 = vunpack.c.h.bf16 %v1845_v62 }
  0x45   : > { %v2190_v24 = vld [vmem:[#allocation11 + $0x48] sm:$0xff]   ;;  %v487_v28 = vsel %vm257_vm0, %v481_v13, %v2448_v1  ;;  %2102 = vmatmul.mubr.msk.bf16.vlgmr.msra.gmra.mxu0 %vm1112_vm1, %v2189_v18  ;;  %446 = vst [vmem:[#allocation11 + $0x20] sm:$0xf] %v443_v19  ;;  %v510_v30 = vsel %vm257_vm0, %v504_v14, %v2448_v1  ;;  %v855_v31 = vsel %vm257_vm0, %v849_v15, %v2448_v1  ;;  %v527_v35 = vunpack.c.l.bf16 %v1831_v10 }
  0x46   : > { %v489_v29 = vpack.c.bf16 %v2419_v23, %v487_v28  ;;  %2118 = vmatmul.mubr.msk.bf16.vlgmr.msra.gmra.mxu1 %vm1112_vm1, %v2190_v24  ;;  %469 = vst [vmem:[#allocation11 + $0x24] sm:$0xf] %v466_v25  ;;  %814 = vst [vmem:[#allocation11 + $0x60] sm:$0xf] %v811_v26  ;;  %v512_v33 = vpack.c.bf16 %v2419_v23, %v510_v30  ;;  %v857_v34 = vpack.c.bf16 %v2419_v23, %v855_v31 }
  0x47   : > { %837 = vst [vmem:[#allocation11 + $0x64] sm:$0xf] %v834_v27  ;;  %v550_v36 = vunpack.c.h.bf16 %v1831_v10  ;;  %v2191_v38 = vld [vmem:[#allocation11 + $0x10] sm:$0xff]   ;;  %v878_v39 = vsel %vm257_vm0, %v872_v32, %v2448_v1  ;;  %v895_v40 = vunpack.c.l.bf16 %v1847_v16  ;;  %v918_v41 = vunpack.c.h.bf16 %v1847_v16  ;;  %v2689_v10 = vld [vmem:[#allocation9] ss:$0 sm:$0xff] }
  0x48   : > { %492 = vst [vmem:[#allocation11 + $0x28] sm:$0xf] %v489_v29  ;;  %v573_v42 = vunpack.c.l.bf16 %v1833_v17  ;;  %v2192_v43 = vld [vmem:[#allocation11 + $0x50] sm:$0xff]   ;;  %515 = vst [vmem:[#allocation11 + $0x2c] sm:$0xf] %v512_v33  ;;  %v880_v44 = vpack.c.bf16 %v2419_v23, %v878_v39  ;;  %v533_v45 = vsel %vm257_vm0, %v527_v35, %v2448_v1  ;;  %v596_v47 = vunpack.c.h.bf16 %v1833_v17  ;;  %2105 = vmatprep.mubr.msk.bf16.mxu0 %vm1112_vm1, %v2191_v38 }
  0x49   : > { %860 = vst [vmem:[#allocation11 + $0x68] sm:$0xf] %v857_v34  ;;  %v556_v46 = vsel %vm257_vm0, %v550_v36, %v2448_v1  ;;  %v2193_v48 = vld [vmem:[#allocation11 + $0x18] sm:$0xff]   ;;  %v535_v49 = vpack.c.bf16 %v2419_v23, %v533_v45  ;;  %v901_v51 = vsel %vm257_vm0, %v895_v40, %v2448_v1  ;;  %v924_v52 = vsel %vm257_vm0, %v918_v41, %v2448_v1 }
  0x4a   : > { %v558_v50 = vpack.c.bf16 %v2419_v23, %v556_v46  ;;  %2121 = vmatprep.mubr.msk.bf16.mxu1 %vm1112_vm1, %v2192_v43  ;;  %883 = vst [vmem:[#allocation11 + $0x6c] sm:$0xf] %v880_v44  ;;  %v903_v54 = vpack.c.bf16 %v2419_v23, %v901_v51  ;;  %v926_v55 = vpack.c.bf16 %v2419_v23, %v924_v52  ;;  %v941_v60 = vunpack.c.l.bf16 %v1849_v37 }
  0x4b   : > { %v2194_v53 = vld [vmem:[#allocation11 + $0x58] sm:$0xff]   ;;  %v579_v56 = vsel %vm257_vm0, %v573_v42, %v2448_v1  ;;  %v602_v57 = vsel %vm257_vm0, %v596_v47, %v2448_v1  ;;  %538 = vst [vmem:[#allocation11 + $0x30] sm:$0xf] %v535_v49  ;;  %v964_v61 = vunpack.c.h.bf16 %v1849_v37 }
  0x4c   : > { %561 = vst [vmem:[#allocation11 + $0x34] sm:$0xf] %v558_v50  ;;  %v581_v58 = vpack.c.bf16 %v2419_v23, %v579_v56  ;;  %v604_v59 = vpack.c.bf16 %v2419_v23, %v602_v57  ;;  %906 = vst [vmem:[#allocation11 + $0x70] sm:$0xf] %v903_v54  ;;  %v947_v63 = vsel %vm257_vm0, %v941_v60, %v2448_v1 }
  0x4d   : > { %929 = vst [vmem:[#allocation11 + $0x74] sm:$0xf] %v926_v55  ;;  %2106 = vmatmul.mubr.msk.bf16.gmra.mxu0 %vm1112_vm1, %v2193_v48  ;;  %v2195_v62 = vld [vmem:[#allocation11 + $0x20] sm:$0xff]   ;;  %v970_v0 = vsel %vm257_vm0, %v964_v61, %v2448_v1  ;;  %v949_v4 = vpack.c.bf16 %v2419_v23, %v947_v63 }
  0x4e   : > { %584 = vst [vmem:[#allocation11 + $0x38] sm:$0xf] %v581_v58  ;;  %607 = vst [vmem:[#allocation11 + $0x3c] sm:$0xf] %v604_v59  ;;  %2122 = vmatmul.mubr.msk.bf16.gmra.mxu1 %vm1112_vm1, %v2194_v53  ;;  %v2196_v2 = vld [vmem:[#allocation11 + $0x60] sm:$0xff]   ;;  %v972_v5 = vpack.c.bf16 %v2419_v23, %v970_v0  ;;  %2109 = vmatprep.mubr.msk.bf16.mxu0 %vm1112_vm1, %v2195_v62 }
  0x4f   : > { %2125 = vmatprep.mubr.msk.bf16.mxu1 %vm1112_vm1, %v2196_v2  ;;  %952 = vst [vmem:[#allocation11 + $0x78] sm:$0xf] %v949_v4  ;;  %v2197_v6 = vld [vmem:[#allocation11 + $0x28] sm:$0xff]  }
  0x50   : > { %975 = vst [vmem:[#allocation11 + $0x7c] sm:$0xf] %v972_v5 }
  0x51   : > { %v2198_v7 = vld [vmem:[#allocation11 + $0x68] sm:$0xff]  }
  0x53   : > { %v2199_v8 = vld [vmem:[#allocation11 + $0x30] sm:$0xff]  }
  0x54   : > { %v2200_v9 = vld [vmem:[#allocation11 + $0x70] sm:$0xff]  }
  0x55   : > { %2110 = vmatmul.mubr.msk.bf16.gmra.mxu0 %vm1112_vm1, %v2197_v6  ;;  %v2201_v3 = vld [vmem:[#allocation11 + $0x38] sm:$0xff]  }
  0x56   : > { %2126 = vmatmul.mubr.msk.bf16.gmra.mxu1 %vm1112_vm1, %v2198_v7  ;;  %2113 = vmatprep.mubr.msk.bf16.mxu0 %vm1112_vm1, %v2199_v8 }
  0x57   : > { %2129 = vmatprep.mubr.msk.bf16.mxu1 %vm1112_vm1, %v2200_v9  ;;  %v2202_v23 = vld [vmem:[#allocation11 + $0x78] sm:$0xff]  }
  0x5d   : > { %2114 = vmatmul.mubr.msk.bf16.gmra.mxu0 %vm1112_vm1, %v2201_v3 }
  0x5e   : > { %2130 = vmatmul.mubr.msk.bf16.gmra.mxu1 %vm1112_vm1, %v2202_v23 }
 0x105   : > { %v2103_v11 = vpop.f32.mrf.mxu0 }
 0x106   : > { %v2692_v12 = vadd.f32 %v2103_v11, %v2689_v10  ;;  %v2119_v13 = vpop.f32.mrf.mxu1 }
 0x107   : > { %v2695_v14 = vadd.f32 %v2119_v13, %v2689_v10  ;;  %v1195_v15 = vpop.f32.mrf.mxu0 }
 0x108   : > { %v1888_v16 = vmul.f32 -1.442695, %v2692_v12  ;;  %v2699_v17 = vadd.f32 %v2689_v10, %v1195_v15  ;;  %v1259_v18 = vpop.f32.mrf.mxu1 }
 0x109   : > { %v1904_v19 = vmul.f32 -1.442695, %v2695_v14  ;;  %v2703_v20 = vadd.f32 %v2689_v10, %v1259_v18  ;;  %v2104_v21 = vpop.f32.mrf.mxu0 }
 0x10a   : > { %2203 = vpow2.f32 %v1888_v16  ;;  %v1886_v22 = vmul.f32 -1.442695, %v2699_v17  ;;  %v2707_v24 = vadd.f32 %v2104_v21, %v2689_v10  ;;  %v2120_v25 = vpop.f32.mrf.mxu1 }
 0x10b   : > { %2205 = vpow2.f32 %v1904_v19  ;;  %v1902_v26 = vmul.f32 -1.442695, %v2703_v20  ;;  %v2711_v27 = vadd.f32 %v2120_v25, %v2689_v10  ;;  %v1198_v28 = vpop.f32.mrf.mxu0 }
 0x10c   : > { %2207 = vpow2.f32 %v1886_v22  ;;  %v1889_v29 = vmul.f32 -1.442695, %v2707_v24  ;;  %v2715_v30 = vadd.f32 %v2689_v10, %v1198_v28  ;;  %v1262_v31 = vpop.f32.mrf.mxu1 }
 0x10d   : > { %2209 = vpow2.f32 %v1902_v26  ;;  %v1905_v32 = vmul.f32 -1.442695, %v2711_v27  ;;  %v2719_v33 = vadd.f32 %v2689_v10, %v1262_v31  ;;  %v2107_v34 = vpop.f32.mrf.mxu0 }
 0x10e   : > { %2211 = vpow2.f32 %v1889_v29  ;;  %v1887_v35 = vmul.f32 -1.442695, %v2715_v30  ;;  %v2723_v36 = vadd.f32 %v2107_v34, %v2689_v10  ;;  %v2123_v37 = vpop.f32.mrf.mxu1 }
 0x10f   : > { %2213 = vpow2.f32 %v1905_v32  ;;  %v1903_v38 = vmul.f32 -1.442695, %v2719_v33  ;;  %v2727_v39 = vadd.f32 %v2123_v37, %v2689_v10  ;;  %v1211_v40 = vpop.f32.mrf.mxu0 }
 0x110   : > { %2215 = vpow2.f32 %v1887_v35  ;;  %v1892_v41 = vmul.f32 -1.442695, %v2723_v36  ;;  %v2731_v42 = vadd.f32 %v2689_v10, %v1211_v40  ;;  %v1275_v43 = vpop.f32.mrf.mxu1 }
 0x111   : > { %2217 = vpow2.f32 %v1903_v38  ;;  %v1908_v44 = vmul.f32 -1.442695, %v2727_v39  ;;  %v2735_v45 = vadd.f32 %v2689_v10, %v1275_v43  ;;  %v2108_v46 = vpop.f32.mrf.mxu0 }
 0x112   : > { %2219 = vpow2.f32 %v1892_v41  ;;  %v1890_v47 = vmul.f32 -1.442695, %v2731_v42  ;;  %v2739_v48 = vadd.f32 %v2108_v46, %v2689_v10  ;;  %v2124_v49 = vpop.f32.mrf.mxu1 }
 0x113   : > { %2221 = vpow2.f32 %v1908_v44  ;;  %v1906_v50 = vmul.f32 -1.442695, %v2735_v45  ;;  %v2743_v51 = vadd.f32 %v2124_v49, %v2689_v10  ;;  %v1214_v52 = vpop.f32.mrf.mxu0 }
 0x114   : > { %2223 = vpow2.f32 %v1890_v47  ;;  %v1893_v53 = vmul.f32 -1.442695, %v2739_v48  ;;  %v2747_v54 = vadd.f32 %v2689_v10, %v1214_v52  ;;  %v1278_v55 = vpop.f32.mrf.mxu1 }
 0x115   : > { %2225 = vpow2.f32 %v1906_v50  ;;  %v1909_v56 = vmul.f32 -1.442695, %v2743_v51  ;;  %v2751_v57 = vadd.f32 %v2689_v10, %v1278_v55  ;;  %v2111_v58 = vpop.f32.mrf.mxu0 }
 0x116   : > { %2227 = vpow2.f32 %v1893_v53  ;;  %v1891_v59 = vmul.f32 -1.442695, %v2747_v54  ;;  %v2127_v60 = vpop.f32.mrf.mxu1  ;;  %v2756_v29 = vadd.f32 %v2111_v58, %v2689_v10 }
 0x117   : > { %v2204_v61 = vpop.eup %2203  ;;  %2229 = vpow2.f32 %v1909_v56  ;;  %v1907_v62 = vmul.f32 -1.442695, %v2751_v57  ;;  %v1227_v63 = vpop.f32.mrf.mxu0  ;;  %v2759_v41 = vadd.f32 %v2127_v60, %v2689_v10 }
 0x118   : > { %v2206_v0 = vpop.eup %2205  ;;  %v1420_v2 = vadd.f32 1.0, %v2204_v61  ;;  %2231 = vpow2.f32 %v1891_v59  ;;  %v1291_v4 = vpop.f32.mrf.mxu1  ;;  %v1896_v47 = vmul.f32 -1.442695, %v2756_v29  ;;  %v2763_v49 = vadd.f32 %v2689_v10, %v1227_v63 }
 0x119   : > { %v2208_v5 = vpop.eup %2207  ;;  %v1436_v6 = vadd.f32 1.0, %v2206_v0  ;;  %2233 = vpow2.f32 %v1907_v62  ;;  %v2112_v7 = vpop.f32.mrf.mxu0  ;;  %v2766_v53 = vadd.f32 %v2689_v10, %v1291_v4 }
 0x11a   : > { %v2210_v8 = vpop.eup %2209  ;;  %2235 = vrcp.f32 %v1420_v2  ;;  %v1418_v9 = vadd.f32 1.0, %v2208_v5  ;;  %v2128_v3 = vpop.f32.mrf.mxu1  ;;  %v2769_v55 = vadd.f32 %v2112_v7, %v2689_v10  ;;  %v1912_v7 = vmul.f32 -1.442695, %v2759_v41 }
 0x11b   : > { %v2212_v23 = vpop.eup %2211  ;;  %2237 = vrcp.f32 %v1436_v6  ;;  %v1434_v11 = vadd.f32 1.0, %v2210_v8  ;;  %v1230_v19 = vpop.f32.mrf.mxu0  ;;  %v2772_v59 = vadd.f32 %v2128_v3, %v2689_v10  ;;  %v1894_v3 = vmul.f32 -1.442695, %v2763_v49 }
 0x11c   : > { %v2214_v13 = vpop.eup %2213  ;;  %2239 = vrcp.f32 %v1418_v9  ;;  %v1421_v15 = vadd.f32 1.0, %v2212_v23  ;;  %v1294_v25 = vpop.f32.mrf.mxu1  ;;  %v2775_v60 = vadd.f32 %v2689_v10, %v1230_v19 }
 0x11d   : > { %v2216_v16 = vpop.eup %2215  ;;  %2241 = vrcp.f32 %v1434_v11  ;;  %v1437_v18 = vadd.f32 1.0, %v2214_v13  ;;  %v2115_v37 = vpop.f32.mrf.mxu0  ;;  %v2778_v0 = vadd.f32 %v2689_v10, %v1294_v25  ;;  %v1910_v11 = vmul.f32 -1.442695, %v2766_v53 }
 0x11e   : > { %v2218_v21 = vpop.eup %2217  ;;  %2243 = vrcp.f32 %v1421_v15  ;;  %v1419_v22 = vadd.f32 1.0, %v2216_v16  ;;  %v2131_v43 = vpop.f32.mrf.mxu1  ;;  %v2781_v2 = vadd.f32 %v2115_v37, %v2689_v10  ;;  %v1897_v13 = vmul.f32 -1.442695, %v2769_v55 }
 0x11f   : > { %v2220_v26 = vpop.eup %2219  ;;  %2245 = vrcp.f32 %v1437_v18  ;;  %v1435_v28 = vadd.f32 1.0, %v2218_v21  ;;  %v1243_v61 = vpop.f32.mrf.mxu0  ;;  %v2785_v8 = vadd.f32 %v2131_v43, %v2689_v10  ;;  %v1913_v15 = vmul.f32 -1.442695, %v2772_v59 }
 0x120   : > { %v2222_v31 = vpop.eup %2221  ;;  %2247 = vrcp.f32 %v1419_v22  ;;  %v1424_v32 = vadd.f32 1.0, %v2220_v26  ;;  %v1307_v4 = vpop.f32.mrf.mxu1  ;;  %v1895_v19 = vmul.f32 -1.442695, %v2775_v60  ;;  %v1911_v21 = vmul.f32 -1.442695, %v2778_v0 }
 0x121   : > { %v2224_v34 = vpop.eup %2223  ;;  %2249 = vrcp.f32 %v1435_v28  ;;  %v1440_v35 = vadd.f32 1.0, %v2222_v31  ;;  %v2116_v16 = vpop.f32.mrf.mxu0  ;;  %v1900_v22 = vmul.f32 -1.442695, %v2781_v2  ;;  %v1916_v28 = vmul.f32 -1.442695, %v2785_v8 }
 0x122   : > { %v2226_v38 = vpop.eup %2225  ;;  %2251 = vrcp.f32 %v1424_v32  ;;  %v1422_v40 = vadd.f32 1.0, %v2224_v34  ;;  %v2132_v25 = vpop.f32.mrf.mxu1  ;;  %v2796_v31 = vadd.f32 %v2689_v10, %v1243_v61  ;;  %v2799_v32 = vadd.f32 %v2689_v10, %v1307_v4 }
 0x123   : > { %v2228_v44 = vpop.eup %2227  ;;  %2253 = vrcp.f32 %v1440_v35  ;;  %v1438_v46 = vadd.f32 1.0, %v2226_v38  ;;  %v2804_v38 = vadd.f32 %v2116_v16, %v2689_v10 }
 0x124   : > { %v2230_v50 = vpop.eup %2229  ;;  %2255 = vrcp.f32 %v1422_v40  ;;  %v1425_v52 = vadd.f32 1.0, %v2228_v44 }
 0x125   : > { %v2232_v56 = vpop.eup %2231  ;;  %2257 = vrcp.f32 %v1438_v46  ;;  %v1441_v58 = vadd.f32 1.0, %v2230_v50 }
 0x126   : > { %v2234_v62 = vpop.eup %2233  ;;  %2259 = vrcp.f32 %v1425_v52  ;;  %v1423_v63 = vadd.f32 1.0, %v2232_v56  ;;  %v1310_v52 = vpop.f32.mrf.mxu1 }
 0x127   : > { %v2236_v5 = vpop.eup %2235  ;;  %2261 = vrcp.f32 %v1441_v58  ;;  %v1439_v6 = vadd.f32 1.0, %v2234_v62 }
 0x128   : > { %v2238_v9 = vpop.eup %2237  ;;  %2263 = vrcp.f32 %v1423_v63  ;;  %v1516_v35 = vmul.f32 %v2236_v5, %v2692_v12  ;;  %v2816_v12 = vadd.f32 %v2132_v25, %v2689_v10 }
 0x129   : > { %v2240_v23 = vpop.eup %2239  ;;  %2265 = vrcp.f32 %v1439_v6  ;;  %v1532_v43 = vmul.f32 %v2238_v9, %v2695_v14  ;;  %v2830_v6 = vadd.f32 %v2689_v10, %v1310_v52 }
 0x12a   : > { %v2242_v18 = vpop.eup %2241  ;;  %2267 = vpow2.f32 %v1896_v47  ;;  %v1514_v47 = vmul.f32 %v2240_v23, %v2699_v17  ;;  %v1898_v17 = vmul.f32 -1.442695, %v2796_v31 }
 0x12b   : > { %v2244_v26 = vpop.eup %2243  ;;  %2269 = vpow2.f32 %v1912_v7  ;;  %v1530_v58 = vmul.f32 %v2242_v18, %v2703_v20  ;;  %v1914_v20 = vmul.f32 -1.442695, %v2799_v32  ;;  %v1901_v7 = vmul.f32 -1.442695, %v2804_v38 }
 0x12c   : > { %v2246_v34 = vpop.eup %2245  ;;  %v1517_v37 = vmul.f32 %v2244_v26, %v2707_v24  ;;  %2271 = vpow2.f32 %v1894_v3  ;;  %v1246_v24 = vpop.f32.mrf.mxu0  ;;  %v1917_v3 = vmul.f32 -1.442695, %v2816_v12 }
 0x12d   : > { %v2248_v40 = vpop.eup %2247  ;;  %v1533_v44 = vmul.f32 %v2246_v34, %v2711_v27  ;;  %2273 = vpow2.f32 %v1910_v11  ;;  %v2825_v4 = vadd.f32 %v2689_v10, %v1246_v24 }
 0x12e   : > { %v2250_v46 = vpop.eup %2249  ;;  %v1992_v50 = vpack.c.bf16 %v1517_v37, %v1516_v35  ;;  %v1515_v14 = vmul.f32 %v2248_v40, %v2715_v30  ;;  %2275 = vpow2.f32 %v1897_v13 }
 0x12f   : > { %v2252_v56 = vpop.eup %2251  ;;  %v2032_v61 = vpack.c.bf16 %v1533_v44, %v1532_v43  ;;  %v1531_v27 = vmul.f32 %v2250_v46, %v2719_v33  ;;  %2277 = vpow2.f32 %v1913_v15  ;;  %v1899_v15 = vmul.f32 -1.442695, %v2825_v4 }
 0x130   : > { %v2254_v62 = vpop.eup %2253  ;;  %2064 = vst [vmem:[%s2812_s3 + $0x8] sm:$0xff] %v1992_v50   ;;  %v1987_v63 = vpack.c.bf16 %v1515_v14, %v1514_v47  ;;  %2279 = vpow2.f32 %v1895_v19  ;;  %v1520_v11 = vmul.f32 %v2252_v56, %v2723_v36  ;;  %v1915_v19 = vmul.f32 -1.442695, %v2830_v6 }
 0x131   : > { %v2256_v30 = vpop.eup %2255  ;;  %2072 = vst [vmem:[%s2812_s3 + $0x48] sm:$0xff] %v2032_v61   ;;  %v2027_v5 = vpack.c.bf16 %v1531_v27, %v1530_v58  ;;  %2281 = vpow2.f32 %v1911_v21  ;;  %v1536_v16 = vmul.f32 %v2254_v62, %v2727_v39 }
 0x132   : > { %v2258_v33 = vpop.eup %2257  ;;  %1988 = vst [vmem:[%s2812_s3] sm:$0xff] %v1987_v63   ;;  %2283 = vpow2.f32 %v1900_v22  ;;  %v1518_v22 = vmul.f32 %v2256_v30, %v2731_v42 }
 0x133   : > { %v2260_v9 = vpop.eup %2259  ;;  %2071 = vst [vmem:[%s2812_s3 + $0x40] sm:$0xff] %v2027_v5   ;;  %2285 = vpow2.f32 %v1916_v28  ;;  %v1534_v26 = vmul.f32 %v2258_v33, %v2735_v45 }
 0x134   : > { %v2262_v23 = vpop.eup %2261  ;;  %v1521_v13 = vmul.f32 %v2260_v9, %v2739_v48  ;;  %2287 = vpow2.f32 %v1898_v17 }
 0x135   : > { %v2264_v10 = vpop.eup %2263  ;;  %v1537_v18 = vmul.f32 %v2262_v23, %v2743_v51  ;;  %2289 = vpow2.f32 %v1914_v20 }
 0x136   : > { %v2266_v21 = vpop.eup %2265  ;;  %v2002_v25 = vpack.c.bf16 %v1521_v13, %v1520_v11  ;;  %v1519_v36 = vmul.f32 %v2264_v10, %v2747_v54  ;;  %2291 = vpow2.f32 %v1901_v7 }
 0x137   : > { %v2268_v48 = vpop.eup %2267  ;;  %v2042_v28 = vpack.c.bf16 %v1537_v18, %v1536_v16  ;;  %v1535_v39 = vmul.f32 %v2266_v21, %v2751_v57  ;;  %2293 = vpow2.f32 %v1917_v3 }
 0x138   : > { %v2270_v51 = vpop.eup %2269  ;;  %2066 = vst [vmem:[%s2812_s3 + $0x18] sm:$0xff] %v2002_v25   ;;  %v1997_v34 = vpack.c.bf16 %v1519_v36, %v1518_v22  ;;  %v1428_v35 = vadd.f32 1.0, %v2268_v48  ;;  %2295 = vpow2.f32 %v1899_v15 }
 0x139   : > { %v2272_v37 = vpop.eup %2271  ;;  %2074 = vst [vmem:[%s2812_s3 + $0x58] sm:$0xff] %v2042_v28   ;;  %v2037_v42 = vpack.c.bf16 %v1535_v39, %v1534_v26  ;;  %v1444_v40 = vadd.f32 1.0, %v2270_v51  ;;  %2297 = vpow2.f32 %v1915_v19 }
 0x13a   : > { %v2274_v54 = vpop.eup %2273  ;;  %2065 = vst [vmem:[%s2812_s3 + $0x10] sm:$0xff] %v1997_v34   ;;  %2299 = vrcp.f32 %v1428_v35  ;;  %v1426_v43 = vadd.f32 1.0, %v2272_v37 }
 0x13b   : > { %v2276_v45 = vpop.eup %2275  ;;  %2073 = vst [vmem:[%s2812_s3 + $0x50] sm:$0xff] %v2037_v42   ;;  %2301 = vrcp.f32 %v1444_v40  ;;  %v1442_v57 = vadd.f32 1.0, %v2274_v54 }
 0x13c   : > { %v2278_v44 = vpop.eup %2277  ;;  %2303 = vrcp.f32 %v1426_v43  ;;  %v1429_v24 = vadd.f32 1.0, %v2276_v45 }
 0x13d   : > { %v2280_v46 = vpop.eup %2279  ;;  %2305 = vrcp.f32 %v1442_v57  ;;  %v1445_v47 = vadd.f32 1.0, %v2278_v44 }
 0x13e   : > { %v2282_v50 = vpop.eup %2281  ;;  %2307 = vrcp.f32 %v1429_v24  ;;  %v1427_v14 = vadd.f32 1.0, %v2280_v46 }
 0x13f   : > { %v2284_v52 = vpop.eup %2283  ;;  %2309 = vrcp.f32 %v1445_v47  ;;  %v1443_v56 = vadd.f32 1.0, %v2282_v50 }
 0x140   : > { %v2286_v58 = vpop.eup %2285  ;;  %2311 = vrcp.f32 %v1427_v14  ;;  %v1432_v61 = vadd.f32 1.0, %v2284_v52 }
 0x141   : > { %v2288_v27 = vpop.eup %2287  ;;  %2313 = vrcp.f32 %v1443_v56  ;;  %v1448_v62 = vadd.f32 1.0, %v2286_v58 }
 0x142   : > { %v2290_v63 = vpop.eup %2289  ;;  %2315 = vrcp.f32 %v1432_v61  ;;  %v1430_v17 = vadd.f32 1.0, %v2288_v27 }
 0x143   : > { %v2292_v30 = vpop.eup %2291  ;;  %2317 = vrcp.f32 %v1448_v62  ;;  %v1446_v5 = vadd.f32 1.0, %v2290_v63 }
 0x144   : > { %v2294_v20 = vpop.eup %2293  ;;  %2319 = vrcp.f32 %v1430_v17  ;;  %v1433_v33 = vadd.f32 1.0, %v2292_v30 }
 0x145   : > { %v2296_v7 = vpop.eup %2295  ;;  %2321 = vrcp.f32 %v1446_v5  ;;  %v1449_v9 = vadd.f32 1.0, %v2294_v20 }
 0x146   : > { %v2298_v3 = vpop.eup %2297  ;;  %2323 = vrcp.f32 %v1433_v33  ;;  %v1431_v23 = vadd.f32 1.0, %v2296_v7 }
 0x147   : > { %v2300_v11 = vpop.eup %2299  ;;  %2325 = vrcp.f32 %v1449_v9  ;;  %v1447_v13 = vadd.f32 1.0, %v2298_v3 }
 0x148   : > { %v2302_v15 = vpop.eup %2301  ;;  %2327 = vrcp.f32 %v1431_v23  ;;  %v1524_v21 = vmul.f32 %v2300_v11, %v2756_v29 }
 0x149   : > { %v2304_v10 = vpop.eup %2303  ;;  %2329 = vrcp.f32 %v1447_v13  ;;  %v1540_v36 = vmul.f32 %v2302_v15, %v2759_v41 }
 0x14a   : > { %v2306_v16 = vpop.eup %2305  ;;  %v1522_v28 = vmul.f32 %v2304_v10, %v2763_v49 }
 0x14b   : > { %v2308_v18 = vpop.eup %2307  ;;  %v1538_v35 = vmul.f32 %v2306_v16, %v2766_v53 }
 0x14c   : > { %v2310_v19 = vpop.eup %2309  ;;  %v1525_v22 = vmul.f32 %v2308_v18, %v2769_v55 }
 0x14d   : > { %v2312_v25 = vpop.eup %2311  ;;  %v1541_v48 = vmul.f32 %v2310_v19, %v2772_v59 }
 0x14e   : > { %v2314_v26 = vpop.eup %2313  ;;  %v2012_v39 = vpack.c.bf16 %v1525_v22, %v1524_v21  ;;  %v1523_v51 = vmul.f32 %v2312_v25, %v2775_v60 }
 0x14f   : > { %v2316_v34 = vpop.eup %2315  ;;  %v2052_v29 = vpack.c.bf16 %v1541_v48, %v1540_v36  ;;  %v1539_v55 = vmul.f32 %v2314_v26, %v2778_v0 }
 0x150   : > { %v2318_v37 = vpop.eup %2317  ;;  %2068 = vst [vmem:[%s2812_s3 + $0x28] sm:$0xff] %v2012_v39   ;;  %v2007_v42 = vpack.c.bf16 %v1523_v51, %v1522_v28  ;;  %v1528_v60 = vmul.f32 %v2316_v34, %v2781_v2 }
 0x151   : > { %v2320_v41 = vpop.eup %2319  ;;  %2076 = vst [vmem:[%s2812_s3 + $0x68] sm:$0xff] %v2052_v29   ;;  %v2047_v59 = vpack.c.bf16 %v1539_v55, %v1538_v35  ;;  %v1544_v43 = vmul.f32 %v2318_v37, %v2785_v8 }
 0x152   : > { %v2322_v40 = vpop.eup %2321  ;;  %2067 = vst [vmem:[%s2812_s3 + $0x20] sm:$0xff] %v2007_v42   ;;  %v1526_v44 = vmul.f32 %v2320_v41, %v2796_v31 }
 0x153   : > { %v2324_v49 = vpop.eup %2323  ;;  %2075 = vst [vmem:[%s2812_s3 + $0x60] sm:$0xff] %v2047_v59   ;;  %v1542_v47 = vmul.f32 %v2322_v40, %v2799_v32 }
 0x154   : > { %v2326_v54 = vpop.eup %2325  ;;  %v1529_v53 = vmul.f32 %v2324_v49, %v2804_v38 }
 0x155   : > { %v2328_v0 = vpop.eup %2327  ;;  %v1545_v45 = vmul.f32 %v2326_v54, %v2816_v12 }
 0x156   : > { %v2330_v57 = vpop.eup %2329  ;;  %v2022_v24 = vpack.c.bf16 %v1529_v53, %v1528_v60  ;;  %v1527_v46 = vmul.f32 %v2328_v0, %v2825_v4 }
 0x157   : > { %v2062_v50 = vpack.c.bf16 %v1545_v45, %v1544_v43  ;;  %v1543_v2 = vmul.f32 %v2330_v57, %v2830_v6 }
 0x158   : > { %2070 = vst [vmem:[%s2812_s3 + $0x38] sm:$0xff] %v2022_v24   ;;  %v2017_v14 = vpack.c.bf16 %v1527_v46, %v1526_v44 }
 0x159   : > { %2078 = vst [vmem:[%s2812_s3 + $0x78] sm:$0xff] %v2062_v50   ;;  %v2057_v38 = vpack.c.bf16 %v1543_v2, %v1542_v47 }
 0x15a   : > { %2069 = vst [vmem:[%s2812_s3 + $0x30] sm:$0xff] %v2017_v14  }
 0x15b   : > { %2077 = vst [vmem:[%s2812_s3 + $0x70] sm:$0xff] %v2057_v38  }
 0x15c PF: > { %s21_s19 = sadd.s32 1, %s2413_s19   ;;  %s2891_s17 = smov %s2409_s18 }
 0x15d   : > { %p18_p3 = scmp.ge.s32.totalorder %s21_s19, 4   ;;  %s2892_s18 = smov %s2894_s20 }
 0x15f   :  { %20 = sbr.rel (!%p18_p3) target bundleno = 6 (0x6), region = 135 }
 0x164   :  { %1734 = vsyncpa [#allocation8], 1 }
 0x165   :  { %1736 = vsyncpa [#allocation8 + $0x1], 1 }
 0x166   :  { %1737 = vsyncpa [#allocation10], 1 }

// kernel: forward.9
= control target key start
LH: loop header
LB: loop body
LE: loop exit
PB: predicated region body
PF: predicated region fallthrough
CT: control target
= control target key end

     0   :  { %s1101_s12 = smov 0   ;;  %s1103_s13 = smov 0   ;;  %s1229_s0 = inlined_call_operand.vmem [shape: bf16[128,288], index: 0, kind: input, shape index: {}]   ;;  %s1230_s1 = inlined_call_operand.vmem [shape: bf16[288,128], index: 1, kind: input, shape index: {}]   ;;  %s1231_s2 = inlined_call_operand.vmem [shape: f32[1,128], index: 2, kind: input, shape index: {}]   ;;  %s1232_s3 = inlined_call_operand.vmem [shape: bf16[128,128], index: 3, kind: output, shape index: {}]  }
   0x1   :  { %s1105_s14 = smov 0  }
   0x2 LB: > { %s25_s15 = sadd.s32 1, %s1075_s13  ;;  %p803_p0 = scmp.ge.s32.totalorder %s1079_s14, 1  ;;  %s1079_s14 = sphi %s1105_s14, %s13_s14   ;;  %s1075_s13 = sphi %s1103_s13, %s1234_s13   ;;  %s1071_s12 = sphi %s1101_s12, %s1233_s12  }
   0x3   : > { %p27_p1 = scmp.ge.s32.totalorder %s25_s15, 2  ;;  %p170_p2 = scmp.lt.s32.totalorder %s1079_s14, 3 }
   0x5   : > { %s1236_s15 = smov (%p27_p1, %s25_s15), 0  ;;  %p171_p3 = pnand %p803_p0, %p170_p2 }
   0x6   : > { %s804_s18 = sshll.u32 (!%p171_p3), %s1071_s12, 3 }
   0x7   : > { %174 = sbr.rel (%p171_p3) target bundleno = 303 (0x12f), region = 32  ;;  %p206_p4 = scmp.lt.s32.totalorder (!%p171_p3), %s804_s18, 15 }
   0xc   : > { %v991_v0 = vld [vmem:[%s1230_s1 + $0x78] sm:$0xff]   ;;  %v993_v2 = vld [vmem:[%s1230_s1 + $0x70] sm:$0xff]   ;;  %v995_v4 = vld [vmem:[%s1230_s1 + $0x68] sm:$0xff]   ;;  %s1238_s18 = smov (!%p206_p4, %s804_s18), 15  ;;  %vm456_vm0 = vcmask 261120  }
   0xd   : > { %v992_v1 = vld [vmem:[%s1230_s1 + $0x38] sm:$0xff]   ;;  %892 = vmatprep.subr.bf16.mxu0 %v991_v0  ;;  %950 = vmatprep.subr.bf16.mxu1 %v991_v0  ;;  %v994_v3 = vld [vmem:[%s1230_s1 + $0x30] sm:$0xff]   ;;  %v996_v5 = vld [vmem:[%s1230_s1 + $0x28] sm:$0xff]   ;;  %s966_s4 = smul.u32 12, %s1238_s18  ;;  %s807_s9 = sshll.u32 %s1238_s18, 2 }
   0xe   : > { %893 = vmatpush3.bf16.msra.mxu0 %v992_v1  ;;  %958 = vmatpush3.bf16.msra.mxu1 %v992_v1  ;;  %v997_v6 = vld [vmem:[%s1230_s1 + $0x60] sm:$0xff]   ;;  %v999_v8 = vld [vmem:[%s1230_s1 + $0x58] sm:$0xff]   ;;  %v1001_v10 = vld [vmem:[%s1230_s1 + $0x50] sm:$0xff]   ;;  %s226_s12 = scalar_lea.vmem %s1232_s3, %s807_s9 }
   0xf   : > { %894 = vmatprep.subr.bf16.mxu0 %v993_v2  ;;  %951 = vmatprep.subr.bf16.mxu1 %v993_v2  ;;  %v998_v7 = vld [vmem:[%s1230_s1 + $0x20] sm:$0xff]   ;;  %s1152_s11 = scalar_lea.vmem %s1229_s0, %s966_s4  ;;  %v1000_v9 = vld [vmem:[%s1230_s1 + $0x18] sm:$0xff]   ;;  %v1002_v13 = vld [vmem:[%s1230_s1 + $0x10] sm:$0xff]  }
  0x10   : > { %v1009_v11 = vld [vmem:[%s1152_s11 + $0x4] ss:$12 sps:$4 sm:$0xff]   ;;  %v1012_v12 = vld [vmem:[%s1152_s11 + $0x4c] ss:$12 sps:$4 sm:$0xff]   ;;  %v1010_v20 = vld [vmem:[%s1152_s11 + $0x48] ss:$12 sps:$4 sm:$0xff]  }
  0x11   : > { %v1003_v14 = vld [vmem:[%s1230_s1 + $0x48] sm:$0xff]   ;;  %501 = vmatprep.mubr.bf16.mxu0 %v1009_v11  ;;  %525 = vmatprep.mubr.bf16.mxu1 %v1012_v12  ;;  %v1005_v16 = vld [vmem:[%s1230_s1 + $0x40] sm:$0xff]   ;;  %v1023_v28 = vld [vmem:[%s1152_s11 + $0x30] ss:$12 sps:$4 sm:$0xff]  }
  0x12   : > { %895 = vmatpush3.bf16.msra.mxu0 %v994_v3  ;;  %959 = vmatpush3.bf16.msra.mxu1 %v994_v3  ;;  %v1004_v15 = vld [vmem:[%s1230_s1 + $0x8] sm:$0xff]   ;;  %v1006_v17 = vld [vmem:[%s1230_s1] sm:$0xff]   ;;  %v1024_v29 = vld [vmem:[%s1152_s11 + $0x50] ss:$12 sps:$4 sm:$0xff]  }
  0x13   : > { %896 = vmatprep.subr.bf16.mxu0 %v995_v4  ;;  %952 = vmatprep.subr.bf16.mxu1 %v995_v4  ;;  %v1013_v18 = vld [vmem:[%s1230_s1 + $0x88] sm:$0xff]   ;;  %v1014_v22 = vld [vmem:[%s1230_s1 + $0x80] sm:$0xff]  }
  0x14   : > { %v1007_v19 = vld [vmem:[%s1152_s11] ss:$12 sps:$4 sm:$0xff]   ;;  %v1015_v21 = vld [vmem:[%s1152_s11 + $0x1c] ss:$12 sps:$4 sm:$0xff]   ;;  %v1018_v24 = vld [vmem:[%s1152_s11 + $0x18] ss:$12 sps:$4 sm:$0xff]  }
  0x15   : > { %v1017_v23 = vld [vmem:[%s1152_s11 + $0x8] ss:$12 sps:$4 sm:$0xff]   ;;  %v1019_v25 = vld [vmem:[%s1152_s11 + $0x20] ss:$12 sps:$4 sm:$0xff]   ;;  %v1022_v27 = vld [vmem:[%s1152_s11 + $0x38] ss:$12 sps:$4 sm:$0xff]  }
  0x16   : > { %897 = vmatpush3.bf16.msra.mxu0 %v996_v5  ;;  %960 = vmatpush3.bf16.msra.mxu1 %v996_v5  ;;  %v1020_v26 = vld [vmem:[%s1152_s11 + $0x34] ss:$12 sps:$4 sm:$0xff]  }
  0x17   : > { %898 = vmatprep.subr.bf16.mxu0 %v997_v6  ;;  %953 = vmatprep.subr.bf16.mxu1 %v997_v6  ;;  %v808_v39 = vld [vmem:[%s1231_s2] ss:$0 sm:$0xff] }
  0x1a   : > { %899 = vmatpush3.bf16.msra.mxu0 %v998_v7  ;;  %961 = vmatpush3.bf16.msra.mxu1 %v998_v7 }
  0x1b   : > { %900 = vmatprep.subr.bf16.mxu0 %v999_v8  ;;  %954 = vmatprep.subr.bf16.mxu1 %v999_v8 }
  0x1e   : > { %901 = vmatpush3.bf16.msra.mxu0 %v1000_v9  ;;  %962 = vmatpush3.bf16.msra.mxu1 %v1000_v9 }
  0x1f   : > { %902 = vmatprep.subr.bf16.mxu0 %v1001_v10  ;;  %955 = vmatprep.subr.bf16.mxu1 %v1001_v10 }
  0x22   : > { %903 = vmatpush3.bf16.msra.mxu0 %v1002_v13  ;;  %963 = vmatpush3.bf16.msra.mxu1 %v1002_v13 }
  0x23   : > { %904 = vmatprep.subr.bf16.mxu0 %v1003_v14  ;;  %956 = vmatprep.subr.bf16.mxu1 %v1003_v14 }
  0x26   : > { %905 = vmatpush3.bf16.msra.mxu0 %v1004_v15  ;;  %964 = vmatpush3.bf16.msra.mxu1 %v1004_v15 }
  0x27   : > { %906 = vmatprep.subr.bf16.mxu0 %v1005_v16  ;;  %957 = vmatprep.subr.bf16.mxu1 %v1005_v16 }
  0x2a   : > { %907 = vmatpush3.bf16.msra.mxu0 %v1006_v17  ;;  %965 = vmatpush3.bf16.msra.mxu1 %v1006_v17 }
  0x2b   : > { %938 = vmatprep.subr.bf16.mxu1 %v1013_v18 }
  0x2d   : > { %502 = vmatmul.mubr.bf16.vlgmr.msra.gmra.mxu0 %v1007_v19  ;;  %526 = vmatmul.mubr.bf16.vlgmr.msra.gmra.mxu1 %v1010_v20 }
  0x2e   : > { %939 = vmatpush3.bf16.msra.mxu1 %v1013_v18  ;;  %509 = vmatprep.mubr.bf16.mxu0 %v1015_v21 }
  0x2f   : > { %940 = vmatprep.subr.bf16.mxu1 %v1014_v22  ;;  %942 = vmatprep.mubr.msk.bf16.mxu1 %vm456_vm0, %v1017_v23 }
  0x32   : > { %941 = vmatpush3.bf16.msra.mxu1 %v1014_v22 }
  0x35   : > { %510 = vmatmul.mubr.bf16.gmra.mxu0 %v1018_v24  ;;  %943 = vmatmul.mubr.msk.bf16.vlgmr.msra.gmra.mxu1 %vm456_vm0, %v1019_v25 }
  0x36   : > { %517 = vmatprep.mubr.bf16.mxu0 %v1020_v26  ;;  %946 = vmatprep.mubr.msk.bf16.mxu1 %vm456_vm0, %v1022_v27 }
  0x3d   : > { %518 = vmatmul.mubr.bf16.gmra.mxu0 %v1023_v28  ;;  %947 = vmatmul.mubr.msk.bf16.gmra.mxu1 %vm456_vm0, %v1024_v29 }
  0xed   : > { %v908_v30 = vpop.f32.mrf.mxu0  ;;  %v926_v31 = vpop.f32.mrf.mxu1 }
  0xef   : > { %v909_v32 = vpop.f32.mrf.mxu0  ;;  %v927_v33 = vpop.f32.mrf.mxu1 }
  0xf0   : > { %v910_v36 = vadd.f32 %v909_v32, %v908_v30  ;;  %v928_v44 = vadd.f32 %v927_v33, %v926_v31 }
  0xf1   : > { %v911_v34 = vpop.f32.mrf.mxu0  ;;  %v929_v35 = vpop.f32.mrf.mxu1 }
  0xf2   : > { %v504_v43 = vadd.f32 %v910_v36, %v808_v39  ;;  %v528_v57 = vadd.f32 %v928_v44, %v808_v39 }
  0xf3   : > { %v912_v37 = vpop.f32.mrf.mxu0  ;;  %v930_v38 = vpop.f32.mrf.mxu1 }
  0xf4   : > { %v913_v42 = vadd.f32 %v912_v37, %v911_v34  ;;  %v931_v54 = vadd.f32 %v930_v38, %v929_v35 }
  0xf5   : > { %v914_v40 = vpop.f32.mrf.mxu0  ;;  %v944_v41 = vpop.f32.mrf.mxu1 }
  0xf6   : > { %v507_v53 = vadd.f32 %v913_v42, %v808_v39  ;;  %v531_v5 = vadd.f32 %v931_v54, %v808_v39 }
  0xf7   : > { %v915_v45 = vpop.f32.mrf.mxu0  ;;  %v568_v46 = vpop.f32.mrf.mxu1 }
  0xf8   : > { %v916_v47 = vadd.f32 %v915_v45, %v914_v40  ;;  %v1200_v48 = vadd.f32 %v568_v46, %v504_v43 }
  0xf9   : > { %v917_v49 = vpop.f32.mrf.mxu0  ;;  %v945_v50 = vpop.f32.mrf.mxu1 }
  0xfa   : > { %v512_v51 = vadd.f32 %v916_v47, %v808_v39  ;;  %v843_v52 = vmul.f32 -1.442695, %v1200_v48 }
  0xfb   : > { %v918_v55 = vpop.f32.mrf.mxu0  ;;  %v571_v56 = vpop.f32.mrf.mxu1 }
  0xfc   : > { %v1203_v58 = vadd.f32 %v944_v41, %v512_v51  ;;  %1025 = vpow2.f32 %v843_v52  ;;  %v919_v59 = vadd.f32 %v918_v55, %v917_v49  ;;  %v1205_v60 = vadd.f32 %v571_v56, %v507_v53 }
  0xfd   : > { %v920_v61 = vpop.f32.mrf.mxu0  ;;  %v948_v62 = vpop.f32.mrf.mxu1 }
  0xfe   : > { %v845_v63 = vmul.f32 -1.442695, %v1203_v58  ;;  %v515_v0 = vadd.f32 %v919_v59, %v808_v39  ;;  %v844_v1 = vmul.f32 -1.442695, %v1205_v60  ;;  %v1209_v2 = vadd.f32 %v948_v62, %v528_v57 }
  0xff   : > { %v921_v3 = vpop.f32.mrf.mxu0  ;;  %v584_v4 = vpop.f32.mrf.mxu1 }
 0x100   : > { %1027 = vpow2.f32 %v845_v63  ;;  %v580_v6 = vadd.f32 %v945_v50, %v515_v0  ;;  %v849_v7 = vmul.f32 -1.442695, %v1209_v2  ;;  %v922_v8 = vadd.f32 %v921_v3, %v920_v61 }
 0x101   : > { %1029 = vpow2.f32 %v844_v1  ;;  %v923_v9 = vpop.f32.mrf.mxu0  ;;  %v949_v10 = vpop.f32.mrf.mxu1 }
 0x102   : > { %v846_v11 = vmul.f32 -1.442695, %v580_v6  ;;  %1031 = vpow2.f32 %v849_v7  ;;  %v520_v12 = vadd.f32 %v922_v8, %v808_v39  ;;  %v596_v13 = vadd.f32 %v949_v10, %v531_v5 }
 0x103   : > { %v924_v14 = vpop.f32.mrf.mxu0  ;;  %v587_v20 = vpop.f32.mrf.mxu1 }
 0x104   : > { %1033 = vpow2.f32 %v846_v11  ;;  %v585_v15 = vadd.f32 %v584_v4, %v520_v12  ;;  %v850_v16 = vmul.f32 -1.442695, %v596_v13  ;;  %v925_v17 = vadd.f32 %v924_v14, %v923_v9 }
 0x106   : > { %v847_v18 = vmul.f32 -1.442695, %v585_v15  ;;  %1035 = vpow2.f32 %v850_v16  ;;  %v523_v19 = vadd.f32 %v925_v17, %v808_v39 }
 0x108   : > { %1037 = vpow2.f32 %v847_v18  ;;  %v588_v21 = vadd.f32 %v587_v20, %v523_v19 }
 0x109   : > { %v1026_v22 = vpop.eup %1025 }
 0x10a   : > { %v848_v23 = vmul.f32 -1.442695, %v588_v21  ;;  %v623_v24 = vadd.f32 1.0, %v1026_v22 }
 0x10c   : > { %1039 = vpow2.f32 %v848_v23 }
 0x10d   : > { %v1028_v25 = vpop.eup %1027  ;;  %1041 = vrcp.f32 %v623_v24 }
 0x10e   : > { %v1030_v26 = vpop.eup %1029  ;;  %v625_v27 = vadd.f32 1.0, %v1028_v25 }
 0x10f   : > { %v1032_v28 = vpop.eup %1031  ;;  %v624_v29 = vadd.f32 1.0, %v1030_v26 }
 0x110   : > { %v629_v30 = vadd.f32 1.0, %v1032_v28 }
 0x111   : > { %v1034_v31 = vpop.eup %1033  ;;  %1043 = vrcp.f32 %v624_v29 }
 0x112   : > { %1045 = vrcp.f32 %v625_v27  ;;  %v626_v32 = vadd.f32 1.0, %v1034_v31 }
 0x113   : > { %v1036_v33 = vpop.eup %1035  ;;  %1047 = vrcp.f32 %v629_v30 }
 0x114   : > { %1049 = vrcp.f32 %v626_v32  ;;  %v630_v34 = vadd.f32 1.0, %v1036_v33 }
 0x115   : > { %v1038_v35 = vpop.eup %1037 }
 0x116   : > { %1051 = vrcp.f32 %v630_v34  ;;  %v627_v36 = vadd.f32 1.0, %v1038_v35 }
 0x118   : > { %1053 = vrcp.f32 %v627_v36 }
 0x119   : > { %v1040_v37 = vpop.eup %1039 }
 0x11a   : > { %v628_v38 = vadd.f32 1.0, %v1040_v37  ;;  %v1042_v39 = vpop.eup %1041 }
 0x11b   : > { %v647_v42 = vmul.f32 %v1042_v39, %v1200_v48 }
 0x11c   : > { %1055 = vrcp.f32 %v628_v38 }
 0x11e   : > { %v1044_v40 = vpop.eup %1043 }
 0x11f   : > { %v1046_v41 = vpop.eup %1045  ;;  %v648_v43 = vmul.f32 %v1044_v40, %v1205_v60 }
 0x120   : > { %v1048_v44 = vpop.eup %1047  ;;  %v649_v47 = vmul.f32 %v1046_v41, %v1203_v58 }
 0x121   : > { %v1050_v45 = vpop.eup %1049  ;;  %v872_v46 = vpack.c.bf16 %v648_v43, %v647_v42  ;;  %v653_v52 = vmul.f32 %v1048_v44, %v1209_v2 }
 0x122   : > { %v650_v49 = vmul.f32 %v1050_v45, %v580_v6 }
 0x123   : > { %v1052_v50 = vpop.eup %1051  ;;  %873 = vst [vmem:[%s226_s12] sm:$0xff] %v872_v46  }
 0x124   : > { %v877_v51 = vpack.c.bf16 %v650_v49, %v649_v47  ;;  %v654_v53 = vmul.f32 %v1052_v50, %v596_v13 }
 0x125   : > { %v1054_v54 = vpop.eup %1053 }
 0x126   : > { %889 = vst [vmem:[%s226_s12 + $0x8] sm:$0xff] %v877_v51   ;;  %v887_v48 = vpack.c.bf16 %v654_v53, %v653_v52  ;;  %v651_v56 = vmul.f32 %v1054_v54, %v585_v15 }
 0x128   : > { %891 = vst [vmem:[%s226_s12 + $0x18] sm:$0xff] %v887_v48  }
 0x129   : > { %v1056_v55 = vpop.eup %1055 }
 0x12a   : > { %v652_v57 = vmul.f32 %v1056_v55, %v588_v21 }
 0x12c   : > { %v882_v59 = vpack.c.bf16 %v652_v57, %v651_v56 }
 0x12e   : > { %890 = vst [vmem:[%s226_s12 + $0x10] sm:$0xff] %v882_v59  }
 0x12f PF: > { %s13_s14 = sadd.s32 1, %s1079_s14   ;;  %s1233_s12 = smov %s1075_s13 }
 0x130   : > { %p10_p5 = scmp.ge.s32.totalorder %s13_s14, 4   ;;  %s1234_s13 = smov %s1236_s15 }
 0x132   :  { %12 = sbr.rel (!%p10_p5) target bundleno = 2 (0x2), region = 68 }

// kernel: forward.10
= control target key start
LH: loop header
LB: loop body
LE: loop exit
PB: predicated region body
PF: predicated region fallthrough
CT: control target
= control target key end

     0   :  { %s1060_s12 = smov 0   ;;  %s1062_s13 = smov 0   ;;  %s1218_s0 = inlined_call_operand.vmem [shape: bf16[32,576], index: 0, kind: input, shape index: {}]   ;;  %s1219_s1 = inlined_call_operand.vmem [shape: bf16[576,128], index: 1, kind: input, shape index: {}]   ;;  %s1220_s2 = inlined_call_operand.vmem [shape: f32[1,128], index: 2, kind: input, shape index: {}]   ;;  %s1221_s3 = inlined_call_operand.vmem [shape: bf16[32,128], index: 3, kind: output, shape index: {}]  }
   0x1   :  { %s1064_s14 = smov 0  }
   0x2 LB: > { %s25_s15 = sadd.s32 1, %s1032_s13  ;;  %p814_p0 = scmp.ge.s32.totalorder %s1036_s14, 1  ;;  %s1036_s14 = sphi %s1064_s14, %s13_s14   ;;  %s1032_s13 = sphi %s1062_s13, %s1223_s13   ;;  %s1028_s12 = sphi %s1060_s12, %s1222_s12  }
   0x3   : > { %p27_p1 = scmp.ge.s32.totalorder %s25_s15, 2  ;;  %p170_p2 = scmp.lt.s32.totalorder %s1036_s14, 3 }
   0x5   : > { %s1225_s15 = smov (%p27_p1, %s25_s15), 0  ;;  %p171_p3 = pnand %p814_p0, %p170_p2 }
   0x6   : > { %s815_s21 = sshll.u32 (!%p171_p3), %s1028_s12, 1 }
   0x7   : > { %174 = sbr.rel (%p171_p3) target bundleno = 297 (0x129), region = 32  ;;  %p206_p4 = scmp.lt.s32.totalorder (!%p171_p3), %s815_s21, 3 }
   0xc   : > { %v963_v0 = vld [vmem:[%s1219_s1 + $0x78] sm:$0xff]   ;;  %v967_v4 = vld [vmem:[%s1219_s1 + $0x70] sm:$0xff]   ;;  %v971_v8 = vld [vmem:[%s1219_s1 + $0x68] sm:$0xff]   ;;  %s1227_s21 = smov (!%p206_p4, %s815_s21), 3  ;;  %v1038_v33 = vmov 0.0   ;;  %vm1039_vm0 = vmmov 0  }
   0xd   : > { %v964_v1 = vld [vmem:[%s1219_s1 + $0x38] sm:$0xff]   ;;  %875 = vmatprep.subr.bf16.mxu0 %v963_v0  ;;  %v968_v5 = vld [vmem:[%s1219_s1 + $0x30] sm:$0xff]   ;;  %v972_v9 = vld [vmem:[%s1219_s1 + $0x28] sm:$0xff]   ;;  %s936_s20 = smul.u32 20, %s1227_s21  ;;  %vm555_vm1 = vcmask 523264   ;;  %s818_s26 = sshll.u32 %s1227_s21, 2 }
   0xe   : > { %v965_v2 = vld [vmem:[%s1219_s1 + $0xf8] sm:$0xff]   ;;  %876 = vmatpush3.bf16.msra.mxu0 %v964_v1  ;;  %v969_v6 = vld [vmem:[%s1219_s1 + $0xf0] sm:$0xff]   ;;  %v973_v10 = vld [vmem:[%s1219_s1 + $0xe8] sm:$0xff]   ;;  %s226_s29 = scalar_lea.vmem %s1221_s3, %s818_s26 }
   0xf   : > { %v966_v3 = vld [vmem:[%s1219_s1 + $0xb8] sm:$0xff]   ;;  %897 = vmatprep.subr.bf16.mxu1 %v965_v2  ;;  %877 = vmatprep.subr.bf16.mxu0 %v967_v4  ;;  %v970_v7 = vld [vmem:[%s1219_s1 + $0xb0] sm:$0xff]   ;;  %v974_v11 = vld [vmem:[%s1219_s1 + $0xa8] sm:$0xff]   ;;  %s1174_s4 = scalar_lea.vmem %s1218_s0, %s936_s20 }
  0x10   : > { %898 = vmatpush3.bf16.msra.mxu1 %v966_v3  ;;  %v975_v12 = vld [vmem:[%s1219_s1 + $0x60] sm:$0xff]   ;;  %v979_v16 = vld [vmem:[%s1219_s1 + $0x58] sm:$0xff]   ;;  %v983_v20 = vld [vmem:[%s1219_s1 + $0x50] sm:$0xff]  }
  0x11   : > { %899 = vmatprep.subr.bf16.mxu1 %v969_v6  ;;  %v976_v13 = vld [vmem:[%s1219_s1 + $0x20] sm:$0xff]   ;;  %v980_v17 = vld [vmem:[%s1219_s1 + $0x18] sm:$0xff]   ;;  %v984_v21 = vld [vmem:[%s1219_s1 + $0x10] sm:$0xff]  }
  0x12   : > { %878 = vmatpush3.bf16.msra.mxu0 %v968_v5  ;;  %v977_v14 = vld [vmem:[%s1219_s1 + $0xe0] sm:$0xff]   ;;  %v981_v18 = vld [vmem:[%s1219_s1 + $0xd8] sm:$0xff]   ;;  %v985_v22 = vld [vmem:[%s1219_s1 + $0xd0] sm:$0xff]  }
  0x13   : > { %879 = vmatprep.subr.bf16.mxu0 %v971_v8  ;;  %v978_v15 = vld [vmem:[%s1219_s1 + $0xa0] sm:$0xff]   ;;  %v982_v19 = vld [vmem:[%s1219_s1 + $0x98] sm:$0xff]   ;;  %v986_v23 = vld [vmem:[%s1219_s1 + $0x90] sm:$0xff]  }
  0x14   : > { %900 = vmatpush3.bf16.msra.mxu1 %v970_v7  ;;  %v987_v24 = vld [vmem:[%s1219_s1 + $0x48] sm:$0xff]   ;;  %v991_v28 = vld [vmem:[%s1219_s1 + $0x40] sm:$0xff]   ;;  %v1001_v37 = vld [vmem:[%s1219_s1 + $0x118] sm:$0xff]  }
  0x15   : > { %901 = vmatprep.subr.bf16.mxu1 %v973_v10  ;;  %v988_v25 = vld [vmem:[%s1219_s1 + $0x8] sm:$0xff]   ;;  %v992_v29 = vld [vmem:[%s1219_s1] sm:$0xff]   ;;  %v1002_v38 = vld [vmem:[%s1219_s1 + $0x110] sm:$0xff]  }
  0x16   : > { %880 = vmatpush3.bf16.msra.mxu0 %v972_v9  ;;  %v989_v26 = vld [vmem:[%s1219_s1 + $0xc8] sm:$0xff]   ;;  %v993_v30 = vld [vmem:[%s1219_s1 + $0xc0] sm:$0xff]  }
  0x17   : > { %881 = vmatprep.subr.bf16.mxu0 %v975_v12  ;;  %v990_v27 = vld [vmem:[%s1219_s1 + $0x88] sm:$0xff]   ;;  %v994_v31 = vld [vmem:[%s1174_s4] ss:$20 sps:$4 sm:$0xff]   ;;  %v996_v32 = vld [vmem:[%s1174_s4 + $0x4] ss:$20 sps:$4 sm:$0xff]  }
  0x18   : > { %902 = vmatpush3.bf16.msra.mxu1 %v974_v11  ;;  %v997_v34 = vld [vmem:[%s1219_s1 + $0x80] sm:$0xff]   ;;  %591 = vmatprep.mubr.bf16.mxu0 %v996_v32  ;;  %v998_v35 = vld [vmem:[%s1174_s4 + $0x8] ss:$20 sps:$4 sm:$0xff]  }
  0x19   : > { %903 = vmatprep.subr.bf16.mxu1 %v977_v14  ;;  %v1000_v36 = vld [vmem:[%s1174_s4 + $0xc] ss:$20 sps:$4 sm:$0xff]   ;;  %v1005_v41 = vld [vmem:[%s1174_s4 + $0x10] ss:$20 sps:$4 sm:$0xff]  }
  0x1a   : > { %882 = vmatpush3.bf16.msra.mxu0 %v976_v13  ;;  %632 = vmatprep.mubr.bf16.mxu1 %v1000_v36  ;;  %v1003_v39 = vld [vmem:[%s1219_s1 + $0x108] sm:$0xff]   ;;  %v1004_v40 = vld [vmem:[%s1219_s1 + $0x100] sm:$0xff]  }
  0x1b   : > { %883 = vmatprep.subr.bf16.mxu0 %v979_v16  ;;  %v819_v48 = vld [vmem:[%s1220_s2] ss:$0 sm:$0xff] }
  0x1c   : > { %904 = vmatpush3.bf16.msra.mxu1 %v978_v15 }
  0x1d   : > { %905 = vmatprep.subr.bf16.mxu1 %v981_v18 }
  0x1e   : > { %884 = vmatpush3.bf16.msra.mxu0 %v980_v17 }
  0x1f   : > { %885 = vmatprep.subr.bf16.mxu0 %v983_v20 }
  0x20   : > { %906 = vmatpush3.bf16.msra.mxu1 %v982_v19 }
  0x21   : > { %907 = vmatprep.subr.bf16.mxu1 %v985_v22 }
  0x22   : > { %886 = vmatpush3.bf16.msra.mxu0 %v984_v21 }
  0x23   : > { %887 = vmatprep.subr.bf16.mxu0 %v987_v24 }
  0x24   : > { %908 = vmatpush3.bf16.msra.mxu1 %v986_v23 }
  0x25   : > { %909 = vmatprep.subr.bf16.mxu1 %v989_v26 }
  0x26   : > { %888 = vmatpush3.bf16.msra.mxu0 %v988_v25 }
  0x27   : > { %889 = vmatprep.subr.bf16.mxu0 %v991_v28 }
  0x28   : > { %910 = vmatpush3.bf16.msra.mxu1 %v990_v27 }
  0x29   : > { %911 = vmatprep.subr.bf16.mxu1 %v993_v30 }
  0x2a   : > { %890 = vmatpush3.bf16.msra.mxu0 %v992_v29 }
  0x2b   : > { %924 = vmatprep.subr.bf16.mxu0 %v1038_v33 }
  0x2c   : > { %912 = vmatpush3.bf16.msra.mxu1 %v997_v34 }
  0x2d   : > { %592 = vmatmul.mubr.bf16.vlgmr.msra.gmra.mxu0 %v994_v31 }
  0x2e   : > { %932 = vmatprep.mubr.msk.bf16.mxu0 %vm1039_vm0, %v1038_v33  ;;  %925 = vmatpush3.bf16.msra.mxu0 %v1001_v37 }
  0x2f   : > { %633 = vmatmul.mubr.bf16.vlgmr.msra.gmra.mxu1 %v998_v35  ;;  %926 = vmatprep.subr.bf16.mxu0 %v1038_v33 }
  0x32   : > { %927 = vmatpush3.bf16.msra.mxu0 %v1002_v38 }
  0x33   : > { %928 = vmatprep.subr.bf16.mxu0 %v1038_v33 }
  0x36   : > { %929 = vmatpush3.bf16.msra.mxu0 %v1003_v39 }
  0x37   : > { %930 = vmatprep.subr.bf16.mxu0 %v1038_v33 }
  0x3a   : > { %931 = vmatpush3.bf16.msra.mxu0 %v1004_v40 }
  0x3d   : > { %933 = vmatmul.mubr.msk.bf16.vlgmr.msra.gmra.mxu0 %vm555_vm1, %v1005_v41 }
  0xed   : > { %v891_v42 = vpop.f32.mrf.mxu0 }
  0xef   : > { %v892_v43 = vpop.f32.mrf.mxu0  ;;  %v913_v44 = vpop.f32.mrf.mxu1 }
  0xf0   : > { %v893_v47 = vadd.f32 %v892_v43, %v891_v42 }
  0xf1   : > { %v894_v45 = vpop.f32.mrf.mxu0  ;;  %v914_v46 = vpop.f32.mrf.mxu1 }
  0xf2   : > { %v594_v51 = vadd.f32 %v893_v47, %v819_v48  ;;  %v915_v52 = vadd.f32 %v914_v46, %v913_v44 }
  0xf3   : > { %v895_v49 = vpop.f32.mrf.mxu0  ;;  %v916_v50 = vpop.f32.mrf.mxu1 }
  0xf4   : > { %v896_v53 = vadd.f32 %v895_v49, %v894_v45  ;;  %v635_v57 = vadd.f32 %v915_v52, %v594_v51 }
  0xf5   : > { %v917_v54 = vpop.f32.mrf.mxu1 }
  0xf6   : > { %v597_v55 = vadd.f32 %v896_v53, %v819_v48  ;;  %v918_v56 = vadd.f32 %v917_v54, %v916_v50 }
  0xf8   : > { %v638_v62 = vadd.f32 %v918_v56, %v597_v55 }
  0xfd   : > { %v675_v58 = vpop.f32.mrf.mxu0 }
  0xfe   : > { %v676_v59 = vadd.f32 %v675_v58, %v635_v57 }
  0xff   : > { %v934_v60 = vpop.f32.mrf.mxu0 }
 0x100   : > { %v862_v61 = vmul.f32 -1.442695, %v676_v59 }
 0x101   : > { %v678_v63 = vpop.f32.mrf.mxu0 }
 0x102   : > { %1006 = vpow2.f32 %v862_v61  ;;  %v679_v0 = vadd.f32 %v678_v63, %v638_v62 }
 0x103   : > { %v935_v1 = vpop.f32.mrf.mxu0 }
 0x104   : > { %v863_v2 = vmul.f32 -1.442695, %v679_v0 }
 0x106   : > { %1008 = vpow2.f32 %v863_v2 }
 0x10f   : > { %v1007_v3 = vpop.eup %1006 }
 0x110   : > { %v688_v4 = vadd.f32 1.0, %v1007_v3 }
 0x112   : > { %1010 = vrcp.f32 %v688_v4 }
 0x113   : > { %v1009_v5 = vpop.eup %1008 }
 0x114   : > { %v689_v6 = vadd.f32 1.0, %v1009_v5 }
 0x116   : > { %1012 = vrcp.f32 %v689_v6 }
 0x11f   : > { %v1011_v7 = vpop.eup %1010 }
 0x120   : > { %v694_v9 = vmul.f32 %v1011_v7, %v676_v59 }
 0x123   : > { %v1013_v8 = vpop.eup %1012 }
 0x124   : > { %v695_v10 = vmul.f32 %v1013_v8, %v679_v0 }
 0x126   : > { %v873_v11 = vpack.c.bf16 %v695_v10, %v694_v9 }
 0x128   : > { %874 = vst [vmem:[%s226_s29] sm:$0xff] %v873_v11  }
 0x129 PF: > { %s13_s14 = sadd.s32 1, %s1036_s14   ;;  %s1222_s12 = smov %s1032_s13 }
 0x12a   : > { %p10_p5 = scmp.ge.s32.totalorder %s13_s14, 4   ;;  %s1223_s13 = smov %s1225_s15 }
 0x12c   :  { %12 = sbr.rel (!%p10_p5) target bundleno = 2 (0x2), region = 68 }

// kernel: forward.14
= control target key start
LH: loop header
LB: loop body
LE: loop exit
PB: predicated region body
PF: predicated region fallthrough
CT: control target
= control target key end

     0   :  { %s3093_s0 = inlined_call_operand.vmem [shape: bf16[1152,256], index: 0, kind: input, shape index: {}]   ;;  %s3094_s1 = inlined_call_operand.vmem [shape: f32[1,256], index: 1, kind: input, shape index: {}]   ;;  %s3095_s2 = inlined_call_operand.vmem [shape: bf16[8,1152], index: 2, kind: input, shape index: {}]   ;;  %s3096_s3 = inlined_call_operand.<no memory space> [shape: bf16[], index: 3, kind: input, shape index: {}]   ;;  %s3097_s4 = inlined_call_operand.vmem [shape: bf16[16,256], index: 4, kind: output, shape index: {}]  }
   0x1   :  { %v9_v0 = vstv %s3096_s3 }
   0x2   :  { %v2614_v1 = vunpack.i.l.bf16 %v9_v0 }
   0x3   :  { %s2616_s17 = smov 0   ;;  %s2618_s18 = smov 0  }
   0x4   :  { %s2620_s19 = smov 0   ;;  %s2622_s20 = smov 0  }
   0x5   :  { %s2624_s21 = smov 0  }
   0x6 LB: > { %s28_s3 = sadd.s32 1, %s2578_s20  ;;  %s2140_s22 = sadd.s32 4294967295, %s2582_s21   ;;  %s2582_s21 = sphi %s2624_s21, %s19_s21   ;;  %s2578_s20 = sphi %s2622_s20, %s3102_s20   ;;  %s2574_s19 = sphi %s2620_s19, %s3101_s19   ;;  %s2570_s18 = sphi %s2618_s18, %s3100_s18   ;;  %s2566_s17 = sphi %s2616_s17, %s3099_s17  }
   0x7   : > { %p29_p0 = scmp.ge.s32.totalorder %s28_s3, 2  ;;  %p71_p1 = scmp.ne.s32.totalorder %s2570_s18, %s2566_s17 }
   0x8   : > { %p72_p2 = scmp.eq.s32.totalorder %s2582_s21, 0  ;;  %p129_p4 = scmp.eq.s32.totalorder %s2140_s22, 1 }
   0x9   : > { %s3104_s3 = smov (%p29_p0, %s28_s3), 0  ;;  %s64_s24 = sadd.s32 1, %s2570_s18 }
   0xa   : > { %p73_p3 = por %p72_p2, %p71_p1  ;;  %s61_s23 = ssub.s32 %s2578_s20, %s3104_s3 }
   0xb   : > { %p62_p5 = scmp.eq.s32.totalorder %s61_s23, 0  ;;  %p2651_p6 = por %p129_p4, %p71_p1 }
   0xc   : > { %p2144_p7 = scmp.ge.s32.totalorder %s2582_s21, 2 }
   0xd   : > { %s2656_s26 = scalar_select %p62_p5, %s2570_s18, %s64_s24  }
   0xe   : > { %167 = sbr.rel (%p2144_p7) target bundleno = 119 (0x77), region = 20 }
  0x13   : > { %170 = sbr.rel (!%p73_p3) target bundleno = 119 (0x77), region = 24  ;;  %s172_s27 = sand.u32 (%p73_p3), 1, %s2570_s18  }
  0x14   : > { %s2145_s28 = sshll.u32 (%p73_p3), %s2578_s20, 2  ;;  %s2413_s29 = smul.u32 (%p73_p3), 576, %s172_s27 }
  0x15   : > { %s2664_s6 = scalar_lea.vmem (%p73_p3), %s3093_s0, %s2145_s28 }
  0x16   : > { %v193_v2 = vld [vmem:[%s2664_s6] sm:$0xf] (%p73_p3)  ;;  %v195_v3 = vld [vmem:[%s2664_s6 + $0x8] sm:$0xf] (%p73_p3)  ;;  %v197_v4 = vld [vmem:[%s2664_s6 + $0x10] sm:$0xf] (%p73_p3) }
  0x17   : > { %v199_v5 = vld [vmem:[%s2664_s6 + $0x18] sm:$0xf] (%p73_p3)  ;;  %v201_v6 = vld [vmem:[%s2664_s6 + $0x20] sm:$0xf] (%p73_p3)  ;;  %s2671_s7 = scalar_lea.vmem (%p73_p3), [#allocation7], %s2413_s29 }
  0x18   : > { %194 = vst [vmem:[%s2671_s7] sm:$0xf] %v193_v2  ;;  %196 = vst [vmem:[%s2671_s7 + $0x4] sm:$0xf] %v195_v3  ;;  %v203_v7 = vld [vmem:[%s2664_s6 + $0x28] sm:$0xf] }
  0x19   : > { %198 = vst [vmem:[%s2671_s7 + $0x8] sm:$0xf] %v197_v4  ;;  %200 = vst [vmem:[%s2671_s7 + $0xc] sm:$0xf] %v199_v5  ;;  %v205_v8 = vld [vmem:[%s2664_s6 + $0x30] sm:$0xf] }
  0x1a   : > { %202 = vst [vmem:[%s2671_s7 + $0x10] sm:$0xf] %v201_v6  ;;  %v207_v9 = vld [vmem:[%s2664_s6 + $0x38] sm:$0xf]  ;;  %204 = vst [vmem:[%s2671_s7 + $0x14] sm:$0xf] %v203_v7 }
  0x1b   : > { %206 = vst [vmem:[%s2671_s7 + $0x18] sm:$0xf] %v205_v8  ;;  %208 = vst [vmem:[%s2671_s7 + $0x1c] sm:$0xf] %v207_v9  ;;  %v209_v10 = vld [vmem:[%s2664_s6 + $0x40] sm:$0xf] }
  0x1c   : > { %v211_v11 = vld [vmem:[%s2664_s6 + $0x48] sm:$0xf]  ;;  %v213_v12 = vld [vmem:[%s2664_s6 + $0x50] sm:$0xf]  ;;  %210 = vst [vmem:[%s2671_s7 + $0x20] sm:$0xf] %v209_v10 }
  0x1d   : > { %212 = vst [vmem:[%s2671_s7 + $0x24] sm:$0xf] %v211_v11  ;;  %214 = vst [vmem:[%s2671_s7 + $0x28] sm:$0xf] %v213_v12  ;;  %v215_v13 = vld [vmem:[%s2664_s6 + $0x58] sm:$0xf] }
  0x1e   : > { %v217_v14 = vld [vmem:[%s2664_s6 + $0x60] sm:$0xf]  ;;  %v219_v15 = vld [vmem:[%s2664_s6 + $0x68] sm:$0xf]  ;;  %216 = vst [vmem:[%s2671_s7 + $0x2c] sm:$0xf] %v215_v13 }
  0x1f   : > { %218 = vst [vmem:[%s2671_s7 + $0x30] sm:$0xf] %v217_v14  ;;  %220 = vst [vmem:[%s2671_s7 + $0x34] sm:$0xf] %v219_v15  ;;  %v221_v16 = vld [vmem:[%s2664_s6 + $0x70] sm:$0xf] }
  0x20   : > { %v223_v17 = vld [vmem:[%s2664_s6 + $0x78] sm:$0xf]  ;;  %v225_v18 = vld [vmem:[%s2664_s6 + $0x80] sm:$0xf]  ;;  %222 = vst [vmem:[%s2671_s7 + $0x38] sm:$0xf] %v221_v16 }
  0x21   : > { %224 = vst [vmem:[%s2671_s7 + $0x3c] sm:$0xf] %v223_v17  ;;  %226 = vst [vmem:[%s2671_s7 + $0x40] sm:$0xf] %v225_v18  ;;  %v227_v19 = vld [vmem:[%s2664_s6 + $0x88] sm:$0xf] }
  0x22   : > { %v229_v20 = vld [vmem:[%s2664_s6 + $0x90] sm:$0xf]  ;;  %v231_v21 = vld [vmem:[%s2664_s6 + $0x98] sm:$0xf]  ;;  %228 = vst [vmem:[%s2671_s7 + $0x44] sm:$0xf] %v227_v19 }
  0x23   : > { %230 = vst [vmem:[%s2671_s7 + $0x48] sm:$0xf] %v229_v20  ;;  %232 = vst [vmem:[%s2671_s7 + $0x4c] sm:$0xf] %v231_v21  ;;  %v233_v22 = vld [vmem:[%s2664_s6 + $0xa0] sm:$0xf] }
  0x24   : > { %v235_v23 = vld [vmem:[%s2664_s6 + $0xa8] sm:$0xf]  ;;  %v237_v24 = vld [vmem:[%s2664_s6 + $0xb0] sm:$0xf]  ;;  %234 = vst [vmem:[%s2671_s7 + $0x50] sm:$0xf] %v233_v22 }
  0x25   : > { %236 = vst [vmem:[%s2671_s7 + $0x54] sm:$0xf] %v235_v23  ;;  %238 = vst [vmem:[%s2671_s7 + $0x58] sm:$0xf] %v237_v24  ;;  %v239_v25 = vld [vmem:[%s2664_s6 + $0xb8] sm:$0xf] }
  0x26   : > { %v241_v26 = vld [vmem:[%s2664_s6 + $0xc0] sm:$0xf]  ;;  %v243_v27 = vld [vmem:[%s2664_s6 + $0xc8] sm:$0xf]  ;;  %240 = vst [vmem:[%s2671_s7 + $0x5c] sm:$0xf] %v239_v25 }
  0x27   : > { %242 = vst [vmem:[%s2671_s7 + $0x60] sm:$0xf] %v241_v26  ;;  %244 = vst [vmem:[%s2671_s7 + $0x64] sm:$0xf] %v243_v27  ;;  %v245_v28 = vld [vmem:[%s2664_s6 + $0xd0] sm:$0xf] }
  0x28   : > { %v247_v29 = vld [vmem:[%s2664_s6 + $0xd8] sm:$0xf]  ;;  %v249_v30 = vld [vmem:[%s2664_s6 + $0xe0] sm:$0xf]  ;;  %246 = vst [vmem:[%s2671_s7 + $0x68] sm:$0xf] %v245_v28 }
  0x29   : > { %248 = vst [vmem:[%s2671_s7 + $0x6c] sm:$0xf] %v247_v29  ;;  %250 = vst [vmem:[%s2671_s7 + $0x70] sm:$0xf] %v249_v30  ;;  %v251_v31 = vld [vmem:[%s2664_s6 + $0xe8] sm:$0xf] }
  0x2a   : > { %v253_v32 = vld [vmem:[%s2664_s6 + $0xf0] sm:$0xf]  ;;  %v255_v33 = vld [vmem:[%s2664_s6 + $0xf8] sm:$0xf]  ;;  %252 = vst [vmem:[%s2671_s7 + $0x74] sm:$0xf] %v251_v31 }
  0x2b   : > { %254 = vst [vmem:[%s2671_s7 + $0x78] sm:$0xf] %v253_v32  ;;  %256 = vst [vmem:[%s2671_s7 + $0x7c] sm:$0xf] %v255_v33  ;;  %v257_v34 = vld [vmem:[%s2664_s6 + $0x100] sm:$0xf] }
  0x2c   : > { %v259_v35 = vld [vmem:[%s2664_s6 + $0x108] sm:$0xf]  ;;  %v261_v36 = vld [vmem:[%s2664_s6 + $0x110] sm:$0xf]  ;;  %258 = vst [vmem:[%s2671_s7 + $0x80] sm:$0xf] %v257_v34 }
  0x2d   : > { %260 = vst [vmem:[%s2671_s7 + $0x84] sm:$0xf] %v259_v35  ;;  %262 = vst [vmem:[%s2671_s7 + $0x88] sm:$0xf] %v261_v36  ;;  %v263_v37 = vld [vmem:[%s2664_s6 + $0x118] sm:$0xf] }
  0x2e   : > { %v265_v38 = vld [vmem:[%s2664_s6 + $0x120] sm:$0xf]  ;;  %v267_v39 = vld [vmem:[%s2664_s6 + $0x128] sm:$0xf]  ;;  %264 = vst [vmem:[%s2671_s7 + $0x8c] sm:$0xf] %v263_v37 }
  0x2f   : > { %266 = vst [vmem:[%s2671_s7 + $0x90] sm:$0xf] %v265_v38  ;;  %268 = vst [vmem:[%s2671_s7 + $0x94] sm:$0xf] %v267_v39  ;;  %v269_v40 = vld [vmem:[%s2664_s6 + $0x130] sm:$0xf] }
  0x30   : > { %v271_v41 = vld [vmem:[%s2664_s6 + $0x138] sm:$0xf]  ;;  %v273_v42 = vld [vmem:[%s2664_s6 + $0x140] sm:$0xf]  ;;  %270 = vst [vmem:[%s2671_s7 + $0x98] sm:$0xf] %v269_v40 }
  0x31   : > { %272 = vst [vmem:[%s2671_s7 + $0x9c] sm:$0xf] %v271_v41  ;;  %274 = vst [vmem:[%s2671_s7 + $0xa0] sm:$0xf] %v273_v42  ;;  %v275_v43 = vld [vmem:[%s2664_s6 + $0x148] sm:$0xf] }
  0x32   : > { %v277_v44 = vld [vmem:[%s2664_s6 + $0x150] sm:$0xf]  ;;  %v279_v45 = vld [vmem:[%s2664_s6 + $0x158] sm:$0xf]  ;;  %276 = vst [vmem:[%s2671_s7 + $0xa4] sm:$0xf] %v275_v43 }
  0x33   : > { %278 = vst [vmem:[%s2671_s7 + $0xa8] sm:$0xf] %v277_v44  ;;  %280 = vst [vmem:[%s2671_s7 + $0xac] sm:$0xf] %v279_v45  ;;  %v281_v46 = vld [vmem:[%s2664_s6 + $0x160] sm:$0xf] }
  0x34   : > { %v283_v47 = vld [vmem:[%s2664_s6 + $0x168] sm:$0xf]  ;;  %v285_v48 = vld [vmem:[%s2664_s6 + $0x170] sm:$0xf]  ;;  %282 = vst [vmem:[%s2671_s7 + $0xb0] sm:$0xf] %v281_v46 }
  0x35   : > { %284 = vst [vmem:[%s2671_s7 + $0xb4] sm:$0xf] %v283_v47  ;;  %286 = vst [vmem:[%s2671_s7 + $0xb8] sm:$0xf] %v285_v48  ;;  %v287_v49 = vld [vmem:[%s2664_s6 + $0x178] sm:$0xf] }
  0x36   : > { %v289_v50 = vld [vmem:[%s2664_s6 + $0x180] sm:$0xf]  ;;  %v291_v51 = vld [vmem:[%s2664_s6 + $0x188] sm:$0xf]  ;;  %288 = vst [vmem:[%s2671_s7 + $0xbc] sm:$0xf] %v287_v49 }
  0x37   : > { %290 = vst [vmem:[%s2671_s7 + $0xc0] sm:$0xf] %v289_v50  ;;  %292 = vst [vmem:[%s2671_s7 + $0xc4] sm:$0xf] %v291_v51  ;;  %v293_v52 = vld [vmem:[%s2664_s6 + $0x190] sm:$0xf] }
  0x38   : > { %v295_v53 = vld [vmem:[%s2664_s6 + $0x198] sm:$0xf]  ;;  %v297_v54 = vld [vmem:[%s2664_s6 + $0x1a0] sm:$0xf]  ;;  %294 = vst [vmem:[%s2671_s7 + $0xc8] sm:$0xf] %v293_v52 }
  0x39   : > { %296 = vst [vmem:[%s2671_s7 + $0xcc] sm:$0xf] %v295_v53  ;;  %298 = vst [vmem:[%s2671_s7 + $0xd0] sm:$0xf] %v297_v54  ;;  %v299_v55 = vld [vmem:[%s2664_s6 + $0x1a8] sm:$0xf] }
  0x3a   : > { %v301_v56 = vld [vmem:[%s2664_s6 + $0x1b0] sm:$0xf]  ;;  %v303_v57 = vld [vmem:[%s2664_s6 + $0x1b8] sm:$0xf]  ;;  %300 = vst [vmem:[%s2671_s7 + $0xd4] sm:$0xf] %v299_v55 }
  0x3b   : > { %302 = vst [vmem:[%s2671_s7 + $0xd8] sm:$0xf] %v301_v56  ;;  %304 = vst [vmem:[%s2671_s7 + $0xdc] sm:$0xf] %v303_v57  ;;  %v305_v58 = vld [vmem:[%s2664_s6 + $0x1c0] sm:$0xf] }
  0x3c   : > { %v307_v59 = vld [vmem:[%s2664_s6 + $0x1c8] sm:$0xf]  ;;  %v309_v60 = vld [vmem:[%s2664_s6 + $0x1d0] sm:$0xf]  ;;  %306 = vst [vmem:[%s2671_s7 + $0xe0] sm:$0xf] %v305_v58 }
  0x3d   : > { %308 = vst [vmem:[%s2671_s7 + $0xe4] sm:$0xf] %v307_v59  ;;  %310 = vst [vmem:[%s2671_s7 + $0xe8] sm:$0xf] %v309_v60  ;;  %v311_v61 = vld [vmem:[%s2664_s6 + $0x1d8] sm:$0xf] }
  0x3e   : > { %v313_v62 = vld [vmem:[%s2664_s6 + $0x1e0] sm:$0xf]  ;;  %v315_v63 = vld [vmem:[%s2664_s6 + $0x1e8] sm:$0xf]  ;;  %312 = vst [vmem:[%s2671_s7 + $0xec] sm:$0xf] %v311_v61 }
  0x3f   : > { %314 = vst [vmem:[%s2671_s7 + $0xf0] sm:$0xf] %v313_v62  ;;  %316 = vst [vmem:[%s2671_s7 + $0xf4] sm:$0xf] %v315_v63  ;;  %v317_v0 = vld [vmem:[%s2664_s6 + $0x1f0] sm:$0xf] }
  0x40   : > { %v319_v2 = vld [vmem:[%s2664_s6 + $0x1f8] sm:$0xf]  ;;  %v321_v3 = vld [vmem:[%s2664_s6 + $0x200] sm:$0xf]  ;;  %318 = vst [vmem:[%s2671_s7 + $0xf8] sm:$0xf] %v317_v0 }
  0x41   : > { %320 = vst [vmem:[%s2671_s7 + $0xfc] sm:$0xf] %v319_v2  ;;  %322 = vst [vmem:[%s2671_s7 + $0x100] sm:$0xf] %v321_v3  ;;  %v323_v4 = vld [vmem:[%s2664_s6 + $0x208] sm:$0xf] }
  0x42   : > { %v325_v5 = vld [vmem:[%s2664_s6 + $0x210] sm:$0xf]  ;;  %v327_v6 = vld [vmem:[%s2664_s6 + $0x218] sm:$0xf]  ;;  %324 = vst [vmem:[%s2671_s7 + $0x104] sm:$0xf] %v323_v4 }
  0x43   : > { %326 = vst [vmem:[%s2671_s7 + $0x108] sm:$0xf] %v325_v5  ;;  %328 = vst [vmem:[%s2671_s7 + $0x10c] sm:$0xf] %v327_v6  ;;  %v329_v7 = vld [vmem:[%s2664_s6 + $0x220] sm:$0xf] }
  0x44   : > { %v331_v8 = vld [vmem:[%s2664_s6 + $0x228] sm:$0xf]  ;;  %v333_v9 = vld [vmem:[%s2664_s6 + $0x230] sm:$0xf]  ;;  %330 = vst [vmem:[%s2671_s7 + $0x110] sm:$0xf] %v329_v7 }
  0x45   : > { %332 = vst [vmem:[%s2671_s7 + $0x114] sm:$0xf] %v331_v8  ;;  %334 = vst [vmem:[%s2671_s7 + $0x118] sm:$0xf] %v333_v9  ;;  %v335_v10 = vld [vmem:[%s2664_s6 + $0x238] sm:$0xf] }
  0x46   : > { %v337_v11 = vld [vmem:[%s2664_s6 + $0x240] sm:$0xf]  ;;  %v339_v12 = vld [vmem:[%s2664_s6 + $0x248] sm:$0xf]  ;;  %336 = vst [vmem:[%s2671_s7 + $0x11c] sm:$0xf] %v335_v10 }
  0x47   : > { %338 = vst [vmem:[%s2671_s7 + $0x120] sm:$0xf] %v337_v11  ;;  %340 = vst [vmem:[%s2671_s7 + $0x124] sm:$0xf] %v339_v12  ;;  %v341_v13 = vld [vmem:[%s2664_s6 + $0x250] sm:$0xf] }
  0x48   : > { %v343_v14 = vld [vmem:[%s2664_s6 + $0x258] sm:$0xf]  ;;  %v345_v15 = vld [vmem:[%s2664_s6 + $0x260] sm:$0xf]  ;;  %342 = vst [vmem:[%s2671_s7 + $0x128] sm:$0xf] %v341_v13 }
  0x49   : > { %344 = vst [vmem:[%s2671_s7 + $0x12c] sm:$0xf] %v343_v14  ;;  %346 = vst [vmem:[%s2671_s7 + $0x130] sm:$0xf] %v345_v15  ;;  %v347_v16 = vld [vmem:[%s2664_s6 + $0x268] sm:$0xf] }
  0x4a   : > { %v349_v17 = vld [vmem:[%s2664_s6 + $0x270] sm:$0xf]  ;;  %v351_v18 = vld [vmem:[%s2664_s6 + $0x278] sm:$0xf]  ;;  %348 = vst [vmem:[%s2671_s7 + $0x134] sm:$0xf] %v347_v16 }
  0x4b   : > { %350 = vst [vmem:[%s2671_s7 + $0x138] sm:$0xf] %v349_v17  ;;  %352 = vst [vmem:[%s2671_s7 + $0x13c] sm:$0xf] %v351_v18  ;;  %v353_v19 = vld [vmem:[%s2664_s6 + $0x280] sm:$0xf] }
  0x4c   : > { %v355_v20 = vld [vmem:[%s2664_s6 + $0x288] sm:$0xf]  ;;  %v357_v21 = vld [vmem:[%s2664_s6 + $0x290] sm:$0xf]  ;;  %354 = vst [vmem:[%s2671_s7 + $0x140] sm:$0xf] %v353_v19 }
  0x4d   : > { %356 = vst [vmem:[%s2671_s7 + $0x144] sm:$0xf] %v355_v20  ;;  %358 = vst [vmem:[%s2671_s7 + $0x148] sm:$0xf] %v357_v21  ;;  %v359_v22 = vld [vmem:[%s2664_s6 + $0x298] sm:$0xf] }
  0x4e   : > { %v361_v23 = vld [vmem:[%s2664_s6 + $0x2a0] sm:$0xf]  ;;  %v363_v24 = vld [vmem:[%s2664_s6 + $0x2a8] sm:$0xf]  ;;  %360 = vst [vmem:[%s2671_s7 + $0x14c] sm:$0xf] %v359_v22 }
  0x4f   : > { %362 = vst [vmem:[%s2671_s7 + $0x150] sm:$0xf] %v361_v23  ;;  %364 = vst [vmem:[%s2671_s7 + $0x154] sm:$0xf] %v363_v24  ;;  %v365_v25 = vld [vmem:[%s2664_s6 + $0x2b0] sm:$0xf] }
  0x50   : > { %v367_v26 = vld [vmem:[%s2664_s6 + $0x2b8] sm:$0xf]  ;;  %v369_v27 = vld [vmem:[%s2664_s6 + $0x2c0] sm:$0xf]  ;;  %366 = vst [vmem:[%s2671_s7 + $0x158] sm:$0xf] %v365_v25 }
  0x51   : > { %368 = vst [vmem:[%s2671_s7 + $0x15c] sm:$0xf] %v367_v26  ;;  %370 = vst [vmem:[%s2671_s7 + $0x160] sm:$0xf] %v369_v27  ;;  %v371_v28 = vld [vmem:[%s2664_s6 + $0x2c8] sm:$0xf] }
  0x52   : > { %v373_v29 = vld [vmem:[%s2664_s6 + $0x2d0] sm:$0xf]  ;;  %v375_v30 = vld [vmem:[%s2664_s6 + $0x2d8] sm:$0xf]  ;;  %372 = vst [vmem:[%s2671_s7 + $0x164] sm:$0xf] %v371_v28 }
  0x53   : > { %374 = vst [vmem:[%s2671_s7 + $0x168] sm:$0xf] %v373_v29  ;;  %376 = vst [vmem:[%s2671_s7 + $0x16c] sm:$0xf] %v375_v30  ;;  %v377_v31 = vld [vmem:[%s2664_s6 + $0x2e0] sm:$0xf] }
  0x54   : > { %v379_v32 = vld [vmem:[%s2664_s6 + $0x2e8] sm:$0xf]  ;;  %v381_v33 = vld [vmem:[%s2664_s6 + $0x2f0] sm:$0xf]  ;;  %378 = vst [vmem:[%s2671_s7 + $0x170] sm:$0xf] %v377_v31 }
  0x55   : > { %380 = vst [vmem:[%s2671_s7 + $0x174] sm:$0xf] %v379_v32  ;;  %382 = vst [vmem:[%s2671_s7 + $0x178] sm:$0xf] %v381_v33  ;;  %v383_v34 = vld [vmem:[%s2664_s6 + $0x2f8] sm:$0xf] }
  0x56   : > { %v385_v35 = vld [vmem:[%s2664_s6 + $0x300] sm:$0xf]  ;;  %v387_v36 = vld [vmem:[%s2664_s6 + $0x308] sm:$0xf]  ;;  %384 = vst [vmem:[%s2671_s7 + $0x17c] sm:$0xf] %v383_v34 }
  0x57   : > { %386 = vst [vmem:[%s2671_s7 + $0x180] sm:$0xf] %v385_v35  ;;  %388 = vst [vmem:[%s2671_s7 + $0x184] sm:$0xf] %v387_v36  ;;  %v389_v37 = vld [vmem:[%s2664_s6 + $0x310] sm:$0xf] }
  0x58   : > { %v391_v38 = vld [vmem:[%s2664_s6 + $0x318] sm:$0xf]  ;;  %v393_v39 = vld [vmem:[%s2664_s6 + $0x320] sm:$0xf]  ;;  %390 = vst [vmem:[%s2671_s7 + $0x188] sm:$0xf] %v389_v37 }
  0x59   : > { %392 = vst [vmem:[%s2671_s7 + $0x18c] sm:$0xf] %v391_v38  ;;  %394 = vst [vmem:[%s2671_s7 + $0x190] sm:$0xf] %v393_v39  ;;  %v395_v40 = vld [vmem:[%s2664_s6 + $0x328] sm:$0xf] }
  0x5a   : > { %v397_v41 = vld [vmem:[%s2664_s6 + $0x330] sm:$0xf]  ;;  %v399_v42 = vld [vmem:[%s2664_s6 + $0x338] sm:$0xf]  ;;  %396 = vst [vmem:[%s2671_s7 + $0x194] sm:$0xf] %v395_v40 }
  0x5b   : > { %398 = vst [vmem:[%s2671_s7 + $0x198] sm:$0xf] %v397_v41  ;;  %400 = vst [vmem:[%s2671_s7 + $0x19c] sm:$0xf] %v399_v42  ;;  %v401_v43 = vld [vmem:[%s2664_s6 + $0x340] sm:$0xf] }
  0x5c   : > { %v403_v44 = vld [vmem:[%s2664_s6 + $0x348] sm:$0xf]  ;;  %v405_v45 = vld [vmem:[%s2664_s6 + $0x350] sm:$0xf]  ;;  %402 = vst [vmem:[%s2671_s7 + $0x1a0] sm:$0xf] %v401_v43 }
  0x5d   : > { %404 = vst [vmem:[%s2671_s7 + $0x1a4] sm:$0xf] %v403_v44  ;;  %406 = vst [vmem:[%s2671_s7 + $0x1a8] sm:$0xf] %v405_v45  ;;  %v407_v46 = vld [vmem:[%s2664_s6 + $0x358] sm:$0xf] }
  0x5e   : > { %v409_v47 = vld [vmem:[%s2664_s6 + $0x360] sm:$0xf]  ;;  %v411_v48 = vld [vmem:[%s2664_s6 + $0x368] sm:$0xf]  ;;  %408 = vst [vmem:[%s2671_s7 + $0x1ac] sm:$0xf] %v407_v46 }
  0x5f   : > { %410 = vst [vmem:[%s2671_s7 + $0x1b0] sm:$0xf] %v409_v47  ;;  %412 = vst [vmem:[%s2671_s7 + $0x1b4] sm:$0xf] %v411_v48  ;;  %v413_v49 = vld [vmem:[%s2664_s6 + $0x370] sm:$0xf] }
  0x60   : > { %v415_v50 = vld [vmem:[%s2664_s6 + $0x378] sm:$0xf]  ;;  %v417_v51 = vld [vmem:[%s2664_s6 + $0x380] sm:$0xf]  ;;  %414 = vst [vmem:[%s2671_s7 + $0x1b8] sm:$0xf] %v413_v49 }
  0x61   : > { %416 = vst [vmem:[%s2671_s7 + $0x1bc] sm:$0xf] %v415_v50  ;;  %418 = vst [vmem:[%s2671_s7 + $0x1c0] sm:$0xf] %v417_v51  ;;  %v419_v52 = vld [vmem:[%s2664_s6 + $0x388] sm:$0xf] }
  0x62   : > { %v421_v53 = vld [vmem:[%s2664_s6 + $0x390] sm:$0xf]  ;;  %v423_v54 = vld [vmem:[%s2664_s6 + $0x398] sm:$0xf]  ;;  %420 = vst [vmem:[%s2671_s7 + $0x1c4] sm:$0xf] %v419_v52 }
  0x63   : > { %422 = vst [vmem:[%s2671_s7 + $0x1c8] sm:$0xf] %v421_v53  ;;  %424 = vst [vmem:[%s2671_s7 + $0x1cc] sm:$0xf] %v423_v54  ;;  %v425_v55 = vld [vmem:[%s2664_s6 + $0x3a0] sm:$0xf] }
  0x64   : > { %v427_v56 = vld [vmem:[%s2664_s6 + $0x3a8] sm:$0xf]  ;;  %v429_v57 = vld [vmem:[%s2664_s6 + $0x3b0] sm:$0xf]  ;;  %426 = vst [vmem:[%s2671_s7 + $0x1d0] sm:$0xf] %v425_v55 }
  0x65   : > { %428 = vst [vmem:[%s2671_s7 + $0x1d4] sm:$0xf] %v427_v56  ;;  %430 = vst [vmem:[%s2671_s7 + $0x1d8] sm:$0xf] %v429_v57  ;;  %v431_v58 = vld [vmem:[%s2664_s6 + $0x3b8] sm:$0xf] }
  0x66   : > { %v433_v59 = vld [vmem:[%s2664_s6 + $0x3c0] sm:$0xf]  ;;  %v435_v60 = vld [vmem:[%s2664_s6 + $0x3c8] sm:$0xf]  ;;  %432 = vst [vmem:[%s2671_s7 + $0x1dc] sm:$0xf] %v431_v58 }
  0x67   : > { %434 = vst [vmem:[%s2671_s7 + $0x1e0] sm:$0xf] %v433_v59  ;;  %436 = vst [vmem:[%s2671_s7 + $0x1e4] sm:$0xf] %v435_v60  ;;  %v437_v61 = vld [vmem:[%s2664_s6 + $0x3d0] sm:$0xf] }
  0x68   : > { %v439_v62 = vld [vmem:[%s2664_s6 + $0x3d8] sm:$0xf]  ;;  %v441_v63 = vld [vmem:[%s2664_s6 + $0x3e0] sm:$0xf]  ;;  %438 = vst [vmem:[%s2671_s7 + $0x1e8] sm:$0xf] %v437_v61 }
  0x69   : > { %440 = vst [vmem:[%s2671_s7 + $0x1ec] sm:$0xf] %v439_v62  ;;  %442 = vst [vmem:[%s2671_s7 + $0x1f0] sm:$0xf] %v441_v63  ;;  %v443_v0 = vld [vmem:[%s2664_s6 + $0x3e8] sm:$0xf] }
  0x6a   : > { %v445_v2 = vld [vmem:[%s2664_s6 + $0x3f0] sm:$0xf]  ;;  %v447_v3 = vld [vmem:[%s2664_s6 + $0x3f8] sm:$0xf]  ;;  %444 = vst [vmem:[%s2671_s7 + $0x1f4] sm:$0xf] %v443_v0 }
  0x6b   : > { %446 = vst [vmem:[%s2671_s7 + $0x1f8] sm:$0xf] %v445_v2  ;;  %448 = vst [vmem:[%s2671_s7 + $0x1fc] sm:$0xf] %v447_v3  ;;  %v449_v4 = vld [vmem:[%s2664_s6 + $0x400] sm:$0xf] }
  0x6c   : > { %v451_v5 = vld [vmem:[%s2664_s6 + $0x408] sm:$0xf]  ;;  %v453_v6 = vld [vmem:[%s2664_s6 + $0x410] sm:$0xf]  ;;  %450 = vst [vmem:[%s2671_s7 + $0x200] sm:$0xf] %v449_v4 }
  0x6d   : > { %452 = vst [vmem:[%s2671_s7 + $0x204] sm:$0xf] %v451_v5  ;;  %454 = vst [vmem:[%s2671_s7 + $0x208] sm:$0xf] %v453_v6  ;;  %v455_v7 = vld [vmem:[%s2664_s6 + $0x418] sm:$0xf] }
  0x6e   : > { %v457_v8 = vld [vmem:[%s2664_s6 + $0x420] sm:$0xf]  ;;  %v459_v9 = vld [vmem:[%s2664_s6 + $0x428] sm:$0xf]  ;;  %456 = vst [vmem:[%s2671_s7 + $0x20c] sm:$0xf] %v455_v7 }
  0x6f   : > { %458 = vst [vmem:[%s2671_s7 + $0x210] sm:$0xf] %v457_v8  ;;  %460 = vst [vmem:[%s2671_s7 + $0x214] sm:$0xf] %v459_v9  ;;  %v461_v10 = vld [vmem:[%s2664_s6 + $0x430] sm:$0xf] }
  0x70   : > { %v463_v11 = vld [vmem:[%s2664_s6 + $0x438] sm:$0xf]  ;;  %v465_v12 = vld [vmem:[%s2664_s6 + $0x440] sm:$0xf]  ;;  %462 = vst [vmem:[%s2671_s7 + $0x218] sm:$0xf] %v461_v10 }
  0x71   : > { %464 = vst [vmem:[%s2671_s7 + $0x21c] sm:$0xf] %v463_v11  ;;  %466 = vst [vmem:[%s2671_s7 + $0x220] sm:$0xf] %v465_v12  ;;  %v467_v13 = vld [vmem:[%s2664_s6 + $0x448] sm:$0xf] }
  0x72   : > { %v469_v14 = vld [vmem:[%s2664_s6 + $0x450] sm:$0xf]  ;;  %v471_v15 = vld [vmem:[%s2664_s6 + $0x458] sm:$0xf]  ;;  %468 = vst [vmem:[%s2671_s7 + $0x224] sm:$0xf] %v467_v13 }
  0x73   : > { %470 = vst [vmem:[%s2671_s7 + $0x228] sm:$0xf] %v469_v14  ;;  %472 = vst [vmem:[%s2671_s7 + $0x22c] sm:$0xf] %v471_v15  ;;  %v473_v16 = vld [vmem:[%s2664_s6 + $0x460] sm:$0xf] }
  0x74   : > { %v475_v17 = vld [vmem:[%s2664_s6 + $0x468] sm:$0xf]  ;;  %v477_v18 = vld [vmem:[%s2664_s6 + $0x470] sm:$0xf]  ;;  %474 = vst [vmem:[%s2671_s7 + $0x230] sm:$0xf] %v473_v16 }
  0x75   : > { %476 = vst [vmem:[%s2671_s7 + $0x234] sm:$0xf] %v475_v17  ;;  %478 = vst [vmem:[%s2671_s7 + $0x238] sm:$0xf] %v477_v18  ;;  %v479_v19 = vld [vmem:[%s2664_s6 + $0x478] sm:$0xf] }
  0x76   : > { %480 = vst [vmem:[%s2671_s7 + $0x23c] sm:$0xf] %v479_v19 }
  0x77 PF: > { %p2146_p8 = scmp.ge.s32.totalorder %s2582_s21, 1  ;;  %p797_p9 = scmp.lt.s32.totalorder %s2582_s21, 3 }
  0x79   : > { %p798_p10 = pnand %p2146_p8, %p797_p9 }
  0x7b   : > { %801 = sbr.rel (%p798_p10) target bundleno = 473 (0x1d9), region = 69 }
  0x80   : > { %s804_s8 = sand.u32 1, %s2566_s17   ;;  %v867_v20 = vld [vmem:[%s3095_s2] sm:$0xff]   ;;  %v2271_v22 = vpack.c.bf16 %v2614_v1, %v2614_v1  ;;  %v2972_v24 = vld [vmem:[%s3095_s2 + $0x8] sm:$0xff]   ;;  %v2977_v25 = vld [vmem:[%s3095_s2 + $0x10] sm:$0xff]   ;;  %vm2585_vm0 = vmmov 0   ;;  %p851_p11 = scmp.lt.s32.totalorder %s2574_s19, 1 }
  0x81   : > { %v2155_v21 = vld [vmem:[%s3095_s2 + $0x20] sm:$0xf]  ;;  %s2414_s13 = smul.u32 576, %s804_s8  ;;  %877 = vst [vmem:[#allocation9] sm:$0xff] %v867_v20   ;;  %v2983_v27 = vld [vmem:[%s3095_s2 + $0x18] sm:$0xff]   ;;  %s2147_s6 = sshll.u32 %s804_s8, 3 }
  0x82   : > { %v2264_v23 = vunpack.c.l.bf16 %v2155_v21  ;;  %2272 = vst [vmem:[#allocation9 + $0x28] sm:$0xff] %v2271_v22   ;;  %2277 = vst [vmem:[#allocation9 + $0x30] sm:$0xff] %v2271_v22   ;;  %s852_s28 = scalar_select %p851_p11, %s2574_s19, 1 }
  0x83   : > { %2282 = vst [vmem:[#allocation9 + $0x38] sm:$0xff] %v2271_v22   ;;  %2287 = vst [vmem:[#allocation9 + $0x40] sm:$0xff] %v2271_v22   ;;  %s2985_s27 = scalar_lea.vmem [#allocation7], %s2414_s13  ;;  %s837_s7 = scalar_lea.vmem [#allocation8], %s2147_s6 }
  0x84   : > { %v2266_v26 = vpack.c.bf16 %v2614_v1, %v2264_v23  ;;  %v2457_v28 = vld [vmem:[%s2985_s27 + $0x78] sm:$0xff]   ;;  %v2461_v32 = vld [vmem:[%s2985_s27 + $0x70] sm:$0xff]   ;;  %v2465_v36 = vld [vmem:[%s2985_s27 + $0x68] sm:$0xff]   ;;  %s853_s5 = scalar_lea.vmem %s3094_s1, %s852_s28  ;;  %s2243_s9 = sshll.u32 (%p2651_p6), %s2574_s19, 2 }
  0x85   : > { %v2458_v29 = vld [vmem:[%s2985_s27 + $0x38] sm:$0xff]   ;;  %2296 = vmatprep.subr.bf16.mxu0 %v2457_v28  ;;  %v2462_v33 = vld [vmem:[%s2985_s27 + $0x30] sm:$0xff]   ;;  %v2466_v37 = vld [vmem:[%s2985_s27 + $0x28] sm:$0xff]   ;;  %s2003_s12 = scalar_lea.vmem (%p2651_p6), %s3097_s4, %s2243_s9 }
  0x86   : > { %2267 = vst [vmem:[#allocation9 + $0x20] sm:$0xff] %v2266_v26   ;;  %v2459_v30 = vld [vmem:[%s2985_s27 + $0xf8] sm:$0xff]   ;;  %2297 = vmatpush3.bf16.msra.mxu0 %v2458_v29  ;;  %v2463_v34 = vld [vmem:[%s2985_s27 + $0xf0] sm:$0xff]   ;;  %v2467_v38 = vld [vmem:[%s2985_s27 + $0xe8] sm:$0xff]  }
  0x87   : > { %v2460_v31 = vld [vmem:[%s2985_s27 + $0xb8] sm:$0xff]   ;;  %2318 = vmatprep.subr.bf16.mxu1 %v2459_v30  ;;  %2298 = vmatprep.subr.bf16.mxu0 %v2461_v32  ;;  %v2464_v35 = vld [vmem:[%s2985_s27 + $0xb0] sm:$0xff]   ;;  %v2468_v39 = vld [vmem:[%s2985_s27 + $0xa8] sm:$0xff]  }
  0x88   : > { %2319 = vmatpush3.bf16.msra.mxu1 %v2460_v31  ;;  %v2469_v40 = vld [vmem:[%s2985_s27 + $0x60] sm:$0xff]   ;;  %v2473_v44 = vld [vmem:[%s2985_s27 + $0x58] sm:$0xff]   ;;  %v2477_v48 = vld [vmem:[%s2985_s27 + $0x50] sm:$0xff]  }
  0x89   : > { %2320 = vmatprep.subr.bf16.mxu1 %v2463_v34  ;;  %v2470_v41 = vld [vmem:[%s2985_s27 + $0x20] sm:$0xff]   ;;  %v2474_v45 = vld [vmem:[%s2985_s27 + $0x18] sm:$0xff]   ;;  %v2478_v49 = vld [vmem:[%s2985_s27 + $0x10] sm:$0xff]  }
  0x8a   : > { %2299 = vmatpush3.bf16.msra.mxu0 %v2462_v33  ;;  %v2471_v42 = vld [vmem:[%s2985_s27 + $0xe0] sm:$0xff]   ;;  %v2475_v46 = vld [vmem:[%s2985_s27 + $0xd8] sm:$0xff]   ;;  %v2479_v50 = vld [vmem:[%s2985_s27 + $0xd0] sm:$0xff]  }
  0x8b   : > { %2300 = vmatprep.subr.bf16.mxu0 %v2465_v36  ;;  %v2472_v43 = vld [vmem:[%s2985_s27 + $0xa0] sm:$0xff]   ;;  %v2476_v47 = vld [vmem:[%s2985_s27 + $0x98] sm:$0xff]   ;;  %v2480_v51 = vld [vmem:[%s2985_s27 + $0x90] sm:$0xff]  }
  0x8c   : > { %2321 = vmatpush3.bf16.msra.mxu1 %v2464_v35  ;;  %v2481_v52 = vld [vmem:[%s2985_s27 + $0x48] sm:$0xff]   ;;  %v2485_v56 = vld [vmem:[%s2985_s27 + $0x40] sm:$0xff]   ;;  %v2490_v60 = vld [vmem:[#allocation9 + $0x4] ss:$36 sps:$4 sm:$0xff]  }
  0x8d   : > { %2322 = vmatprep.subr.bf16.mxu1 %v2467_v38  ;;  %v2482_v53 = vld [vmem:[%s2985_s27 + $0x8] sm:$0xff]   ;;  %v2486_v57 = vld [vmem:[%s2985_s27] sm:$0xff]   ;;  %v2488_v59 = vld [vmem:[#allocation9] ss:$36 sps:$4 sm:$0xff]   ;;  %1795 = vmatprep.mubr.bf16.mxu0 %v2490_v60 }
  0x8e   : > { %2301 = vmatpush3.bf16.msra.mxu0 %v2466_v37  ;;  %v2483_v54 = vld [vmem:[%s2985_s27 + $0xc8] sm:$0xff]   ;;  %v2487_v58 = vld [vmem:[%s2985_s27 + $0xc0] sm:$0xff]   ;;  %v2492_v62 = vld [vmem:[%s2985_s27 + $0x178] sm:$0xff]  }
  0x8f   : > { %2302 = vmatprep.subr.bf16.mxu0 %v2469_v40  ;;  %v2484_v55 = vld [vmem:[%s2985_s27 + $0x88] sm:$0xff]   ;;  %v2491_v61 = vld [vmem:[%s2985_s27 + $0x80] sm:$0xff]   ;;  %v2494_v3 = vld [vmem:[%s2985_s27 + $0x138] sm:$0xff]  }
  0x90   : > { %2323 = vmatpush3.bf16.msra.mxu1 %v2468_v39  ;;  %v1130_v63 = vld [vmem:[#allocation9 + $0x2c] sm:$0xff]  ;;  %v2497_v6 = vld [vmem:[%s2985_s27 + $0x170] sm:$0xff]   ;;  %v2501_v10 = vld [vmem:[%s2985_s27 + $0x168] sm:$0xff]   ;;  %v2584_v39 = vmov 0.0  }
  0x91   : > { %2324 = vmatprep.subr.bf16.mxu1 %v2471_v42  ;;  %v2159_v0 = vcombine.low %v2972_v24, %v1130_v63  ;;  %v2160_v2 = vcombine.high %v2972_v24, %v1130_v63  ;;  %v2495_v4 = vld [vmem:[%s2985_s27 + $0x1f8] sm:$0xff]   ;;  %v2498_v7 = vld [vmem:[%s2985_s27 + $0x130] sm:$0xff]   ;;  %v2502_v11 = vld [vmem:[%s2985_s27 + $0x128] sm:$0xff]  }
  0x92   : > { %2303 = vmatpush3.bf16.msra.mxu0 %v2470_v41  ;;  %v2496_v5 = vld [vmem:[%s2985_s27 + $0x1b8] sm:$0xff]   ;;  %v2499_v8 = vld [vmem:[%s2985_s27 + $0x1f0] sm:$0xff]   ;;  %v2503_v12 = vld [vmem:[%s2985_s27 + $0x1e8] sm:$0xff]  }
  0x93   : > { %2304 = vmatprep.subr.bf16.mxu0 %v2473_v44  ;;  %1836 = vmatprep.mubr.bf16.mxu1 %v2160_v2  ;;  %v2500_v9 = vld [vmem:[%s2985_s27 + $0x1b0] sm:$0xff]   ;;  %v2504_v13 = vld [vmem:[%s2985_s27 + $0x1a8] sm:$0xff]   ;;  %v2505_v14 = vld [vmem:[%s2985_s27 + $0x160] sm:$0xff]  }
  0x94   : > { %2325 = vmatpush3.bf16.msra.mxu1 %v2472_v43  ;;  %v2506_v15 = vld [vmem:[%s2985_s27 + $0x120] sm:$0xff]   ;;  %v2509_v18 = vld [vmem:[%s2985_s27 + $0x158] sm:$0xff]   ;;  %v2513_v22 = vld [vmem:[%s2985_s27 + $0x150] sm:$0xff]  }
  0x95   : > { %2326 = vmatprep.subr.bf16.mxu1 %v2475_v46  ;;  %v2507_v16 = vld [vmem:[%s2985_s27 + $0x1e0] sm:$0xff]   ;;  %v2510_v19 = vld [vmem:[%s2985_s27 + $0x118] sm:$0xff]   ;;  %v2514_v23 = vld [vmem:[%s2985_s27 + $0x110] sm:$0xff]  }
  0x96   : > { %2305 = vmatpush3.bf16.msra.mxu0 %v2474_v45  ;;  %v2508_v17 = vld [vmem:[%s2985_s27 + $0x1a0] sm:$0xff]   ;;  %v2511_v20 = vld [vmem:[%s2985_s27 + $0x1d8] sm:$0xff]   ;;  %v2515_v24 = vld [vmem:[%s2985_s27 + $0x1d0] sm:$0xff]  }
  0x97   : > { %2306 = vmatprep.subr.bf16.mxu0 %v2477_v48  ;;  %v2512_v21 = vld [vmem:[%s2985_s27 + $0x198] sm:$0xff]   ;;  %v2516_v26 = vld [vmem:[%s2985_s27 + $0x190] sm:$0xff]   ;;  %v2517_v28 = vld [vmem:[%s2985_s27 + $0x148] sm:$0xff]  }
  0x98   : > { %2327 = vmatpush3.bf16.msra.mxu1 %v2476_v47  ;;  %v2518_v29 = vld [vmem:[%s2985_s27 + $0x108] sm:$0xff]   ;;  %v2521_v32 = vld [vmem:[%s2985_s27 + $0x140] sm:$0xff]   ;;  %v2527_v43 = vld [vmem:[%s2985_s27 + $0x238] sm:$0xff]  }
  0x99   : > { %2328 = vmatprep.subr.bf16.mxu1 %v2479_v50  ;;  %v2519_v30 = vld [vmem:[%s2985_s27 + $0x1c8] sm:$0xff]   ;;  %v2522_v33 = vld [vmem:[%s2985_s27 + $0x100] sm:$0xff]   ;;  %v2532_v46 = vld [vmem:[%s2985_s27 + $0x210] sm:$0xff]  }
  0x9a   : > { %2307 = vmatpush3.bf16.msra.mxu0 %v2478_v49  ;;  %v2520_v31 = vld [vmem:[%s2985_s27 + $0x188] sm:$0xff]   ;;  %v2523_v34 = vld [vmem:[%s2985_s27 + $0x1c0] sm:$0xff]   ;;  %v2535_v49 = vld [vmem:[#allocation9 + $0x20] ss:$36 sps:$4 sm:$0xff]  }
  0x9b   : > { %2308 = vmatprep.subr.bf16.mxu0 %v2481_v52  ;;  %v1131_v35 = vld [vmem:[#allocation9 + $0x34] sm:$0xff]  ;;  %v1132_v40 = vld [vmem:[#allocation9 + $0x3c] sm:$0xff] }
  0x9c   : > { %2329 = vmatpush3.bf16.msra.mxu1 %v2480_v51  ;;  %v2161_v36 = vcombine.low %v2977_v25, %v1131_v35  ;;  %v2162_v37 = vcombine.high %v2977_v25, %v1131_v35  ;;  %v2525_v38 = vld [vmem:[%s2985_s27 + $0x180] sm:$0xff]   ;;  %v2163_v41 = vcombine.low %v2983_v27, %v1132_v40  ;;  %v2164_v42 = vcombine.high %v2983_v27, %v1132_v40  ;;  %v2528_v25 = vld [vmem:[%s2985_s27 + $0x230] sm:$0xff]   ;;  %v2529_v44 = vld [vmem:[%s2985_s27 + $0x228] sm:$0xff]  }
  0x9d   : > { %2330 = vmatprep.subr.bf16.mxu1 %v2483_v54  ;;  %v2530_v45 = vld [vmem:[%s2985_s27 + $0x220] sm:$0xff]   ;;  %v2531_v27 = vld [vmem:[%s2985_s27 + $0x218] sm:$0xff]   ;;  %v2533_v47 = vld [vmem:[%s2985_s27 + $0x208] sm:$0xff]  }
  0x9e   : > { %2309 = vmatpush3.bf16.msra.mxu0 %v2482_v53  ;;  %v2534_v48 = vld [vmem:[%s2985_s27 + $0x200] sm:$0xff]  }
  0x9f   : > { %2310 = vmatprep.subr.bf16.mxu0 %v2485_v56 }
  0xa0   : > { %2331 = vmatpush3.bf16.msra.mxu1 %v2484_v55 }
  0xa1   : > { %2332 = vmatprep.subr.bf16.mxu1 %v2487_v58 }
  0xa2   : > { %2311 = vmatpush3.bf16.msra.mxu0 %v2486_v57 }
  0xa3   : > { %2340 = vmatprep.subr.bf16.mxu0 %v2492_v62  ;;  %v2156_v62 = vld [vmem:[%s853_s5] ss:$0 sm:$0xff] }
  0xa4   : > { %2333 = vmatpush3.bf16.msra.mxu1 %v2491_v61 }
  0xa5   : > { %1796 = vmatmul.mubr.bf16.vlgmr.msra.gmra.mxu0 %v2488_v59  ;;  %2362 = vmatprep.subr.bf16.mxu1 %v2495_v4 }
  0xa6   : > { %2341 = vmatpush3.bf16.msra.mxu0 %v2494_v3  ;;  %1877 = vmatprep.mubr.bf16.mxu0 %v2162_v37 }
  0xa7   : > { %1837 = vmatmul.mubr.bf16.vlgmr.msra.gmra.mxu1 %v2159_v0  ;;  %2342 = vmatprep.subr.bf16.mxu0 %v2497_v6 }
  0xa8   : > { %2363 = vmatpush3.bf16.msra.mxu1 %v2496_v5  ;;  %1918 = vmatprep.mubr.bf16.mxu1 %v2164_v42 }
  0xa9   : > { %2364 = vmatprep.subr.bf16.mxu1 %v2499_v8 }
  0xaa   : > { %2343 = vmatpush3.bf16.msra.mxu0 %v2498_v7 }
  0xab   : > { %2344 = vmatprep.subr.bf16.mxu0 %v2501_v10 }
  0xac   : > { %2365 = vmatpush3.bf16.msra.mxu1 %v2500_v9 }
  0xad   : > { %2366 = vmatprep.subr.bf16.mxu1 %v2503_v12 }
  0xae   : > { %2345 = vmatpush3.bf16.msra.mxu0 %v2502_v11 }
  0xaf   : > { %2346 = vmatprep.subr.bf16.mxu0 %v2505_v14 }
  0xb0   : > { %2367 = vmatpush3.bf16.msra.mxu1 %v2504_v13 }
  0xb1   : > { %2368 = vmatprep.subr.bf16.mxu1 %v2507_v16 }
  0xb2   : > { %2347 = vmatpush3.bf16.msra.mxu0 %v2506_v15 }
  0xb3   : > { %2348 = vmatprep.subr.bf16.mxu0 %v2509_v18 }
  0xb4   : > { %2369 = vmatpush3.bf16.msra.mxu1 %v2508_v17 }
  0xb5   : > { %2370 = vmatprep.subr.bf16.mxu1 %v2511_v20 }
  0xb6   : > { %2349 = vmatpush3.bf16.msra.mxu0 %v2510_v19 }
  0xb7   : > { %2350 = vmatprep.subr.bf16.mxu0 %v2513_v22 }
  0xb8   : > { %2371 = vmatpush3.bf16.msra.mxu1 %v2512_v21 }
  0xb9   : > { %2372 = vmatprep.subr.bf16.mxu1 %v2515_v24 }
  0xba   : > { %2351 = vmatpush3.bf16.msra.mxu0 %v2514_v23 }
  0xbb   : > { %2352 = vmatprep.subr.bf16.mxu0 %v2517_v28 }
  0xbc   : > { %2373 = vmatpush3.bf16.msra.mxu1 %v2516_v26 }
  0xbd   : > { %2374 = vmatprep.subr.bf16.mxu1 %v2519_v30 }
  0xbe   : > { %2353 = vmatpush3.bf16.msra.mxu0 %v2518_v29 }
  0xbf   : > { %2354 = vmatprep.subr.bf16.mxu0 %v2521_v32 }
  0xc0   : > { %2375 = vmatpush3.bf16.msra.mxu1 %v2520_v31 }
  0xc1   : > { %2376 = vmatprep.subr.bf16.mxu1 %v2523_v34 }
  0xc2   : > { %2355 = vmatpush3.bf16.msra.mxu0 %v2522_v33 }
  0xc3   : > { %2393 = vmatprep.subr.bf16.mxu0 %v2584_v39 }
  0xc4   : > { %2377 = vmatpush3.bf16.msra.mxu1 %v2525_v38 }
  0xc5   : > { %1878 = vmatmul.mubr.bf16.vlgmr.msra.gmra.mxu0 %v2161_v36 }
  0xc6   : > { %2394 = vmatpush3.bf16.msra.mxu0 %v2527_v43  ;;  %2409 = vmatprep.mubr.msk.bf16.mxu0 %vm2585_vm0, %v2584_v39 }
  0xc7   : > { %1919 = vmatmul.mubr.bf16.vlgmr.msra.gmra.mxu1 %v2163_v41  ;;  %2395 = vmatprep.subr.bf16.mxu0 %v2584_v39 }
  0xca   : > { %2396 = vmatpush3.bf16.msra.mxu0 %v2528_v25 }
  0xcb   : > { %2397 = vmatprep.subr.bf16.mxu0 %v2584_v39 }
  0xce   : > { %2398 = vmatpush3.bf16.msra.mxu0 %v2529_v44 }
  0xcf   : > { %2399 = vmatprep.subr.bf16.mxu0 %v2584_v39 }
  0xd2   : > { %2400 = vmatpush3.bf16.msra.mxu0 %v2530_v45 }
  0xd3   : > { %2401 = vmatprep.subr.bf16.mxu0 %v2584_v39 }
  0xd6   : > { %2402 = vmatpush3.bf16.msra.mxu0 %v2531_v27 }
  0xd7   : > { %2403 = vmatprep.subr.bf16.mxu0 %v2584_v39 }
  0xda   : > { %2404 = vmatpush3.bf16.msra.mxu0 %v2532_v46 }
  0xdb   : > { %2405 = vmatprep.subr.bf16.mxu0 %v2584_v39 }
  0xde   : > { %2406 = vmatpush3.bf16.msra.mxu0 %v2533_v47 }
  0xdf   : > { %2407 = vmatprep.subr.bf16.mxu0 %v2584_v39 }
  0xe2   : > { %2408 = vmatpush3.bf16.msra.mxu0 %v2534_v48 }
  0xe5   : > { %2410 = vmatmul.mubr.bf16.vlgmr.msra.gmra.mxu0 %v2535_v49 }
 0x165   : > { %v2312_v50 = vpop.f32.mrf.mxu0 }
 0x167   : > { %v2313_v51 = vpop.f32.mrf.mxu0  ;;  %v2334_v52 = vpop.f32.mrf.mxu1 }
 0x168   : > { %v2314_v61 = vadd.f32 %v2313_v51, %v2312_v50 }
 0x169   : > { %v2315_v53 = vpop.f32.mrf.mxu0  ;;  %v2335_v54 = vpop.f32.mrf.mxu1 }
 0x16a   : > { %v1798_v2 = vadd.f32 %v2314_v61, %v2156_v62  ;;  %v2336_v3 = vadd.f32 %v2335_v54, %v2334_v52 }
 0x16b   : > { %v2316_v55 = vpop.f32.mrf.mxu0  ;;  %v2337_v56 = vpop.f32.mrf.mxu1 }
 0x16c   : > { %v2317_v4 = vadd.f32 %v2316_v55, %v2315_v53  ;;  %v1839_v8 = vadd.f32 %v2336_v3, %v1798_v2 }
 0x16d   : > { %v2338_v58 = vpop.f32.mrf.mxu1 }
 0x16e   : > { %v1801_v9 = vadd.f32 %v2317_v4, %v2156_v62  ;;  %v2339_v10 = vadd.f32 %v2338_v58, %v2337_v56 }
 0x170   : > { %v1842_v15 = vadd.f32 %v2339_v10, %v1801_v9 }
 0x185   : > { %v2356_v57 = vpop.f32.mrf.mxu0 }
 0x187   : > { %v2357_v59 = vpop.f32.mrf.mxu0  ;;  %v2378_v60 = vpop.f32.mrf.mxu1 }
 0x188   : > { %v2358_v5 = vadd.f32 %v2357_v59, %v2356_v57 }
 0x189   : > { %v2359_v63 = vpop.f32.mrf.mxu0  ;;  %v2379_v0 = vpop.f32.mrf.mxu1 }
 0x18a   : > { %v1880_v11 = vadd.f32 %v2358_v5, %v1839_v8  ;;  %v2380_v12 = vadd.f32 %v2379_v0, %v2378_v60 }
 0x18b   : > { %v2360_v6 = vpop.f32.mrf.mxu0  ;;  %v2381_v7 = vpop.f32.mrf.mxu1 }
 0x18c   : > { %v2361_v13 = vadd.f32 %v2360_v6, %v2359_v63  ;;  %v1921_v18 = vadd.f32 %v2380_v12, %v1880_v11 }
 0x18d   : > { %v2382_v14 = vpop.f32.mrf.mxu1 }
 0x18e   : > { %v1883_v16 = vadd.f32 %v2361_v13, %v1842_v15  ;;  %v2383_v17 = vadd.f32 %v2382_v14, %v2381_v7 }
 0x190   : > { %v1924_v23 = vadd.f32 %v2383_v17, %v1883_v16 }
 0x1a5   : > { %v1961_v19 = vpop.f32.mrf.mxu0 }
 0x1a6   : > { %v1962_v20 = vadd.f32 %v1961_v19, %v1921_v18 }
 0x1a7   : > { %v2411_v21 = vpop.f32.mrf.mxu0 }
 0x1a8   : > { %v2238_v22 = vmul.f32 -1.442695, %v1962_v20 }
 0x1a9   : > { %v1964_v24 = vpop.f32.mrf.mxu0 }
 0x1aa   : > { %2536 = vpow2.f32 %v2238_v22  ;;  %v1965_v26 = vadd.f32 %v1964_v24, %v1924_v23 }
 0x1ab   : > { %v2412_v28 = vpop.f32.mrf.mxu0 }
 0x1ac   : > { %v2239_v29 = vmul.f32 -1.442695, %v1965_v26 }
 0x1ae   : > { %2538 = vpow2.f32 %v2239_v29 }
 0x1b7   : > { %v2537_v30 = vpop.eup %2536 }
 0x1b8   : > { %v1974_v31 = vadd.f32 1.0, %v2537_v30 }
 0x1ba   : > { %2540 = vrcp.f32 %v1974_v31 }
 0x1bb   : > { %v2539_v32 = vpop.eup %2538 }
 0x1bc   : > { %v1975_v33 = vadd.f32 1.0, %v2539_v32 }
 0x1be   : > { %2542 = vrcp.f32 %v1975_v33 }
 0x1c7   : > { %v2541_v34 = vpop.eup %2540 }
 0x1c8   : > { %v1980_v36 = vmul.f32 %v2541_v34, %v1962_v20 }
 0x1cb   : > { %v2543_v35 = vpop.eup %2542 }
 0x1cc   : > { %v1981_v37 = vmul.f32 %v2543_v35, %v1965_v26  ;;  %1998 = sbr.rel (!%p2651_p6) target bundleno = 473 (0x1d9), region = 77 }
 0x1ce   : > { %v2291_v38 = vpack.c.bf16 %v1981_v37, %v1980_v36 }
 0x1d0   : > { %2292 = vst [vmem:[%s837_s7] sm:$0xff] %v2291_v38  }
 0x1d7   : > { %v2020_v39 = vld [vmem:[%s837_s7] sm:$0xf]  ;;  %v2022_v40 = vld [vmem:[%s837_s7 + $0x4] sm:$0xf] }
 0x1d8   : > { %2021 = vst [vmem:[%s2003_s12] sm:$0xf] %v2020_v39  ;;  %2023 = vst [vmem:[%s2003_s12 + $0x8] sm:$0xf] %v2022_v40 }
 0x1d9 PF: > { %s19_s21 = sadd.s32 1, %s2582_s21   ;;  %s3099_s17 = smov %s2570_s18 }
 0x1da   : > { %p16_p12 = scmp.ge.s32.totalorder %s19_s21, 4   ;;  %s3100_s18 = smov %s2656_s26 }
 0x1db   : > { %s3101_s19 = smov %s2578_s20  ;;  %s3102_s20 = smov %s3104_s3 }
 0x1dc   :  { %18 = sbr.rel (!%p16_p12) target bundleno = 6 (0x6), region = 180 }

// kernel: forward.13
= control target key start
LH: loop header
LB: loop body
LE: loop exit
PB: predicated region body
PF: predicated region fallthrough
CT: control target
= control target key end

     0   :  { %s6515_s0 = inlined_call_operand.vmem [shape: bf16[2304,512], index: 0, kind: input, shape index: {}]   ;;  %s6516_s1 = inlined_call_operand.vmem [shape: f32[1,512], index: 1, kind: input, shape index: {}]   ;;  %s6517_s2 = inlined_call_operand.vmem [shape: bf16[2,2304], index: 2, kind: input, shape index: {}]   ;;  %s6518_s3 = inlined_call_operand.<no memory space> [shape: bf16[], index: 3, kind: input, shape index: {}]   ;;  %s6519_s4 = inlined_call_operand.vmem [shape: bf16[16,512], index: 4, kind: output, shape index: {}]  }
   0x1   :  { %v9_v0 = vstv %s6518_s3 }
   0x2   :  { %v5394_v1 = vunpack.i.l.bf16 %v9_v0 }
   0x3   :  { %s5396_s17 = smov 0   ;;  %s5398_s18 = smov 0  }
   0x4   :  { %s5400_s19 = smov 0   ;;  %s5402_s20 = smov 0  }
   0x5   :  { %s5404_s21 = smov 0  }
   0x6 LB: > { %s28_s3 = sadd.s32 1, %s5359_s20  ;;  %s4431_s22 = sadd.s32 4294967295, %s5363_s21   ;;  %s5363_s21 = sphi %s5404_s21, %s19_s21   ;;  %s5359_s20 = sphi %s5402_s20, %s6524_s20   ;;  %s5355_s19 = sphi %s5400_s19, %s6523_s19   ;;  %s5351_s18 = sphi %s5398_s18, %s6522_s18   ;;  %s5347_s17 = sphi %s5396_s17, %s6521_s17  }
   0x7   : > { %p29_p0 = scmp.ge.s32.totalorder %s28_s3, 2  ;;  %p71_p1 = scmp.ne.s32.totalorder %s5351_s18, %s5347_s17 }
   0x8   : > { %p72_p2 = scmp.eq.s32.totalorder %s5363_s21, 0  ;;  %p129_p4 = scmp.eq.s32.totalorder %s4431_s22, 1 }
   0x9   : > { %s6526_s3 = smov (%p29_p0, %s28_s3), 0  ;;  %s64_s24 = sadd.s32 1, %s5351_s18 }
   0xa   : > { %p73_p3 = por %p72_p2, %p71_p1  ;;  %s61_s23 = ssub.s32 %s5359_s20, %s6526_s3 }
   0xb   : > { %p62_p5 = scmp.eq.s32.totalorder %s61_s23, 0  ;;  %p5431_p6 = por %p129_p4, %p71_p1 }
   0xc   : > { %p4435_p7 = scmp.ge.s32.totalorder %s5363_s21, 2 }
   0xd   : > { %s5436_s26 = scalar_select %p62_p5, %s5351_s18, %s64_s24  }
   0xe   : > { %170 = sbr.rel (%p4435_p7) target bundleno = 167 (0xa7), region = 20 }
  0x13   : > { %173 = sbr.rel (!%p73_p3) target bundleno = 167 (0xa7), region = 24  ;;  %s175_s27 = sand.u32 (%p73_p3), 1, %s5351_s18  }
  0x14   : > { %s4775_s28 = sshll.u32 (%p73_p3), %s5359_s20, 3  ;;  %s4824_s29 = smul.u32 (%p73_p3), 2304, %s175_s27 }
  0x15   : > { %s5444_s6 = scalar_lea.vmem (%p73_p3), %s6515_s0, %s4775_s28 }
  0x16   : > { %v783_v2 = vld [vmem:[%s5444_s6] sm:$0xff] (%p73_p3)  ;;  %v785_v3 = vld [vmem:[%s5444_s6 + $0x10] sm:$0xff] (%p73_p3)  ;;  %s5452_s7 = scalar_lea.vmem (%p73_p3), [#allocation7], %s4824_s29 }
  0x17   : > { %v787_v4 = vld [vmem:[%s5444_s6 + $0x20] sm:$0xff] (%p73_p3)  ;;  %v789_v5 = vld [vmem:[%s5444_s6 + $0x30] sm:$0xff] (%p73_p3)  ;;  %784 = vst [vmem:[%s5452_s7] sm:$0xff] (%p73_p3), %v783_v2  ;;  %786 = vst [vmem:[%s5452_s7 + $0x8] sm:$0xff] (%p73_p3), %v785_v3 }
  0x18   : > { %v791_v6 = vld [vmem:[%s5444_s6 + $0x40] sm:$0xff]  ;;  %v793_v7 = vld [vmem:[%s5444_s6 + $0x50] sm:$0xff]  ;;  %788 = vst [vmem:[%s5452_s7 + $0x10] sm:$0xff] %v787_v4  ;;  %790 = vst [vmem:[%s5452_s7 + $0x18] sm:$0xff] %v789_v5 }
  0x19   : > { %792 = vst [vmem:[%s5452_s7 + $0x20] sm:$0xff] %v791_v6  ;;  %794 = vst [vmem:[%s5452_s7 + $0x28] sm:$0xff] %v793_v7  ;;  %v795_v8 = vld [vmem:[%s5444_s6 + $0x60] sm:$0xff]  ;;  %v797_v9 = vld [vmem:[%s5444_s6 + $0x70] sm:$0xff] }
  0x1a   : > { %v799_v10 = vld [vmem:[%s5444_s6 + $0x80] sm:$0xff]  ;;  %796 = vst [vmem:[%s5452_s7 + $0x30] sm:$0xff] %v795_v8  ;;  %798 = vst [vmem:[%s5452_s7 + $0x38] sm:$0xff] %v797_v9  ;;  %v801_v11 = vld [vmem:[%s5444_s6 + $0x90] sm:$0xff] }
  0x1b   : > { %800 = vst [vmem:[%s5452_s7 + $0x40] sm:$0xff] %v799_v10  ;;  %v803_v12 = vld [vmem:[%s5444_s6 + $0xa0] sm:$0xff]  ;;  %v805_v13 = vld [vmem:[%s5444_s6 + $0xb0] sm:$0xff]  ;;  %802 = vst [vmem:[%s5452_s7 + $0x48] sm:$0xff] %v801_v11 }
  0x1c   : > { %804 = vst [vmem:[%s5452_s7 + $0x50] sm:$0xff] %v803_v12  ;;  %806 = vst [vmem:[%s5452_s7 + $0x58] sm:$0xff] %v805_v13  ;;  %v807_v14 = vld [vmem:[%s5444_s6 + $0xc0] sm:$0xff]  ;;  %v809_v15 = vld [vmem:[%s5444_s6 + $0xd0] sm:$0xff] }
  0x1d   : > { %v811_v16 = vld [vmem:[%s5444_s6 + $0xe0] sm:$0xff]  ;;  %808 = vst [vmem:[%s5452_s7 + $0x60] sm:$0xff] %v807_v14  ;;  %810 = vst [vmem:[%s5452_s7 + $0x68] sm:$0xff] %v809_v15  ;;  %v813_v17 = vld [vmem:[%s5444_s6 + $0xf0] sm:$0xff] }
  0x1e   : > { %812 = vst [vmem:[%s5452_s7 + $0x70] sm:$0xff] %v811_v16  ;;  %v815_v18 = vld [vmem:[%s5444_s6 + $0x100] sm:$0xff]  ;;  %v817_v19 = vld [vmem:[%s5444_s6 + $0x110] sm:$0xff]  ;;  %814 = vst [vmem:[%s5452_s7 + $0x78] sm:$0xff] %v813_v17 }
  0x1f   : > { %816 = vst [vmem:[%s5452_s7 + $0x80] sm:$0xff] %v815_v18  ;;  %818 = vst [vmem:[%s5452_s7 + $0x88] sm:$0xff] %v817_v19  ;;  %v819_v20 = vld [vmem:[%s5444_s6 + $0x120] sm:$0xff]  ;;  %v821_v21 = vld [vmem:[%s5444_s6 + $0x130] sm:$0xff] }
  0x20   : > { %v823_v22 = vld [vmem:[%s5444_s6 + $0x140] sm:$0xff]  ;;  %820 = vst [vmem:[%s5452_s7 + $0x90] sm:$0xff] %v819_v20  ;;  %822 = vst [vmem:[%s5452_s7 + $0x98] sm:$0xff] %v821_v21  ;;  %v825_v23 = vld [vmem:[%s5444_s6 + $0x150] sm:$0xff] }
  0x21   : > { %824 = vst [vmem:[%s5452_s7 + $0xa0] sm:$0xff] %v823_v22  ;;  %v827_v24 = vld [vmem:[%s5444_s6 + $0x160] sm:$0xff]  ;;  %v829_v25 = vld [vmem:[%s5444_s6 + $0x170] sm:$0xff]  ;;  %826 = vst [vmem:[%s5452_s7 + $0xa8] sm:$0xff] %v825_v23 }
  0x22   : > { %828 = vst [vmem:[%s5452_s7 + $0xb0] sm:$0xff] %v827_v24  ;;  %830 = vst [vmem:[%s5452_s7 + $0xb8] sm:$0xff] %v829_v25  ;;  %v831_v26 = vld [vmem:[%s5444_s6 + $0x180] sm:$0xff]  ;;  %v833_v27 = vld [vmem:[%s5444_s6 + $0x190] sm:$0xff] }
  0x23   : > { %v835_v28 = vld [vmem:[%s5444_s6 + $0x1a0] sm:$0xff]  ;;  %832 = vst [vmem:[%s5452_s7 + $0xc0] sm:$0xff] %v831_v26  ;;  %834 = vst [vmem:[%s5452_s7 + $0xc8] sm:$0xff] %v833_v27  ;;  %v837_v29 = vld [vmem:[%s5444_s6 + $0x1b0] sm:$0xff] }
  0x24   : > { %836 = vst [vmem:[%s5452_s7 + $0xd0] sm:$0xff] %v835_v28  ;;  %v839_v30 = vld [vmem:[%s5444_s6 + $0x1c0] sm:$0xff]  ;;  %v841_v31 = vld [vmem:[%s5444_s6 + $0x1d0] sm:$0xff]  ;;  %838 = vst [vmem:[%s5452_s7 + $0xd8] sm:$0xff] %v837_v29 }
  0x25   : > { %840 = vst [vmem:[%s5452_s7 + $0xe0] sm:$0xff] %v839_v30  ;;  %842 = vst [vmem:[%s5452_s7 + $0xe8] sm:$0xff] %v841_v31  ;;  %v843_v32 = vld [vmem:[%s5444_s6 + $0x1e0] sm:$0xff]  ;;  %v845_v33 = vld [vmem:[%s5444_s6 + $0x1f0] sm:$0xff] }
  0x26   : > { %v847_v34 = vld [vmem:[%s5444_s6 + $0x200] sm:$0xff]  ;;  %844 = vst [vmem:[%s5452_s7 + $0xf0] sm:$0xff] %v843_v32  ;;  %846 = vst [vmem:[%s5452_s7 + $0xf8] sm:$0xff] %v845_v33  ;;  %v849_v35 = vld [vmem:[%s5444_s6 + $0x210] sm:$0xff] }
  0x27   : > { %848 = vst [vmem:[%s5452_s7 + $0x100] sm:$0xff] %v847_v34  ;;  %v851_v36 = vld [vmem:[%s5444_s6 + $0x220] sm:$0xff]  ;;  %v853_v37 = vld [vmem:[%s5444_s6 + $0x230] sm:$0xff]  ;;  %850 = vst [vmem:[%s5452_s7 + $0x108] sm:$0xff] %v849_v35 }
  0x28   : > { %852 = vst [vmem:[%s5452_s7 + $0x110] sm:$0xff] %v851_v36  ;;  %854 = vst [vmem:[%s5452_s7 + $0x118] sm:$0xff] %v853_v37  ;;  %v855_v38 = vld [vmem:[%s5444_s6 + $0x240] sm:$0xff]  ;;  %v857_v39 = vld [vmem:[%s5444_s6 + $0x250] sm:$0xff] }
  0x29   : > { %v859_v40 = vld [vmem:[%s5444_s6 + $0x260] sm:$0xff]  ;;  %856 = vst [vmem:[%s5452_s7 + $0x120] sm:$0xff] %v855_v38  ;;  %858 = vst [vmem:[%s5452_s7 + $0x128] sm:$0xff] %v857_v39  ;;  %v861_v41 = vld [vmem:[%s5444_s6 + $0x270] sm:$0xff] }
  0x2a   : > { %860 = vst [vmem:[%s5452_s7 + $0x130] sm:$0xff] %v859_v40  ;;  %v863_v42 = vld [vmem:[%s5444_s6 + $0x280] sm:$0xff]  ;;  %v865_v43 = vld [vmem:[%s5444_s6 + $0x290] sm:$0xff]  ;;  %862 = vst [vmem:[%s5452_s7 + $0x138] sm:$0xff] %v861_v41 }
  0x2b   : > { %864 = vst [vmem:[%s5452_s7 + $0x140] sm:$0xff] %v863_v42  ;;  %866 = vst [vmem:[%s5452_s7 + $0x148] sm:$0xff] %v865_v43  ;;  %v867_v44 = vld [vmem:[%s5444_s6 + $0x2a0] sm:$0xff]  ;;  %v869_v45 = vld [vmem:[%s5444_s6 + $0x2b0] sm:$0xff] }
  0x2c   : > { %v871_v46 = vld [vmem:[%s5444_s6 + $0x2c0] sm:$0xff]  ;;  %868 = vst [vmem:[%s5452_s7 + $0x150] sm:$0xff] %v867_v44  ;;  %870 = vst [vmem:[%s5452_s7 + $0x158] sm:$0xff] %v869_v45  ;;  %v873_v47 = vld [vmem:[%s5444_s6 + $0x2d0] sm:$0xff] }
  0x2d   : > { %872 = vst [vmem:[%s5452_s7 + $0x160] sm:$0xff] %v871_v46  ;;  %v875_v48 = vld [vmem:[%s5444_s6 + $0x2e0] sm:$0xff]  ;;  %v877_v49 = vld [vmem:[%s5444_s6 + $0x2f0] sm:$0xff]  ;;  %874 = vst [vmem:[%s5452_s7 + $0x168] sm:$0xff] %v873_v47 }
  0x2e   : > { %876 = vst [vmem:[%s5452_s7 + $0x170] sm:$0xff] %v875_v48  ;;  %878 = vst [vmem:[%s5452_s7 + $0x178] sm:$0xff] %v877_v49  ;;  %v879_v50 = vld [vmem:[%s5444_s6 + $0x300] sm:$0xff]  ;;  %v881_v51 = vld [vmem:[%s5444_s6 + $0x310] sm:$0xff] }
  0x2f   : > { %v883_v52 = vld [vmem:[%s5444_s6 + $0x320] sm:$0xff]  ;;  %880 = vst [vmem:[%s5452_s7 + $0x180] sm:$0xff] %v879_v50  ;;  %882 = vst [vmem:[%s5452_s7 + $0x188] sm:$0xff] %v881_v51  ;;  %v885_v53 = vld [vmem:[%s5444_s6 + $0x330] sm:$0xff] }
  0x30   : > { %884 = vst [vmem:[%s5452_s7 + $0x190] sm:$0xff] %v883_v52  ;;  %v887_v54 = vld [vmem:[%s5444_s6 + $0x340] sm:$0xff]  ;;  %v889_v55 = vld [vmem:[%s5444_s6 + $0x350] sm:$0xff]  ;;  %886 = vst [vmem:[%s5452_s7 + $0x198] sm:$0xff] %v885_v53 }
  0x31   : > { %888 = vst [vmem:[%s5452_s7 + $0x1a0] sm:$0xff] %v887_v54  ;;  %890 = vst [vmem:[%s5452_s7 + $0x1a8] sm:$0xff] %v889_v55  ;;  %v891_v56 = vld [vmem:[%s5444_s6 + $0x360] sm:$0xff]  ;;  %v893_v57 = vld [vmem:[%s5444_s6 + $0x370] sm:$0xff] }
  0x32   : > { %v895_v58 = vld [vmem:[%s5444_s6 + $0x380] sm:$0xff]  ;;  %892 = vst [vmem:[%s5452_s7 + $0x1b0] sm:$0xff] %v891_v56  ;;  %894 = vst [vmem:[%s5452_s7 + $0x1b8] sm:$0xff] %v893_v57  ;;  %v897_v59 = vld [vmem:[%s5444_s6 + $0x390] sm:$0xff] }
  0x33   : > { %896 = vst [vmem:[%s5452_s7 + $0x1c0] sm:$0xff] %v895_v58  ;;  %v899_v60 = vld [vmem:[%s5444_s6 + $0x3a0] sm:$0xff]  ;;  %v901_v61 = vld [vmem:[%s5444_s6 + $0x3b0] sm:$0xff]  ;;  %898 = vst [vmem:[%s5452_s7 + $0x1c8] sm:$0xff] %v897_v59 }
  0x34   : > { %900 = vst [vmem:[%s5452_s7 + $0x1d0] sm:$0xff] %v899_v60  ;;  %902 = vst [vmem:[%s5452_s7 + $0x1d8] sm:$0xff] %v901_v61  ;;  %v903_v62 = vld [vmem:[%s5444_s6 + $0x3c0] sm:$0xff]  ;;  %v905_v63 = vld [vmem:[%s5444_s6 + $0x3d0] sm:$0xff] }
  0x35   : > { %v907_v0 = vld [vmem:[%s5444_s6 + $0x3e0] sm:$0xff]  ;;  %904 = vst [vmem:[%s5452_s7 + $0x1e0] sm:$0xff] %v903_v62  ;;  %906 = vst [vmem:[%s5452_s7 + $0x1e8] sm:$0xff] %v905_v63  ;;  %v909_v2 = vld [vmem:[%s5444_s6 + $0x3f0] sm:$0xff] }
  0x36   : > { %908 = vst [vmem:[%s5452_s7 + $0x1f0] sm:$0xff] %v907_v0  ;;  %v911_v3 = vld [vmem:[%s5444_s6 + $0x400] sm:$0xff]  ;;  %v913_v4 = vld [vmem:[%s5444_s6 + $0x410] sm:$0xff]  ;;  %910 = vst [vmem:[%s5452_s7 + $0x1f8] sm:$0xff] %v909_v2 }
  0x37   : > { %912 = vst [vmem:[%s5452_s7 + $0x200] sm:$0xff] %v911_v3  ;;  %914 = vst [vmem:[%s5452_s7 + $0x208] sm:$0xff] %v913_v4  ;;  %v915_v5 = vld [vmem:[%s5444_s6 + $0x420] sm:$0xff]  ;;  %v917_v6 = vld [vmem:[%s5444_s6 + $0x430] sm:$0xff] }
  0x38   : > { %v919_v7 = vld [vmem:[%s5444_s6 + $0x440] sm:$0xff]  ;;  %916 = vst [vmem:[%s5452_s7 + $0x210] sm:$0xff] %v915_v5  ;;  %918 = vst [vmem:[%s5452_s7 + $0x218] sm:$0xff] %v917_v6  ;;  %v921_v8 = vld [vmem:[%s5444_s6 + $0x450] sm:$0xff] }
  0x39   : > { %920 = vst [vmem:[%s5452_s7 + $0x220] sm:$0xff] %v919_v7  ;;  %v923_v9 = vld [vmem:[%s5444_s6 + $0x460] sm:$0xff]  ;;  %v925_v10 = vld [vmem:[%s5444_s6 + $0x470] sm:$0xff]  ;;  %922 = vst [vmem:[%s5452_s7 + $0x228] sm:$0xff] %v921_v8 }
  0x3a   : > { %924 = vst [vmem:[%s5452_s7 + $0x230] sm:$0xff] %v923_v9  ;;  %926 = vst [vmem:[%s5452_s7 + $0x238] sm:$0xff] %v925_v10  ;;  %v927_v11 = vld [vmem:[%s5444_s6 + $0x480] sm:$0xff]  ;;  %v929_v12 = vld [vmem:[%s5444_s6 + $0x490] sm:$0xff] }
  0x3b   : > { %v931_v13 = vld [vmem:[%s5444_s6 + $0x4a0] sm:$0xff]  ;;  %928 = vst [vmem:[%s5452_s7 + $0x240] sm:$0xff] %v927_v11  ;;  %930 = vst [vmem:[%s5452_s7 + $0x248] sm:$0xff] %v929_v12  ;;  %v933_v14 = vld [vmem:[%s5444_s6 + $0x4b0] sm:$0xff] }
  0x3c   : > { %932 = vst [vmem:[%s5452_s7 + $0x250] sm:$0xff] %v931_v13  ;;  %v935_v15 = vld [vmem:[%s5444_s6 + $0x4c0] sm:$0xff]  ;;  %v937_v16 = vld [vmem:[%s5444_s6 + $0x4d0] sm:$0xff]  ;;  %934 = vst [vmem:[%s5452_s7 + $0x258] sm:$0xff] %v933_v14 }
  0x3d   : > { %936 = vst [vmem:[%s5452_s7 + $0x260] sm:$0xff] %v935_v15  ;;  %938 = vst [vmem:[%s5452_s7 + $0x268] sm:$0xff] %v937_v16  ;;  %v939_v17 = vld [vmem:[%s5444_s6 + $0x4e0] sm:$0xff]  ;;  %v941_v18 = vld [vmem:[%s5444_s6 + $0x4f0] sm:$0xff] }
  0x3e   : > { %v943_v19 = vld [vmem:[%s5444_s6 + $0x500] sm:$0xff]  ;;  %940 = vst [vmem:[%s5452_s7 + $0x270] sm:$0xff] %v939_v17  ;;  %942 = vst [vmem:[%s5452_s7 + $0x278] sm:$0xff] %v941_v18  ;;  %v945_v20 = vld [vmem:[%s5444_s6 + $0x510] sm:$0xff] }
  0x3f   : > { %944 = vst [vmem:[%s5452_s7 + $0x280] sm:$0xff] %v943_v19  ;;  %v947_v21 = vld [vmem:[%s5444_s6 + $0x520] sm:$0xff]  ;;  %v949_v22 = vld [vmem:[%s5444_s6 + $0x530] sm:$0xff]  ;;  %946 = vst [vmem:[%s5452_s7 + $0x288] sm:$0xff] %v945_v20 }
  0x40   : > { %948 = vst [vmem:[%s5452_s7 + $0x290] sm:$0xff] %v947_v21  ;;  %950 = vst [vmem:[%s5452_s7 + $0x298] sm:$0xff] %v949_v22  ;;  %v951_v23 = vld [vmem:[%s5444_s6 + $0x540] sm:$0xff]  ;;  %v953_v24 = vld [vmem:[%s5444_s6 + $0x550] sm:$0xff] }
  0x41   : > { %v955_v25 = vld [vmem:[%s5444_s6 + $0x560] sm:$0xff]  ;;  %952 = vst [vmem:[%s5452_s7 + $0x2a0] sm:$0xff] %v951_v23  ;;  %954 = vst [vmem:[%s5452_s7 + $0x2a8] sm:$0xff] %v953_v24  ;;  %v957_v26 = vld [vmem:[%s5444_s6 + $0x570] sm:$0xff] }
  0x42   : > { %956 = vst [vmem:[%s5452_s7 + $0x2b0] sm:$0xff] %v955_v25  ;;  %v959_v27 = vld [vmem:[%s5444_s6 + $0x580] sm:$0xff]  ;;  %v961_v28 = vld [vmem:[%s5444_s6 + $0x590] sm:$0xff]  ;;  %958 = vst [vmem:[%s5452_s7 + $0x2b8] sm:$0xff] %v957_v26 }
  0x43   : > { %960 = vst [vmem:[%s5452_s7 + $0x2c0] sm:$0xff] %v959_v27  ;;  %962 = vst [vmem:[%s5452_s7 + $0x2c8] sm:$0xff] %v961_v28  ;;  %v963_v29 = vld [vmem:[%s5444_s6 + $0x5a0] sm:$0xff]  ;;  %v965_v30 = vld [vmem:[%s5444_s6 + $0x5b0] sm:$0xff] }
  0x44   : > { %v967_v31 = vld [vmem:[%s5444_s6 + $0x5c0] sm:$0xff]  ;;  %964 = vst [vmem:[%s5452_s7 + $0x2d0] sm:$0xff] %v963_v29  ;;  %966 = vst [vmem:[%s5452_s7 + $0x2d8] sm:$0xff] %v965_v30  ;;  %v969_v32 = vld [vmem:[%s5444_s6 + $0x5d0] sm:$0xff] }
  0x45   : > { %968 = vst [vmem:[%s5452_s7 + $0x2e0] sm:$0xff] %v967_v31  ;;  %v971_v33 = vld [vmem:[%s5444_s6 + $0x5e0] sm:$0xff]  ;;  %v973_v34 = vld [vmem:[%s5444_s6 + $0x5f0] sm:$0xff]  ;;  %970 = vst [vmem:[%s5452_s7 + $0x2e8] sm:$0xff] %v969_v32 }
  0x46   : > { %972 = vst [vmem:[%s5452_s7 + $0x2f0] sm:$0xff] %v971_v33  ;;  %974 = vst [vmem:[%s5452_s7 + $0x2f8] sm:$0xff] %v973_v34  ;;  %v975_v35 = vld [vmem:[%s5444_s6 + $0x600] sm:$0xff]  ;;  %v977_v36 = vld [vmem:[%s5444_s6 + $0x610] sm:$0xff] }
  0x47   : > { %v979_v37 = vld [vmem:[%s5444_s6 + $0x620] sm:$0xff]  ;;  %976 = vst [vmem:[%s5452_s7 + $0x300] sm:$0xff] %v975_v35  ;;  %978 = vst [vmem:[%s5452_s7 + $0x308] sm:$0xff] %v977_v36  ;;  %v981_v38 = vld [vmem:[%s5444_s6 + $0x630] sm:$0xff] }
  0x48   : > { %980 = vst [vmem:[%s5452_s7 + $0x310] sm:$0xff] %v979_v37  ;;  %v983_v39 = vld [vmem:[%s5444_s6 + $0x640] sm:$0xff]  ;;  %v985_v40 = vld [vmem:[%s5444_s6 + $0x650] sm:$0xff]  ;;  %982 = vst [vmem:[%s5452_s7 + $0x318] sm:$0xff] %v981_v38 }
  0x49   : > { %984 = vst [vmem:[%s5452_s7 + $0x320] sm:$0xff] %v983_v39  ;;  %986 = vst [vmem:[%s5452_s7 + $0x328] sm:$0xff] %v985_v40  ;;  %v987_v41 = vld [vmem:[%s5444_s6 + $0x660] sm:$0xff]  ;;  %v989_v42 = vld [vmem:[%s5444_s6 + $0x670] sm:$0xff] }
  0x4a   : > { %v991_v43 = vld [vmem:[%s5444_s6 + $0x680] sm:$0xff]  ;;  %988 = vst [vmem:[%s5452_s7 + $0x330] sm:$0xff] %v987_v41  ;;  %990 = vst [vmem:[%s5452_s7 + $0x338] sm:$0xff] %v989_v42  ;;  %v993_v44 = vld [vmem:[%s5444_s6 + $0x690] sm:$0xff] }
  0x4b   : > { %992 = vst [vmem:[%s5452_s7 + $0x340] sm:$0xff] %v991_v43  ;;  %v995_v45 = vld [vmem:[%s5444_s6 + $0x6a0] sm:$0xff]  ;;  %v997_v46 = vld [vmem:[%s5444_s6 + $0x6b0] sm:$0xff]  ;;  %994 = vst [vmem:[%s5452_s7 + $0x348] sm:$0xff] %v993_v44 }
  0x4c   : > { %996 = vst [vmem:[%s5452_s7 + $0x350] sm:$0xff] %v995_v45  ;;  %998 = vst [vmem:[%s5452_s7 + $0x358] sm:$0xff] %v997_v46  ;;  %v999_v47 = vld [vmem:[%s5444_s6 + $0x6c0] sm:$0xff]  ;;  %v1001_v48 = vld [vmem:[%s5444_s6 + $0x6d0] sm:$0xff] }
  0x4d   : > { %v1003_v49 = vld [vmem:[%s5444_s6 + $0x6e0] sm:$0xff]  ;;  %1000 = vst [vmem:[%s5452_s7 + $0x360] sm:$0xff] %v999_v47  ;;  %1002 = vst [vmem:[%s5452_s7 + $0x368] sm:$0xff] %v1001_v48  ;;  %v1005_v50 = vld [vmem:[%s5444_s6 + $0x6f0] sm:$0xff] }
  0x4e   : > { %1004 = vst [vmem:[%s5452_s7 + $0x370] sm:$0xff] %v1003_v49  ;;  %v1007_v51 = vld [vmem:[%s5444_s6 + $0x700] sm:$0xff]  ;;  %v1009_v52 = vld [vmem:[%s5444_s6 + $0x710] sm:$0xff]  ;;  %1006 = vst [vmem:[%s5452_s7 + $0x378] sm:$0xff] %v1005_v50 }
  0x4f   : > { %1008 = vst [vmem:[%s5452_s7 + $0x380] sm:$0xff] %v1007_v51  ;;  %1010 = vst [vmem:[%s5452_s7 + $0x388] sm:$0xff] %v1009_v52  ;;  %v1011_v53 = vld [vmem:[%s5444_s6 + $0x720] sm:$0xff]  ;;  %v1013_v54 = vld [vmem:[%s5444_s6 + $0x730] sm:$0xff] }
  0x50   : > { %v1015_v55 = vld [vmem:[%s5444_s6 + $0x740] sm:$0xff]  ;;  %1012 = vst [vmem:[%s5452_s7 + $0x390] sm:$0xff] %v1011_v53  ;;  %1014 = vst [vmem:[%s5452_s7 + $0x398] sm:$0xff] %v1013_v54  ;;  %v1017_v56 = vld [vmem:[%s5444_s6 + $0x750] sm:$0xff] }
  0x51   : > { %1016 = vst [vmem:[%s5452_s7 + $0x3a0] sm:$0xff] %v1015_v55  ;;  %v1019_v57 = vld [vmem:[%s5444_s6 + $0x760] sm:$0xff]  ;;  %v1021_v58 = vld [vmem:[%s5444_s6 + $0x770] sm:$0xff]  ;;  %1018 = vst [vmem:[%s5452_s7 + $0x3a8] sm:$0xff] %v1017_v56 }
  0x52   : > { %1020 = vst [vmem:[%s5452_s7 + $0x3b0] sm:$0xff] %v1019_v57  ;;  %1022 = vst [vmem:[%s5452_s7 + $0x3b8] sm:$0xff] %v1021_v58  ;;  %v1023_v59 = vld [vmem:[%s5444_s6 + $0x780] sm:$0xff]  ;;  %v1025_v60 = vld [vmem:[%s5444_s6 + $0x790] sm:$0xff] }
  0x53   : > { %v1027_v61 = vld [vmem:[%s5444_s6 + $0x7a0] sm:$0xff]  ;;  %1024 = vst [vmem:[%s5452_s7 + $0x3c0] sm:$0xff] %v1023_v59  ;;  %1026 = vst [vmem:[%s5452_s7 + $0x3c8] sm:$0xff] %v1025_v60  ;;  %v1029_v62 = vld [vmem:[%s5444_s6 + $0x7b0] sm:$0xff] }
  0x54   : > { %1028 = vst [vmem:[%s5452_s7 + $0x3d0] sm:$0xff] %v1027_v61  ;;  %v1031_v63 = vld [vmem:[%s5444_s6 + $0x7c0] sm:$0xff]  ;;  %v1033_v0 = vld [vmem:[%s5444_s6 + $0x7d0] sm:$0xff]  ;;  %1030 = vst [vmem:[%s5452_s7 + $0x3d8] sm:$0xff] %v1029_v62 }
  0x55   : > { %1032 = vst [vmem:[%s5452_s7 + $0x3e0] sm:$0xff] %v1031_v63  ;;  %1034 = vst [vmem:[%s5452_s7 + $0x3e8] sm:$0xff] %v1033_v0  ;;  %v1035_v2 = vld [vmem:[%s5444_s6 + $0x7e0] sm:$0xff]  ;;  %v1037_v3 = vld [vmem:[%s5444_s6 + $0x7f0] sm:$0xff] }
  0x56   : > { %v1039_v4 = vld [vmem:[%s5444_s6 + $0x800] sm:$0xff]  ;;  %1036 = vst [vmem:[%s5452_s7 + $0x3f0] sm:$0xff] %v1035_v2  ;;  %1038 = vst [vmem:[%s5452_s7 + $0x3f8] sm:$0xff] %v1037_v3  ;;  %v1041_v5 = vld [vmem:[%s5444_s6 + $0x810] sm:$0xff] }
  0x57   : > { %1040 = vst [vmem:[%s5452_s7 + $0x400] sm:$0xff] %v1039_v4  ;;  %v1043_v6 = vld [vmem:[%s5444_s6 + $0x820] sm:$0xff]  ;;  %v1045_v7 = vld [vmem:[%s5444_s6 + $0x830] sm:$0xff]  ;;  %1042 = vst [vmem:[%s5452_s7 + $0x408] sm:$0xff] %v1041_v5 }
  0x58   : > { %1044 = vst [vmem:[%s5452_s7 + $0x410] sm:$0xff] %v1043_v6  ;;  %1046 = vst [vmem:[%s5452_s7 + $0x418] sm:$0xff] %v1045_v7  ;;  %v1047_v8 = vld [vmem:[%s5444_s6 + $0x840] sm:$0xff]  ;;  %v1049_v9 = vld [vmem:[%s5444_s6 + $0x850] sm:$0xff] }
  0x59   : > { %v1051_v10 = vld [vmem:[%s5444_s6 + $0x860] sm:$0xff]  ;;  %1048 = vst [vmem:[%s5452_s7 + $0x420] sm:$0xff] %v1047_v8  ;;  %1050 = vst [vmem:[%s5452_s7 + $0x428] sm:$0xff] %v1049_v9  ;;  %v1053_v11 = vld [vmem:[%s5444_s6 + $0x870] sm:$0xff] }
  0x5a   : > { %1052 = vst [vmem:[%s5452_s7 + $0x430] sm:$0xff] %v1051_v10  ;;  %v1055_v12 = vld [vmem:[%s5444_s6 + $0x880] sm:$0xff]  ;;  %v1057_v13 = vld [vmem:[%s5444_s6 + $0x890] sm:$0xff]  ;;  %1054 = vst [vmem:[%s5452_s7 + $0x438] sm:$0xff] %v1053_v11 }
  0x5b   : > { %1056 = vst [vmem:[%s5452_s7 + $0x440] sm:$0xff] %v1055_v12  ;;  %1058 = vst [vmem:[%s5452_s7 + $0x448] sm:$0xff] %v1057_v13  ;;  %v1059_v14 = vld [vmem:[%s5444_s6 + $0x8a0] sm:$0xff]  ;;  %v1061_v15 = vld [vmem:[%s5444_s6 + $0x8b0] sm:$0xff] }
  0x5c   : > { %v1063_v16 = vld [vmem:[%s5444_s6 + $0x8c0] sm:$0xff]  ;;  %1060 = vst [vmem:[%s5452_s7 + $0x450] sm:$0xff] %v1059_v14  ;;  %1062 = vst [vmem:[%s5452_s7 + $0x458] sm:$0xff] %v1061_v15  ;;  %v1065_v17 = vld [vmem:[%s5444_s6 + $0x8d0] sm:$0xff] }
  0x5d   : > { %1064 = vst [vmem:[%s5452_s7 + $0x460] sm:$0xff] %v1063_v16  ;;  %v1067_v18 = vld [vmem:[%s5444_s6 + $0x8e0] sm:$0xff]  ;;  %v1069_v19 = vld [vmem:[%s5444_s6 + $0x8f0] sm:$0xff]  ;;  %1066 = vst [vmem:[%s5452_s7 + $0x468] sm:$0xff] %v1065_v17 }
  0x5e   : > { %1068 = vst [vmem:[%s5452_s7 + $0x470] sm:$0xff] %v1067_v18  ;;  %1070 = vst [vmem:[%s5452_s7 + $0x478] sm:$0xff] %v1069_v19  ;;  %v1071_v20 = vld [vmem:[%s5444_s6 + $0x900] sm:$0xff]  ;;  %v1073_v21 = vld [vmem:[%s5444_s6 + $0x910] sm:$0xff] }
  0x5f   : > { %v1075_v22 = vld [vmem:[%s5444_s6 + $0x920] sm:$0xff]  ;;  %1072 = vst [vmem:[%s5452_s7 + $0x480] sm:$0xff] %v1071_v20  ;;  %1074 = vst [vmem:[%s5452_s7 + $0x488] sm:$0xff] %v1073_v21  ;;  %v1077_v23 = vld [vmem:[%s5444_s6 + $0x930] sm:$0xff] }
  0x60   : > { %1076 = vst [vmem:[%s5452_s7 + $0x490] sm:$0xff] %v1075_v22  ;;  %v1079_v24 = vld [vmem:[%s5444_s6 + $0x940] sm:$0xff]  ;;  %v1081_v25 = vld [vmem:[%s5444_s6 + $0x950] sm:$0xff]  ;;  %1078 = vst [vmem:[%s5452_s7 + $0x498] sm:$0xff] %v1077_v23 }
  0x61   : > { %1080 = vst [vmem:[%s5452_s7 + $0x4a0] sm:$0xff] %v1079_v24  ;;  %1082 = vst [vmem:[%s5452_s7 + $0x4a8] sm:$0xff] %v1081_v25  ;;  %v1083_v26 = vld [vmem:[%s5444_s6 + $0x960] sm:$0xff]  ;;  %v1085_v27 = vld [vmem:[%s5444_s6 + $0x970] sm:$0xff] }
  0x62   : > { %v1087_v28 = vld [vmem:[%s5444_s6 + $0x980] sm:$0xff]  ;;  %1084 = vst [vmem:[%s5452_s7 + $0x4b0] sm:$0xff] %v1083_v26  ;;  %1086 = vst [vmem:[%s5452_s7 + $0x4b8] sm:$0xff] %v1085_v27  ;;  %v1089_v29 = vld [vmem:[%s5444_s6 + $0x990] sm:$0xff] }
  0x63   : > { %1088 = vst [vmem:[%s5452_s7 + $0x4c0] sm:$0xff] %v1087_v28  ;;  %v1091_v30 = vld [vmem:[%s5444_s6 + $0x9a0] sm:$0xff]  ;;  %v1093_v31 = vld [vmem:[%s5444_s6 + $0x9b0] sm:$0xff]  ;;  %1090 = vst [vmem:[%s5452_s7 + $0x4c8] sm:$0xff] %v1089_v29 }
  0x64   : > { %1092 = vst [vmem:[%s5452_s7 + $0x4d0] sm:$0xff] %v1091_v30  ;;  %1094 = vst [vmem:[%s5452_s7 + $0x4d8] sm:$0xff] %v1093_v31  ;;  %v1095_v32 = vld [vmem:[%s5444_s6 + $0x9c0] sm:$0xff]  ;;  %v1097_v33 = vld [vmem:[%s5444_s6 + $0x9d0] sm:$0xff] }
  0x65   : > { %v1099_v34 = vld [vmem:[%s5444_s6 + $0x9e0] sm:$0xff]  ;;  %1096 = vst [vmem:[%s5452_s7 + $0x4e0] sm:$0xff] %v1095_v32  ;;  %1098 = vst [vmem:[%s5452_s7 + $0x4e8] sm:$0xff] %v1097_v33  ;;  %v1101_v35 = vld [vmem:[%s5444_s6 + $0x9f0] sm:$0xff] }
  0x66   : > { %1100 = vst [vmem:[%s5452_s7 + $0x4f0] sm:$0xff] %v1099_v34  ;;  %v1103_v36 = vld [vmem:[%s5444_s6 + $0xa00] sm:$0xff]  ;;  %v1105_v37 = vld [vmem:[%s5444_s6 + $0xa10] sm:$0xff]  ;;  %1102 = vst [vmem:[%s5452_s7 + $0x4f8] sm:$0xff] %v1101_v35 }
  0x67   : > { %1104 = vst [vmem:[%s5452_s7 + $0x500] sm:$0xff] %v1103_v36  ;;  %1106 = vst [vmem:[%s5452_s7 + $0x508] sm:$0xff] %v1105_v37  ;;  %v1107_v38 = vld [vmem:[%s5444_s6 + $0xa20] sm:$0xff]  ;;  %v1109_v39 = vld [vmem:[%s5444_s6 + $0xa30] sm:$0xff] }
  0x68   : > { %v1111_v40 = vld [vmem:[%s5444_s6 + $0xa40] sm:$0xff]  ;;  %1108 = vst [vmem:[%s5452_s7 + $0x510] sm:$0xff] %v1107_v38  ;;  %1110 = vst [vmem:[%s5452_s7 + $0x518] sm:$0xff] %v1109_v39  ;;  %v1113_v41 = vld [vmem:[%s5444_s6 + $0xa50] sm:$0xff] }
  0x69   : > { %1112 = vst [vmem:[%s5452_s7 + $0x520] sm:$0xff] %v1111_v40  ;;  %v1115_v42 = vld [vmem:[%s5444_s6 + $0xa60] sm:$0xff]  ;;  %v1117_v43 = vld [vmem:[%s5444_s6 + $0xa70] sm:$0xff]  ;;  %1114 = vst [vmem:[%s5452_s7 + $0x528] sm:$0xff] %v1113_v41 }
  0x6a   : > { %1116 = vst [vmem:[%s5452_s7 + $0x530] sm:$0xff] %v1115_v42  ;;  %1118 = vst [vmem:[%s5452_s7 + $0x538] sm:$0xff] %v1117_v43  ;;  %v1119_v44 = vld [vmem:[%s5444_s6 + $0xa80] sm:$0xff]  ;;  %v1121_v45 = vld [vmem:[%s5444_s6 + $0xa90] sm:$0xff] }
  0x6b   : > { %v1123_v46 = vld [vmem:[%s5444_s6 + $0xaa0] sm:$0xff]  ;;  %1120 = vst [vmem:[%s5452_s7 + $0x540] sm:$0xff] %v1119_v44  ;;  %1122 = vst [vmem:[%s5452_s7 + $0x548] sm:$0xff] %v1121_v45  ;;  %v1125_v47 = vld [vmem:[%s5444_s6 + $0xab0] sm:$0xff] }
  0x6c   : > { %1124 = vst [vmem:[%s5452_s7 + $0x550] sm:$0xff] %v1123_v46  ;;  %v1127_v48 = vld [vmem:[%s5444_s6 + $0xac0] sm:$0xff]  ;;  %v1129_v49 = vld [vmem:[%s5444_s6 + $0xad0] sm:$0xff]  ;;  %1126 = vst [vmem:[%s5452_s7 + $0x558] sm:$0xff] %v1125_v47 }
  0x6d   : > { %1128 = vst [vmem:[%s5452_s7 + $0x560] sm:$0xff] %v1127_v48  ;;  %1130 = vst [vmem:[%s5452_s7 + $0x568] sm:$0xff] %v1129_v49  ;;  %v1131_v50 = vld [vmem:[%s5444_s6 + $0xae0] sm:$0xff]  ;;  %v1133_v51 = vld [vmem:[%s5444_s6 + $0xaf0] sm:$0xff] }
  0x6e   : > { %v1135_v52 = vld [vmem:[%s5444_s6 + $0xb00] sm:$0xff]  ;;  %1132 = vst [vmem:[%s5452_s7 + $0x570] sm:$0xff] %v1131_v50  ;;  %1134 = vst [vmem:[%s5452_s7 + $0x578] sm:$0xff] %v1133_v51  ;;  %v1137_v53 = vld [vmem:[%s5444_s6 + $0xb10] sm:$0xff] }
  0x6f   : > { %1136 = vst [vmem:[%s5452_s7 + $0x580] sm:$0xff] %v1135_v52  ;;  %v1139_v54 = vld [vmem:[%s5444_s6 + $0xb20] sm:$0xff]  ;;  %v1141_v55 = vld [vmem:[%s5444_s6 + $0xb30] sm:$0xff]  ;;  %1138 = vst [vmem:[%s5452_s7 + $0x588] sm:$0xff] %v1137_v53 }
  0x70   : > { %1140 = vst [vmem:[%s5452_s7 + $0x590] sm:$0xff] %v1139_v54  ;;  %1142 = vst [vmem:[%s5452_s7 + $0x598] sm:$0xff] %v1141_v55  ;;  %v1143_v56 = vld [vmem:[%s5444_s6 + $0xb40] sm:$0xff]  ;;  %v1145_v57 = vld [vmem:[%s5444_s6 + $0xb50] sm:$0xff] }
  0x71   : > { %v1147_v58 = vld [vmem:[%s5444_s6 + $0xb60] sm:$0xff]  ;;  %1144 = vst [vmem:[%s5452_s7 + $0x5a0] sm:$0xff] %v1143_v56  ;;  %1146 = vst [vmem:[%s5452_s7 + $0x5a8] sm:$0xff] %v1145_v57  ;;  %v1149_v59 = vld [vmem:[%s5444_s6 + $0xb70] sm:$0xff] }
  0x72   : > { %1148 = vst [vmem:[%s5452_s7 + $0x5b0] sm:$0xff] %v1147_v58  ;;  %v1151_v60 = vld [vmem:[%s5444_s6 + $0xb80] sm:$0xff]  ;;  %v1153_v61 = vld [vmem:[%s5444_s6 + $0xb90] sm:$0xff]  ;;  %1150 = vst [vmem:[%s5452_s7 + $0x5b8] sm:$0xff] %v1149_v59 }
  0x73   : > { %1152 = vst [vmem:[%s5452_s7 + $0x5c0] sm:$0xff] %v1151_v60  ;;  %1154 = vst [vmem:[%s5452_s7 + $0x5c8] sm:$0xff] %v1153_v61  ;;  %v1155_v62 = vld [vmem:[%s5444_s6 + $0xba0] sm:$0xff]  ;;  %v1157_v63 = vld [vmem:[%s5444_s6 + $0xbb0] sm:$0xff] }
  0x74   : > { %v1159_v0 = vld [vmem:[%s5444_s6 + $0xbc0] sm:$0xff]  ;;  %1156 = vst [vmem:[%s5452_s7 + $0x5d0] sm:$0xff] %v1155_v62  ;;  %1158 = vst [vmem:[%s5452_s7 + $0x5d8] sm:$0xff] %v1157_v63  ;;  %v1161_v2 = vld [vmem:[%s5444_s6 + $0xbd0] sm:$0xff] }
  0x75   : > { %1160 = vst [vmem:[%s5452_s7 + $0x5e0] sm:$0xff] %v1159_v0  ;;  %v1163_v3 = vld [vmem:[%s5444_s6 + $0xbe0] sm:$0xff]  ;;  %v1165_v4 = vld [vmem:[%s5444_s6 + $0xbf0] sm:$0xff]  ;;  %1162 = vst [vmem:[%s5452_s7 + $0x5e8] sm:$0xff] %v1161_v2 }
  0x76   : > { %1164 = vst [vmem:[%s5452_s7 + $0x5f0] sm:$0xff] %v1163_v3  ;;  %1166 = vst [vmem:[%s5452_s7 + $0x5f8] sm:$0xff] %v1165_v4  ;;  %v1167_v5 = vld [vmem:[%s5444_s6 + $0xc00] sm:$0xff]  ;;  %v1169_v6 = vld [vmem:[%s5444_s6 + $0xc10] sm:$0xff] }
  0x77   : > { %v1171_v7 = vld [vmem:[%s5444_s6 + $0xc20] sm:$0xff]  ;;  %1168 = vst [vmem:[%s5452_s7 + $0x600] sm:$0xff] %v1167_v5  ;;  %1170 = vst [vmem:[%s5452_s7 + $0x608] sm:$0xff] %v1169_v6  ;;  %v1173_v8 = vld [vmem:[%s5444_s6 + $0xc30] sm:$0xff] }
  0x78   : > { %1172 = vst [vmem:[%s5452_s7 + $0x610] sm:$0xff] %v1171_v7  ;;  %v1175_v9 = vld [vmem:[%s5444_s6 + $0xc40] sm:$0xff]  ;;  %v1177_v10 = vld [vmem:[%s5444_s6 + $0xc50] sm:$0xff]  ;;  %1174 = vst [vmem:[%s5452_s7 + $0x618] sm:$0xff] %v1173_v8 }
  0x79   : > { %1176 = vst [vmem:[%s5452_s7 + $0x620] sm:$0xff] %v1175_v9  ;;  %1178 = vst [vmem:[%s5452_s7 + $0x628] sm:$0xff] %v1177_v10  ;;  %v1179_v11 = vld [vmem:[%s5444_s6 + $0xc60] sm:$0xff]  ;;  %v1181_v12 = vld [vmem:[%s5444_s6 + $0xc70] sm:$0xff] }
  0x7a   : > { %v1183_v13 = vld [vmem:[%s5444_s6 + $0xc80] sm:$0xff]  ;;  %1180 = vst [vmem:[%s5452_s7 + $0x630] sm:$0xff] %v1179_v11  ;;  %1182 = vst [vmem:[%s5452_s7 + $0x638] sm:$0xff] %v1181_v12  ;;  %v1185_v14 = vld [vmem:[%s5444_s6 + $0xc90] sm:$0xff] }
  0x7b   : > { %1184 = vst [vmem:[%s5452_s7 + $0x640] sm:$0xff] %v1183_v13  ;;  %v1187_v15 = vld [vmem:[%s5444_s6 + $0xca0] sm:$0xff]  ;;  %v1189_v16 = vld [vmem:[%s5444_s6 + $0xcb0] sm:$0xff]  ;;  %1186 = vst [vmem:[%s5452_s7 + $0x648] sm:$0xff] %v1185_v14 }
  0x7c   : > { %1188 = vst [vmem:[%s5452_s7 + $0x650] sm:$0xff] %v1187_v15  ;;  %1190 = vst [vmem:[%s5452_s7 + $0x658] sm:$0xff] %v1189_v16  ;;  %v1191_v17 = vld [vmem:[%s5444_s6 + $0xcc0] sm:$0xff]  ;;  %v1193_v18 = vld [vmem:[%s5444_s6 + $0xcd0] sm:$0xff] }
  0x7d   : > { %v1195_v19 = vld [vmem:[%s5444_s6 + $0xce0] sm:$0xff]  ;;  %1192 = vst [vmem:[%s5452_s7 + $0x660] sm:$0xff] %v1191_v17  ;;  %1194 = vst [vmem:[%s5452_s7 + $0x668] sm:$0xff] %v1193_v18  ;;  %v1197_v20 = vld [vmem:[%s5444_s6 + $0xcf0] sm:$0xff] }
  0x7e   : > { %1196 = vst [vmem:[%s5452_s7 + $0x670] sm:$0xff] %v1195_v19  ;;  %v1199_v21 = vld [vmem:[%s5444_s6 + $0xd00] sm:$0xff]  ;;  %v1201_v22 = vld [vmem:[%s5444_s6 + $0xd10] sm:$0xff]  ;;  %1198 = vst [vmem:[%s5452_s7 + $0x678] sm:$0xff] %v1197_v20 }
  0x7f   : > { %1200 = vst [vmem:[%s5452_s7 + $0x680] sm:$0xff] %v1199_v21  ;;  %1202 = vst [vmem:[%s5452_s7 + $0x688] sm:$0xff] %v1201_v22  ;;  %v1203_v23 = vld [vmem:[%s5444_s6 + $0xd20] sm:$0xff]  ;;  %v1205_v24 = vld [vmem:[%s5444_s6 + $0xd30] sm:$0xff] }
  0x80   : > { %v1207_v25 = vld [vmem:[%s5444_s6 + $0xd40] sm:$0xff]  ;;  %1204 = vst [vmem:[%s5452_s7 + $0x690] sm:$0xff] %v1203_v23  ;;  %1206 = vst [vmem:[%s5452_s7 + $0x698] sm:$0xff] %v1205_v24  ;;  %v1209_v26 = vld [vmem:[%s5444_s6 + $0xd50] sm:$0xff] }
  0x81   : > { %1208 = vst [vmem:[%s5452_s7 + $0x6a0] sm:$0xff] %v1207_v25  ;;  %v1211_v27 = vld [vmem:[%s5444_s6 + $0xd60] sm:$0xff]  ;;  %v1213_v28 = vld [vmem:[%s5444_s6 + $0xd70] sm:$0xff]  ;;  %1210 = vst [vmem:[%s5452_s7 + $0x6a8] sm:$0xff] %v1209_v26 }
  0x82   : > { %1212 = vst [vmem:[%s5452_s7 + $0x6b0] sm:$0xff] %v1211_v27  ;;  %1214 = vst [vmem:[%s5452_s7 + $0x6b8] sm:$0xff] %v1213_v28  ;;  %v1215_v29 = vld [vmem:[%s5444_s6 + $0xd80] sm:$0xff]  ;;  %v1217_v30 = vld [vmem:[%s5444_s6 + $0xd90] sm:$0xff] }
  0x83   : > { %v1219_v31 = vld [vmem:[%s5444_s6 + $0xda0] sm:$0xff]  ;;  %1216 = vst [vmem:[%s5452_s7 + $0x6c0] sm:$0xff] %v1215_v29  ;;  %1218 = vst [vmem:[%s5452_s7 + $0x6c8] sm:$0xff] %v1217_v30  ;;  %v1221_v32 = vld [vmem:[%s5444_s6 + $0xdb0] sm:$0xff] }
  0x84   : > { %1220 = vst [vmem:[%s5452_s7 + $0x6d0] sm:$0xff] %v1219_v31  ;;  %v1223_v33 = vld [vmem:[%s5444_s6 + $0xdc0] sm:$0xff]  ;;  %v1225_v34 = vld [vmem:[%s5444_s6 + $0xdd0] sm:$0xff]  ;;  %1222 = vst [vmem:[%s5452_s7 + $0x6d8] sm:$0xff] %v1221_v32 }
  0x85   : > { %1224 = vst [vmem:[%s5452_s7 + $0x6e0] sm:$0xff] %v1223_v33  ;;  %1226 = vst [vmem:[%s5452_s7 + $0x6e8] sm:$0xff] %v1225_v34  ;;  %v1227_v35 = vld [vmem:[%s5444_s6 + $0xde0] sm:$0xff]  ;;  %v1229_v36 = vld [vmem:[%s5444_s6 + $0xdf0] sm:$0xff] }
  0x86   : > { %v1231_v37 = vld [vmem:[%s5444_s6 + $0xe00] sm:$0xff]  ;;  %1228 = vst [vmem:[%s5452_s7 + $0x6f0] sm:$0xff] %v1227_v35  ;;  %1230 = vst [vmem:[%s5452_s7 + $0x6f8] sm:$0xff] %v1229_v36  ;;  %v1233_v38 = vld [vmem:[%s5444_s6 + $0xe10] sm:$0xff] }
  0x87   : > { %1232 = vst [vmem:[%s5452_s7 + $0x700] sm:$0xff] %v1231_v37  ;;  %v1235_v39 = vld [vmem:[%s5444_s6 + $0xe20] sm:$0xff]  ;;  %v1237_v40 = vld [vmem:[%s5444_s6 + $0xe30] sm:$0xff]  ;;  %1234 = vst [vmem:[%s5452_s7 + $0x708] sm:$0xff] %v1233_v38 }
  0x88   : > { %1236 = vst [vmem:[%s5452_s7 + $0x710] sm:$0xff] %v1235_v39  ;;  %1238 = vst [vmem:[%s5452_s7 + $0x718] sm:$0xff] %v1237_v40  ;;  %v1239_v41 = vld [vmem:[%s5444_s6 + $0xe40] sm:$0xff]  ;;  %v1241_v42 = vld [vmem:[%s5444_s6 + $0xe50] sm:$0xff] }
  0x89   : > { %v1243_v43 = vld [vmem:[%s5444_s6 + $0xe60] sm:$0xff]  ;;  %1240 = vst [vmem:[%s5452_s7 + $0x720] sm:$0xff] %v1239_v41  ;;  %1242 = vst [vmem:[%s5452_s7 + $0x728] sm:$0xff] %v1241_v42  ;;  %v1245_v44 = vld [vmem:[%s5444_s6 + $0xe70] sm:$0xff] }
  0x8a   : > { %1244 = vst [vmem:[%s5452_s7 + $0x730] sm:$0xff] %v1243_v43  ;;  %v1247_v45 = vld [vmem:[%s5444_s6 + $0xe80] sm:$0xff]  ;;  %v1249_v46 = vld [vmem:[%s5444_s6 + $0xe90] sm:$0xff]  ;;  %1246 = vst [vmem:[%s5452_s7 + $0x738] sm:$0xff] %v1245_v44 }
  0x8b   : > { %1248 = vst [vmem:[%s5452_s7 + $0x740] sm:$0xff] %v1247_v45  ;;  %1250 = vst [vmem:[%s5452_s7 + $0x748] sm:$0xff] %v1249_v46  ;;  %v1251_v47 = vld [vmem:[%s5444_s6 + $0xea0] sm:$0xff]  ;;  %v1253_v48 = vld [vmem:[%s5444_s6 + $0xeb0] sm:$0xff] }
  0x8c   : > { %v1255_v49 = vld [vmem:[%s5444_s6 + $0xec0] sm:$0xff]  ;;  %1252 = vst [vmem:[%s5452_s7 + $0x750] sm:$0xff] %v1251_v47  ;;  %1254 = vst [vmem:[%s5452_s7 + $0x758] sm:$0xff] %v1253_v48  ;;  %v1257_v50 = vld [vmem:[%s5444_s6 + $0xed0] sm:$0xff] }
  0x8d   : > { %1256 = vst [vmem:[%s5452_s7 + $0x760] sm:$0xff] %v1255_v49  ;;  %v1259_v51 = vld [vmem:[%s5444_s6 + $0xee0] sm:$0xff]  ;;  %v1261_v52 = vld [vmem:[%s5444_s6 + $0xef0] sm:$0xff]  ;;  %1258 = vst [vmem:[%s5452_s7 + $0x768] sm:$0xff] %v1257_v50 }
  0x8e   : > { %1260 = vst [vmem:[%s5452_s7 + $0x770] sm:$0xff] %v1259_v51  ;;  %1262 = vst [vmem:[%s5452_s7 + $0x778] sm:$0xff] %v1261_v52  ;;  %v1263_v53 = vld [vmem:[%s5444_s6 + $0xf00] sm:$0xff]  ;;  %v1265_v54 = vld [vmem:[%s5444_s6 + $0xf10] sm:$0xff] }
  0x8f   : > { %v1267_v55 = vld [vmem:[%s5444_s6 + $0xf20] sm:$0xff]  ;;  %1264 = vst [vmem:[%s5452_s7 + $0x780] sm:$0xff] %v1263_v53  ;;  %1266 = vst [vmem:[%s5452_s7 + $0x788] sm:$0xff] %v1265_v54  ;;  %v1269_v56 = vld [vmem:[%s5444_s6 + $0xf30] sm:$0xff] }
  0x90   : > { %1268 = vst [vmem:[%s5452_s7 + $0x790] sm:$0xff] %v1267_v55  ;;  %v1271_v57 = vld [vmem:[%s5444_s6 + $0xf40] sm:$0xff]  ;;  %v1273_v58 = vld [vmem:[%s5444_s6 + $0xf50] sm:$0xff]  ;;  %1270 = vst [vmem:[%s5452_s7 + $0x798] sm:$0xff] %v1269_v56 }
  0x91   : > { %1272 = vst [vmem:[%s5452_s7 + $0x7a0] sm:$0xff] %v1271_v57  ;;  %1274 = vst [vmem:[%s5452_s7 + $0x7a8] sm:$0xff] %v1273_v58  ;;  %v1275_v59 = vld [vmem:[%s5444_s6 + $0xf60] sm:$0xff]  ;;  %v1277_v60 = vld [vmem:[%s5444_s6 + $0xf70] sm:$0xff] }
  0x92   : > { %v1279_v61 = vld [vmem:[%s5444_s6 + $0xf80] sm:$0xff]  ;;  %1276 = vst [vmem:[%s5452_s7 + $0x7b0] sm:$0xff] %v1275_v59  ;;  %1278 = vst [vmem:[%s5452_s7 + $0x7b8] sm:$0xff] %v1277_v60  ;;  %v1281_v62 = vld [vmem:[%s5444_s6 + $0xf90] sm:$0xff] }
  0x93   : > { %1280 = vst [vmem:[%s5452_s7 + $0x7c0] sm:$0xff] %v1279_v61  ;;  %v1283_v63 = vld [vmem:[%s5444_s6 + $0xfa0] sm:$0xff]  ;;  %v1285_v0 = vld [vmem:[%s5444_s6 + $0xfb0] sm:$0xff]  ;;  %1282 = vst [vmem:[%s5452_s7 + $0x7c8] sm:$0xff] %v1281_v62 }
  0x94   : > { %1284 = vst [vmem:[%s5452_s7 + $0x7d0] sm:$0xff] %v1283_v63  ;;  %1286 = vst [vmem:[%s5452_s7 + $0x7d8] sm:$0xff] %v1285_v0  ;;  %v1287_v2 = vld [vmem:[%s5444_s6 + $0xfc0] sm:$0xff]  ;;  %v1289_v3 = vld [vmem:[%s5444_s6 + $0xfd0] sm:$0xff] }
  0x95   : > { %v1291_v4 = vld [vmem:[%s5444_s6 + $0xfe0] sm:$0xff]  ;;  %1288 = vst [vmem:[%s5452_s7 + $0x7e0] sm:$0xff] %v1287_v2  ;;  %1290 = vst [vmem:[%s5452_s7 + $0x7e8] sm:$0xff] %v1289_v3  ;;  %v1293_v5 = vld [vmem:[%s5444_s6 + $0xff0] sm:$0xff] }
  0x96   : > { %1292 = vst [vmem:[%s5452_s7 + $0x7f0] sm:$0xff] %v1291_v4  ;;  %v1295_v6 = vld [vmem:[%s5444_s6 + $0x1000] sm:$0xff]  ;;  %v1297_v7 = vld [vmem:[%s5444_s6 + $0x1010] sm:$0xff]  ;;  %1294 = vst [vmem:[%s5452_s7 + $0x7f8] sm:$0xff] %v1293_v5 }
  0x97   : > { %1296 = vst [vmem:[%s5452_s7 + $0x800] sm:$0xff] %v1295_v6  ;;  %1298 = vst [vmem:[%s5452_s7 + $0x808] sm:$0xff] %v1297_v7  ;;  %v1299_v8 = vld [vmem:[%s5444_s6 + $0x1020] sm:$0xff]  ;;  %v1301_v9 = vld [vmem:[%s5444_s6 + $0x1030] sm:$0xff] }
  0x98   : > { %v1303_v10 = vld [vmem:[%s5444_s6 + $0x1040] sm:$0xff]  ;;  %1300 = vst [vmem:[%s5452_s7 + $0x810] sm:$0xff] %v1299_v8  ;;  %1302 = vst [vmem:[%s5452_s7 + $0x818] sm:$0xff] %v1301_v9  ;;  %v1305_v11 = vld [vmem:[%s5444_s6 + $0x1050] sm:$0xff] }
  0x99   : > { %1304 = vst [vmem:[%s5452_s7 + $0x820] sm:$0xff] %v1303_v10  ;;  %v1307_v12 = vld [vmem:[%s5444_s6 + $0x1060] sm:$0xff]  ;;  %v1309_v13 = vld [vmem:[%s5444_s6 + $0x1070] sm:$0xff]  ;;  %1306 = vst [vmem:[%s5452_s7 + $0x828] sm:$0xff] %v1305_v11 }
  0x9a   : > { %1308 = vst [vmem:[%s5452_s7 + $0x830] sm:$0xff] %v1307_v12  ;;  %1310 = vst [vmem:[%s5452_s7 + $0x838] sm:$0xff] %v1309_v13  ;;  %v1311_v14 = vld [vmem:[%s5444_s6 + $0x1080] sm:$0xff]  ;;  %v1313_v15 = vld [vmem:[%s5444_s6 + $0x1090] sm:$0xff] }
  0x9b   : > { %v1315_v16 = vld [vmem:[%s5444_s6 + $0x10a0] sm:$0xff]  ;;  %1312 = vst [vmem:[%s5452_s7 + $0x840] sm:$0xff] %v1311_v14  ;;  %1314 = vst [vmem:[%s5452_s7 + $0x848] sm:$0xff] %v1313_v15  ;;  %v1317_v17 = vld [vmem:[%s5444_s6 + $0x10b0] sm:$0xff] }
  0x9c   : > { %1316 = vst [vmem:[%s5452_s7 + $0x850] sm:$0xff] %v1315_v16  ;;  %v1319_v18 = vld [vmem:[%s5444_s6 + $0x10c0] sm:$0xff]  ;;  %v1321_v19 = vld [vmem:[%s5444_s6 + $0x10d0] sm:$0xff]  ;;  %1318 = vst [vmem:[%s5452_s7 + $0x858] sm:$0xff] %v1317_v17 }
  0x9d   : > { %1320 = vst [vmem:[%s5452_s7 + $0x860] sm:$0xff] %v1319_v18  ;;  %1322 = vst [vmem:[%s5452_s7 + $0x868] sm:$0xff] %v1321_v19  ;;  %v1323_v20 = vld [vmem:[%s5444_s6 + $0x10e0] sm:$0xff]  ;;  %v1325_v21 = vld [vmem:[%s5444_s6 + $0x10f0] sm:$0xff] }
  0x9e   : > { %v1327_v22 = vld [vmem:[%s5444_s6 + $0x1100] sm:$0xff]  ;;  %1324 = vst [vmem:[%s5452_s7 + $0x870] sm:$0xff] %v1323_v20  ;;  %1326 = vst [vmem:[%s5452_s7 + $0x878] sm:$0xff] %v1325_v21  ;;  %v1329_v23 = vld [vmem:[%s5444_s6 + $0x1110] sm:$0xff] }
  0x9f   : > { %1328 = vst [vmem:[%s5452_s7 + $0x880] sm:$0xff] %v1327_v22  ;;  %v1331_v24 = vld [vmem:[%s5444_s6 + $0x1120] sm:$0xff]  ;;  %v1333_v25 = vld [vmem:[%s5444_s6 + $0x1130] sm:$0xff]  ;;  %1330 = vst [vmem:[%s5452_s7 + $0x888] sm:$0xff] %v1329_v23 }
  0xa0   : > { %1332 = vst [vmem:[%s5452_s7 + $0x890] sm:$0xff] %v1331_v24  ;;  %1334 = vst [vmem:[%s5452_s7 + $0x898] sm:$0xff] %v1333_v25  ;;  %v1335_v26 = vld [vmem:[%s5444_s6 + $0x1140] sm:$0xff]  ;;  %v1337_v27 = vld [vmem:[%s5444_s6 + $0x1150] sm:$0xff] }
  0xa1   : > { %v1339_v28 = vld [vmem:[%s5444_s6 + $0x1160] sm:$0xff]  ;;  %1336 = vst [vmem:[%s5452_s7 + $0x8a0] sm:$0xff] %v1335_v26  ;;  %1338 = vst [vmem:[%s5452_s7 + $0x8a8] sm:$0xff] %v1337_v27  ;;  %v1341_v29 = vld [vmem:[%s5444_s6 + $0x1170] sm:$0xff] }
  0xa2   : > { %1340 = vst [vmem:[%s5452_s7 + $0x8b0] sm:$0xff] %v1339_v28  ;;  %v1343_v30 = vld [vmem:[%s5444_s6 + $0x1180] sm:$0xff]  ;;  %v1345_v31 = vld [vmem:[%s5444_s6 + $0x1190] sm:$0xff]  ;;  %1342 = vst [vmem:[%s5452_s7 + $0x8b8] sm:$0xff] %v1341_v29 }
  0xa3   : > { %1344 = vst [vmem:[%s5452_s7 + $0x8c0] sm:$0xff] %v1343_v30  ;;  %1346 = vst [vmem:[%s5452_s7 + $0x8c8] sm:$0xff] %v1345_v31  ;;  %v1347_v32 = vld [vmem:[%s5444_s6 + $0x11a0] sm:$0xff]  ;;  %v1349_v33 = vld [vmem:[%s5444_s6 + $0x11b0] sm:$0xff] }
  0xa4   : > { %v1351_v34 = vld [vmem:[%s5444_s6 + $0x11c0] sm:$0xff]  ;;  %1348 = vst [vmem:[%s5452_s7 + $0x8d0] sm:$0xff] %v1347_v32  ;;  %1350 = vst [vmem:[%s5452_s7 + $0x8d8] sm:$0xff] %v1349_v33  ;;  %v1353_v35 = vld [vmem:[%s5444_s6 + $0x11d0] sm:$0xff] }
  0xa5   : > { %1352 = vst [vmem:[%s5452_s7 + $0x8e0] sm:$0xff] %v1351_v34  ;;  %v1355_v36 = vld [vmem:[%s5444_s6 + $0x11e0] sm:$0xff]  ;;  %v1357_v37 = vld [vmem:[%s5444_s6 + $0x11f0] sm:$0xff]  ;;  %1354 = vst [vmem:[%s5452_s7 + $0x8e8] sm:$0xff] %v1353_v35 }
  0xa6   : > { %1356 = vst [vmem:[%s5452_s7 + $0x8f0] sm:$0xff] %v1355_v36  ;;  %1358 = vst [vmem:[%s5452_s7 + $0x8f8] sm:$0xff] %v1357_v37 }
  0xa7 PF: > { %p4438_p8 = scmp.ge.s32.totalorder %s5363_s21, 1  ;;  %p1371_p9 = scmp.lt.s32.totalorder %s5363_s21, 3 }
  0xa9   : > { %p1372_p10 = pnand %p4438_p8, %p1371_p9 }
  0xab   : > { %1375 = sbr.rel (%p1372_p10) target bundleno = 748 (0x2ec), region = 66 }
  0xb0   : > { %s1378_s8 = sand.u32 1, %s5347_s17   ;;  %v1445_v38 = vld [vmem:[%s6517_s2] sm:$0x1]  ;;  %v1453_v39 = vlaneseq  ;;  %v4441_v40 = vld [vmem:[%s6517_s2 + $0x1] sm:$0x1]  ;;  %v6035_v41 = vpack.c.bf16 %v5394_v1, %v5394_v1  ;;  %v5365_v2 = vmov 0.0  }
  0xb1   : > { %s4825_s13 = smul.u32 2304, %s1378_s8  ;;  %v1446_v42 = vunpack.c.l.bf16 %v1445_v38  ;;  %v1472_v43 = vunpack.c.l.bf16 %v4441_v40  ;;  %v4442_v44 = vld [vmem:[%s6517_s2 + $0x2] sm:$0x1]  ;;  %v4443_v45 = vld [vmem:[%s6517_s2 + $0x3] sm:$0x1]  ;;  %s4440_s12 = sshll.u32 %s5355_s19, 1 }
  0xb2   : > { %v6045_v46 = vshrl.u32 %v1453_v39, 7  ;;  %4783 = vst [vmem:[#allocation9 + $0x48] sm:$0xff] %v6035_v41   ;;  %4813 = vst [vmem:[#allocation9 + $0x78] sm:$0xff] %v6035_v41   ;;  %v1499_v47 = vunpack.c.l.bf16 %v4442_v44  ;;  %v1526_v48 = vunpack.c.l.bf16 %v4443_v45  ;;  %v4444_v49 = vld [vmem:[%s6517_s2 + $0x4] sm:$0x1]  ;;  %p1432_p11 = scmp.lt.s32.totalorder %s4440_s12, 3 }
  0xb3   : > { %4818 = vst [vmem:[#allocation9 + $0x80] sm:$0xff] %v6035_v41   ;;  %4823 = vst [vmem:[#allocation9 + $0x88] sm:$0xff] %v6035_v41   ;;  %v4445_v50 = vld [vmem:[%s6517_s2 + $0x5] sm:$0x1]  ;;  %v1553_v51 = vunpack.c.l.bf16 %v4444_v49  ;;  %v4446_v53 = vld [vmem:[%s6517_s2 + $0x6] sm:$0x1] }
  0xb4   : > { %v1580_v52 = vunpack.c.l.bf16 %v4445_v50  ;;  %v4447_v54 = vld [vmem:[%s6517_s2 + $0x7] sm:$0x1]  ;;  %s6063_s7 = scalar_lea.vmem [#allocation7], %s4825_s13  ;;  %vm1457_vm0 = vcmp.lt.s32.totalorder %v6045_v46, 2  ;;  %v1607_v56 = vunpack.c.l.bf16 %v4446_v53  ;;  %s6528_s12 = smov (!%p1432_p11, %s4440_s12), 3 }
  0xb5   : > { %v4867_v55 = vld [vmem:[%s6063_s7 + $0x74] ss:$8 sps:$4 sm:$0xff]   ;;  %v1634_v57 = vunpack.c.l.bf16 %v4447_v54  ;;  %v4869_v58 = vld [vmem:[%s6063_s7 + $0x70] ss:$8 sps:$4 sm:$0xff]   ;;  %v1458_v59 = vsel %vm1457_vm0, %v1446_v42, %v5394_v1  ;;  %v1484_v60 = vsel %vm1457_vm0, %v1472_v43, %v5394_v1  ;;  %v1511_v61 = vsel %vm1457_vm0, %v1499_v47, %v5394_v1  ;;  %v4873_v7 = vld [vmem:[%s6063_s7 + $0x64] ss:$8 sps:$4 sm:$0xff]   ;;  %s1434_s14 = scalar_lea.vmem %s6516_s1, %s6528_s12 }
  0xb6   : > { %v1538_v62 = vsel %vm1457_vm0, %v1526_v48, %v5394_v1  ;;  %3860 = vmatprep.subr.bf16.mxu0 %v4867_v55  ;;  %v4870_v63 = vld [vmem:[%s6063_s7 + $0x174] ss:$8 sps:$4 sm:$0xff]   ;;  %v4872_v0 = vld [vmem:[%s6063_s7 + $0x170] ss:$8 sps:$4 sm:$0xff]   ;;  %v1459_v3 = vpack.c.bf16 %v5365_v2, %v1458_v59  ;;  %v1486_v4 = vpack.c.bf16 %v5365_v2, %v1484_v60  ;;  %v1513_v5 = vpack.c.bf16 %v5365_v2, %v1511_v61  ;;  %v4875_v8 = vld [vmem:[%s6063_s7 + $0x60] ss:$8 sps:$4 sm:$0xff]  }
  0xb7   : > { %v1540_v6 = vpack.c.bf16 %v5365_v2, %v1538_v62  ;;  %3861 = vmatpush1.bf16.msra.mxu0 %v4869_v58  ;;  %v1565_v9 = vsel %vm1457_vm0, %v1553_v51, %v5394_v1  ;;  %v1592_v10 = vsel %vm1457_vm0, %v1580_v52, %v5394_v1  ;;  %v1619_v11 = vsel %vm1457_vm0, %v1607_v56, %v5394_v1  ;;  %v4876_v13 = vld [vmem:[%s6063_s7 + $0x164] ss:$8 sps:$4 sm:$0xff]   ;;  %v4878_v18 = vld [vmem:[%s6063_s7 + $0x160] ss:$8 sps:$4 sm:$0xff]   ;;  %v4879_v19 = vld [vmem:[%s6063_s7 + $0x54] ss:$8 sps:$4 sm:$0xff]  }
  0xb8   : > { %v1646_v12 = vsel %vm1457_vm0, %v1634_v57, %v5394_v1  ;;  %3903 = vmatprep.subr.bf16.mxu1 %v4870_v63  ;;  %1462 = vst [vmem:[#allocation9] sm:$0xf] %v1459_v3  ;;  %1489 = vst [vmem:[#allocation9 + $0x4] sm:$0xf] %v1486_v4  ;;  %v1567_v14 = vpack.c.bf16 %v5365_v2, %v1565_v9  ;;  %v1594_v15 = vpack.c.bf16 %v5365_v2, %v1592_v10  ;;  %v4881_v20 = vld [vmem:[%s6063_s7 + $0x50] ss:$8 sps:$4 sm:$0xff]  }
  0xb9   : > { %1516 = vst [vmem:[#allocation9 + $0x8] sm:$0xf] %v1513_v5  ;;  %1543 = vst [vmem:[#allocation9 + $0xc] sm:$0xf] %v1540_v6  ;;  %v1621_v16 = vpack.c.bf16 %v5365_v2, %v1619_v11  ;;  %v1648_v17 = vpack.c.bf16 %v5365_v2, %v1646_v12  ;;  %3904 = vmatpush1.bf16.msra.mxu1 %v4872_v0  ;;  %3862 = vmatprep.subr.bf16.mxu0 %v4873_v7  ;;  %v4882_v21 = vld [vmem:[%s6063_s7 + $0x154] ss:$8 sps:$4 sm:$0xff]  }
  0xba   : > { %3905 = vmatprep.subr.bf16.mxu1 %v4876_v13  ;;  %1570 = vst [vmem:[#allocation9 + $0x10] sm:$0xf] %v1567_v14  ;;  %1597 = vst [vmem:[#allocation9 + $0x14] sm:$0xf] %v1594_v15  ;;  %v4885_v22 = vld [vmem:[%s6063_s7 + $0x44] ss:$8 sps:$4 sm:$0xff]  }
  0xbb   : > { %1624 = vst [vmem:[#allocation9 + $0x18] sm:$0xf] %v1621_v16  ;;  %1651 = vst [vmem:[#allocation9 + $0x1c] sm:$0xf] %v1648_v17  ;;  %3863 = vmatpush1.bf16.msra.mxu0 %v4875_v8  ;;  %v4884_v23 = vld [vmem:[%s6063_s7 + $0x150] ss:$8 sps:$4 sm:$0xff]  }
  0xbc   : > { %3864 = vmatprep.subr.bf16.mxu0 %v4879_v19  ;;  %v4888_v24 = vld [vmem:[%s6063_s7 + $0x144] ss:$8 sps:$4 sm:$0xff]   ;;  %v4887_v25 = vld [vmem:[%s6063_s7 + $0x40] ss:$8 sps:$4 sm:$0xff]   ;;  %v4891_v26 = vld [vmem:[%s6063_s7 + $0x34] ss:$8 sps:$4 sm:$0xff]  }
  0xbd   : > { %3906 = vmatpush1.bf16.msra.mxu1 %v4878_v18  ;;  %v4890_v27 = vld [vmem:[%s6063_s7 + $0x140] ss:$8 sps:$4 sm:$0xff]   ;;  %v4894_v28 = vld [vmem:[%s6063_s7 + $0x134] ss:$8 sps:$4 sm:$0xff]   ;;  %v4893_v29 = vld [vmem:[%s6063_s7 + $0x30] ss:$8 sps:$4 sm:$0xff]  }
  0xbe   : > { %3907 = vmatprep.subr.bf16.mxu1 %v4882_v21  ;;  %v4897_v30 = vld [vmem:[%s6063_s7 + $0x24] ss:$8 sps:$4 sm:$0xff]   ;;  %v4896_v31 = vld [vmem:[%s6063_s7 + $0x130] ss:$8 sps:$4 sm:$0xff]   ;;  %v4899_v33 = vld [vmem:[%s6063_s7 + $0x20] ss:$8 sps:$4 sm:$0xff]  }
  0xbf   : > { %3865 = vmatpush1.bf16.msra.mxu0 %v4881_v20  ;;  %v4900_v32 = vld [vmem:[%s6063_s7 + $0x124] ss:$8 sps:$4 sm:$0xff]   ;;  %v4903_v34 = vld [vmem:[%s6063_s7 + $0x14] ss:$8 sps:$4 sm:$0xff]   ;;  %v4902_v35 = vld [vmem:[%s6063_s7 + $0x120] ss:$8 sps:$4 sm:$0xff]  }
  0xc0   : > { %3866 = vmatprep.subr.bf16.mxu0 %v4885_v22  ;;  %v4906_v36 = vld [vmem:[%s6063_s7 + $0x114] ss:$8 sps:$4 sm:$0xff]   ;;  %v4905_v37 = vld [vmem:[%s6063_s7 + $0x10] ss:$8 sps:$4 sm:$0xff]   ;;  %v4909_v38 = vld [vmem:[%s6063_s7 + $0x4] ss:$8 sps:$4 sm:$0xff]  }
  0xc1   : > { %3908 = vmatpush1.bf16.msra.mxu1 %v4884_v23  ;;  %v4908_v39 = vld [vmem:[%s6063_s7 + $0x110] ss:$8 sps:$4 sm:$0xff]   ;;  %v4912_v40 = vld [vmem:[%s6063_s7 + $0x104] ss:$8 sps:$4 sm:$0xff]   ;;  %v4911_v42 = vld [vmem:[%s6063_s7] ss:$8 sps:$4 sm:$0xff]  }
  0xc2   : > { %3909 = vmatprep.subr.bf16.mxu1 %v4888_v24  ;;  %v4915_v43 = vld [vmem:[%s6063_s7 + $0xf4] ss:$8 sps:$4 sm:$0xff]   ;;  %v4914_v44 = vld [vmem:[%s6063_s7 + $0x100] ss:$8 sps:$4 sm:$0xff]   ;;  %v4917_v47 = vld [vmem:[%s6063_s7 + $0xf0] ss:$8 sps:$4 sm:$0xff]  }
  0xc3   : > { %3867 = vmatpush1.bf16.msra.mxu0 %v4887_v25  ;;  %v4918_v45 = vld [vmem:[%s6063_s7 + $0x1f4] ss:$8 sps:$4 sm:$0xff]   ;;  %v4921_v48 = vld [vmem:[%s6063_s7 + $0xe4] ss:$8 sps:$4 sm:$0xff]   ;;  %v4920_v49 = vld [vmem:[%s6063_s7 + $0x1f0] ss:$8 sps:$4 sm:$0xff]  }
  0xc4   : > { %3868 = vmatprep.subr.bf16.mxu0 %v4891_v26  ;;  %v4924_v50 = vld [vmem:[%s6063_s7 + $0x1e4] ss:$8 sps:$4 sm:$0xff]   ;;  %v4923_v51 = vld [vmem:[%s6063_s7 + $0xe0] ss:$8 sps:$4 sm:$0xff]   ;;  %v4927_v52 = vld [vmem:[%s6063_s7 + $0xd4] ss:$8 sps:$4 sm:$0xff]  }
  0xc5   : > { %3910 = vmatpush1.bf16.msra.mxu1 %v4890_v27  ;;  %v4926_v53 = vld [vmem:[%s6063_s7 + $0x1e0] ss:$8 sps:$4 sm:$0xff]   ;;  %v4930_v54 = vld [vmem:[%s6063_s7 + $0x1d4] ss:$8 sps:$4 sm:$0xff]   ;;  %v4929_v55 = vld [vmem:[%s6063_s7 + $0xd0] ss:$8 sps:$4 sm:$0xff]  }
  0xc6   : > { %3911 = vmatprep.subr.bf16.mxu1 %v4894_v28  ;;  %v4933_v56 = vld [vmem:[%s6063_s7 + $0xc4] ss:$8 sps:$4 sm:$0xff]   ;;  %v4932_v57 = vld [vmem:[%s6063_s7 + $0x1d0] ss:$8 sps:$4 sm:$0xff]   ;;  %v4935_v60 = vld [vmem:[%s6063_s7 + $0xc0] ss:$8 sps:$4 sm:$0xff]  }
  0xc7   : > { %3869 = vmatpush1.bf16.msra.mxu0 %v4893_v29  ;;  %v4936_v58 = vld [vmem:[%s6063_s7 + $0x1c4] ss:$8 sps:$4 sm:$0xff]   ;;  %v4939_v62 = vld [vmem:[%s6063_s7 + $0xb4] ss:$8 sps:$4 sm:$0xff]   ;;  %v4938_v0 = vld [vmem:[%s6063_s7 + $0x1c0] ss:$8 sps:$4 sm:$0xff]  }
  0xc8   : > { %3870 = vmatprep.subr.bf16.mxu0 %v4897_v30  ;;  %v2012_v59 = vld [vmem:[#allocation9] sm:$0xff]  ;;  %v2013_v63 = vld [vmem:[#allocation9 + $0x8] sm:$0xff]  ;;  %v4942_v4 = vld [vmem:[%s6063_s7 + $0x1b4] ss:$8 sps:$4 sm:$0xff]   ;;  %s4439_s15 = sshll.u32 %s1378_s8, 4  ;;  %s4778_s22 = sshll.u32 (%p5431_p6), %s5355_s19, 3 }
  0xc9   : > { %3912 = vmatpush1.bf16.msra.mxu1 %v4896_v31  ;;  %v4459_v61 = vcombine.high %v2012_v59, %v6035_v41  ;;  %v4461_v3 = vcombine.high %v2013_v63, %v6035_v41  ;;  %v4941_v5 = vld [vmem:[%s6063_s7 + $0xb0] ss:$8 sps:$4 sm:$0xff]   ;;  %v4945_v6 = vld [vmem:[%s6063_s7 + $0xa4] ss:$8 sps:$4 sm:$0xff]   ;;  %v4947_v9 = vld [vmem:[%s6063_s7 + $0xa0] ss:$8 sps:$4 sm:$0xff]   ;;  %v4458_v20 = vcombine.low %v2012_v59, %v6035_v41  ;;  %v4460_v23 = vcombine.low %v2013_v63, %v6035_v41  ;;  %s4301_s23 = scalar_lea.vmem (%p5431_p6), %s6519_s4, %s4778_s22 }
  0xca   : > { %3913 = vmatprep.subr.bf16.mxu1 %v4900_v32  ;;  %v4944_v7 = vld [vmem:[%s6063_s7 + $0x1b0] ss:$8 sps:$4 sm:$0xff]   ;;  %v4948_v8 = vld [vmem:[%s6063_s7 + $0x1a4] ss:$8 sps:$4 sm:$0xff]   ;;  %v4951_v10 = vld [vmem:[%s6063_s7 + $0x94] ss:$8 sps:$4 sm:$0xff]  }
  0xcb   : > { %3871 = vmatpush1.bf16.msra.mxu0 %v4899_v33  ;;  %3892 = vmatprep.mubr.bf16.mxu0 %v4459_v61  ;;  %v4950_v11 = vld [vmem:[%s6063_s7 + $0x1a0] ss:$8 sps:$4 sm:$0xff]   ;;  %v4954_v12 = vld [vmem:[%s6063_s7 + $0x194] ss:$8 sps:$4 sm:$0xff]   ;;  %v4953_v13 = vld [vmem:[%s6063_s7 + $0x90] ss:$8 sps:$4 sm:$0xff]  }
  0xcc   : > { %3872 = vmatprep.subr.bf16.mxu0 %v4903_v34  ;;  %3935 = vmatprep.mubr.bf16.mxu1 %v4461_v3  ;;  %v4957_v14 = vld [vmem:[%s6063_s7 + $0x84] ss:$8 sps:$4 sm:$0xff]   ;;  %v4956_v15 = vld [vmem:[%s6063_s7 + $0x190] ss:$8 sps:$4 sm:$0xff]   ;;  %v4959_v17 = vld [vmem:[%s6063_s7 + $0x80] ss:$8 sps:$4 sm:$0xff]  }
  0xcd   : > { %3914 = vmatpush1.bf16.msra.mxu1 %v4902_v35  ;;  %v4960_v16 = vld [vmem:[%s6063_s7 + $0x184] ss:$8 sps:$4 sm:$0xff]   ;;  %v4965_v18 = vld [vmem:[%s6063_s7 + $0x274] ss:$8 sps:$4 sm:$0xff]   ;;  %v4962_v19 = vld [vmem:[%s6063_s7 + $0x180] ss:$8 sps:$4 sm:$0xff]  }
  0xce   : > { %3915 = vmatprep.subr.bf16.mxu1 %v4906_v36  ;;  %v4968_v21 = vld [vmem:[%s6063_s7 + $0x374] ss:$8 sps:$4 sm:$0xff]   ;;  %v4963_v22 = vld [vmem:[%s6063_s7 + $0x270] ss:$8 sps:$4 sm:$0xff]   ;;  %v4971_v24 = vld [vmem:[%s6063_s7 + $0x264] ss:$8 sps:$4 sm:$0xff]  }
  0xcf   : > { %3873 = vmatpush1.bf16.msra.mxu0 %v4905_v37  ;;  %v4966_v25 = vld [vmem:[%s6063_s7 + $0x370] ss:$8 sps:$4 sm:$0xff]   ;;  %v4974_v26 = vld [vmem:[%s6063_s7 + $0x364] ss:$8 sps:$4 sm:$0xff]   ;;  %v4969_v27 = vld [vmem:[%s6063_s7 + $0x260] ss:$8 sps:$4 sm:$0xff]  }
  0xd0   : > { %3874 = vmatprep.subr.bf16.mxu0 %v4909_v38  ;;  %v4977_v28 = vld [vmem:[%s6063_s7 + $0x254] ss:$8 sps:$4 sm:$0xff]   ;;  %v4972_v29 = vld [vmem:[%s6063_s7 + $0x360] ss:$8 sps:$4 sm:$0xff]   ;;  %v4975_v31 = vld [vmem:[%s6063_s7 + $0x250] ss:$8 sps:$4 sm:$0xff]  }
  0xd1   : > { %3916 = vmatpush1.bf16.msra.mxu1 %v4908_v39  ;;  %v4980_v30 = vld [vmem:[%s6063_s7 + $0x354] ss:$8 sps:$4 sm:$0xff]   ;;  %v4983_v32 = vld [vmem:[%s6063_s7 + $0x244] ss:$8 sps:$4 sm:$0xff]   ;;  %v4978_v33 = vld [vmem:[%s6063_s7 + $0x350] ss:$8 sps:$4 sm:$0xff]  }
  0xd2   : > { %3917 = vmatprep.subr.bf16.mxu1 %v4912_v40  ;;  %v4986_v34 = vld [vmem:[%s6063_s7 + $0x344] ss:$8 sps:$4 sm:$0xff]   ;;  %v4981_v35 = vld [vmem:[%s6063_s7 + $0x240] ss:$8 sps:$4 sm:$0xff]   ;;  %v4989_v36 = vld [vmem:[%s6063_s7 + $0x234] ss:$8 sps:$4 sm:$0xff]  }
  0xd3   : > { %3875 = vmatpush1.bf16.msra.mxu0 %v4911_v42  ;;  %v4984_v37 = vld [vmem:[%s6063_s7 + $0x340] ss:$8 sps:$4 sm:$0xff]   ;;  %v4992_v38 = vld [vmem:[%s6063_s7 + $0x334] ss:$8 sps:$4 sm:$0xff]   ;;  %v4987_v39 = vld [vmem:[%s6063_s7 + $0x230] ss:$8 sps:$4 sm:$0xff]  }
  0xd4   : > { %3876 = vmatprep.subr.bf16.mxu0 %v4915_v43  ;;  %v4995_v40 = vld [vmem:[%s6063_s7 + $0x224] ss:$8 sps:$4 sm:$0xff]   ;;  %v4990_v42 = vld [vmem:[%s6063_s7 + $0x330] ss:$8 sps:$4 sm:$0xff]   ;;  %v5008_v59 = vld [vmem:[%s6063_s7 + $0x300] ss:$8 sps:$4 sm:$0xff]  }
  0xd5   : > { %3918 = vmatpush1.bf16.msra.mxu1 %v4914_v44  ;;  %v4998_v43 = vld [vmem:[%s6063_s7 + $0x324] ss:$8 sps:$4 sm:$0xff]   ;;  %v4993_v44 = vld [vmem:[%s6063_s7 + $0x220] ss:$8 sps:$4 sm:$0xff]   ;;  %v5011_v61 = vld [vmem:[%s6063_s7 + $0x2f0] ss:$8 sps:$4 sm:$0xff]  }
  0xd6   : > { %3919 = vmatprep.subr.bf16.mxu1 %v4918_v45  ;;  %v5001_v45 = vld [vmem:[%s6063_s7 + $0x214] ss:$8 sps:$4 sm:$0xff]   ;;  %v5014_v63 = vld [vmem:[%s6063_s7 + $0x3f0] ss:$8 sps:$4 sm:$0xff]   ;;  %v5017_v3 = vld [vmem:[%s6063_s7 + $0x2e0] ss:$8 sps:$4 sm:$0xff]  }
  0xd7   : > { %3877 = vmatpush2.bf16.msra.mxu0 %v4917_v47  ;;  %v4996_v47 = vld [vmem:[%s6063_s7 + $0x320] ss:$8 sps:$4 sm:$0xff]   ;;  %s1413_s16 = scalar_lea.vmem [#allocation8], %s4439_s15 }
  0xd8   : > { %3878 = vmatprep.subr.bf16.mxu0 %v4921_v48  ;;  %v5004_v48 = vld [vmem:[%s6063_s7 + $0x314] ss:$8 sps:$4 sm:$0xff]  }
  0xd9   : > { %3920 = vmatpush2.bf16.msra.mxu1 %v4920_v49  ;;  %v6192_v49 = vld [vmem:[#allocation9 + $0x10] sm:$0xff] }
  0xda   : > { %3921 = vmatprep.subr.bf16.mxu1 %v4924_v50  ;;  %v4999_v50 = vld [vmem:[%s6063_s7 + $0x210] ss:$8 sps:$4 sm:$0xff]  }
  0xdb   : > { %3879 = vmatpush2.bf16.msra.mxu0 %v4923_v51  ;;  %v4463_v51 = vcombine.high %v6192_v49, %v6035_v41 }
  0xdc   : > { %3880 = vmatprep.subr.bf16.mxu0 %v4927_v52  ;;  %v6197_v52 = vld [vmem:[#allocation9 + $0x18] sm:$0xff] }
  0xdd   : > { %3922 = vmatpush2.bf16.msra.mxu1 %v4926_v53  ;;  %v5007_v53 = vld [vmem:[%s6063_s7 + $0x204] ss:$8 sps:$4 sm:$0xff]  }
  0xde   : > { %3923 = vmatprep.subr.bf16.mxu1 %v4930_v54  ;;  %v4465_v54 = vcombine.high %v6197_v52, %v6035_v41 }
  0xdf   : > { %3881 = vmatpush2.bf16.msra.mxu0 %v4929_v55  ;;  %v5002_v55 = vld [vmem:[%s6063_s7 + $0x310] ss:$8 sps:$4 sm:$0xff]  }
  0xe0   : > { %3882 = vmatprep.subr.bf16.mxu0 %v4933_v56  ;;  %v5010_v56 = vld [vmem:[%s6063_s7 + $0x304] ss:$8 sps:$4 sm:$0xff]  }
  0xe1   : > { %3924 = vmatpush2.bf16.msra.mxu1 %v4932_v57  ;;  %v5005_v57 = vld [vmem:[%s6063_s7 + $0x200] ss:$8 sps:$4 sm:$0xff]  }
  0xe2   : > { %3925 = vmatprep.subr.bf16.mxu1 %v4936_v58  ;;  %v5013_v58 = vld [vmem:[%s6063_s7 + $0x2f4] ss:$8 sps:$4 sm:$0xff]  }
  0xe3   : > { %3883 = vmatpush2.bf16.msra.mxu0 %v4935_v60  ;;  %v5016_v60 = vld [vmem:[%s6063_s7 + $0x3f4] ss:$8 sps:$4 sm:$0xff]  }
  0xe4   : > { %3884 = vmatprep.subr.bf16.mxu0 %v4939_v62  ;;  %v5019_v62 = vld [vmem:[%s6063_s7 + $0x2e4] ss:$8 sps:$4 sm:$0xff]  }
  0xe5   : > { %3926 = vmatpush2.bf16.msra.mxu1 %v4938_v0  ;;  %v5022_v0 = vld [vmem:[%s6063_s7 + $0x3e4] ss:$8 sps:$4 sm:$0xff]  }
  0xe6   : > { %3927 = vmatprep.subr.bf16.mxu1 %v4942_v4  ;;  %v5025_v4 = vld [vmem:[%s6063_s7 + $0x2d4] ss:$8 sps:$4 sm:$0xff]  }
  0xe7   : > { %3885 = vmatpush2.bf16.msra.mxu0 %v4941_v5  ;;  %v5020_v5 = vld [vmem:[%s6063_s7 + $0x3e0] ss:$8 sps:$4 sm:$0xff]  }
  0xe8   : > { %3886 = vmatprep.subr.bf16.mxu0 %v4945_v6  ;;  %v5028_v6 = vld [vmem:[%s6063_s7 + $0x3d4] ss:$8 sps:$4 sm:$0xff]  }
  0xe9   : > { %3928 = vmatpush2.bf16.msra.mxu1 %v4944_v7  ;;  %v5023_v7 = vld [vmem:[%s6063_s7 + $0x2d0] ss:$8 sps:$4 sm:$0xff]  }
  0xea   : > { %3929 = vmatprep.subr.bf16.mxu1 %v4948_v8  ;;  %v5031_v8 = vld [vmem:[%s6063_s7 + $0x2c4] ss:$8 sps:$4 sm:$0xff]  }
  0xeb   : > { %3887 = vmatpush2.bf16.msra.mxu0 %v4947_v9  ;;  %v5026_v9 = vld [vmem:[%s6063_s7 + $0x3d0] ss:$8 sps:$4 sm:$0xff]  }
  0xec   : > { %3888 = vmatprep.subr.bf16.mxu0 %v4951_v10  ;;  %v5034_v10 = vld [vmem:[%s6063_s7 + $0x3c4] ss:$8 sps:$4 sm:$0xff]  }
  0xed   : > { %3930 = vmatpush2.bf16.msra.mxu1 %v4950_v11  ;;  %v5029_v11 = vld [vmem:[%s6063_s7 + $0x2c0] ss:$8 sps:$4 sm:$0xff]  }
  0xee   : > { %3931 = vmatprep.subr.bf16.mxu1 %v4954_v12  ;;  %v5037_v12 = vld [vmem:[%s6063_s7 + $0x2b4] ss:$8 sps:$4 sm:$0xff]  }
  0xef   : > { %3889 = vmatpush2.bf16.msra.mxu0 %v4953_v13  ;;  %v5032_v13 = vld [vmem:[%s6063_s7 + $0x3c0] ss:$8 sps:$4 sm:$0xff]  }
  0xf0   : > { %3890 = vmatprep.subr.bf16.mxu0 %v4957_v14  ;;  %v5040_v14 = vld [vmem:[%s6063_s7 + $0x3b4] ss:$8 sps:$4 sm:$0xff]  }
  0xf1   : > { %3932 = vmatpush2.bf16.msra.mxu1 %v4956_v15  ;;  %v5035_v15 = vld [vmem:[%s6063_s7 + $0x2b0] ss:$8 sps:$4 sm:$0xff]  }
  0xf2   : > { %3933 = vmatprep.subr.bf16.mxu1 %v4960_v16  ;;  %v5043_v16 = vld [vmem:[%s6063_s7 + $0x2a4] ss:$8 sps:$4 sm:$0xff]  }
  0xf3   : > { %3891 = vmatpush2.bf16.msra.mxu0 %v4959_v17  ;;  %v5038_v17 = vld [vmem:[%s6063_s7 + $0x3b0] ss:$8 sps:$4 sm:$0xff]  }
  0xf4   : > { %3946 = vmatprep.subr.bf16.mxu0 %v4965_v18  ;;  %v5046_v18 = vld [vmem:[%s6063_s7 + $0x3a4] ss:$8 sps:$4 sm:$0xff]  }
  0xf5   : > { %3934 = vmatpush2.bf16.msra.mxu1 %v4962_v19  ;;  %v5041_v19 = vld [vmem:[%s6063_s7 + $0x2a0] ss:$8 sps:$4 sm:$0xff]  }
  0xf6   : > { %3893 = vmatmul.mubr.bf16.vlgmr.msra.gmra.mxu0 %v4458_v20  ;;  %3989 = vmatprep.subr.bf16.mxu1 %v4968_v21  ;;  %v5049_v20 = vld [vmem:[%s6063_s7 + $0x294] ss:$8 sps:$4 sm:$0xff]   ;;  %v5044_v21 = vld [vmem:[%s6063_s7 + $0x3a0] ss:$8 sps:$4 sm:$0xff]  }
  0xf7   : > { %3947 = vmatpush1.bf16.msra.mxu0 %v4963_v22  ;;  %3978 = vmatprep.mubr.bf16.mxu0 %v4463_v51  ;;  %v5052_v22 = vld [vmem:[%s6063_s7 + $0x394] ss:$8 sps:$4 sm:$0xff]   ;;  %v5068_v51 = vld [vmem:[%s6063_s7 + $0x560] ss:$8 sps:$4 sm:$0xff]  }
  0xf8   : > { %3936 = vmatmul.mubr.bf16.vlgmr.msra.gmra.mxu1 %v4460_v23  ;;  %3948 = vmatprep.subr.bf16.mxu0 %v4971_v24  ;;  %v5047_v23 = vld [vmem:[%s6063_s7 + $0x290] ss:$8 sps:$4 sm:$0xff]   ;;  %v5055_v24 = vld [vmem:[%s6063_s7 + $0x284] ss:$8 sps:$4 sm:$0xff]  }
  0xf9   : > { %3990 = vmatpush1.bf16.msra.mxu1 %v4966_v25  ;;  %4021 = vmatprep.mubr.bf16.mxu1 %v4465_v54  ;;  %v5050_v25 = vld [vmem:[%s6063_s7 + $0x390] ss:$8 sps:$4 sm:$0xff]   ;;  %v5076_v54 = vld [vmem:[%s6063_s7 + $0x554] ss:$8 sps:$4 sm:$0xff]  }
  0xfa   : > { %3991 = vmatprep.subr.bf16.mxu1 %v4974_v26  ;;  %v5058_v26 = vld [vmem:[%s6063_s7 + $0x384] ss:$8 sps:$4 sm:$0xff]  }
  0xfb   : > { %3949 = vmatpush1.bf16.msra.mxu0 %v4969_v27  ;;  %v5053_v27 = vld [vmem:[%s6063_s7 + $0x280] ss:$8 sps:$4 sm:$0xff]  }
  0xfc   : > { %3950 = vmatprep.subr.bf16.mxu0 %v4977_v28  ;;  %v5061_v28 = vld [vmem:[%s6063_s7 + $0x474] ss:$8 sps:$4 sm:$0xff]  }
  0xfd   : > { %3992 = vmatpush1.bf16.msra.mxu1 %v4972_v29  ;;  %v5056_v29 = vld [vmem:[%s6063_s7 + $0x380] ss:$8 sps:$4 sm:$0xff]  }
  0xfe   : > { %3993 = vmatprep.subr.bf16.mxu1 %v4980_v30  ;;  %v4462_v30 = vcombine.low %v6192_v49, %v6035_v41  ;;  %v4449_v41 = vld [vmem:[%s6517_s2 + $0x9] sm:$0x1] }
  0xff   : > { %3951 = vmatpush1.bf16.msra.mxu0 %v4975_v31  ;;  %v5064_v31 = vld [vmem:[%s6063_s7 + $0x574] ss:$8 sps:$4 sm:$0xff]  }
 0x100   : > { %3952 = vmatprep.subr.bf16.mxu0 %v4983_v32  ;;  %v5059_v32 = vld [vmem:[%s6063_s7 + $0x470] ss:$8 sps:$4 sm:$0xff]  }
 0x101   : > { %3994 = vmatpush1.bf16.msra.mxu1 %v4978_v33  ;;  %v6243_v33 = vld [vmem:[#allocation9 + $0x48] sm:$0xff] }
 0x102   : > { %3995 = vmatprep.subr.bf16.mxu1 %v4986_v34  ;;  %v4464_v34 = vcombine.low %v6197_v52, %v6243_v33 }
 0x103   : > { %3953 = vmatpush1.bf16.msra.mxu0 %v4981_v35  ;;  %v5067_v35 = vld [vmem:[%s6063_s7 + $0x464] ss:$8 sps:$4 sm:$0xff]  }
 0x104   : > { %3954 = vmatprep.subr.bf16.mxu0 %v4989_v36  ;;  %v5062_v36 = vld [vmem:[%s6063_s7 + $0x570] ss:$8 sps:$4 sm:$0xff]  }
 0x105   : > { %3996 = vmatpush1.bf16.msra.mxu1 %v4984_v37  ;;  %v4448_v37 = vld [vmem:[%s6517_s2 + $0x8] sm:$0x1] }
 0x106   : > { %3997 = vmatprep.subr.bf16.mxu1 %v4992_v38  ;;  %v5070_v38 = vld [vmem:[%s6063_s7 + $0x564] ss:$8 sps:$4 sm:$0xff]  }
 0x107   : > { %3955 = vmatpush1.bf16.msra.mxu0 %v4987_v39  ;;  %v1661_v39 = vunpack.c.l.bf16 %v4448_v37  ;;  %v5130_v37 = vld [vmem:[%s6063_s7 + $0x5c4] ss:$8 sps:$4 sm:$0xff]  }
 0x108   : > { %3956 = vmatprep.subr.bf16.mxu0 %v4995_v40  ;;  %v1688_v40 = vunpack.c.l.bf16 %v4449_v41  ;;  %v5125_v41 = vld [vmem:[%s6063_s7 + $0x4c0] ss:$8 sps:$4 sm:$0xff]  }
 0x109   : > { %3998 = vmatpush1.bf16.msra.mxu1 %v4990_v42  ;;  %v5065_v42 = vld [vmem:[%s6063_s7 + $0x460] ss:$8 sps:$4 sm:$0xff]  }
 0x10a   : > { %3999 = vmatprep.subr.bf16.mxu1 %v4998_v43  ;;  %v4450_v43 = vld [vmem:[%s6517_s2 + $0xa] sm:$0x1] }
 0x10b   : > { %3957 = vmatpush1.bf16.msra.mxu0 %v4993_v44  ;;  %v4451_v44 = vld [vmem:[%s6517_s2 + $0xb] sm:$0x1]  ;;  %v1715_v49 = vunpack.c.l.bf16 %v4450_v43  ;;  %v4453_v43 = vld [vmem:[%s6517_s2 + $0xd] sm:$0x1] }
 0x10c   : > { %3958 = vmatprep.subr.bf16.mxu0 %v5001_v45  ;;  %v5073_v45 = vld [vmem:[%s6063_s7 + $0x454] ss:$8 sps:$4 sm:$0xff]  }
 0x10d   : > { %4000 = vmatpush1.bf16.msra.mxu1 %v4996_v47  ;;  %v1673_v47 = vsel %vm1457_vm0, %v1661_v39, %v5394_v1  ;;  %v5128_v39 = vld [vmem:[%s6063_s7 + $0x5c0] ss:$8 sps:$4 sm:$0xff]  }
 0x10e   : > { %4001 = vmatprep.subr.bf16.mxu1 %v5004_v48  ;;  %v1700_v48 = vsel %vm1457_vm0, %v1688_v40, %v5394_v1  ;;  %v1675_v52 = vpack.c.bf16 %v5365_v2, %v1673_v47  ;;  %v5136_v40 = vld [vmem:[%s6063_s7 + $0x5b4] ss:$8 sps:$4 sm:$0xff]   ;;  %v1796_v47 = vunpack.c.l.bf16 %v4453_v43  ;;  %v5182_v43 = vld [vmem:[%s6063_s7 + $0x730] ss:$8 sps:$4 sm:$0xff]  }
 0x10f   : > { %3959 = vmatpush1.bf16.msra.mxu0 %v4999_v50  ;;  %v1742_v50 = vunpack.c.l.bf16 %v4451_v44  ;;  %v5131_v44 = vld [vmem:[%s6063_s7 + $0x4b0] ss:$8 sps:$4 sm:$0xff]  }
 0x110   : > { %3960 = vmatprep.subr.bf16.mxu0 %v5007_v53  ;;  %v1702_v53 = vpack.c.bf16 %v5365_v2, %v1700_v48  ;;  %1678 = vst [vmem:[#allocation9 + $0x20] sm:$0xf] %v1675_v52  ;;  %v5134_v48 = vld [vmem:[%s6063_s7 + $0x5b0] ss:$8 sps:$4 sm:$0xff]   ;;  %v1808_v52 = vsel %vm1457_vm0, %v1796_v47, %v5394_v1  ;;  %v5188_v47 = vld [vmem:[%s6063_s7 + $0x720] ss:$8 sps:$4 sm:$0xff]  }
 0x111   : > { %4002 = vmatpush1.bf16.msra.mxu1 %v5002_v55  ;;  %v1727_v55 = vsel %vm1457_vm0, %v1715_v49, %v5394_v1  ;;  %v5139_v49 = vld [vmem:[%s6063_s7 + $0x4a4] ss:$8 sps:$4 sm:$0xff]  }
 0x112   : > { %4003 = vmatprep.subr.bf16.mxu1 %v5010_v56  ;;  %v1754_v56 = vsel %vm1457_vm0, %v1742_v50, %v5394_v1  ;;  %1705 = vst [vmem:[#allocation9 + $0x24] sm:$0xf] %v1702_v53  ;;  %v4454_v50 = vld [vmem:[%s6517_s2 + $0xe] sm:$0x1] }
 0x113   : > { %3961 = vmatpush1.bf16.msra.mxu0 %v5005_v57  ;;  %v5071_v57 = vld [vmem:[%s6063_s7 + $0x450] ss:$8 sps:$4 sm:$0xff]   ;;  %v1823_v53 = vunpack.c.l.bf16 %v4454_v50  ;;  %v5199_v50 = vld [vmem:[%s6063_s7 + $0x604] ss:$8 sps:$4 sm:$0xff]  }
 0x114   : > { %3962 = vmatprep.subr.bf16.mxu0 %v5013_v58  ;;  %v1729_v58 = vpack.c.bf16 %v5365_v2, %v1727_v55  ;;  %v5142_v55 = vld [vmem:[%s6063_s7 + $0x5a4] ss:$8 sps:$4 sm:$0xff]  }
 0x115   : > { %4004 = vmatpush1.bf16.msra.mxu1 %v5008_v59  ;;  %v1756_v59 = vpack.c.bf16 %v5365_v2, %v1754_v56 }
 0x116   : > { %4005 = vmatprep.subr.bf16.mxu1 %v5016_v60  ;;  %v5079_v60 = vld [vmem:[%s6063_s7 + $0x444] ss:$8 sps:$4 sm:$0xff]   ;;  %1732 = vst [vmem:[#allocation9 + $0x28] sm:$0xf] %v1729_v58 }
 0x117   : > { %3963 = vmatpush2.bf16.msra.mxu0 %v5011_v61  ;;  %v5074_v61 = vld [vmem:[%s6063_s7 + $0x550] ss:$8 sps:$4 sm:$0xff]   ;;  %1759 = vst [vmem:[#allocation9 + $0x2c] sm:$0xf] %v1756_v59  ;;  %v5137_v59 = vld [vmem:[%s6063_s7 + $0x4a0] ss:$8 sps:$4 sm:$0xff]  }
 0x118   : > { %3964 = vmatprep.subr.bf16.mxu0 %v5019_v62  ;;  %v5082_v62 = vld [vmem:[%s6063_s7 + $0x544] ss:$8 sps:$4 sm:$0xff]  }
 0x119   : > { %4006 = vmatpush2.bf16.msra.mxu1 %v5014_v63  ;;  %v5077_v63 = vld [vmem:[%s6063_s7 + $0x440] ss:$8 sps:$4 sm:$0xff]  }
 0x11a   : > { %4007 = vmatprep.subr.bf16.mxu1 %v5022_v0  ;;  %v5085_v0 = vld [vmem:[%s6063_s7 + $0x434] ss:$8 sps:$4 sm:$0xff]  }
 0x11b   : > { %3965 = vmatpush2.bf16.msra.mxu0 %v5017_v3  ;;  %v5080_v3 = vld [vmem:[%s6063_s7 + $0x540] ss:$8 sps:$4 sm:$0xff]  }
 0x11c   : > { %3966 = vmatprep.subr.bf16.mxu0 %v5025_v4  ;;  %v5088_v4 = vld [vmem:[%s6063_s7 + $0x534] ss:$8 sps:$4 sm:$0xff]  }
 0x11d   : > { %4008 = vmatpush2.bf16.msra.mxu1 %v5020_v5  ;;  %v6290_v5 = vld [vmem:[#allocation9 + $0x20] sm:$0xff] }
 0x11e   : > { %4009 = vmatprep.subr.bf16.mxu1 %v5028_v6  ;;  %v5083_v6 = vld [vmem:[%s6063_s7 + $0x430] ss:$8 sps:$4 sm:$0xff]  }
 0x11f   : > { %3967 = vmatpush2.bf16.msra.mxu0 %v5023_v7  ;;  %v4467_v7 = vcombine.high %v6290_v5, %v6243_v33 }
 0x120   : > { %3968 = vmatprep.subr.bf16.mxu0 %v5031_v8  ;;  %v5091_v8 = vld [vmem:[%s6063_s7 + $0x424] ss:$8 sps:$4 sm:$0xff]  }
 0x121   : > { %4010 = vmatpush2.bf16.msra.mxu1 %v5026_v9  ;;  %v6296_v9 = vld [vmem:[#allocation9 + $0x28] sm:$0xff] }
 0x122   : > { %4011 = vmatprep.subr.bf16.mxu1 %v5034_v10  ;;  %v5086_v10 = vld [vmem:[%s6063_s7 + $0x530] ss:$8 sps:$4 sm:$0xff]  }
 0x123   : > { %3969 = vmatpush2.bf16.msra.mxu0 %v5029_v11  ;;  %v4469_v11 = vcombine.high %v6296_v9, %v6243_v33 }
 0x124   : > { %3970 = vmatprep.subr.bf16.mxu0 %v5037_v12  ;;  %v5094_v12 = vld [vmem:[%s6063_s7 + $0x524] ss:$8 sps:$4 sm:$0xff]  }
 0x125   : > { %4012 = vmatpush2.bf16.msra.mxu1 %v5032_v13  ;;  %v5089_v13 = vld [vmem:[%s6063_s7 + $0x420] ss:$8 sps:$4 sm:$0xff]  }
 0x126   : > { %4013 = vmatprep.subr.bf16.mxu1 %v5040_v14  ;;  %v5097_v14 = vld [vmem:[%s6063_s7 + $0x414] ss:$8 sps:$4 sm:$0xff]  }
 0x127   : > { %3971 = vmatpush2.bf16.msra.mxu0 %v5035_v15  ;;  %v5092_v15 = vld [vmem:[%s6063_s7 + $0x520] ss:$8 sps:$4 sm:$0xff]  }
 0x128   : > { %3972 = vmatprep.subr.bf16.mxu0 %v5043_v16  ;;  %v5100_v16 = vld [vmem:[%s6063_s7 + $0x514] ss:$8 sps:$4 sm:$0xff]  }
 0x129   : > { %4014 = vmatpush2.bf16.msra.mxu1 %v5038_v17  ;;  %v5095_v17 = vld [vmem:[%s6063_s7 + $0x410] ss:$8 sps:$4 sm:$0xff]  }
 0x12a   : > { %4015 = vmatprep.subr.bf16.mxu1 %v5046_v18  ;;  %v5103_v18 = vld [vmem:[%s6063_s7 + $0x404] ss:$8 sps:$4 sm:$0xff]  }
 0x12b   : > { %3973 = vmatpush2.bf16.msra.mxu0 %v5041_v19  ;;  %v5098_v19 = vld [vmem:[%s6063_s7 + $0x510] ss:$8 sps:$4 sm:$0xff]  }
 0x12c   : > { %3974 = vmatprep.subr.bf16.mxu0 %v5049_v20  ;;  %v5106_v20 = vld [vmem:[%s6063_s7 + $0x504] ss:$8 sps:$4 sm:$0xff]  }
 0x12d   : > { %4016 = vmatpush2.bf16.msra.mxu1 %v5044_v21  ;;  %v5101_v21 = vld [vmem:[%s6063_s7 + $0x400] ss:$8 sps:$4 sm:$0xff]  }
 0x12e   : > { %4017 = vmatprep.subr.bf16.mxu1 %v5052_v22  ;;  %v5109_v22 = vld [vmem:[%s6063_s7 + $0x4f4] ss:$8 sps:$4 sm:$0xff]  }
 0x12f   : > { %3975 = vmatpush2.bf16.msra.mxu0 %v5047_v23  ;;  %v5104_v23 = vld [vmem:[%s6063_s7 + $0x500] ss:$8 sps:$4 sm:$0xff]  }
 0x130   : > { %3976 = vmatprep.subr.bf16.mxu0 %v5055_v24  ;;  %v5112_v24 = vld [vmem:[%s6063_s7 + $0x5f4] ss:$8 sps:$4 sm:$0xff]  }
 0x131   : > { %4018 = vmatpush2.bf16.msra.mxu1 %v5050_v25  ;;  %v5107_v25 = vld [vmem:[%s6063_s7 + $0x4f0] ss:$8 sps:$4 sm:$0xff]  }
 0x132   : > { %4019 = vmatprep.subr.bf16.mxu1 %v5058_v26  ;;  %v5115_v26 = vld [vmem:[%s6063_s7 + $0x4e4] ss:$8 sps:$4 sm:$0xff]  }
 0x133   : > { %3977 = vmatpush2.bf16.msra.mxu0 %v5053_v27  ;;  %v5110_v27 = vld [vmem:[%s6063_s7 + $0x5f0] ss:$8 sps:$4 sm:$0xff]  }
 0x134   : > { %4032 = vmatprep.subr.bf16.mxu0 %v5061_v28  ;;  %v5118_v28 = vld [vmem:[%s6063_s7 + $0x5e4] ss:$8 sps:$4 sm:$0xff]  }
 0x135   : > { %4020 = vmatpush2.bf16.msra.mxu1 %v5056_v29  ;;  %v5113_v29 = vld [vmem:[%s6063_s7 + $0x4e0] ss:$8 sps:$4 sm:$0xff]  }
 0x136   : > { %3979 = vmatmul.mubr.bf16.vlgmr.msra.gmra.mxu0 %v4462_v30  ;;  %4075 = vmatprep.subr.bf16.mxu1 %v5064_v31  ;;  %v5121_v30 = vld [vmem:[%s6063_s7 + $0x4d4] ss:$8 sps:$4 sm:$0xff]   ;;  %v5116_v31 = vld [vmem:[%s6063_s7 + $0x5e0] ss:$8 sps:$4 sm:$0xff]  }
 0x137   : > { %4033 = vmatpush1.bf16.msra.mxu0 %v5059_v32  ;;  %4064 = vmatprep.mubr.bf16.mxu0 %v4467_v7  ;;  %v5124_v32 = vld [vmem:[%s6063_s7 + $0x5d4] ss:$8 sps:$4 sm:$0xff]   ;;  %v5151_v7 = vld [vmem:[%s6063_s7 + $0x484] ss:$8 sps:$4 sm:$0xff]  }
 0x138   : > { %4022 = vmatmul.mubr.bf16.vlgmr.msra.gmra.mxu1 %v4464_v34  ;;  %4034 = vmatprep.subr.bf16.mxu0 %v5067_v35  ;;  %v5119_v34 = vld [vmem:[%s6063_s7 + $0x4d0] ss:$8 sps:$4 sm:$0xff]   ;;  %v5127_v35 = vld [vmem:[%s6063_s7 + $0x4c4] ss:$8 sps:$4 sm:$0xff]  }
 0x139   : > { %4076 = vmatpush1.bf16.msra.mxu1 %v5062_v36  ;;  %4107 = vmatprep.mubr.bf16.mxu1 %v4469_v11  ;;  %v5122_v36 = vld [vmem:[%s6063_s7 + $0x5d0] ss:$8 sps:$4 sm:$0xff]   ;;  %v5149_v11 = vld [vmem:[%s6063_s7 + $0x480] ss:$8 sps:$4 sm:$0xff]  }
 0x13a   : > { %4077 = vmatprep.subr.bf16.mxu1 %v5070_v38  ;;  %v5133_v38 = vld [vmem:[%s6063_s7 + $0x4b4] ss:$8 sps:$4 sm:$0xff]  }
 0x13b   : > { %4035 = vmatpush1.bf16.msra.mxu0 %v5065_v42  ;;  %v4452_v42 = vld [vmem:[%s6517_s2 + $0xc] sm:$0x1] }
 0x13c   : > { %4036 = vmatprep.subr.bf16.mxu0 %v5073_v45  ;;  %v1769_v45 = vunpack.c.l.bf16 %v4452_v42  ;;  %v5187_v42 = vld [vmem:[%s6063_s7 + $0x624] ss:$8 sps:$4 sm:$0xff]  }
 0x13d   : > { %4078 = vmatpush1.bf16.msra.mxu1 %v5068_v51 }
 0x13e   : > { %4079 = vmatprep.subr.bf16.mxu1 %v5076_v54  ;;  %v1781_v51 = vsel %vm1457_vm0, %v1769_v45, %v5394_v1  ;;  %v4455_v54 = vld [vmem:[%s6517_s2 + $0xf] sm:$0x1]  ;;  %v5193_v45 = vld [vmem:[%s6063_s7 + $0x614] ss:$8 sps:$4 sm:$0xff]  }
 0x13f   : > { %4037 = vmatpush1.bf16.msra.mxu0 %v5071_v57  ;;  %v1783_v56 = vpack.c.bf16 %v5365_v2, %v1781_v51  ;;  %v1810_v57 = vpack.c.bf16 %v5365_v2, %v1808_v52  ;;  %v1850_v58 = vunpack.c.l.bf16 %v4455_v54  ;;  %v5194_v51 = vld [vmem:[%s6063_s7 + $0x710] ss:$8 sps:$4 sm:$0xff]   ;;  %v5202_v52 = vld [vmem:[%s6063_s7 + $0x704] ss:$8 sps:$4 sm:$0xff]   ;;  %v5205_v54 = vld [vmem:[%s6063_s7 + $0x6f4] ss:$8 sps:$4 sm:$0xff]  }
 0x140   : > { %4038 = vmatprep.subr.bf16.mxu0 %v5079_v60  ;;  %v1835_v60 = vsel %vm1457_vm0, %v1823_v53, %v5394_v1  ;;  %v5197_v53 = vld [vmem:[%s6063_s7 + $0x600] ss:$8 sps:$4 sm:$0xff]  }
 0x141   : > { %4080 = vmatpush1.bf16.msra.mxu1 %v5074_v61  ;;  %v5145_v61 = vld [vmem:[%s6063_s7 + $0x494] ss:$8 sps:$4 sm:$0xff]   ;;  %1786 = vst [vmem:[#allocation9 + $0x30] sm:$0xf] %v1783_v56  ;;  %1813 = vst [vmem:[#allocation9 + $0x34] sm:$0xf] %v1810_v57 }
 0x142   : > { %4081 = vmatprep.subr.bf16.mxu1 %v5082_v62  ;;  %v1837_v62 = vpack.c.bf16 %v5365_v2, %v1835_v60  ;;  %v5208_v56 = vld [vmem:[%s6063_s7 + $0x7f4] ss:$8 sps:$4 sm:$0xff]   ;;  %v5203_v57 = vld [vmem:[%s6063_s7 + $0x6f0] ss:$8 sps:$4 sm:$0xff]   ;;  %v5214_v60 = vld [vmem:[%s6063_s7 + $0x7e4] ss:$8 sps:$4 sm:$0xff]  }
 0x143   : > { %4039 = vmatpush1.bf16.msra.mxu0 %v5077_v63  ;;  %v1862_v63 = vsel %vm1457_vm0, %v1850_v58, %v5394_v1  ;;  %v5211_v58 = vld [vmem:[%s6063_s7 + $0x6e4] ss:$8 sps:$4 sm:$0xff]  }
 0x144   : > { %4040 = vmatprep.subr.bf16.mxu0 %v5085_v0  ;;  %v5140_v0 = vld [vmem:[%s6063_s7 + $0x5a0] ss:$8 sps:$4 sm:$0xff]   ;;  %1840 = vst [vmem:[#allocation9 + $0x38] sm:$0xf] %v1837_v62  ;;  %v5217_v62 = vld [vmem:[%s6063_s7 + $0x6d4] ss:$8 sps:$4 sm:$0xff]  }
 0x145   : > { %4082 = vmatpush1.bf16.msra.mxu1 %v5080_v3  ;;  %v1864_v3 = vpack.c.bf16 %v5365_v2, %v1862_v63  ;;  %v5212_v63 = vld [vmem:[%s6063_s7 + $0x7e0] ss:$8 sps:$4 sm:$0xff]  }
 0x146   : > { %4083 = vmatprep.subr.bf16.mxu1 %v5088_v4  ;;  %v5148_v4 = vld [vmem:[%s6063_s7 + $0x594] ss:$8 sps:$4 sm:$0xff]  }
 0x147   : > { %4041 = vmatpush1.bf16.msra.mxu0 %v5083_v6  ;;  %v5143_v6 = vld [vmem:[%s6063_s7 + $0x490] ss:$8 sps:$4 sm:$0xff]   ;;  %1867 = vst [vmem:[#allocation9 + $0x3c] sm:$0xf] %v1864_v3 }
 0x148   : > { %4042 = vmatprep.subr.bf16.mxu0 %v5091_v8  ;;  %v5146_v8 = vld [vmem:[%s6063_s7 + $0x590] ss:$8 sps:$4 sm:$0xff]  }
 0x149   : > { %4084 = vmatpush1.bf16.msra.mxu1 %v5086_v10  ;;  %v5154_v10 = vld [vmem:[%s6063_s7 + $0x584] ss:$8 sps:$4 sm:$0xff]   ;;  %v5215_v3 = vld [vmem:[%s6063_s7 + $0x6d0] ss:$8 sps:$4 sm:$0xff]  }
 0x14a   : > { %4085 = vmatprep.subr.bf16.mxu1 %v5094_v12  ;;  %v5157_v12 = vld [vmem:[%s6063_s7 + $0x674] ss:$8 sps:$4 sm:$0xff]  }
 0x14b   : > { %4043 = vmatpush1.bf16.msra.mxu0 %v5089_v13  ;;  %v5152_v13 = vld [vmem:[%s6063_s7 + $0x580] ss:$8 sps:$4 sm:$0xff]  }
 0x14c   : > { %4044 = vmatprep.subr.bf16.mxu0 %v5097_v14  ;;  %v4466_v14 = vcombine.low %v6290_v5, %v6243_v33  ;;  %v5161_v5 = vld [vmem:[%s6063_s7 + $0x660] ss:$8 sps:$4 sm:$0xff]  }
 0x14d   : > { %4086 = vmatpush1.bf16.msra.mxu1 %v5092_v15  ;;  %v5160_v15 = vld [vmem:[%s6063_s7 + $0x774] ss:$8 sps:$4 sm:$0xff]  }
 0x14e   : > { %4087 = vmatprep.subr.bf16.mxu1 %v5100_v16  ;;  %v5155_v16 = vld [vmem:[%s6063_s7 + $0x670] ss:$8 sps:$4 sm:$0xff]  }
 0x14f   : > { %4045 = vmatpush1.bf16.msra.mxu0 %v5095_v17  ;;  %v5253_v17 = vld [vmem:[#allocation9 + $0x34] ss:$72 sps:$4 sm:$0xff]  }
 0x150   : > { %4046 = vmatprep.subr.bf16.mxu0 %v5103_v18  ;;  %v4468_v18 = vcombine.low %v6296_v9, %v6243_v33  ;;  %v5164_v33 = vld [vmem:[%s6063_s7 + $0x760] ss:$8 sps:$4 sm:$0xff]   ;;  %v5172_v9 = vld [vmem:[%s6063_s7 + $0x754] ss:$8 sps:$4 sm:$0xff]  }
 0x151   : > { %4088 = vmatpush1.bf16.msra.mxu1 %v5098_v19  ;;  %v5158_v19 = vld [vmem:[%s6063_s7 + $0x770] ss:$8 sps:$4 sm:$0xff]  }
 0x152   : > { %4089 = vmatprep.subr.bf16.mxu1 %v5106_v20  ;;  %v5163_v20 = vld [vmem:[%s6063_s7 + $0x664] ss:$8 sps:$4 sm:$0xff]  }
 0x153   : > { %4047 = vmatpush1.bf16.msra.mxu0 %v5101_v21  ;;  %v5259_v21 = vld [vmem:[#allocation9 + $0x3c] ss:$72 sps:$4 sm:$0xff]  }
 0x154   : > { %4048 = vmatprep.subr.bf16.mxu0 %v5109_v22  ;;  %v5166_v22 = vld [vmem:[%s6063_s7 + $0x764] ss:$8 sps:$4 sm:$0xff]  }
 0x155   : > { %4090 = vmatpush1.bf16.msra.mxu1 %v5104_v23  ;;  %v5169_v23 = vld [vmem:[%s6063_s7 + $0x654] ss:$8 sps:$4 sm:$0xff]  }
 0x156   : > { %4091 = vmatprep.subr.bf16.mxu1 %v5112_v24  ;;  %v5167_v24 = vld [vmem:[%s6063_s7 + $0x650] ss:$8 sps:$4 sm:$0xff]  }
 0x157   : > { %4049 = vmatpush2.bf16.msra.mxu0 %v5107_v25  ;;  %v4456_v25 = vld [vmem:[%s6517_s2 + $0x10] sm:$0x1] }
 0x158   : > { %4050 = vmatprep.subr.bf16.mxu0 %v5115_v26  ;;  %v5175_v26 = vld [vmem:[%s6063_s7 + $0x644] ss:$8 sps:$4 sm:$0xff]  }
 0x159   : > { %4092 = vmatpush2.bf16.msra.mxu1 %v5110_v27  ;;  %v1877_v27 = vunpack.c.l.bf16 %v4456_v25  ;;  %v5251_v25 = vld [vmem:[#allocation9 + $0x30] ss:$72 sps:$4 sm:$0xff]  }
 0x15a   : > { %4093 = vmatprep.subr.bf16.mxu1 %v5118_v28  ;;  %v4457_v28 = vld [vmem:[%s6517_s2 + $0x11] sm:$0x1] }
 0x15b   : > { %4051 = vmatpush2.bf16.msra.mxu0 %v5113_v29  ;;  %v5170_v29 = vld [vmem:[%s6063_s7 + $0x750] ss:$8 sps:$4 sm:$0xff]  }
 0x15c   : > { %4052 = vmatprep.subr.bf16.mxu0 %v5121_v30  ;;  %v1904_v30 = vunpack.c.l.bf16 %v4457_v28  ;;  %v5257_v28 = vld [vmem:[#allocation9 + $0x38] ss:$72 sps:$4 sm:$0xff]  }
 0x15d   : > { %4094 = vmatpush2.bf16.msra.mxu1 %v5116_v31  ;;  %v5178_v31 = vld [vmem:[%s6063_s7 + $0x744] ss:$8 sps:$4 sm:$0xff]  }
 0x15e   : > { %4095 = vmatprep.subr.bf16.mxu1 %v5124_v32  ;;  %v1889_v32 = vsel %vm1457_vm0, %v1877_v27, %v5394_v1 }
 0x15f   : > { %4053 = vmatpush2.bf16.msra.mxu0 %v5119_v34  ;;  %v5173_v34 = vld [vmem:[%s6063_s7 + $0x640] ss:$8 sps:$4 sm:$0xff]  }
 0x160   : > { %4054 = vmatprep.subr.bf16.mxu0 %v5127_v35  ;;  %v1891_v35 = vpack.c.bf16 %v5365_v2, %v1889_v32  ;;  %v5263_v32 = vld [vmem:[%s6063_s7 + $0x850] ss:$8 sps:$4 sm:$0xff]  }
 0x161   : > { %4096 = vmatpush2.bf16.msra.mxu1 %v5122_v36  ;;  %v1916_v36 = vsel %vm1457_vm0, %v1904_v30, %v5394_v1  ;;  %v5260_v30 = vld [vmem:[%s6063_s7 + $0x860] ss:$8 sps:$4 sm:$0xff]  }
 0x162   : > { %4097 = vmatprep.subr.bf16.mxu1 %v5130_v37  ;;  %v5181_v37 = vld [vmem:[%s6063_s7 + $0x634] ss:$8 sps:$4 sm:$0xff]   ;;  %1894 = vst [vmem:[#allocation9 + $0x40] sm:$0xf] %v1891_v35  ;;  %v5266_v35 = vld [vmem:[%s6063_s7 + $0x840] ss:$8 sps:$4 sm:$0xff]  }
 0x163   : > { %4055 = vmatpush2.bf16.msra.mxu0 %v5125_v41  ;;  %v1918_v41 = vpack.c.bf16 %v5365_v2, %v1916_v36  ;;  %v5190_v2 = vld [vmem:[%s6063_s7 + $0x724] ss:$8 sps:$4 sm:$0xff]   ;;  %v5271_v36 = vld [vmem:[%s6063_s7 + $0x834] ss:$8 sps:$4 sm:$0xff]  }
 0x164   : > { %4056 = vmatprep.subr.bf16.mxu0 %v5133_v38  ;;  %v5176_v38 = vld [vmem:[%s6063_s7 + $0x740] ss:$8 sps:$4 sm:$0xff]  }
 0x165   : > { %4098 = vmatpush2.bf16.msra.mxu1 %v5128_v39  ;;  %v5184_v39 = vld [vmem:[%s6063_s7 + $0x734] ss:$8 sps:$4 sm:$0xff]   ;;  %1921 = vst [vmem:[#allocation9 + $0x44] sm:$0xf] %v1918_v41  ;;  %v5274_v41 = vld [vmem:[%s6063_s7 + $0x824] ss:$8 sps:$4 sm:$0xff]  }
 0x166   : > { %4099 = vmatprep.subr.bf16.mxu1 %v5136_v40  ;;  %v5179_v40 = vld [vmem:[%s6063_s7 + $0x630] ss:$8 sps:$4 sm:$0xff]  }
 0x167   : > { %4057 = vmatpush2.bf16.msra.mxu0 %v5131_v44  ;;  %v5185_v44 = vld [vmem:[%s6063_s7 + $0x620] ss:$8 sps:$4 sm:$0xff]  }
 0x168   : > { %4058 = vmatprep.subr.bf16.mxu0 %v5139_v49  ;;  %v5191_v49 = vld [vmem:[%s6063_s7 + $0x610] ss:$8 sps:$4 sm:$0xff]  }
 0x169   : > { %4100 = vmatpush2.bf16.msra.mxu1 %v5134_v48  ;;  %v5196_v48 = vld [vmem:[%s6063_s7 + $0x714] ss:$8 sps:$4 sm:$0xff]  }
 0x16a   : > { %4101 = vmatprep.subr.bf16.mxu1 %v5142_v55  ;;  %v5200_v55 = vld [vmem:[%s6063_s7 + $0x700] ss:$8 sps:$4 sm:$0xff]  }
 0x16b   : > { %4059 = vmatpush2.bf16.msra.mxu0 %v5137_v59  ;;  %v5206_v59 = vld [vmem:[%s6063_s7 + $0x7f0] ss:$8 sps:$4 sm:$0xff]  }
 0x16c   : > { %4060 = vmatprep.subr.bf16.mxu0 %v5145_v61  ;;  %v5209_v61 = vld [vmem:[%s6063_s7 + $0x6e0] ss:$8 sps:$4 sm:$0xff]   ;;  %v5307_v27 = vld [vmem:[#allocation9 + $0x44] ss:$72 sps:$4 sm:$0xff]  }
 0x16d   : > { %4102 = vmatpush2.bf16.msra.mxu1 %v5140_v0  ;;  %v5220_v0 = vld [vmem:[%s6063_s7 + $0x7d4] ss:$8 sps:$4 sm:$0xff]  }
 0x16e   : > { %4103 = vmatprep.subr.bf16.mxu1 %v5148_v4  ;;  %v5223_v4 = vld [vmem:[%s6063_s7 + $0x6c4] ss:$8 sps:$4 sm:$0xff]  }
 0x16f   : > { %4061 = vmatpush2.bf16.msra.mxu0 %v5143_v6  ;;  %v5218_v6 = vld [vmem:[%s6063_s7 + $0x7d0] ss:$8 sps:$4 sm:$0xff]  }
 0x170   : > { %4062 = vmatprep.subr.bf16.mxu0 %v5151_v7  ;;  %v5226_v7 = vld [vmem:[%s6063_s7 + $0x7c4] ss:$8 sps:$4 sm:$0xff]  }
 0x171   : > { %4104 = vmatpush2.bf16.msra.mxu1 %v5146_v8  ;;  %v5221_v8 = vld [vmem:[%s6063_s7 + $0x6c0] ss:$8 sps:$4 sm:$0xff]  }
 0x172   : > { %4105 = vmatprep.subr.bf16.mxu1 %v5154_v10  ;;  %v5229_v10 = vld [vmem:[%s6063_s7 + $0x6b4] ss:$8 sps:$4 sm:$0xff]  }
 0x173   : > { %4063 = vmatpush2.bf16.msra.mxu0 %v5149_v11  ;;  %v5224_v11 = vld [vmem:[%s6063_s7 + $0x7c0] ss:$8 sps:$4 sm:$0xff]  }
 0x174   : > { %4118 = vmatprep.subr.bf16.mxu0 %v5157_v12  ;;  %v5232_v12 = vld [vmem:[%s6063_s7 + $0x7b4] ss:$8 sps:$4 sm:$0xff]  }
 0x175   : > { %4106 = vmatpush2.bf16.msra.mxu1 %v5152_v13  ;;  %v5227_v13 = vld [vmem:[%s6063_s7 + $0x6b0] ss:$8 sps:$4 sm:$0xff]  }
 0x176   : > { %4065 = vmatmul.mubr.bf16.vlgmr.msra.gmra.mxu0 %v4466_v14  ;;  %4161 = vmatprep.subr.bf16.mxu1 %v5160_v15  ;;  %v5235_v14 = vld [vmem:[%s6063_s7 + $0x6a4] ss:$8 sps:$4 sm:$0xff]   ;;  %v5230_v15 = vld [vmem:[%s6063_s7 + $0x7b0] ss:$8 sps:$4 sm:$0xff]  }
 0x177   : > { %4119 = vmatpush1.bf16.msra.mxu0 %v5155_v16  ;;  %4150 = vmatprep.mubr.bf16.mxu0 %v5253_v17  ;;  %v5238_v16 = vld [vmem:[%s6063_s7 + $0x7a4] ss:$8 sps:$4 sm:$0xff]   ;;  %v5233_v17 = vld [vmem:[%s6063_s7 + $0x6a0] ss:$8 sps:$4 sm:$0xff]  }
 0x178   : > { %4108 = vmatmul.mubr.bf16.vlgmr.msra.gmra.mxu1 %v4468_v18  ;;  %4120 = vmatprep.subr.bf16.mxu0 %v5163_v20  ;;  %v5241_v18 = vld [vmem:[%s6063_s7 + $0x694] ss:$8 sps:$4 sm:$0xff]  }
 0x179   : > { %4162 = vmatpush1.bf16.msra.mxu1 %v5158_v19  ;;  %4193 = vmatprep.mubr.bf16.mxu1 %v5259_v21  ;;  %v5236_v19 = vld [vmem:[%s6063_s7 + $0x7a0] ss:$8 sps:$4 sm:$0xff]   ;;  %v5244_v20 = vld [vmem:[%s6063_s7 + $0x794] ss:$8 sps:$4 sm:$0xff]   ;;  %v5239_v21 = vld [vmem:[%s6063_s7 + $0x690] ss:$8 sps:$4 sm:$0xff]  }
 0x17a   : > { %4163 = vmatprep.subr.bf16.mxu1 %v5166_v22  ;;  %v5247_v22 = vld [vmem:[%s6063_s7 + $0x684] ss:$8 sps:$4 sm:$0xff]  }
 0x17b   : > { %4121 = vmatpush1.bf16.msra.mxu0 %v5161_v5  ;;  %v5242_v5 = vld [vmem:[%s6063_s7 + $0x790] ss:$8 sps:$4 sm:$0xff]  }
 0x17c   : > { %4122 = vmatprep.subr.bf16.mxu0 %v5169_v23  ;;  %v5250_v23 = vld [vmem:[%s6063_s7 + $0x784] ss:$8 sps:$4 sm:$0xff]  }
 0x17d   : > { %4164 = vmatpush1.bf16.msra.mxu1 %v5164_v33  ;;  %v5245_v33 = vld [vmem:[%s6063_s7 + $0x680] ss:$8 sps:$4 sm:$0xff]  }
 0x17e   : > { %4165 = vmatprep.subr.bf16.mxu1 %v5172_v9  ;;  %v5256_v9 = vld [vmem:[%s6063_s7 + $0x874] ss:$8 sps:$4 sm:$0xff]  }
 0x17f   : > { %4123 = vmatpush1.bf16.msra.mxu0 %v5167_v24  ;;  %v5248_v24 = vld [vmem:[%s6063_s7 + $0x780] ss:$8 sps:$4 sm:$0xff]  }
 0x180   : > { %4124 = vmatprep.subr.bf16.mxu0 %v5175_v26  ;;  %v5254_v26 = vld [vmem:[%s6063_s7 + $0x870] ss:$8 sps:$4 sm:$0xff]  }
 0x181   : > { %4166 = vmatpush1.bf16.msra.mxu1 %v5170_v29  ;;  %v5262_v29 = vld [vmem:[%s6063_s7 + $0x864] ss:$8 sps:$4 sm:$0xff]  }
 0x182   : > { %4167 = vmatprep.subr.bf16.mxu1 %v5178_v31  ;;  %v5265_v31 = vld [vmem:[%s6063_s7 + $0x854] ss:$8 sps:$4 sm:$0xff]  }
 0x183   : > { %4125 = vmatpush1.bf16.msra.mxu0 %v5173_v34  ;;  %v5268_v34 = vld [vmem:[%s6063_s7 + $0x844] ss:$8 sps:$4 sm:$0xff]  }
 0x184   : > { %4126 = vmatprep.subr.bf16.mxu0 %v5181_v37  ;;  %v5269_v37 = vld [vmem:[%s6063_s7 + $0x830] ss:$8 sps:$4 sm:$0xff]  }
 0x185   : > { %4168 = vmatpush1.bf16.msra.mxu1 %v5176_v38  ;;  %v5272_v38 = vld [vmem:[%s6063_s7 + $0x820] ss:$8 sps:$4 sm:$0xff]  }
 0x186   : > { %4169 = vmatprep.subr.bf16.mxu1 %v5184_v39  ;;  %v5277_v39 = vld [vmem:[%s6063_s7 + $0x814] ss:$8 sps:$4 sm:$0xff]  }
 0x187   : > { %4127 = vmatpush1.bf16.msra.mxu0 %v5179_v40  ;;  %v5275_v40 = vld [vmem:[%s6063_s7 + $0x810] ss:$8 sps:$4 sm:$0xff]  }
 0x188   : > { %4128 = vmatprep.subr.bf16.mxu0 %v5187_v42  ;;  %v5280_v42 = vld [vmem:[%s6063_s7 + $0x804] ss:$8 sps:$4 sm:$0xff]  }
 0x189   : > { %4170 = vmatpush1.bf16.msra.mxu1 %v5182_v43  ;;  %v5278_v43 = vld [vmem:[%s6063_s7 + $0x800] ss:$8 sps:$4 sm:$0xff]  }
 0x18a   : > { %4171 = vmatprep.subr.bf16.mxu1 %v5190_v2  ;;  %v5283_v2 = vld [vmem:[%s6063_s7 + $0x8f4] ss:$8 sps:$4 sm:$0xff]  }
 0x18b   : > { %4129 = vmatpush1.bf16.msra.mxu0 %v5185_v44  ;;  %v5281_v44 = vld [vmem:[%s6063_s7 + $0x8f0] ss:$8 sps:$4 sm:$0xff]  }
 0x18c   : > { %4130 = vmatprep.subr.bf16.mxu0 %v5193_v45  ;;  %v5286_v45 = vld [vmem:[%s6063_s7 + $0x8e4] ss:$8 sps:$4 sm:$0xff]  }
 0x18d   : > { %4172 = vmatpush1.bf16.msra.mxu1 %v5188_v47  ;;  %v5284_v47 = vld [vmem:[%s6063_s7 + $0x8e0] ss:$8 sps:$4 sm:$0xff]  }
 0x18e   : > { %4173 = vmatprep.subr.bf16.mxu1 %v5196_v48  ;;  %v5289_v48 = vld [vmem:[%s6063_s7 + $0x8d4] ss:$8 sps:$4 sm:$0xff]  }
 0x18f   : > { %4131 = vmatpush1.bf16.msra.mxu0 %v5191_v49  ;;  %v5287_v49 = vld [vmem:[%s6063_s7 + $0x8d0] ss:$8 sps:$4 sm:$0xff]  }
 0x190   : > { %4132 = vmatprep.subr.bf16.mxu0 %v5199_v50  ;;  %v5292_v50 = vld [vmem:[%s6063_s7 + $0x8c4] ss:$8 sps:$4 sm:$0xff]  }
 0x191   : > { %4174 = vmatpush1.bf16.msra.mxu1 %v5194_v51  ;;  %v5290_v51 = vld [vmem:[%s6063_s7 + $0x8c0] ss:$8 sps:$4 sm:$0xff]  }
 0x192   : > { %4175 = vmatprep.subr.bf16.mxu1 %v5202_v52  ;;  %v5295_v52 = vld [vmem:[%s6063_s7 + $0x8b4] ss:$8 sps:$4 sm:$0xff]  }
 0x193   : > { %4133 = vmatpush1.bf16.msra.mxu0 %v5197_v53  ;;  %v5293_v53 = vld [vmem:[%s6063_s7 + $0x8b0] ss:$8 sps:$4 sm:$0xff]  }
 0x194   : > { %4134 = vmatprep.subr.bf16.mxu0 %v5205_v54  ;;  %v5298_v54 = vld [vmem:[%s6063_s7 + $0x8a4] ss:$8 sps:$4 sm:$0xff]  }
 0x195   : > { %4176 = vmatpush1.bf16.msra.mxu1 %v5200_v55  ;;  %v5296_v55 = vld [vmem:[%s6063_s7 + $0x8a0] ss:$8 sps:$4 sm:$0xff]  }
 0x196   : > { %4177 = vmatprep.subr.bf16.mxu1 %v5208_v56  ;;  %v5301_v56 = vld [vmem:[%s6063_s7 + $0x894] ss:$8 sps:$4 sm:$0xff]  }
 0x197   : > { %4135 = vmatpush2.bf16.msra.mxu0 %v5203_v57  ;;  %v5299_v57 = vld [vmem:[%s6063_s7 + $0x890] ss:$8 sps:$4 sm:$0xff]  }
 0x198   : > { %4136 = vmatprep.subr.bf16.mxu0 %v5211_v58  ;;  %v5304_v58 = vld [vmem:[%s6063_s7 + $0x884] ss:$8 sps:$4 sm:$0xff]  }
 0x199   : > { %4178 = vmatpush2.bf16.msra.mxu1 %v5206_v59  ;;  %v5302_v59 = vld [vmem:[%s6063_s7 + $0x880] ss:$8 sps:$4 sm:$0xff]  }
 0x19a   : > { %4179 = vmatprep.subr.bf16.mxu1 %v5214_v60  ;;  %v5305_v60 = vld [vmem:[#allocation9 + $0x40] ss:$72 sps:$4 sm:$0xff]  }
 0x19b   : > { %4137 = vmatpush2.bf16.msra.mxu0 %v5209_v61 }
 0x19c   : > { %4138 = vmatprep.subr.bf16.mxu0 %v5217_v62 }
 0x19d   : > { %4180 = vmatpush2.bf16.msra.mxu1 %v5212_v63 }
 0x19e   : > { %4181 = vmatprep.subr.bf16.mxu1 %v5220_v0 }
 0x19f   : > { %4139 = vmatpush2.bf16.msra.mxu0 %v5215_v3 }
 0x1a0   : > { %4140 = vmatprep.subr.bf16.mxu0 %v5223_v4 }
 0x1a1   : > { %4182 = vmatpush2.bf16.msra.mxu1 %v5218_v6 }
 0x1a2   : > { %4183 = vmatprep.subr.bf16.mxu1 %v5226_v7 }
 0x1a3   : > { %4141 = vmatpush2.bf16.msra.mxu0 %v5221_v8 }
 0x1a4   : > { %4142 = vmatprep.subr.bf16.mxu0 %v5229_v10 }
 0x1a5   : > { %4184 = vmatpush2.bf16.msra.mxu1 %v5224_v11 }
 0x1a6   : > { %4185 = vmatprep.subr.bf16.mxu1 %v5232_v12 }
 0x1a7   : > { %4143 = vmatpush2.bf16.msra.mxu0 %v5227_v13 }
 0x1a8   : > { %4144 = vmatprep.subr.bf16.mxu0 %v5235_v14  ;;  %v2322_v14 = vsub.s32 0, %v6045_v46 }
 0x1a9   : > { %4186 = vmatpush2.bf16.msra.mxu1 %v5230_v15  ;;  %v2318_v15 = vld [vmem:[%s1434_s14] sm:$0x3] }
 0x1aa   : > { %4187 = vmatprep.subr.bf16.mxu1 %v5238_v16 }
 0x1ab   : > { %4145 = vmatpush2.bf16.msra.mxu0 %v5233_v17 }
 0x1ac   : > { %4146 = vmatprep.subr.bf16.mxu0 %v5241_v18  ;;  %v2326_v18 = vsub.s32 1, %v6045_v46 }
 0x1ad   : > { %4188 = vmatpush2.bf16.msra.mxu1 %v5236_v19 }
 0x1ae   : > { %4189 = vmatprep.subr.bf16.mxu1 %v5244_v20  ;;  %v2323_v20 = vrot.slane %v2318_v15, %v2322_v14 }
 0x1af   : > { %4147 = vmatpush2.bf16.msra.mxu0 %v5239_v21 }
 0x1b0   : > { %4148 = vmatprep.subr.bf16.mxu0 %v5247_v22  ;;  %v2327_v22 = vrot.slane %v2318_v15, %v2326_v18 }
 0x1b1   : > { %4190 = vmatpush2.bf16.msra.mxu1 %v5242_v5 }
 0x1b2   : > { %4191 = vmatprep.subr.bf16.mxu1 %v5250_v23 }
 0x1b3   : > { %4149 = vmatpush2.bf16.msra.mxu0 %v5245_v33 }
 0x1b4   : > { %4204 = vmatprep.subr.bf16.mxu0 %v5256_v9 }
 0x1b5   : > { %4192 = vmatpush2.bf16.msra.mxu1 %v5248_v24 }
 0x1b6   : > { %4151 = vmatmul.mubr.bf16.vlgmr.msra.gmra.mxu0 %v5251_v25  ;;  %v3894_v61 = vpop.f32.mrf.mxu0 }
 0x1b7   : > { %4205 = vmatpush1.bf16.msra.mxu0 %v5254_v26  ;;  %4236 = vmatprep.mubr.bf16.mxu0 %v5307_v27  ;;  %v3895_v33 = vadd.f32 %v3894_v61, %v2323_v20 }
 0x1b8   : > { %4194 = vmatmul.mubr.bf16.vlgmr.msra.gmra.mxu1 %v5257_v28  ;;  %4206 = vmatprep.subr.bf16.mxu0 %v5262_v29  ;;  %v3896_v62 = vpop.f32.mrf.mxu0  ;;  %v3937_v63 = vpop.f32.mrf.mxu1 }
 0x1b9   : > { %v3897_v9 = vadd.f32 %v3896_v62, %v2327_v22  ;;  %v3938_v26 = vadd.f32 %v3937_v63, %v3895_v33 }
 0x1ba   : > { %v3898_v0 = vpop.f32.mrf.mxu0  ;;  %v3939_v3 = vpop.f32.mrf.mxu1 }
 0x1bb   : > { %4207 = vmatpush1.bf16.msra.mxu0 %v5260_v30  ;;  %v3899_v27 = vadd.f32 %v3898_v0, %v2323_v20  ;;  %v3940_v28 = vadd.f32 %v3939_v3, %v3897_v9 }
 0x1bc   : > { %4208 = vmatprep.subr.bf16.mxu0 %v5265_v31  ;;  %v3900_v4 = vpop.f32.mrf.mxu0  ;;  %v3941_v6 = vpop.f32.mrf.mxu1 }
 0x1bd   : > { %v3901_v29 = vadd.f32 %v3900_v4, %v2327_v22 }
 0x1be   : > { %v3943_v8 = vpop.f32.mrf.mxu1 }
 0x1bf   : > { %4209 = vmatpush1.bf16.msra.mxu0 %v5263_v32 }
 0x1c0   : > { %4210 = vmatprep.subr.bf16.mxu0 %v5268_v34  ;;  %v3942_v34 = vadd.f32 %v3941_v6, %v3899_v27 }
 0x1c3   : > { %4211 = vmatpush1.bf16.msra.mxu0 %v5266_v35 }
 0x1c4   : > { %4212 = vmatprep.subr.bf16.mxu0 %v5271_v36  ;;  %v3944_v36 = vadd.f32 %v3943_v8, %v3901_v29 }
 0x1c7   : > { %4213 = vmatpush1.bf16.msra.mxu0 %v5269_v37 }
 0x1c8   : > { %4214 = vmatprep.subr.bf16.mxu0 %v5274_v41 }
 0x1cb   : > { %4215 = vmatpush1.bf16.msra.mxu0 %v5272_v38 }
 0x1cc   : > { %4216 = vmatprep.subr.bf16.mxu0 %v5277_v39 }
 0x1cf   : > { %4217 = vmatpush1.bf16.msra.mxu0 %v5275_v40 }
 0x1d0   : > { %4218 = vmatprep.subr.bf16.mxu0 %v5280_v42 }
 0x1d3   : > { %4219 = vmatpush1.bf16.msra.mxu0 %v5278_v43 }
 0x1d4   : > { %4220 = vmatprep.subr.bf16.mxu0 %v5283_v2 }
 0x1d7   : > { %4221 = vmatpush2.bf16.msra.mxu0 %v5281_v44 }
 0x1d8   : > { %4222 = vmatprep.subr.bf16.mxu0 %v5286_v45 }
 0x1db   : > { %4223 = vmatpush2.bf16.msra.mxu0 %v5284_v47 }
 0x1dc   : > { %4224 = vmatprep.subr.bf16.mxu0 %v5289_v48 }
 0x1df   : > { %4225 = vmatpush2.bf16.msra.mxu0 %v5287_v49 }
 0x1e0   : > { %4226 = vmatprep.subr.bf16.mxu0 %v5292_v50 }
 0x1e3   : > { %4227 = vmatpush2.bf16.msra.mxu0 %v5290_v51 }
 0x1e4   : > { %4228 = vmatprep.subr.bf16.mxu0 %v5295_v52 }
 0x1e7   : > { %4229 = vmatpush2.bf16.msra.mxu0 %v5293_v53 }
 0x1e8   : > { %4230 = vmatprep.subr.bf16.mxu0 %v5298_v54 }
 0x1eb   : > { %4231 = vmatpush2.bf16.msra.mxu0 %v5296_v55 }
 0x1ec   : > { %4232 = vmatprep.subr.bf16.mxu0 %v5301_v56 }
 0x1ef   : > { %4233 = vmatpush2.bf16.msra.mxu0 %v5299_v57 }
 0x1f0   : > { %4234 = vmatprep.subr.bf16.mxu0 %v5304_v58 }
 0x1f3   : > { %4235 = vmatpush2.bf16.msra.mxu0 %v5302_v59 }
 0x1f6   : > { %4237 = vmatmul.mubr.bf16.vlgmr.msra.gmra.mxu0 %v5305_v60  ;;  %v3980_v7 = vpop.f32.mrf.mxu0 }
 0x1f7   : > { %v3981_v30 = vadd.f32 %v3980_v7, %v3938_v26 }
 0x1f8   : > { %v3982_v10 = vpop.f32.mrf.mxu0  ;;  %v4023_v11 = vpop.f32.mrf.mxu1 }
 0x1f9   : > { %v3983_v35 = vadd.f32 %v3982_v10, %v3940_v28  ;;  %v4024_v37 = vadd.f32 %v4023_v11, %v3981_v30 }
 0x1fa   : > { %v3984_v12 = vpop.f32.mrf.mxu0  ;;  %v4025_v13 = vpop.f32.mrf.mxu1 }
 0x1fb   : > { %v3985_v41 = vadd.f32 %v3984_v12, %v3942_v34  ;;  %v4026_v39 = vadd.f32 %v4025_v13, %v3983_v35 }
 0x1fc   : > { %v3986_v16 = vpop.f32.mrf.mxu0  ;;  %v4027_v17 = vpop.f32.mrf.mxu1 }
 0x1fd   : > { %v3987_v40 = vadd.f32 %v3986_v16, %v3944_v36  ;;  %v4028_v44 = vadd.f32 %v4027_v17, %v3985_v41 }
 0x1fe   : > { %v4029_v21 = vpop.f32.mrf.mxu1 }
 0x1ff   : > { %v4030_v47 = vadd.f32 %v4029_v21, %v3987_v40 }
 0x236   : > { %v4066_v19 = vpop.f32.mrf.mxu0 }
 0x237   : > { %v4067_v42 = vadd.f32 %v4066_v19, %v4024_v37 }
 0x238   : > { %v4068_v5 = vpop.f32.mrf.mxu0  ;;  %v4109_v23 = vpop.f32.mrf.mxu1 }
 0x239   : > { %v4069_v45 = vadd.f32 %v4068_v5, %v4026_v39  ;;  %v4110_v48 = vadd.f32 %v4109_v23, %v4067_v42 }
 0x23a   : > { %v4070_v24 = vpop.f32.mrf.mxu0  ;;  %v4111_v25 = vpop.f32.mrf.mxu1 }
 0x23b   : > { %v4071_v49 = vadd.f32 %v4070_v24, %v4028_v44  ;;  %v4112_v52 = vadd.f32 %v4111_v25, %v4069_v45 }
 0x23c   : > { %v4072_v31 = vpop.f32.mrf.mxu0  ;;  %v4113_v32 = vpop.f32.mrf.mxu1 }
 0x23d   : > { %v4073_v53 = vadd.f32 %v4072_v31, %v4030_v47  ;;  %v4114_v55 = vadd.f32 %v4113_v32, %v4071_v49 }
 0x23e   : > { %v4115_v38 = vpop.f32.mrf.mxu1 }
 0x23f   : > { %v4116_v59 = vadd.f32 %v4115_v38, %v4073_v53 }
 0x276   : > { %v4152_v46 = vpop.f32.mrf.mxu0 }
 0x277   : > { %v4153_v54 = vadd.f32 %v4152_v46, %v4110_v48 }
 0x278   : > { %v4154_v43 = vpop.f32.mrf.mxu0  ;;  %v4195_v2 = vpop.f32.mrf.mxu1 }
 0x279   : > { %v4155_v56 = vadd.f32 %v4154_v43, %v4112_v52  ;;  %v4196_v60 = vadd.f32 %v4195_v2, %v4153_v54 }
 0x27a   : > { %v4156_v50 = vpop.f32.mrf.mxu0  ;;  %v4197_v51 = vpop.f32.mrf.mxu1 }
 0x27b   : > { %v4157_v61 = vadd.f32 %v4156_v50, %v4114_v55  ;;  %v4198_v63 = vadd.f32 %v4197_v51, %v4155_v56 }
 0x27c   : > { %v4158_v57 = vpop.f32.mrf.mxu0  ;;  %v4199_v58 = vpop.f32.mrf.mxu1 }
 0x27d   : > { %v4159_v0 = vadd.f32 %v4158_v57, %v4116_v59  ;;  %v4200_v7 = vadd.f32 %v4199_v58, %v4157_v61 }
 0x27e   : > { %v4201_v4 = vpop.f32.mrf.mxu1 }
 0x27f   : > { %v4202_v12 = vadd.f32 %v4201_v4, %v4159_v0 }
 0x2b6   : > { %v4238_v62 = vpop.f32.mrf.mxu0 }
 0x2b7   : > { %v4239_v3 = vadd.f32 %v4238_v62, %v4196_v60 }
 0x2b8   : > { %v4240_v6 = vpop.f32.mrf.mxu0 }
 0x2b9   : > { %v4764_v8 = vmul.f32 -1.442695, %v4239_v3  ;;  %v4241_v10 = vadd.f32 %v4240_v6, %v4198_v63 }
 0x2ba   : > { %v4242_v11 = vpop.f32.mrf.mxu0 }
 0x2bb   : > { %5308 = vpow2.f32 %v4764_v8  ;;  %v4765_v13 = vmul.f32 -1.442695, %v4241_v10  ;;  %v4243_v14 = vadd.f32 %v4242_v11, %v4200_v7 }
 0x2bc   : > { %v4244_v15 = vpop.f32.mrf.mxu0 }
 0x2bd   : > { %5310 = vpow2.f32 %v4765_v13  ;;  %v4766_v16 = vmul.f32 -1.442695, %v4243_v14  ;;  %v4245_v17 = vadd.f32 %v4244_v15, %v4202_v12 }
 0x2bf   : > { %5312 = vpow2.f32 %v4766_v16  ;;  %v4767_v18 = vmul.f32 -1.442695, %v4245_v17 }
 0x2c1   : > { %5314 = vpow2.f32 %v4767_v18 }
 0x2c8   : > { %v5309_v19 = vpop.eup %5308 }
 0x2c9   : > { %v4259_v20 = vadd.f32 1.0, %v5309_v19 }
 0x2ca   : > { %v5311_v21 = vpop.eup %5310 }
 0x2cb   : > { %5316 = vrcp.f32 %v4259_v20  ;;  %v4260_v22 = vadd.f32 1.0, %v5311_v21 }
 0x2cc   : > { %v5313_v5 = vpop.eup %5312 }
 0x2cd   : > { %5318 = vrcp.f32 %v4260_v22  ;;  %v4261_v23 = vadd.f32 1.0, %v5313_v5 }
 0x2ce   : > { %v5315_v33 = vpop.eup %5314 }
 0x2cf   : > { %5320 = vrcp.f32 %v4261_v23  ;;  %v4262_v9 = vadd.f32 1.0, %v5315_v33 }
 0x2d1   : > { %5322 = vrcp.f32 %v4262_v9 }
 0x2d8   : > { %v5317_v24 = vpop.eup %5316 }
 0x2d9   : > { %v4271_v26 = vmul.f32 %v5317_v24, %v4239_v3 }
 0x2da   : > { %v5319_v25 = vpop.eup %5318 }
 0x2db   : > { %v4272_v27 = vmul.f32 %v5319_v25, %v4241_v10 }
 0x2dc   : > { %v5321_v28 = vpop.eup %5320 }
 0x2dd   : > { %v4776_v29 = vpack.c.bf16 %v4272_v27, %v4271_v26  ;;  %v4273_v31 = vmul.f32 %v5321_v28, %v4243_v14 }
 0x2de   : > { %v5323_v30 = vpop.eup %5322 }
 0x2df   : > { %4287 = vst [vmem:[%s1413_s16] sm:$0xff] %v4776_v29  ;;  %v4274_v32 = vmul.f32 %v5323_v30, %v4245_v17  ;;  %4295 = sbr.rel (!%p5431_p6) target bundleno = 748 (0x2ec), region = 74 }
 0x2e1   : > { %v4777_v34 = vpack.c.bf16 %v4274_v32, %v4273_v31 }
 0x2e3   : > { %4288 = vst [vmem:[%s1413_s16 + $0x8] sm:$0xff] %v4777_v34 }
 0x2e6   : > { %v4332_v35 = vld [vmem:[%s1413_s16] sm:$0xff] }
 0x2e7   : > { %4333 = vst [vmem:[%s4301_s23] sm:$0xff] %v4332_v35 }
 0x2ea   : > { %v4334_v46 = vld [vmem:[%s1413_s16 + $0x8] sm:$0xff] }
 0x2eb   : > { %4335 = vst [vmem:[%s4301_s23 + $0x10] sm:$0xff] %v4334_v46 }
 0x2ec PF: > { %s19_s21 = sadd.s32 1, %s5363_s21   ;;  %s6521_s17 = smov %s5351_s18 }
 0x2ed   : > { %p16_p12 = scmp.ge.s32.totalorder %s19_s21, 4   ;;  %s6522_s18 = smov %s5436_s26 }
 0x2ee   : > { %s6523_s19 = smov %s5359_s20  ;;  %s6524_s20 = smov %s6526_s3 }
 0x2ef   :  { %18 = sbr.rel (!%p16_p12) target bundleno = 6 (0x6), region = 201 }

// kernel: forward.11
= control target key start
LH: loop header
LB: loop body
LE: loop exit
PB: predicated region body
PF: predicated region fallthrough
CT: control target
= control target key end

     0   :  { %8 = vsyncpa [#allocation3], 0  ;;  %s14077_s0 = inlined_call_operand.vmem [shape: bf16[16,4608], index: 0, kind: input, shape index: {}]   ;;  %s14078_s1 = inlined_call_operand.hbm [shape: bf16[4608,1024], index: 1, kind: input, shape index: {}]   ;;  %s14079_s2 = inlined_call_operand.vmem [shape: f32[1,1024], index: 2, kind: input, shape index: {}]   ;;  %s14080_s3 = inlined_call_operand.vmem [shape: bf16[16,1024], index: 3, kind: output, shape index: {}]  }
   0x1   :  { %10 = vsyncpa [#allocation3 + $0x1], 0  ;;  %s12397_s12 = smov 0   ;;  %s12399_s13 = smov 0  }
   0x2   :  { %s12401_s14 = smov 0   ;;  %s12403_s15 = smov 0  }
   0x3   :  { %s12405_s16 = smov 0   ;;  %s12407_s17 = smov 0  }
   0x4 LB: > { %s9161_s18 = sadd.s32 4294967295, %s12371_s17   ;;  %s25_s19 = sadd.s32 1, %s12367_s16  ;;  %s12371_s17 = sphi %s12407_s17, %s16_s17   ;;  %s12367_s16 = sphi %s12405_s16, %s14090_s16   ;;  %s12363_s15 = sphi %s12403_s15, %s14089_s15   ;;  %s12359_s14 = sphi %s12401_s14, %s14088_s14   ;;  %s12355_s13 = sphi %s12399_s13, %s14087_s13   ;;  %s12351_s12 = sphi %s12397_s12, %s14086_s12  }
   0x5   : > { %p26_p0 = scmp.ge.s32.totalorder %s25_s19, 2  ;;  %s61_s20 = sadd.s32 1, %s12359_s14 }
   0x6   : > { %p68_p1 = scmp.ne.s32.totalorder %s12359_s14, %s12355_s13  ;;  %p69_p2 = scmp.eq.s32.totalorder %s12371_s17, 0 }
   0x7   : > { %s14092_s19 = smov (%p26_p0, %s25_s19), 0  ;;  %p74_p4 = scmp.ne.s32.totalorder %s12355_s13, %s12351_s12 }
   0x8   : > { %p12433_p3 = por %p69_p2, %p68_p1  ;;  %s58_s22 = ssub.s32 %s12367_s16, %s14092_s19 }
   0x9   : > { %p75_p5 = scmp.eq.s32.totalorder %s9161_s18, 0  ;;  %p59_p6 = scmp.eq.s32.totalorder %s58_s22, 0 }
   0xa   : > { %p126_p7 = scmp.eq.s32.totalorder %s9161_s18, 1  ;;  %p10390_p10 = scmp.lt.s32.totalorder %s12371_s17, 2 }
   0xb   : > { %p12440_p8 = por %p75_p5, %p74_p4  ;;  %s162_s26 = sand.u32 1, %s12359_s14  }
   0xc   : > { %s12445_s24 = scalar_select %p59_p6, %s12359_s14, %s61_s20  }
   0xd   : > { %p12447_p9 = por %p126_p7, %p68_p1  ;;  %s10376_s27 = sshll.u32 %s12367_s16, 8 }
   0xe   : > { %s10382_s28 = smul.u32 9216, %s162_s26  ;;  %s172_s4 = scalar_lea.hbm %s14078_s1, %s10376_s27 }
   0xf   : > { %p12459_p11 = pnand %p10390_p10, %p12433_p3  ;;  %p9168_p12 = scmp.ge.s32.totalorder %s12371_s17, 1 }
  0x10   : > { %s166_s6 = scalar_lea.vmem [#allocation2], %s10382_s28  ;;  %s163_s8 = scalar_lea.sflag [#allocation3], %s162_s26 }
  0x11   : > { %s173_s7 = sshll.u32 %s166_s6, 4  ;;  %p12295_p13 = pneg %p12459_p11  ;;  %s174_s7 = int_to_ptr.vmem [resolvable:$true] %s173_s7 }
  0x12   : > { %s12306_s9 = scalar_lea.vmem %s174_s7, 147456  ;;  %s12373_s10 = smov [#allocation2]  }
  0x13   : > { %p12307_p0 = scmp.ne.s32.totalorder %s174_s7, %s12306_s9  ;;  %s12311_s11 = sshll.u32 %s12373_s10, 4  ;;  %s12312_s11 = int_to_ptr.vmem [resolvable:$false] %s12311_s11 }
  0x14   : > { %s12313_s12 = scalar_lea.vmem %s12312_s11, 294912  ;;  %p12314_p3 = scmp.lt.s32.totalorder %s174_s7, %s12312_s11 }
  0x15   : > { %p12309_p1 = pnand %p12307_p0, %p12295_p13  ;;  %p12315_p4 = scmp.lt.s32.totalorder %s12313_s12, %s12306_s9 }
  0x17   : > { %p12310_p2 = pneg %p12309_p1  ;;  %p12316_p5 = por %p12315_p4, %p12314_p3 }
  0x19   : > { %p12317_p6 = pnand %p12316_p5, %p12310_p2 }
  0x1b   : > { %12320 = shalt.err (!%p12317_p6)
}
  0x1c   : > { %s12374_s18 = smov 512   ;;  %s12375_s20 = smov 256  }
  0x1d   : > { %s12376_s21 = smov 16   ;;  %p189_p7 = scmp.lt.s32.totalorder %s12371_s17, 3 }
  0x1e   : > { %10389 = dma.hbm_to_vmem [thread:$0]  (!%p12459_p11), %s172_s4, 147456, %s174_s7, %s163_s8, %s12374_s18, %s12375_s20, %s12376_s21  }
  0x1f   : > { %p190_p10 = pnand %p9168_p12, %p189_p7 }
  0x20   : > { %s12472_s22 = sand.u32 (!%p190_p10), 1, %s12355_s13  }
  0x21   : > { %193 = sbr.rel (%p190_p10) target bundleno = 1440 (0x5a0), region = 32  ;;  %s196_s27 = scalar_lea.sflag (!%p190_p10), [#allocation3], %s12472_s22 }
  0x22   : > { %s10383_s26 = smul.u32 (!%p190_p10), 9216, %s12472_s22 }
  0x24   : > { %s12476_s28 = scalar_lea.vmem (!%p190_p10), [#allocation2], %s10383_s26 }
  0x26   : > { %12346 = dma.done.wait (%p12440_p8), %s196_s27, 147456  }
  0x27   : > { %12348 = vsyncadd (%p12440_p8), %s196_s27, 4294819840  ;;  %v10442_v0 = vld [vmem:[%s12476_s28 + $0xe4] ss:$16 sps:$4 sm:$0xff]   ;;  %v10446_v2 = vld [vmem:[%s12476_s28 + $0xe0] ss:$16 sps:$4 sm:$0xff]   ;;  %s9170_s27 = sshll.u32 %s12363_s15, 2 }
  0x28   : > { %v10444_v1 = vld [vmem:[%s12476_s28 + $0x2e4] ss:$16 sps:$4 sm:$0xff]   ;;  %7396 = vmatprep.subr.bf16.mxu0 %v10442_v0  ;;  %v10447_v3 = vld [vmem:[%s12476_s28 + $0x2e0] ss:$16 sps:$4 sm:$0xff]   ;;  %v10543_v51 = vld [vmem:[%s14077_s0 + $0xc] ss:$144 sps:$4 sm:$0xff]  }
  0x29   : > { %7439 = vmatprep.subr.bf16.mxu1 %v10444_v1  ;;  %v10448_v4 = vld [vmem:[%s12476_s28 + $0xc4] ss:$16 sps:$4 sm:$0xff]   ;;  %7397 = vmatpush1.bf16.msra.mxu0 %v10446_v2  ;;  %v10452_v6 = vld [vmem:[%s12476_s28 + $0xc0] ss:$16 sps:$4 sm:$0xff]   ;;  %p13375_p8 = scmp.lt.s32.totalorder %s9170_s27, 7  ;;  %s9169_s4 = sshll.u32 %s12472_s22, 5 }
  0x2a   : > { %7440 = vmatpush1.bf16.msra.mxu1 %v10447_v3  ;;  %v10450_v5 = vld [vmem:[%s12476_s28 + $0x2c4] ss:$16 sps:$4 sm:$0xff]   ;;  %7398 = vmatprep.subr.bf16.mxu0 %v10448_v4  ;;  %v10453_v7 = vld [vmem:[%s12476_s28 + $0x2c0] ss:$16 sps:$4 sm:$0xff]   ;;  %s13638_s22 = scalar_lea.vmem [#allocation4], %s9169_s4 }
  0x2b   : > { %7441 = vmatprep.subr.bf16.mxu1 %v10450_v5  ;;  %v10454_v8 = vld [vmem:[%s12476_s28 + $0xa4] ss:$16 sps:$4 sm:$0xff]   ;;  %v10458_v10 = vld [vmem:[%s12476_s28 + $0xa0] ss:$16 sps:$4 sm:$0xff]   ;;  %7471 = vmatprep.mubr.bf16.mxu1 %v10543_v51  ;;  %v10541_v5 = vld [vmem:[%s14077_s0 + $0x8] ss:$144 sps:$4 sm:$0xff]  }
  0x2c   : > { %v10456_v9 = vld [vmem:[%s12476_s28 + $0x2a4] ss:$16 sps:$4 sm:$0xff]   ;;  %v10459_v11 = vld [vmem:[%s12476_s28 + $0x2a0] ss:$16 sps:$4 sm:$0xff]   ;;  %s14094_s27 = smov (!%p13375_p8, %s9170_s27), 7 }
  0x2d   : > { %7399 = vmatpush1.bf16.msra.mxu0 %v10452_v6  ;;  %v10460_v12 = vld [vmem:[%s12476_s28 + $0x84] ss:$16 sps:$4 sm:$0xff]   ;;  %v10464_v14 = vld [vmem:[%s12476_s28 + $0x80] ss:$16 sps:$4 sm:$0xff]   ;;  %s13414_s12 = scalar_lea.vmem %s14079_s2, %s14094_s27 }
  0x2e   : > { %7442 = vmatpush1.bf16.msra.mxu1 %v10453_v7  ;;  %7400 = vmatprep.subr.bf16.mxu0 %v10454_v8  ;;  %v10462_v13 = vld [vmem:[%s12476_s28 + $0x284] ss:$16 sps:$4 sm:$0xff]   ;;  %v10465_v15 = vld [vmem:[%s12476_s28 + $0x280] ss:$16 sps:$4 sm:$0xff]  }
  0x2f   : > { %7443 = vmatprep.subr.bf16.mxu1 %v10456_v9  ;;  %v10466_v16 = vld [vmem:[%s12476_s28 + $0x64] ss:$16 sps:$4 sm:$0xff]   ;;  %v10470_v18 = vld [vmem:[%s12476_s28 + $0x60] ss:$16 sps:$4 sm:$0xff]  }
  0x30   : > { %v10468_v17 = vld [vmem:[%s12476_s28 + $0x264] ss:$16 sps:$4 sm:$0xff]   ;;  %v10471_v19 = vld [vmem:[%s12476_s28 + $0x260] ss:$16 sps:$4 sm:$0xff]  }
  0x31   : > { %7401 = vmatpush1.bf16.msra.mxu0 %v10458_v10  ;;  %v10472_v20 = vld [vmem:[%s12476_s28 + $0x44] ss:$16 sps:$4 sm:$0xff]   ;;  %v10476_v22 = vld [vmem:[%s12476_s28 + $0x40] ss:$16 sps:$4 sm:$0xff]  }
  0x32   : > { %7444 = vmatpush1.bf16.msra.mxu1 %v10459_v11  ;;  %7402 = vmatprep.subr.bf16.mxu0 %v10460_v12  ;;  %v10474_v21 = vld [vmem:[%s12476_s28 + $0x244] ss:$16 sps:$4 sm:$0xff]   ;;  %v10477_v23 = vld [vmem:[%s12476_s28 + $0x240] ss:$16 sps:$4 sm:$0xff]  }
  0x33   : > { %7445 = vmatprep.subr.bf16.mxu1 %v10462_v13  ;;  %v10478_v24 = vld [vmem:[%s12476_s28 + $0x24] ss:$16 sps:$4 sm:$0xff]   ;;  %v10482_v26 = vld [vmem:[%s12476_s28 + $0x20] ss:$16 sps:$4 sm:$0xff]  }
  0x34   : > { %v10480_v25 = vld [vmem:[%s12476_s28 + $0x224] ss:$16 sps:$4 sm:$0xff]   ;;  %v10483_v27 = vld [vmem:[%s12476_s28 + $0x220] ss:$16 sps:$4 sm:$0xff]  }
  0x35   : > { %7403 = vmatpush1.bf16.msra.mxu0 %v10464_v14  ;;  %v10484_v28 = vld [vmem:[%s12476_s28 + $0x4] ss:$16 sps:$4 sm:$0xff]   ;;  %v10488_v30 = vld [vmem:[%s12476_s28] ss:$16 sps:$4 sm:$0xff]  }
  0x36   : > { %7446 = vmatpush1.bf16.msra.mxu1 %v10465_v15  ;;  %7404 = vmatprep.subr.bf16.mxu0 %v10466_v16  ;;  %v10486_v29 = vld [vmem:[%s12476_s28 + $0x204] ss:$16 sps:$4 sm:$0xff]   ;;  %v10489_v31 = vld [vmem:[%s12476_s28 + $0x200] ss:$16 sps:$4 sm:$0xff]  }
  0x37   : > { %7447 = vmatprep.subr.bf16.mxu1 %v10468_v17  ;;  %v10490_v32 = vld [vmem:[%s12476_s28 + $0x1e4] ss:$16 sps:$4 sm:$0xff]   ;;  %v10494_v34 = vld [vmem:[%s12476_s28 + $0x1e0] ss:$16 sps:$4 sm:$0xff]  }
  0x38   : > { %v10492_v33 = vld [vmem:[%s12476_s28 + $0x3e4] ss:$16 sps:$4 sm:$0xff]   ;;  %v10495_v35 = vld [vmem:[%s12476_s28 + $0x3e0] ss:$16 sps:$4 sm:$0xff]  }
  0x39   : > { %7405 = vmatpush1.bf16.msra.mxu0 %v10470_v18  ;;  %v10496_v36 = vld [vmem:[%s12476_s28 + $0x1c4] ss:$16 sps:$4 sm:$0xff]   ;;  %v10500_v38 = vld [vmem:[%s12476_s28 + $0x1c0] ss:$16 sps:$4 sm:$0xff]  }
  0x3a   : > { %7448 = vmatpush1.bf16.msra.mxu1 %v10471_v19  ;;  %7406 = vmatprep.subr.bf16.mxu0 %v10472_v20  ;;  %v10498_v37 = vld [vmem:[%s12476_s28 + $0x3c4] ss:$16 sps:$4 sm:$0xff]   ;;  %v10501_v39 = vld [vmem:[%s12476_s28 + $0x3c0] ss:$16 sps:$4 sm:$0xff]  }
  0x3b   : > { %7449 = vmatprep.subr.bf16.mxu1 %v10474_v21  ;;  %v10502_v40 = vld [vmem:[%s12476_s28 + $0x1a4] ss:$16 sps:$4 sm:$0xff]   ;;  %v10506_v42 = vld [vmem:[%s12476_s28 + $0x1a0] ss:$16 sps:$4 sm:$0xff]  }
  0x3c   : > { %v10504_v41 = vld [vmem:[%s12476_s28 + $0x3a4] ss:$16 sps:$4 sm:$0xff]   ;;  %v10507_v43 = vld [vmem:[%s12476_s28 + $0x3a0] ss:$16 sps:$4 sm:$0xff]  }
  0x3d   : > { %7407 = vmatpush1.bf16.msra.mxu0 %v10476_v22  ;;  %v10508_v44 = vld [vmem:[%s12476_s28 + $0x184] ss:$16 sps:$4 sm:$0xff]   ;;  %v10512_v46 = vld [vmem:[%s12476_s28 + $0x180] ss:$16 sps:$4 sm:$0xff]  }
  0x3e   : > { %7450 = vmatpush1.bf16.msra.mxu1 %v10477_v23  ;;  %7408 = vmatprep.subr.bf16.mxu0 %v10478_v24  ;;  %v10510_v45 = vld [vmem:[%s12476_s28 + $0x384] ss:$16 sps:$4 sm:$0xff]   ;;  %v10513_v47 = vld [vmem:[%s12476_s28 + $0x380] ss:$16 sps:$4 sm:$0xff]  }
  0x3f   : > { %7451 = vmatprep.subr.bf16.mxu1 %v10480_v25  ;;  %v10514_v48 = vld [vmem:[%s12476_s28 + $0x164] ss:$16 sps:$4 sm:$0xff]   ;;  %v10518_v52 = vld [vmem:[%s12476_s28 + $0x160] ss:$16 sps:$4 sm:$0xff]  }
  0x40   : > { %v10540_v49 = vld [vmem:[%s14077_s0 + $0x4] ss:$144 sps:$4 sm:$0xff]   ;;  %v10519_v53 = vld [vmem:[%s12476_s28 + $0x360] ss:$16 sps:$4 sm:$0xff]  }
  0x41   : > { %7409 = vmatpush1.bf16.msra.mxu0 %v10482_v26  ;;  %v10516_v50 = vld [vmem:[%s12476_s28 + $0x364] ss:$16 sps:$4 sm:$0xff]   ;;  %7428 = vmatprep.mubr.bf16.mxu0 %v10540_v49  ;;  %v10524_v56 = vld [vmem:[%s12476_s28 + $0x140] ss:$16 sps:$4 sm:$0xff]  }
  0x42   : > { %7452 = vmatpush1.bf16.msra.mxu1 %v10483_v27  ;;  %7410 = vmatprep.subr.bf16.mxu0 %v10484_v28  ;;  %v10520_v54 = vld [vmem:[%s12476_s28 + $0x144] ss:$16 sps:$4 sm:$0xff]   ;;  %v10525_v57 = vld [vmem:[%s12476_s28 + $0x340] ss:$16 sps:$4 sm:$0xff]  }
  0x43   : > { %7453 = vmatprep.subr.bf16.mxu1 %v10486_v29  ;;  %v10522_v55 = vld [vmem:[%s12476_s28 + $0x344] ss:$16 sps:$4 sm:$0xff]   ;;  %v10530_v60 = vld [vmem:[%s12476_s28 + $0x120] ss:$16 sps:$4 sm:$0xff]  }
  0x44   : > { %v10526_v58 = vld [vmem:[%s12476_s28 + $0x124] ss:$16 sps:$4 sm:$0xff]   ;;  %v10531_v61 = vld [vmem:[%s12476_s28 + $0x320] ss:$16 sps:$4 sm:$0xff]  }
  0x45   : > { %7411 = vmatpush1.bf16.msra.mxu0 %v10488_v30  ;;  %v10528_v59 = vld [vmem:[%s12476_s28 + $0x324] ss:$16 sps:$4 sm:$0xff]   ;;  %v10536_v0 = vld [vmem:[%s12476_s28 + $0x100] ss:$16 sps:$4 sm:$0xff]  }
  0x46   : > { %7454 = vmatpush1.bf16.msra.mxu1 %v10489_v31  ;;  %7412 = vmatprep.subr.bf16.mxu0 %v10490_v32  ;;  %v10532_v62 = vld [vmem:[%s12476_s28 + $0x104] ss:$16 sps:$4 sm:$0xff]   ;;  %v10537_v1 = vld [vmem:[%s12476_s28 + $0x300] ss:$16 sps:$4 sm:$0xff]  }
  0x47   : > { %7455 = vmatprep.subr.bf16.mxu1 %v10492_v33  ;;  %v10534_v63 = vld [vmem:[%s12476_s28 + $0x304] ss:$16 sps:$4 sm:$0xff]   ;;  %v10538_v4 = vld [vmem:[%s14077_s0] ss:$144 sps:$4 sm:$0xff]  }
  0x48   : > { %v10546_v2 = vld [vmem:[%s12476_s28 + $0x4e4] ss:$16 sps:$4 sm:$0xff]   ;;  %v10544_v6 = vld [vmem:[%s12476_s28 + $0x4e0] ss:$16 sps:$4 sm:$0xff]  }
  0x49   : > { %7413 = vmatpush2.bf16.msra.mxu0 %v10494_v34  ;;  %v10549_v3 = vld [vmem:[%s12476_s28 + $0x6e4] ss:$16 sps:$4 sm:$0xff]   ;;  %v10547_v7 = vld [vmem:[%s12476_s28 + $0x6e0] ss:$16 sps:$4 sm:$0xff]  }
  0x4a   : > { %7456 = vmatpush2.bf16.msra.mxu1 %v10495_v35  ;;  %7414 = vmatprep.subr.bf16.mxu0 %v10496_v36  ;;  %v10552_v8 = vld [vmem:[%s12476_s28 + $0x4c4] ss:$16 sps:$4 sm:$0xff]   ;;  %v10550_v10 = vld [vmem:[%s12476_s28 + $0x4c0] ss:$16 sps:$4 sm:$0xff]   ;;  %v10645_v35 = vld [vmem:[%s14077_s0 + $0x1c] ss:$144 sps:$4 sm:$0xff]  }
  0x4b   : > { %7457 = vmatprep.subr.bf16.mxu1 %v10498_v37  ;;  %v10555_v9 = vld [vmem:[%s12476_s28 + $0x6c4] ss:$16 sps:$4 sm:$0xff]   ;;  %v10553_v11 = vld [vmem:[%s12476_s28 + $0x6c0] ss:$16 sps:$4 sm:$0xff]  }
  0x4c   : > { %v10558_v12 = vld [vmem:[%s12476_s28 + $0x4a4] ss:$16 sps:$4 sm:$0xff]   ;;  %v10556_v14 = vld [vmem:[%s12476_s28 + $0x4a0] ss:$16 sps:$4 sm:$0xff]  }
  0x4d   : > { %7415 = vmatpush2.bf16.msra.mxu0 %v10500_v38  ;;  %v10561_v13 = vld [vmem:[%s12476_s28 + $0x6a4] ss:$16 sps:$4 sm:$0xff]   ;;  %v10559_v15 = vld [vmem:[%s12476_s28 + $0x6a0] ss:$16 sps:$4 sm:$0xff]  }
  0x4e   : > { %7458 = vmatpush2.bf16.msra.mxu1 %v10501_v39  ;;  %7416 = vmatprep.subr.bf16.mxu0 %v10502_v40  ;;  %v10564_v16 = vld [vmem:[%s12476_s28 + $0x484] ss:$16 sps:$4 sm:$0xff]   ;;  %v10562_v18 = vld [vmem:[%s12476_s28 + $0x480] ss:$16 sps:$4 sm:$0xff]  }
  0x4f   : > { %7459 = vmatprep.subr.bf16.mxu1 %v10504_v41  ;;  %v10567_v17 = vld [vmem:[%s12476_s28 + $0x684] ss:$16 sps:$4 sm:$0xff]   ;;  %v10565_v19 = vld [vmem:[%s12476_s28 + $0x680] ss:$16 sps:$4 sm:$0xff]  }
  0x50   : > { %v10570_v20 = vld [vmem:[%s12476_s28 + $0x464] ss:$16 sps:$4 sm:$0xff]   ;;  %v10568_v22 = vld [vmem:[%s12476_s28 + $0x460] ss:$16 sps:$4 sm:$0xff]  }
  0x51   : > { %7417 = vmatpush2.bf16.msra.mxu0 %v10506_v42  ;;  %v10573_v21 = vld [vmem:[%s12476_s28 + $0x664] ss:$16 sps:$4 sm:$0xff]   ;;  %v10571_v23 = vld [vmem:[%s12476_s28 + $0x660] ss:$16 sps:$4 sm:$0xff]  }
  0x52   : > { %7460 = vmatpush2.bf16.msra.mxu1 %v10507_v43  ;;  %7418 = vmatprep.subr.bf16.mxu0 %v10508_v44  ;;  %v10576_v24 = vld [vmem:[%s12476_s28 + $0x444] ss:$16 sps:$4 sm:$0xff]   ;;  %v10574_v26 = vld [vmem:[%s12476_s28 + $0x440] ss:$16 sps:$4 sm:$0xff]  }
  0x53   : > { %7461 = vmatprep.subr.bf16.mxu1 %v10510_v45  ;;  %v10579_v25 = vld [vmem:[%s12476_s28 + $0x644] ss:$16 sps:$4 sm:$0xff]   ;;  %v10577_v27 = vld [vmem:[%s12476_s28 + $0x640] ss:$16 sps:$4 sm:$0xff]  }
  0x54   : > { %v10582_v28 = vld [vmem:[%s12476_s28 + $0x424] ss:$16 sps:$4 sm:$0xff]   ;;  %v10580_v30 = vld [vmem:[%s12476_s28 + $0x420] ss:$16 sps:$4 sm:$0xff]  }
  0x55   : > { %7419 = vmatpush2.bf16.msra.mxu0 %v10512_v46  ;;  %v10585_v29 = vld [vmem:[%s12476_s28 + $0x624] ss:$16 sps:$4 sm:$0xff]   ;;  %v10583_v31 = vld [vmem:[%s12476_s28 + $0x620] ss:$16 sps:$4 sm:$0xff]  }
  0x56   : > { %7462 = vmatpush2.bf16.msra.mxu1 %v10513_v47  ;;  %7420 = vmatprep.subr.bf16.mxu0 %v10514_v48  ;;  %v10588_v32 = vld [vmem:[%s12476_s28 + $0x404] ss:$16 sps:$4 sm:$0xff]   ;;  %v10586_v36 = vld [vmem:[%s12476_s28 + $0x400] ss:$16 sps:$4 sm:$0xff]  }
  0x57   : > { %7463 = vmatprep.subr.bf16.mxu1 %v10516_v50  ;;  %v10591_v33 = vld [vmem:[%s12476_s28 + $0x604] ss:$16 sps:$4 sm:$0xff]   ;;  %v10589_v37 = vld [vmem:[%s12476_s28 + $0x600] ss:$16 sps:$4 sm:$0xff]  }
  0x58   : > { %v10642_v34 = vld [vmem:[%s14077_s0 + $0x14] ss:$144 sps:$4 sm:$0xff]   ;;  %v10592_v40 = vld [vmem:[%s12476_s28 + $0x5e0] ss:$16 sps:$4 sm:$0xff]  }
  0x59   : > { %7421 = vmatpush2.bf16.msra.mxu0 %v10518_v52  ;;  %v10594_v38 = vld [vmem:[%s12476_s28 + $0x5e4] ss:$16 sps:$4 sm:$0xff]   ;;  %v10595_v41 = vld [vmem:[%s12476_s28 + $0x7e0] ss:$16 sps:$4 sm:$0xff]  }
  0x5a   : > { %7464 = vmatpush2.bf16.msra.mxu1 %v10519_v53  ;;  %7422 = vmatprep.subr.bf16.mxu0 %v10520_v54  ;;  %v10597_v39 = vld [vmem:[%s12476_s28 + $0x7e4] ss:$16 sps:$4 sm:$0xff]   ;;  %v10598_v44 = vld [vmem:[%s12476_s28 + $0x5c0] ss:$16 sps:$4 sm:$0xff]  }
  0x5b   : > { %7465 = vmatprep.subr.bf16.mxu1 %v10522_v55  ;;  %v10600_v42 = vld [vmem:[%s12476_s28 + $0x5c4] ss:$16 sps:$4 sm:$0xff]   ;;  %v10601_v45 = vld [vmem:[%s12476_s28 + $0x7c0] ss:$16 sps:$4 sm:$0xff]  }
  0x5c   : > { %v10603_v43 = vld [vmem:[%s12476_s28 + $0x7c4] ss:$16 sps:$4 sm:$0xff]   ;;  %v10604_v48 = vld [vmem:[%s12476_s28 + $0x5a0] ss:$16 sps:$4 sm:$0xff]  }
  0x5d   : > { %7423 = vmatpush2.bf16.msra.mxu0 %v10524_v56  ;;  %v10606_v46 = vld [vmem:[%s12476_s28 + $0x5a4] ss:$16 sps:$4 sm:$0xff]   ;;  %v10607_v49 = vld [vmem:[%s12476_s28 + $0x7a0] ss:$16 sps:$4 sm:$0xff]  }
  0x5e   : > { %7466 = vmatpush2.bf16.msra.mxu1 %v10525_v57  ;;  %7424 = vmatprep.subr.bf16.mxu0 %v10526_v58  ;;  %v10609_v47 = vld [vmem:[%s12476_s28 + $0x7a4] ss:$16 sps:$4 sm:$0xff]   ;;  %v10610_v52 = vld [vmem:[%s12476_s28 + $0x580] ss:$16 sps:$4 sm:$0xff]  }
  0x5f   : > { %7467 = vmatprep.subr.bf16.mxu1 %v10528_v59  ;;  %v10612_v50 = vld [vmem:[%s12476_s28 + $0x584] ss:$16 sps:$4 sm:$0xff]   ;;  %v10613_v53 = vld [vmem:[%s12476_s28 + $0x780] ss:$16 sps:$4 sm:$0xff]  }
  0x60   : > { %v10615_v51 = vld [vmem:[%s12476_s28 + $0x784] ss:$16 sps:$4 sm:$0xff]   ;;  %v10616_v56 = vld [vmem:[%s12476_s28 + $0x560] ss:$16 sps:$4 sm:$0xff]  }
  0x61   : > { %7425 = vmatpush2.bf16.msra.mxu0 %v10530_v60  ;;  %v10618_v54 = vld [vmem:[%s12476_s28 + $0x564] ss:$16 sps:$4 sm:$0xff]   ;;  %v10619_v57 = vld [vmem:[%s12476_s28 + $0x760] ss:$16 sps:$4 sm:$0xff]  }
  0x62   : > { %7468 = vmatpush2.bf16.msra.mxu1 %v10531_v61  ;;  %7426 = vmatprep.subr.bf16.mxu0 %v10532_v62  ;;  %v10621_v55 = vld [vmem:[%s12476_s28 + $0x764] ss:$16 sps:$4 sm:$0xff]   ;;  %v10622_v60 = vld [vmem:[%s12476_s28 + $0x540] ss:$16 sps:$4 sm:$0xff]  }
  0x63   : > { %7469 = vmatprep.subr.bf16.mxu1 %v10534_v63  ;;  %v10624_v58 = vld [vmem:[%s12476_s28 + $0x544] ss:$16 sps:$4 sm:$0xff]   ;;  %v10625_v61 = vld [vmem:[%s12476_s28 + $0x740] ss:$16 sps:$4 sm:$0xff]  }
  0x64   : > { %v10627_v59 = vld [vmem:[%s12476_s28 + $0x744] ss:$16 sps:$4 sm:$0xff]  }
  0x65   : > { %7427 = vmatpush2.bf16.msra.mxu0 %v10536_v0  ;;  %v10630_v62 = vld [vmem:[%s12476_s28 + $0x524] ss:$16 sps:$4 sm:$0xff]   ;;  %v10628_v0 = vld [vmem:[%s12476_s28 + $0x520] ss:$16 sps:$4 sm:$0xff]  }
  0x66   : > { %7470 = vmatpush2.bf16.msra.mxu1 %v10537_v1  ;;  %7482 = vmatprep.subr.bf16.mxu0 %v10546_v2  ;;  %v10633_v63 = vld [vmem:[%s12476_s28 + $0x724] ss:$16 sps:$4 sm:$0xff]   ;;  %v10631_v1 = vld [vmem:[%s12476_s28 + $0x720] ss:$16 sps:$4 sm:$0xff]  }
  0x67   : > { %7525 = vmatprep.subr.bf16.mxu1 %v10549_v3  ;;  %v10636_v2 = vld [vmem:[%s12476_s28 + $0x504] ss:$16 sps:$4 sm:$0xff]  }
  0x68   : > { %7429 = vmatmul.mubr.bf16.vlgmr.msra.gmra.mxu0 %v10538_v4  ;;  %v10639_v3 = vld [vmem:[%s12476_s28 + $0x704] ss:$16 sps:$4 sm:$0xff]   ;;  %v10634_v4 = vld [vmem:[%s12476_s28 + $0x500] ss:$16 sps:$4 sm:$0xff]  }
  0x69   : > { %7472 = vmatmul.mubr.bf16.vlgmr.msra.gmra.mxu1 %v10541_v5  ;;  %7483 = vmatpush1.bf16.msra.mxu0 %v10544_v6  ;;  %v10637_v5 = vld [vmem:[%s12476_s28 + $0x700] ss:$16 sps:$4 sm:$0xff]   ;;  %v10648_v6 = vld [vmem:[%s12476_s28 + $0x8e4] ss:$16 sps:$4 sm:$0xff]  }
  0x6a   : > { %7526 = vmatpush1.bf16.msra.mxu1 %v10547_v7  ;;  %7484 = vmatprep.subr.bf16.mxu0 %v10552_v8  ;;  %v10651_v7 = vld [vmem:[%s12476_s28 + $0xae4] ss:$16 sps:$4 sm:$0xff]   ;;  %v10640_v8 = vld [vmem:[%s14077_s0 + $0x10] ss:$144 sps:$4 sm:$0xff]  }
  0x6b   : > { %7527 = vmatprep.subr.bf16.mxu1 %v10555_v9  ;;  %7514 = vmatprep.mubr.bf16.mxu0 %v10642_v34  ;;  %v10643_v9 = vld [vmem:[%s14077_s0 + $0x18] ss:$144 sps:$4 sm:$0xff]   ;;  %v10684_v34 = vld [vmem:[%s12476_s28 + $0x824] ss:$16 sps:$4 sm:$0xff]  }
  0x6c   : > { %7557 = vmatprep.mubr.bf16.mxu1 %v10645_v35  ;;  %v10687_v35 = vld [vmem:[%s12476_s28 + $0xa24] ss:$16 sps:$4 sm:$0xff]  }
  0x6d   : > { %7485 = vmatpush1.bf16.msra.mxu0 %v10550_v10  ;;  %v10646_v10 = vld [vmem:[%s12476_s28 + $0x8e0] ss:$16 sps:$4 sm:$0xff]  }
  0x6e   : > { %7528 = vmatpush1.bf16.msra.mxu1 %v10553_v11  ;;  %7486 = vmatprep.subr.bf16.mxu0 %v10558_v12  ;;  %v10649_v11 = vld [vmem:[%s12476_s28 + $0xae0] ss:$16 sps:$4 sm:$0xff]   ;;  %v10654_v12 = vld [vmem:[%s12476_s28 + $0x8c4] ss:$16 sps:$4 sm:$0xff]  }
  0x6f   : > { %7529 = vmatprep.subr.bf16.mxu1 %v10561_v13  ;;  %v10657_v13 = vld [vmem:[%s12476_s28 + $0xac4] ss:$16 sps:$4 sm:$0xff]  }
  0x71   : > { %7487 = vmatpush1.bf16.msra.mxu0 %v10556_v14  ;;  %v10652_v14 = vld [vmem:[%s12476_s28 + $0x8c0] ss:$16 sps:$4 sm:$0xff]  }
  0x72   : > { %7530 = vmatpush1.bf16.msra.mxu1 %v10559_v15  ;;  %7488 = vmatprep.subr.bf16.mxu0 %v10564_v16  ;;  %v10655_v15 = vld [vmem:[%s12476_s28 + $0xac0] ss:$16 sps:$4 sm:$0xff]   ;;  %v10660_v16 = vld [vmem:[%s12476_s28 + $0x8a4] ss:$16 sps:$4 sm:$0xff]  }
  0x73   : > { %7531 = vmatprep.subr.bf16.mxu1 %v10567_v17  ;;  %v10663_v17 = vld [vmem:[%s12476_s28 + $0xaa4] ss:$16 sps:$4 sm:$0xff]  }
  0x75   : > { %7489 = vmatpush1.bf16.msra.mxu0 %v10562_v18  ;;  %v10658_v18 = vld [vmem:[%s12476_s28 + $0x8a0] ss:$16 sps:$4 sm:$0xff]  }
  0x76   : > { %7532 = vmatpush1.bf16.msra.mxu1 %v10565_v19  ;;  %7490 = vmatprep.subr.bf16.mxu0 %v10570_v20  ;;  %v10744_v19 = vld [vmem:[%s14077_s0 + $0x24] ss:$144 sps:$4 sm:$0xff]   ;;  %v10661_v20 = vld [vmem:[%s12476_s28 + $0xaa0] ss:$16 sps:$4 sm:$0xff]  }
  0x77   : > { %7533 = vmatprep.subr.bf16.mxu1 %v10573_v21  ;;  %v10747_v21 = vld [vmem:[%s14077_s0 + $0x2c] ss:$144 sps:$4 sm:$0xff]  }
  0x79   : > { %7491 = vmatpush1.bf16.msra.mxu0 %v10568_v22  ;;  %v10666_v22 = vld [vmem:[%s12476_s28 + $0x884] ss:$16 sps:$4 sm:$0xff]  }
  0x7a   : > { %7534 = vmatpush1.bf16.msra.mxu1 %v10571_v23  ;;  %7492 = vmatprep.subr.bf16.mxu0 %v10576_v24  ;;  %v10669_v23 = vld [vmem:[%s12476_s28 + $0xa84] ss:$16 sps:$4 sm:$0xff]   ;;  %v10664_v24 = vld [vmem:[%s12476_s28 + $0x880] ss:$16 sps:$4 sm:$0xff]  }
  0x7b   : > { %7535 = vmatprep.subr.bf16.mxu1 %v10579_v25  ;;  %v10667_v25 = vld [vmem:[%s12476_s28 + $0xa80] ss:$16 sps:$4 sm:$0xff]  }
  0x7d   : > { %7493 = vmatpush1.bf16.msra.mxu0 %v10574_v26  ;;  %v10672_v26 = vld [vmem:[%s12476_s28 + $0x864] ss:$16 sps:$4 sm:$0xff]  }
  0x7e   : > { %7536 = vmatpush1.bf16.msra.mxu1 %v10577_v27  ;;  %7494 = vmatprep.subr.bf16.mxu0 %v10582_v28  ;;  %v10675_v27 = vld [vmem:[%s12476_s28 + $0xa64] ss:$16 sps:$4 sm:$0xff]   ;;  %v10670_v28 = vld [vmem:[%s12476_s28 + $0x860] ss:$16 sps:$4 sm:$0xff]  }
  0x7f   : > { %7537 = vmatprep.subr.bf16.mxu1 %v10585_v29  ;;  %v10673_v29 = vld [vmem:[%s12476_s28 + $0xa60] ss:$16 sps:$4 sm:$0xff]  }
  0x81   : > { %7495 = vmatpush1.bf16.msra.mxu0 %v10580_v30  ;;  %v10678_v30 = vld [vmem:[%s12476_s28 + $0x844] ss:$16 sps:$4 sm:$0xff]  }
  0x82   : > { %7538 = vmatpush1.bf16.msra.mxu1 %v10583_v31  ;;  %7496 = vmatprep.subr.bf16.mxu0 %v10588_v32  ;;  %v10681_v31 = vld [vmem:[%s12476_s28 + $0xa44] ss:$16 sps:$4 sm:$0xff]   ;;  %v10676_v32 = vld [vmem:[%s12476_s28 + $0x840] ss:$16 sps:$4 sm:$0xff]  }
  0x83   : > { %7539 = vmatprep.subr.bf16.mxu1 %v10591_v33  ;;  %v10679_v33 = vld [vmem:[%s12476_s28 + $0xa40] ss:$16 sps:$4 sm:$0xff]  }
  0x85   : > { %7497 = vmatpush1.bf16.msra.mxu0 %v10586_v36  ;;  %v10682_v36 = vld [vmem:[%s12476_s28 + $0x820] ss:$16 sps:$4 sm:$0xff]  }
  0x86   : > { %7540 = vmatpush1.bf16.msra.mxu1 %v10589_v37  ;;  %7498 = vmatprep.subr.bf16.mxu0 %v10594_v38  ;;  %v10685_v37 = vld [vmem:[%s12476_s28 + $0xa20] ss:$16 sps:$4 sm:$0xff]   ;;  %v10690_v38 = vld [vmem:[%s12476_s28 + $0x804] ss:$16 sps:$4 sm:$0xff]  }
  0x87   : > { %7541 = vmatprep.subr.bf16.mxu1 %v10597_v39  ;;  %v10693_v39 = vld [vmem:[%s12476_s28 + $0xa04] ss:$16 sps:$4 sm:$0xff]  }
  0x89   : > { %7499 = vmatpush2.bf16.msra.mxu0 %v10592_v40  ;;  %v10688_v40 = vld [vmem:[%s12476_s28 + $0x800] ss:$16 sps:$4 sm:$0xff]  }
  0x8a   : > { %7542 = vmatpush2.bf16.msra.mxu1 %v10595_v41  ;;  %7500 = vmatprep.subr.bf16.mxu0 %v10600_v42  ;;  %v10691_v41 = vld [vmem:[%s12476_s28 + $0xa00] ss:$16 sps:$4 sm:$0xff]   ;;  %v10696_v42 = vld [vmem:[%s12476_s28 + $0x9e4] ss:$16 sps:$4 sm:$0xff]  }
  0x8b   : > { %7543 = vmatprep.subr.bf16.mxu1 %v10603_v43  ;;  %v10699_v43 = vld [vmem:[%s12476_s28 + $0xbe4] ss:$16 sps:$4 sm:$0xff]  }
  0x8d   : > { %7501 = vmatpush2.bf16.msra.mxu0 %v10598_v44  ;;  %v10694_v44 = vld [vmem:[%s12476_s28 + $0x9e0] ss:$16 sps:$4 sm:$0xff]  }
  0x8e   : > { %7544 = vmatpush2.bf16.msra.mxu1 %v10601_v45  ;;  %7502 = vmatprep.subr.bf16.mxu0 %v10606_v46  ;;  %v10697_v45 = vld [vmem:[%s12476_s28 + $0xbe0] ss:$16 sps:$4 sm:$0xff]   ;;  %v10702_v46 = vld [vmem:[%s12476_s28 + $0x9c4] ss:$16 sps:$4 sm:$0xff]  }
  0x8f   : > { %7545 = vmatprep.subr.bf16.mxu1 %v10609_v47  ;;  %v10705_v47 = vld [vmem:[%s12476_s28 + $0xbc4] ss:$16 sps:$4 sm:$0xff]  }
  0x91   : > { %7503 = vmatpush2.bf16.msra.mxu0 %v10604_v48  ;;  %v10700_v48 = vld [vmem:[%s12476_s28 + $0x9c0] ss:$16 sps:$4 sm:$0xff]  }
  0x92   : > { %7546 = vmatpush2.bf16.msra.mxu1 %v10607_v49  ;;  %7504 = vmatprep.subr.bf16.mxu0 %v10612_v50  ;;  %v10703_v49 = vld [vmem:[%s12476_s28 + $0xbc0] ss:$16 sps:$4 sm:$0xff]   ;;  %v10708_v50 = vld [vmem:[%s12476_s28 + $0x9a4] ss:$16 sps:$4 sm:$0xff]  }
  0x93   : > { %7547 = vmatprep.subr.bf16.mxu1 %v10615_v51  ;;  %v10711_v51 = vld [vmem:[%s12476_s28 + $0xba4] ss:$16 sps:$4 sm:$0xff]  }
  0x95   : > { %7505 = vmatpush2.bf16.msra.mxu0 %v10610_v52  ;;  %v10706_v52 = vld [vmem:[%s12476_s28 + $0x9a0] ss:$16 sps:$4 sm:$0xff]  }
  0x96   : > { %7548 = vmatpush2.bf16.msra.mxu1 %v10613_v53  ;;  %7506 = vmatprep.subr.bf16.mxu0 %v10618_v54  ;;  %v10709_v53 = vld [vmem:[%s12476_s28 + $0xba0] ss:$16 sps:$4 sm:$0xff]   ;;  %v10714_v54 = vld [vmem:[%s12476_s28 + $0x984] ss:$16 sps:$4 sm:$0xff]  }
  0x97   : > { %7549 = vmatprep.subr.bf16.mxu1 %v10621_v55  ;;  %v10717_v55 = vld [vmem:[%s12476_s28 + $0xb84] ss:$16 sps:$4 sm:$0xff]  }
  0x99   : > { %7507 = vmatpush2.bf16.msra.mxu0 %v10616_v56  ;;  %v10712_v56 = vld [vmem:[%s12476_s28 + $0x980] ss:$16 sps:$4 sm:$0xff]  }
  0x9a   : > { %7550 = vmatpush2.bf16.msra.mxu1 %v10619_v57  ;;  %7508 = vmatprep.subr.bf16.mxu0 %v10624_v58  ;;  %v10715_v57 = vld [vmem:[%s12476_s28 + $0xb80] ss:$16 sps:$4 sm:$0xff]   ;;  %v10720_v58 = vld [vmem:[%s12476_s28 + $0x964] ss:$16 sps:$4 sm:$0xff]  }
  0x9b   : > { %7551 = vmatprep.subr.bf16.mxu1 %v10627_v59  ;;  %v10723_v59 = vld [vmem:[%s12476_s28 + $0xb64] ss:$16 sps:$4 sm:$0xff]  }
  0x9d   : > { %7509 = vmatpush2.bf16.msra.mxu0 %v10622_v60  ;;  %v10718_v60 = vld [vmem:[%s12476_s28 + $0x960] ss:$16 sps:$4 sm:$0xff]  }
  0x9e   : > { %7552 = vmatpush2.bf16.msra.mxu1 %v10625_v61  ;;  %7510 = vmatprep.subr.bf16.mxu0 %v10630_v62  ;;  %v10721_v61 = vld [vmem:[%s12476_s28 + $0xb60] ss:$16 sps:$4 sm:$0xff]   ;;  %v10726_v62 = vld [vmem:[%s12476_s28 + $0x944] ss:$16 sps:$4 sm:$0xff]  }
  0x9f   : > { %7553 = vmatprep.subr.bf16.mxu1 %v10633_v63  ;;  %v10729_v63 = vld [vmem:[%s12476_s28 + $0xb44] ss:$16 sps:$4 sm:$0xff]  }
  0xa1   : > { %7511 = vmatpush2.bf16.msra.mxu0 %v10628_v0  ;;  %v10724_v0 = vld [vmem:[%s12476_s28 + $0x940] ss:$16 sps:$4 sm:$0xff]  }
  0xa2   : > { %7554 = vmatpush2.bf16.msra.mxu1 %v10631_v1  ;;  %7512 = vmatprep.subr.bf16.mxu0 %v10636_v2  ;;  %v10727_v1 = vld [vmem:[%s12476_s28 + $0xb40] ss:$16 sps:$4 sm:$0xff]   ;;  %v10732_v2 = vld [vmem:[%s12476_s28 + $0x924] ss:$16 sps:$4 sm:$0xff]  }
  0xa3   : > { %7555 = vmatprep.subr.bf16.mxu1 %v10639_v3  ;;  %v10735_v3 = vld [vmem:[%s12476_s28 + $0xb24] ss:$16 sps:$4 sm:$0xff]  }
  0xa5   : > { %7513 = vmatpush2.bf16.msra.mxu0 %v10634_v4  ;;  %v10730_v4 = vld [vmem:[%s12476_s28 + $0x920] ss:$16 sps:$4 sm:$0xff]  }
  0xa6   : > { %7556 = vmatpush2.bf16.msra.mxu1 %v10637_v5  ;;  %7568 = vmatprep.subr.bf16.mxu0 %v10648_v6  ;;  %v10733_v5 = vld [vmem:[%s12476_s28 + $0xb20] ss:$16 sps:$4 sm:$0xff]   ;;  %v10738_v6 = vld [vmem:[%s12476_s28 + $0x904] ss:$16 sps:$4 sm:$0xff]  }
  0xa7   : > { %7611 = vmatprep.subr.bf16.mxu1 %v10651_v7  ;;  %v10741_v7 = vld [vmem:[%s12476_s28 + $0xb04] ss:$16 sps:$4 sm:$0xff]  }
  0xa8   : > { %7515 = vmatmul.mubr.bf16.vlgmr.msra.gmra.mxu0 %v10640_v8  ;;  %v10736_v8 = vld [vmem:[%s12476_s28 + $0x900] ss:$16 sps:$4 sm:$0xff]  }
  0xa9   : > { %7558 = vmatmul.mubr.bf16.vlgmr.msra.gmra.mxu1 %v10643_v9  ;;  %7569 = vmatpush1.bf16.msra.mxu0 %v10646_v10  ;;  %v10739_v9 = vld [vmem:[%s12476_s28 + $0xb00] ss:$16 sps:$4 sm:$0xff]   ;;  %v10750_v10 = vld [vmem:[%s12476_s28 + $0xce4] ss:$16 sps:$4 sm:$0xff]  }
  0xaa   : > { %7612 = vmatpush1.bf16.msra.mxu1 %v10649_v11  ;;  %7570 = vmatprep.subr.bf16.mxu0 %v10654_v12  ;;  %v10753_v11 = vld [vmem:[%s12476_s28 + $0xee4] ss:$16 sps:$4 sm:$0xff]   ;;  %v10742_v12 = vld [vmem:[%s14077_s0 + $0x20] ss:$144 sps:$4 sm:$0xff]  }
  0xab   : > { %7613 = vmatprep.subr.bf16.mxu1 %v10657_v13  ;;  %7600 = vmatprep.mubr.bf16.mxu0 %v10744_v19  ;;  %v10745_v13 = vld [vmem:[%s14077_s0 + $0x28] ss:$144 sps:$4 sm:$0xff]   ;;  %v10849_v19 = vld [vmem:[%s14077_s0 + $0x3c] ss:$144 sps:$4 sm:$0xff]  }
  0xac   : > { %7643 = vmatprep.mubr.bf16.mxu1 %v10747_v21  ;;  %v10757_v21 = vld [vmem:[%s12476_s28 + $0xec0] ss:$16 sps:$4 sm:$0xff]  }
  0xad   : > { %7571 = vmatpush1.bf16.msra.mxu0 %v10652_v14  ;;  %v10748_v14 = vld [vmem:[%s12476_s28 + $0xce0] ss:$16 sps:$4 sm:$0xff]  }
  0xae   : > { %7614 = vmatpush1.bf16.msra.mxu1 %v10655_v15  ;;  %7572 = vmatprep.subr.bf16.mxu0 %v10660_v16  ;;  %v10751_v15 = vld [vmem:[%s12476_s28 + $0xee0] ss:$16 sps:$4 sm:$0xff]   ;;  %v10756_v16 = vld [vmem:[%s12476_s28 + $0xcc4] ss:$16 sps:$4 sm:$0xff]  }
  0xaf   : > { %7615 = vmatprep.subr.bf16.mxu1 %v10663_v17  ;;  %v10759_v17 = vld [vmem:[%s12476_s28 + $0xec4] ss:$16 sps:$4 sm:$0xff]  }
  0xb1   : > { %7573 = vmatpush1.bf16.msra.mxu0 %v10658_v18  ;;  %v10846_v18 = vld [vmem:[%s14077_s0 + $0x34] ss:$144 sps:$4 sm:$0xff]  }
  0xb2   : > { %7616 = vmatpush1.bf16.msra.mxu1 %v10661_v20  ;;  %7574 = vmatprep.subr.bf16.mxu0 %v10666_v22  ;;  %v10754_v20 = vld [vmem:[%s12476_s28 + $0xcc0] ss:$16 sps:$4 sm:$0xff]   ;;  %v10762_v22 = vld [vmem:[%s12476_s28 + $0xca4] ss:$16 sps:$4 sm:$0xff]  }
  0xb3   : > { %7617 = vmatprep.subr.bf16.mxu1 %v10669_v23  ;;  %v10765_v23 = vld [vmem:[%s12476_s28 + $0xea4] ss:$16 sps:$4 sm:$0xff]  }
  0xb5   : > { %7575 = vmatpush1.bf16.msra.mxu0 %v10664_v24  ;;  %v10760_v24 = vld [vmem:[%s12476_s28 + $0xca0] ss:$16 sps:$4 sm:$0xff]  }
  0xb6   : > { %7618 = vmatpush1.bf16.msra.mxu1 %v10667_v25  ;;  %7576 = vmatprep.subr.bf16.mxu0 %v10672_v26  ;;  %v10763_v25 = vld [vmem:[%s12476_s28 + $0xea0] ss:$16 sps:$4 sm:$0xff]   ;;  %v10768_v26 = vld [vmem:[%s12476_s28 + $0xc84] ss:$16 sps:$4 sm:$0xff]  }
  0xb7   : > { %7619 = vmatprep.subr.bf16.mxu1 %v10675_v27  ;;  %v10771_v27 = vld [vmem:[%s12476_s28 + $0xe84] ss:$16 sps:$4 sm:$0xff]  }
  0xb9   : > { %7577 = vmatpush1.bf16.msra.mxu0 %v10670_v28  ;;  %v10766_v28 = vld [vmem:[%s12476_s28 + $0xc80] ss:$16 sps:$4 sm:$0xff]  }
  0xba   : > { %7620 = vmatpush1.bf16.msra.mxu1 %v10673_v29  ;;  %7578 = vmatprep.subr.bf16.mxu0 %v10678_v30  ;;  %v10769_v29 = vld [vmem:[%s12476_s28 + $0xe80] ss:$16 sps:$4 sm:$0xff]   ;;  %v10774_v30 = vld [vmem:[%s12476_s28 + $0xc64] ss:$16 sps:$4 sm:$0xff]  }
  0xbb   : > { %7621 = vmatprep.subr.bf16.mxu1 %v10681_v31  ;;  %v10777_v31 = vld [vmem:[%s12476_s28 + $0xe64] ss:$16 sps:$4 sm:$0xff]  }
  0xbd   : > { %7579 = vmatpush1.bf16.msra.mxu0 %v10676_v32  ;;  %v10772_v32 = vld [vmem:[%s12476_s28 + $0xc60] ss:$16 sps:$4 sm:$0xff]  }
  0xbe   : > { %7622 = vmatpush1.bf16.msra.mxu1 %v10679_v33  ;;  %7580 = vmatprep.subr.bf16.mxu0 %v10684_v34  ;;  %v10775_v33 = vld [vmem:[%s12476_s28 + $0xe60] ss:$16 sps:$4 sm:$0xff]   ;;  %v10780_v34 = vld [vmem:[%s12476_s28 + $0xc44] ss:$16 sps:$4 sm:$0xff]  }
  0xbf   : > { %7623 = vmatprep.subr.bf16.mxu1 %v10687_v35  ;;  %v10783_v35 = vld [vmem:[%s12476_s28 + $0xe44] ss:$16 sps:$4 sm:$0xff]  }
  0xc1   : > { %7581 = vmatpush1.bf16.msra.mxu0 %v10682_v36  ;;  %v10778_v36 = vld [vmem:[%s12476_s28 + $0xc40] ss:$16 sps:$4 sm:$0xff]  }
  0xc2   : > { %7624 = vmatpush1.bf16.msra.mxu1 %v10685_v37  ;;  %7582 = vmatprep.subr.bf16.mxu0 %v10690_v38  ;;  %v10781_v37 = vld [vmem:[%s12476_s28 + $0xe40] ss:$16 sps:$4 sm:$0xff]   ;;  %v10786_v38 = vld [vmem:[%s12476_s28 + $0xc24] ss:$16 sps:$4 sm:$0xff]  }
  0xc3   : > { %7625 = vmatprep.subr.bf16.mxu1 %v10693_v39  ;;  %v10789_v39 = vld [vmem:[%s12476_s28 + $0xe24] ss:$16 sps:$4 sm:$0xff]  }
  0xc5   : > { %7583 = vmatpush1.bf16.msra.mxu0 %v10688_v40  ;;  %v10784_v40 = vld [vmem:[%s12476_s28 + $0xc20] ss:$16 sps:$4 sm:$0xff]  }
  0xc6   : > { %7626 = vmatpush1.bf16.msra.mxu1 %v10691_v41  ;;  %7584 = vmatprep.subr.bf16.mxu0 %v10696_v42  ;;  %v10787_v41 = vld [vmem:[%s12476_s28 + $0xe20] ss:$16 sps:$4 sm:$0xff]   ;;  %v10792_v42 = vld [vmem:[%s12476_s28 + $0xc04] ss:$16 sps:$4 sm:$0xff]  }
  0xc7   : > { %7627 = vmatprep.subr.bf16.mxu1 %v10699_v43  ;;  %v10795_v43 = vld [vmem:[%s12476_s28 + $0xe04] ss:$16 sps:$4 sm:$0xff]  }
  0xc9   : > { %7585 = vmatpush2.bf16.msra.mxu0 %v10694_v44  ;;  %v10790_v44 = vld [vmem:[%s12476_s28 + $0xc00] ss:$16 sps:$4 sm:$0xff]  }
  0xca   : > { %7628 = vmatpush2.bf16.msra.mxu1 %v10697_v45  ;;  %7586 = vmatprep.subr.bf16.mxu0 %v10702_v46  ;;  %v10793_v45 = vld [vmem:[%s12476_s28 + $0xe00] ss:$16 sps:$4 sm:$0xff]   ;;  %v10798_v46 = vld [vmem:[%s12476_s28 + $0xde4] ss:$16 sps:$4 sm:$0xff]  }
  0xcb   : > { %7629 = vmatprep.subr.bf16.mxu1 %v10705_v47  ;;  %v10801_v47 = vld [vmem:[%s12476_s28 + $0xfe4] ss:$16 sps:$4 sm:$0xff]  }
  0xcd   : > { %7587 = vmatpush2.bf16.msra.mxu0 %v10700_v48  ;;  %v10796_v48 = vld [vmem:[%s12476_s28 + $0xde0] ss:$16 sps:$4 sm:$0xff]  }
  0xce   : > { %7630 = vmatpush2.bf16.msra.mxu1 %v10703_v49  ;;  %7588 = vmatprep.subr.bf16.mxu0 %v10708_v50  ;;  %v10799_v49 = vld [vmem:[%s12476_s28 + $0xfe0] ss:$16 sps:$4 sm:$0xff]   ;;  %v10804_v50 = vld [vmem:[%s12476_s28 + $0xdc4] ss:$16 sps:$4 sm:$0xff]  }
  0xcf   : > { %7631 = vmatprep.subr.bf16.mxu1 %v10711_v51  ;;  %v10807_v51 = vld [vmem:[%s12476_s28 + $0xfc4] ss:$16 sps:$4 sm:$0xff]  }
  0xd1   : > { %7589 = vmatpush2.bf16.msra.mxu0 %v10706_v52  ;;  %v10802_v52 = vld [vmem:[%s12476_s28 + $0xdc0] ss:$16 sps:$4 sm:$0xff]  }
  0xd2   : > { %7632 = vmatpush2.bf16.msra.mxu1 %v10709_v53  ;;  %7590 = vmatprep.subr.bf16.mxu0 %v10714_v54  ;;  %v10805_v53 = vld [vmem:[%s12476_s28 + $0xfc0] ss:$16 sps:$4 sm:$0xff]   ;;  %v10810_v54 = vld [vmem:[%s12476_s28 + $0xda4] ss:$16 sps:$4 sm:$0xff]  }
  0xd3   : > { %7633 = vmatprep.subr.bf16.mxu1 %v10717_v55  ;;  %v10813_v55 = vld [vmem:[%s12476_s28 + $0xfa4] ss:$16 sps:$4 sm:$0xff]  }
  0xd5   : > { %7591 = vmatpush2.bf16.msra.mxu0 %v10712_v56  ;;  %v10808_v56 = vld [vmem:[%s12476_s28 + $0xda0] ss:$16 sps:$4 sm:$0xff]  }
  0xd6   : > { %7634 = vmatpush2.bf16.msra.mxu1 %v10715_v57  ;;  %7592 = vmatprep.subr.bf16.mxu0 %v10720_v58  ;;  %v10811_v57 = vld [vmem:[%s12476_s28 + $0xfa0] ss:$16 sps:$4 sm:$0xff]   ;;  %v10816_v58 = vld [vmem:[%s12476_s28 + $0xd84] ss:$16 sps:$4 sm:$0xff]  }
  0xd7   : > { %7635 = vmatprep.subr.bf16.mxu1 %v10723_v59  ;;  %v10819_v59 = vld [vmem:[%s12476_s28 + $0xf84] ss:$16 sps:$4 sm:$0xff]  }
  0xd9   : > { %7593 = vmatpush2.bf16.msra.mxu0 %v10718_v60  ;;  %v10814_v60 = vld [vmem:[%s12476_s28 + $0xd80] ss:$16 sps:$4 sm:$0xff]  }
  0xda   : > { %7636 = vmatpush2.bf16.msra.mxu1 %v10721_v61  ;;  %7594 = vmatprep.subr.bf16.mxu0 %v10726_v62  ;;  %v10817_v61 = vld [vmem:[%s12476_s28 + $0xf80] ss:$16 sps:$4 sm:$0xff]   ;;  %v10822_v62 = vld [vmem:[%s12476_s28 + $0xd64] ss:$16 sps:$4 sm:$0xff]  }
  0xdb   : > { %7637 = vmatprep.subr.bf16.mxu1 %v10729_v63  ;;  %v10825_v63 = vld [vmem:[%s12476_s28 + $0xf64] ss:$16 sps:$4 sm:$0xff]  }
  0xdd   : > { %7595 = vmatpush2.bf16.msra.mxu0 %v10724_v0  ;;  %v10820_v0 = vld [vmem:[%s12476_s28 + $0xd60] ss:$16 sps:$4 sm:$0xff]  }
  0xde   : > { %7638 = vmatpush2.bf16.msra.mxu1 %v10727_v1  ;;  %7596 = vmatprep.subr.bf16.mxu0 %v10732_v2  ;;  %v10823_v1 = vld [vmem:[%s12476_s28 + $0xf60] ss:$16 sps:$4 sm:$0xff]   ;;  %v10828_v2 = vld [vmem:[%s12476_s28 + $0xd44] ss:$16 sps:$4 sm:$0xff]  }
  0xdf   : > { %7639 = vmatprep.subr.bf16.mxu1 %v10735_v3  ;;  %v10831_v3 = vld [vmem:[%s12476_s28 + $0xf44] ss:$16 sps:$4 sm:$0xff]  }
  0xe1   : > { %7597 = vmatpush2.bf16.msra.mxu0 %v10730_v4  ;;  %v10826_v4 = vld [vmem:[%s12476_s28 + $0xd40] ss:$16 sps:$4 sm:$0xff]  }
  0xe2   : > { %7640 = vmatpush2.bf16.msra.mxu1 %v10733_v5  ;;  %7598 = vmatprep.subr.bf16.mxu0 %v10738_v6  ;;  %v10829_v5 = vld [vmem:[%s12476_s28 + $0xf40] ss:$16 sps:$4 sm:$0xff]   ;;  %v10834_v6 = vld [vmem:[%s12476_s28 + $0xd24] ss:$16 sps:$4 sm:$0xff]  }
  0xe3   : > { %7641 = vmatprep.subr.bf16.mxu1 %v10741_v7  ;;  %v10837_v7 = vld [vmem:[%s12476_s28 + $0xf24] ss:$16 sps:$4 sm:$0xff]  }
  0xe5   : > { %7599 = vmatpush2.bf16.msra.mxu0 %v10736_v8  ;;  %v10832_v8 = vld [vmem:[%s12476_s28 + $0xd20] ss:$16 sps:$4 sm:$0xff]  }
  0xe6   : > { %7642 = vmatpush2.bf16.msra.mxu1 %v10739_v9  ;;  %7654 = vmatprep.subr.bf16.mxu0 %v10750_v10  ;;  %v10835_v9 = vld [vmem:[%s12476_s28 + $0xf20] ss:$16 sps:$4 sm:$0xff]   ;;  %v10840_v10 = vld [vmem:[%s12476_s28 + $0xd04] ss:$16 sps:$4 sm:$0xff]  }
  0xe7   : > { %7697 = vmatprep.subr.bf16.mxu1 %v10753_v11  ;;  %v10843_v11 = vld [vmem:[%s12476_s28 + $0xf04] ss:$16 sps:$4 sm:$0xff]  }
  0xe8   : > { %7601 = vmatmul.mubr.bf16.vlgmr.msra.gmra.mxu0 %v10742_v12  ;;  %v10838_v12 = vld [vmem:[%s12476_s28 + $0xd00] ss:$16 sps:$4 sm:$0xff]  }
  0xe9   : > { %7644 = vmatmul.mubr.bf16.vlgmr.msra.gmra.mxu1 %v10745_v13  ;;  %7655 = vmatpush1.bf16.msra.mxu0 %v10748_v14  ;;  %v10841_v13 = vld [vmem:[%s12476_s28 + $0xf00] ss:$16 sps:$4 sm:$0xff]   ;;  %v10852_v14 = vld [vmem:[%s12476_s28 + $0x10e4] ss:$16 sps:$4 sm:$0xff]  }
  0xea   : > { %7698 = vmatpush1.bf16.msra.mxu1 %v10751_v15  ;;  %7656 = vmatprep.subr.bf16.mxu0 %v10756_v16  ;;  %v10855_v15 = vld [vmem:[%s12476_s28 + $0x12e4] ss:$16 sps:$4 sm:$0xff]   ;;  %v10844_v16 = vld [vmem:[%s14077_s0 + $0x30] ss:$144 sps:$4 sm:$0xff]  }
  0xeb   : > { %7699 = vmatprep.subr.bf16.mxu1 %v10759_v17  ;;  %7686 = vmatprep.mubr.bf16.mxu0 %v10846_v18  ;;  %v10847_v17 = vld [vmem:[%s14077_s0 + $0x38] ss:$144 sps:$4 sm:$0xff]   ;;  %v10850_v18 = vld [vmem:[%s12476_s28 + $0x10e0] ss:$16 sps:$4 sm:$0xff]  }
  0xec   : > { %7729 = vmatprep.mubr.bf16.mxu1 %v10849_v19  ;;  %v10853_v19 = vld [vmem:[%s12476_s28 + $0x12e0] ss:$16 sps:$4 sm:$0xff]  }
  0xed   : > { %7657 = vmatpush1.bf16.msra.mxu0 %v10754_v20  ;;  %v10858_v20 = vld [vmem:[%s12476_s28 + $0x10c4] ss:$16 sps:$4 sm:$0xff]  }
  0xee   : > { %7700 = vmatpush1.bf16.msra.mxu1 %v10757_v21  ;;  %7658 = vmatprep.subr.bf16.mxu0 %v10762_v22  ;;  %v10861_v21 = vld [vmem:[%s12476_s28 + $0x12c4] ss:$16 sps:$4 sm:$0xff]  }
  0xef   : > { %7701 = vmatprep.subr.bf16.mxu1 %v10765_v23  ;;  %v10948_v22 = vld [vmem:[%s14077_s0 + $0x44] ss:$144 sps:$4 sm:$0xff]   ;;  %v10951_v23 = vld [vmem:[%s14077_s0 + $0x4c] ss:$144 sps:$4 sm:$0xff]  }
  0xf1   : > { %7659 = vmatpush1.bf16.msra.mxu0 %v10760_v24  ;;  %v10856_v24 = vld [vmem:[%s12476_s28 + $0x10c0] ss:$16 sps:$4 sm:$0xff]  }
  0xf2   : > { %7702 = vmatpush1.bf16.msra.mxu1 %v10763_v25  ;;  %7660 = vmatprep.subr.bf16.mxu0 %v10768_v26  ;;  %v10859_v25 = vld [vmem:[%s12476_s28 + $0x12c0] ss:$16 sps:$4 sm:$0xff]   ;;  %v10864_v26 = vld [vmem:[%s12476_s28 + $0x10a4] ss:$16 sps:$4 sm:$0xff]  }
  0xf3   : > { %7703 = vmatprep.subr.bf16.mxu1 %v10771_v27  ;;  %v10867_v27 = vld [vmem:[%s12476_s28 + $0x12a4] ss:$16 sps:$4 sm:$0xff]  }
  0xf5   : > { %7661 = vmatpush1.bf16.msra.mxu0 %v10766_v28  ;;  %v10862_v28 = vld [vmem:[%s12476_s28 + $0x10a0] ss:$16 sps:$4 sm:$0xff]  }
  0xf6   : > { %7704 = vmatpush1.bf16.msra.mxu1 %v10769_v29  ;;  %7662 = vmatprep.subr.bf16.mxu0 %v10774_v30  ;;  %v10865_v29 = vld [vmem:[%s12476_s28 + $0x12a0] ss:$16 sps:$4 sm:$0xff]   ;;  %v10870_v30 = vld [vmem:[%s12476_s28 + $0x1084] ss:$16 sps:$4 sm:$0xff]  }
  0xf7   : > { %7705 = vmatprep.subr.bf16.mxu1 %v10777_v31  ;;  %v10873_v31 = vld [vmem:[%s12476_s28 + $0x1284] ss:$16 sps:$4 sm:$0xff]  }
  0xf9   : > { %7663 = vmatpush1.bf16.msra.mxu0 %v10772_v32  ;;  %v10868_v32 = vld [vmem:[%s12476_s28 + $0x1080] ss:$16 sps:$4 sm:$0xff]  }
  0xfa   : > { %7706 = vmatpush1.bf16.msra.mxu1 %v10775_v33  ;;  %7664 = vmatprep.subr.bf16.mxu0 %v10780_v34  ;;  %v10871_v33 = vld [vmem:[%s12476_s28 + $0x1280] ss:$16 sps:$4 sm:$0xff]   ;;  %v10876_v34 = vld [vmem:[%s12476_s28 + $0x1064] ss:$16 sps:$4 sm:$0xff]  }
  0xfb   : > { %7707 = vmatprep.subr.bf16.mxu1 %v10783_v35  ;;  %v10879_v35 = vld [vmem:[%s12476_s28 + $0x1264] ss:$16 sps:$4 sm:$0xff]  }
  0xfd   : > { %7665 = vmatpush1.bf16.msra.mxu0 %v10778_v36  ;;  %v10874_v36 = vld [vmem:[%s12476_s28 + $0x1060] ss:$16 sps:$4 sm:$0xff]  }
  0xfe   : > { %7708 = vmatpush1.bf16.msra.mxu1 %v10781_v37  ;;  %7666 = vmatprep.subr.bf16.mxu0 %v10786_v38  ;;  %v10877_v37 = vld [vmem:[%s12476_s28 + $0x1260] ss:$16 sps:$4 sm:$0xff]   ;;  %v10882_v38 = vld [vmem:[%s12476_s28 + $0x1044] ss:$16 sps:$4 sm:$0xff]  }
  0xff   : > { %7709 = vmatprep.subr.bf16.mxu1 %v10789_v39  ;;  %v10885_v39 = vld [vmem:[%s12476_s28 + $0x1244] ss:$16 sps:$4 sm:$0xff]  }
 0x101   : > { %7667 = vmatpush1.bf16.msra.mxu0 %v10784_v40  ;;  %v10880_v40 = vld [vmem:[%s12476_s28 + $0x1040] ss:$16 sps:$4 sm:$0xff]  }
 0x102   : > { %7710 = vmatpush1.bf16.msra.mxu1 %v10787_v41  ;;  %7668 = vmatprep.subr.bf16.mxu0 %v10792_v42  ;;  %v10883_v41 = vld [vmem:[%s12476_s28 + $0x1240] ss:$16 sps:$4 sm:$0xff]   ;;  %v10888_v42 = vld [vmem:[%s12476_s28 + $0x1024] ss:$16 sps:$4 sm:$0xff]  }
 0x103   : > { %7711 = vmatprep.subr.bf16.mxu1 %v10795_v43  ;;  %v10891_v43 = vld [vmem:[%s12476_s28 + $0x1224] ss:$16 sps:$4 sm:$0xff]  }
 0x105   : > { %7669 = vmatpush1.bf16.msra.mxu0 %v10790_v44  ;;  %v10886_v44 = vld [vmem:[%s12476_s28 + $0x1020] ss:$16 sps:$4 sm:$0xff]  }
 0x106   : > { %7712 = vmatpush1.bf16.msra.mxu1 %v10793_v45  ;;  %7670 = vmatprep.subr.bf16.mxu0 %v10798_v46  ;;  %v10889_v45 = vld [vmem:[%s12476_s28 + $0x1220] ss:$16 sps:$4 sm:$0xff]   ;;  %v10894_v46 = vld [vmem:[%s12476_s28 + $0x1004] ss:$16 sps:$4 sm:$0xff]  }
 0x107   : > { %7713 = vmatprep.subr.bf16.mxu1 %v10801_v47  ;;  %v10897_v47 = vld [vmem:[%s12476_s28 + $0x1204] ss:$16 sps:$4 sm:$0xff]  }
 0x109   : > { %7671 = vmatpush2.bf16.msra.mxu0 %v10796_v48  ;;  %v10892_v48 = vld [vmem:[%s12476_s28 + $0x1000] ss:$16 sps:$4 sm:$0xff]  }
 0x10a   : > { %7714 = vmatpush2.bf16.msra.mxu1 %v10799_v49  ;;  %7672 = vmatprep.subr.bf16.mxu0 %v10804_v50  ;;  %v10895_v49 = vld [vmem:[%s12476_s28 + $0x1200] ss:$16 sps:$4 sm:$0xff]   ;;  %v10900_v50 = vld [vmem:[%s12476_s28 + $0x11e4] ss:$16 sps:$4 sm:$0xff]  }
 0x10b   : > { %7715 = vmatprep.subr.bf16.mxu1 %v10807_v51  ;;  %v10903_v51 = vld [vmem:[%s12476_s28 + $0x13e4] ss:$16 sps:$4 sm:$0xff]  }
 0x10d   : > { %7673 = vmatpush2.bf16.msra.mxu0 %v10802_v52  ;;  %v10898_v52 = vld [vmem:[%s12476_s28 + $0x11e0] ss:$16 sps:$4 sm:$0xff]  }
 0x10e   : > { %7716 = vmatpush2.bf16.msra.mxu1 %v10805_v53  ;;  %7674 = vmatprep.subr.bf16.mxu0 %v10810_v54  ;;  %v10901_v53 = vld [vmem:[%s12476_s28 + $0x13e0] ss:$16 sps:$4 sm:$0xff]   ;;  %v10906_v54 = vld [vmem:[%s12476_s28 + $0x11c4] ss:$16 sps:$4 sm:$0xff]  }
 0x10f   : > { %7717 = vmatprep.subr.bf16.mxu1 %v10813_v55  ;;  %v10909_v55 = vld [vmem:[%s12476_s28 + $0x13c4] ss:$16 sps:$4 sm:$0xff]  }
 0x111   : > { %7675 = vmatpush2.bf16.msra.mxu0 %v10808_v56  ;;  %v10904_v56 = vld [vmem:[%s12476_s28 + $0x11c0] ss:$16 sps:$4 sm:$0xff]  }
 0x112   : > { %7718 = vmatpush2.bf16.msra.mxu1 %v10811_v57  ;;  %7676 = vmatprep.subr.bf16.mxu0 %v10816_v58  ;;  %v10907_v57 = vld [vmem:[%s12476_s28 + $0x13c0] ss:$16 sps:$4 sm:$0xff]   ;;  %v10912_v58 = vld [vmem:[%s12476_s28 + $0x11a4] ss:$16 sps:$4 sm:$0xff]  }
 0x113   : > { %7719 = vmatprep.subr.bf16.mxu1 %v10819_v59  ;;  %v10915_v59 = vld [vmem:[%s12476_s28 + $0x13a4] ss:$16 sps:$4 sm:$0xff]  }
 0x115   : > { %7677 = vmatpush2.bf16.msra.mxu0 %v10814_v60  ;;  %v10910_v60 = vld [vmem:[%s12476_s28 + $0x11a0] ss:$16 sps:$4 sm:$0xff]  }
 0x116   : > { %7720 = vmatpush2.bf16.msra.mxu1 %v10817_v61  ;;  %7678 = vmatprep.subr.bf16.mxu0 %v10822_v62  ;;  %v10913_v61 = vld [vmem:[%s12476_s28 + $0x13a0] ss:$16 sps:$4 sm:$0xff]   ;;  %v10918_v62 = vld [vmem:[%s12476_s28 + $0x1184] ss:$16 sps:$4 sm:$0xff]  }
 0x117   : > { %7721 = vmatprep.subr.bf16.mxu1 %v10825_v63  ;;  %v10921_v63 = vld [vmem:[%s12476_s28 + $0x1384] ss:$16 sps:$4 sm:$0xff]  }
 0x119   : > { %7679 = vmatpush2.bf16.msra.mxu0 %v10820_v0  ;;  %v10916_v0 = vld [vmem:[%s12476_s28 + $0x1180] ss:$16 sps:$4 sm:$0xff]  }
 0x11a   : > { %7722 = vmatpush2.bf16.msra.mxu1 %v10823_v1  ;;  %7680 = vmatprep.subr.bf16.mxu0 %v10828_v2  ;;  %v10919_v1 = vld [vmem:[%s12476_s28 + $0x1380] ss:$16 sps:$4 sm:$0xff]   ;;  %v10924_v2 = vld [vmem:[%s12476_s28 + $0x1164] ss:$16 sps:$4 sm:$0xff]  }
 0x11b   : > { %7723 = vmatprep.subr.bf16.mxu1 %v10831_v3  ;;  %v10927_v3 = vld [vmem:[%s12476_s28 + $0x1364] ss:$16 sps:$4 sm:$0xff]  }
 0x11d   : > { %7681 = vmatpush2.bf16.msra.mxu0 %v10826_v4  ;;  %v10922_v4 = vld [vmem:[%s12476_s28 + $0x1160] ss:$16 sps:$4 sm:$0xff]  }
 0x11e   : > { %7724 = vmatpush2.bf16.msra.mxu1 %v10829_v5  ;;  %7682 = vmatprep.subr.bf16.mxu0 %v10834_v6  ;;  %v10925_v5 = vld [vmem:[%s12476_s28 + $0x1360] ss:$16 sps:$4 sm:$0xff]   ;;  %v10930_v6 = vld [vmem:[%s12476_s28 + $0x1144] ss:$16 sps:$4 sm:$0xff]  }
 0x11f   : > { %7725 = vmatprep.subr.bf16.mxu1 %v10837_v7  ;;  %v10933_v7 = vld [vmem:[%s12476_s28 + $0x1344] ss:$16 sps:$4 sm:$0xff]  }
 0x121   : > { %7683 = vmatpush2.bf16.msra.mxu0 %v10832_v8  ;;  %v10928_v8 = vld [vmem:[%s12476_s28 + $0x1140] ss:$16 sps:$4 sm:$0xff]  }
 0x122   : > { %7726 = vmatpush2.bf16.msra.mxu1 %v10835_v9  ;;  %7684 = vmatprep.subr.bf16.mxu0 %v10840_v10  ;;  %v10931_v9 = vld [vmem:[%s12476_s28 + $0x1340] ss:$16 sps:$4 sm:$0xff]   ;;  %v10936_v10 = vld [vmem:[%s12476_s28 + $0x1124] ss:$16 sps:$4 sm:$0xff]  }
 0x123   : > { %7727 = vmatprep.subr.bf16.mxu1 %v10843_v11  ;;  %v10939_v11 = vld [vmem:[%s12476_s28 + $0x1324] ss:$16 sps:$4 sm:$0xff]  }
 0x125   : > { %7685 = vmatpush2.bf16.msra.mxu0 %v10838_v12  ;;  %v10934_v12 = vld [vmem:[%s12476_s28 + $0x1120] ss:$16 sps:$4 sm:$0xff]  }
 0x126   : > { %7728 = vmatpush2.bf16.msra.mxu1 %v10841_v13  ;;  %7740 = vmatprep.subr.bf16.mxu0 %v10852_v14  ;;  %v10937_v13 = vld [vmem:[%s12476_s28 + $0x1320] ss:$16 sps:$4 sm:$0xff]   ;;  %v10942_v14 = vld [vmem:[%s12476_s28 + $0x1104] ss:$16 sps:$4 sm:$0xff]  }
 0x127   : > { %7783 = vmatprep.subr.bf16.mxu1 %v10855_v15  ;;  %v10945_v15 = vld [vmem:[%s12476_s28 + $0x1304] ss:$16 sps:$4 sm:$0xff]  }
 0x128   : > { %7687 = vmatmul.mubr.bf16.vlgmr.msra.gmra.mxu0 %v10844_v16  ;;  %v10940_v16 = vld [vmem:[%s12476_s28 + $0x1100] ss:$16 sps:$4 sm:$0xff]  }
 0x129   : > { %7730 = vmatmul.mubr.bf16.vlgmr.msra.gmra.mxu1 %v10847_v17  ;;  %7741 = vmatpush1.bf16.msra.mxu0 %v10850_v18  ;;  %v10943_v17 = vld [vmem:[%s12476_s28 + $0x1300] ss:$16 sps:$4 sm:$0xff]  }
 0x12a   : > { %7784 = vmatpush1.bf16.msra.mxu1 %v10853_v19  ;;  %7742 = vmatprep.subr.bf16.mxu0 %v10858_v20  ;;  %v10946_v18 = vld [vmem:[%s14077_s0 + $0x40] ss:$144 sps:$4 sm:$0xff]   ;;  %v10949_v19 = vld [vmem:[%s14077_s0 + $0x48] ss:$144 sps:$4 sm:$0xff]   ;;  %v10954_v20 = vld [vmem:[%s12476_s28 + $0x14e4] ss:$16 sps:$4 sm:$0xff]  }
 0x12b   : > { %7785 = vmatprep.subr.bf16.mxu1 %v10861_v21  ;;  %7772 = vmatprep.mubr.bf16.mxu0 %v10948_v22  ;;  %v10957_v21 = vld [vmem:[%s12476_s28 + $0x16e4] ss:$16 sps:$4 sm:$0xff]   ;;  %v10952_v22 = vld [vmem:[%s12476_s28 + $0x14e0] ss:$16 sps:$4 sm:$0xff]  }
 0x12c   : > { %7815 = vmatprep.mubr.bf16.mxu1 %v10951_v23  ;;  %v10955_v23 = vld [vmem:[%s12476_s28 + $0x16e0] ss:$16 sps:$4 sm:$0xff]  }
 0x12d   : > { %7743 = vmatpush1.bf16.msra.mxu0 %v10856_v24  ;;  %v10960_v24 = vld [vmem:[%s12476_s28 + $0x14c4] ss:$16 sps:$4 sm:$0xff]  }
 0x12e   : > { %7786 = vmatpush1.bf16.msra.mxu1 %v10859_v25  ;;  %7744 = vmatprep.subr.bf16.mxu0 %v10864_v26  ;;  %v10963_v25 = vld [vmem:[%s12476_s28 + $0x16c4] ss:$16 sps:$4 sm:$0xff]   ;;  %v10958_v26 = vld [vmem:[%s12476_s28 + $0x14c0] ss:$16 sps:$4 sm:$0xff]  }
 0x12f   : > { %7787 = vmatprep.subr.bf16.mxu1 %v10867_v27  ;;  %v10961_v27 = vld [vmem:[%s12476_s28 + $0x16c0] ss:$16 sps:$4 sm:$0xff]  }
 0x131   : > { %7745 = vmatpush1.bf16.msra.mxu0 %v10862_v28  ;;  %v11050_v28 = vld [vmem:[%s14077_s0 + $0x54] ss:$144 sps:$4 sm:$0xff]  }
 0x132   : > { %7788 = vmatpush1.bf16.msra.mxu1 %v10865_v29  ;;  %7746 = vmatprep.subr.bf16.mxu0 %v10870_v30  ;;  %v11053_v29 = vld [vmem:[%s14077_s0 + $0x5c] ss:$144 sps:$4 sm:$0xff]   ;;  %v10966_v30 = vld [vmem:[%s12476_s28 + $0x14a4] ss:$16 sps:$4 sm:$0xff]  }
 0x133   : > { %7789 = vmatprep.subr.bf16.mxu1 %v10873_v31  ;;  %v10969_v31 = vld [vmem:[%s12476_s28 + $0x16a4] ss:$16 sps:$4 sm:$0xff]  }
 0x135   : > { %7747 = vmatpush1.bf16.msra.mxu0 %v10868_v32  ;;  %v10964_v32 = vld [vmem:[%s12476_s28 + $0x14a0] ss:$16 sps:$4 sm:$0xff]  }
 0x136   : > { %7790 = vmatpush1.bf16.msra.mxu1 %v10871_v33  ;;  %7748 = vmatprep.subr.bf16.mxu0 %v10876_v34  ;;  %v10967_v33 = vld [vmem:[%s12476_s28 + $0x16a0] ss:$16 sps:$4 sm:$0xff]   ;;  %v10972_v34 = vld [vmem:[%s12476_s28 + $0x1484] ss:$16 sps:$4 sm:$0xff]  }
 0x137   : > { %7791 = vmatprep.subr.bf16.mxu1 %v10879_v35  ;;  %v10975_v35 = vld [vmem:[%s12476_s28 + $0x1684] ss:$16 sps:$4 sm:$0xff]  }
 0x139   : > { %7749 = vmatpush1.bf16.msra.mxu0 %v10874_v36  ;;  %v10970_v36 = vld [vmem:[%s12476_s28 + $0x1480] ss:$16 sps:$4 sm:$0xff]  }
 0x13a   : > { %7792 = vmatpush1.bf16.msra.mxu1 %v10877_v37  ;;  %7750 = vmatprep.subr.bf16.mxu0 %v10882_v38  ;;  %v10973_v37 = vld [vmem:[%s12476_s28 + $0x1680] ss:$16 sps:$4 sm:$0xff]   ;;  %v10978_v38 = vld [vmem:[%s12476_s28 + $0x1464] ss:$16 sps:$4 sm:$0xff]  }
 0x13b   : > { %7793 = vmatprep.subr.bf16.mxu1 %v10885_v39  ;;  %v10981_v39 = vld [vmem:[%s12476_s28 + $0x1664] ss:$16 sps:$4 sm:$0xff]  }
 0x13d   : > { %7751 = vmatpush1.bf16.msra.mxu0 %v10880_v40  ;;  %v10976_v40 = vld [vmem:[%s12476_s28 + $0x1460] ss:$16 sps:$4 sm:$0xff]  }
 0x13e   : > { %7794 = vmatpush1.bf16.msra.mxu1 %v10883_v41  ;;  %7752 = vmatprep.subr.bf16.mxu0 %v10888_v42  ;;  %v10979_v41 = vld [vmem:[%s12476_s28 + $0x1660] ss:$16 sps:$4 sm:$0xff]   ;;  %v10984_v42 = vld [vmem:[%s12476_s28 + $0x1444] ss:$16 sps:$4 sm:$0xff]  }
 0x13f   : > { %7795 = vmatprep.subr.bf16.mxu1 %v10891_v43  ;;  %v10987_v43 = vld [vmem:[%s12476_s28 + $0x1644] ss:$16 sps:$4 sm:$0xff]  }
 0x141   : > { %7753 = vmatpush1.bf16.msra.mxu0 %v10886_v44  ;;  %v10982_v44 = vld [vmem:[%s12476_s28 + $0x1440] ss:$16 sps:$4 sm:$0xff]  }
 0x142   : > { %7796 = vmatpush1.bf16.msra.mxu1 %v10889_v45  ;;  %7754 = vmatprep.subr.bf16.mxu0 %v10894_v46  ;;  %v10985_v45 = vld [vmem:[%s12476_s28 + $0x1640] ss:$16 sps:$4 sm:$0xff]   ;;  %v10990_v46 = vld [vmem:[%s12476_s28 + $0x1424] ss:$16 sps:$4 sm:$0xff]  }
 0x143   : > { %7797 = vmatprep.subr.bf16.mxu1 %v10897_v47  ;;  %v10993_v47 = vld [vmem:[%s12476_s28 + $0x1624] ss:$16 sps:$4 sm:$0xff]  }
 0x145   : > { %7755 = vmatpush1.bf16.msra.mxu0 %v10892_v48  ;;  %v10988_v48 = vld [vmem:[%s12476_s28 + $0x1420] ss:$16 sps:$4 sm:$0xff]  }
 0x146   : > { %7798 = vmatpush1.bf16.msra.mxu1 %v10895_v49  ;;  %7756 = vmatprep.subr.bf16.mxu0 %v10900_v50  ;;  %v10991_v49 = vld [vmem:[%s12476_s28 + $0x1620] ss:$16 sps:$4 sm:$0xff]   ;;  %v10996_v50 = vld [vmem:[%s12476_s28 + $0x1404] ss:$16 sps:$4 sm:$0xff]  }
 0x147   : > { %7799 = vmatprep.subr.bf16.mxu1 %v10903_v51  ;;  %v10999_v51 = vld [vmem:[%s12476_s28 + $0x1604] ss:$16 sps:$4 sm:$0xff]  }
 0x149   : > { %7757 = vmatpush2.bf16.msra.mxu0 %v10898_v52  ;;  %v10994_v52 = vld [vmem:[%s12476_s28 + $0x1400] ss:$16 sps:$4 sm:$0xff]  }
 0x14a   : > { %7800 = vmatpush2.bf16.msra.mxu1 %v10901_v53  ;;  %7758 = vmatprep.subr.bf16.mxu0 %v10906_v54  ;;  %v10997_v53 = vld [vmem:[%s12476_s28 + $0x1600] ss:$16 sps:$4 sm:$0xff]   ;;  %v11002_v54 = vld [vmem:[%s12476_s28 + $0x15e4] ss:$16 sps:$4 sm:$0xff]  }
 0x14b   : > { %7801 = vmatprep.subr.bf16.mxu1 %v10909_v55  ;;  %v11005_v55 = vld [vmem:[%s12476_s28 + $0x17e4] ss:$16 sps:$4 sm:$0xff]  }
 0x14d   : > { %7759 = vmatpush2.bf16.msra.mxu0 %v10904_v56  ;;  %v11000_v56 = vld [vmem:[%s12476_s28 + $0x15e0] ss:$16 sps:$4 sm:$0xff]  }
 0x14e   : > { %7802 = vmatpush2.bf16.msra.mxu1 %v10907_v57  ;;  %7760 = vmatprep.subr.bf16.mxu0 %v10912_v58  ;;  %v11003_v57 = vld [vmem:[%s12476_s28 + $0x17e0] ss:$16 sps:$4 sm:$0xff]   ;;  %v11008_v58 = vld [vmem:[%s12476_s28 + $0x15c4] ss:$16 sps:$4 sm:$0xff]  }
 0x14f   : > { %7803 = vmatprep.subr.bf16.mxu1 %v10915_v59  ;;  %v11011_v59 = vld [vmem:[%s12476_s28 + $0x17c4] ss:$16 sps:$4 sm:$0xff]  }
 0x151   : > { %7761 = vmatpush2.bf16.msra.mxu0 %v10910_v60  ;;  %v11006_v60 = vld [vmem:[%s12476_s28 + $0x15c0] ss:$16 sps:$4 sm:$0xff]  }
 0x152   : > { %7804 = vmatpush2.bf16.msra.mxu1 %v10913_v61  ;;  %7762 = vmatprep.subr.bf16.mxu0 %v10918_v62  ;;  %v11009_v61 = vld [vmem:[%s12476_s28 + $0x17c0] ss:$16 sps:$4 sm:$0xff]   ;;  %v11014_v62 = vld [vmem:[%s12476_s28 + $0x15a4] ss:$16 sps:$4 sm:$0xff]  }
 0x153   : > { %7805 = vmatprep.subr.bf16.mxu1 %v10921_v63  ;;  %v11017_v63 = vld [vmem:[%s12476_s28 + $0x17a4] ss:$16 sps:$4 sm:$0xff]  }
 0x155   : > { %7763 = vmatpush2.bf16.msra.mxu0 %v10916_v0  ;;  %v11012_v0 = vld [vmem:[%s12476_s28 + $0x15a0] ss:$16 sps:$4 sm:$0xff]  }
 0x156   : > { %7806 = vmatpush2.bf16.msra.mxu1 %v10919_v1  ;;  %7764 = vmatprep.subr.bf16.mxu0 %v10924_v2  ;;  %v11015_v1 = vld [vmem:[%s12476_s28 + $0x17a0] ss:$16 sps:$4 sm:$0xff]   ;;  %v11020_v2 = vld [vmem:[%s12476_s28 + $0x1584] ss:$16 sps:$4 sm:$0xff]  }
 0x157   : > { %7807 = vmatprep.subr.bf16.mxu1 %v10927_v3  ;;  %v11023_v3 = vld [vmem:[%s12476_s28 + $0x1784] ss:$16 sps:$4 sm:$0xff]  }
 0x159   : > { %7765 = vmatpush2.bf16.msra.mxu0 %v10922_v4  ;;  %v11018_v4 = vld [vmem:[%s12476_s28 + $0x1580] ss:$16 sps:$4 sm:$0xff]  }
 0x15a   : > { %7808 = vmatpush2.bf16.msra.mxu1 %v10925_v5  ;;  %7766 = vmatprep.subr.bf16.mxu0 %v10930_v6  ;;  %v11021_v5 = vld [vmem:[%s12476_s28 + $0x1780] ss:$16 sps:$4 sm:$0xff]   ;;  %v11026_v6 = vld [vmem:[%s12476_s28 + $0x1564] ss:$16 sps:$4 sm:$0xff]  }
 0x15b   : > { %7809 = vmatprep.subr.bf16.mxu1 %v10933_v7  ;;  %v11029_v7 = vld [vmem:[%s12476_s28 + $0x1764] ss:$16 sps:$4 sm:$0xff]  }
 0x15d   : > { %7767 = vmatpush2.bf16.msra.mxu0 %v10928_v8  ;;  %v11024_v8 = vld [vmem:[%s12476_s28 + $0x1560] ss:$16 sps:$4 sm:$0xff]  }
 0x15e   : > { %7810 = vmatpush2.bf16.msra.mxu1 %v10931_v9  ;;  %7768 = vmatprep.subr.bf16.mxu0 %v10936_v10  ;;  %v11027_v9 = vld [vmem:[%s12476_s28 + $0x1760] ss:$16 sps:$4 sm:$0xff]   ;;  %v11032_v10 = vld [vmem:[%s12476_s28 + $0x1544] ss:$16 sps:$4 sm:$0xff]  }
 0x15f   : > { %7811 = vmatprep.subr.bf16.mxu1 %v10939_v11  ;;  %v11035_v11 = vld [vmem:[%s12476_s28 + $0x1744] ss:$16 sps:$4 sm:$0xff]  }
 0x161   : > { %7769 = vmatpush2.bf16.msra.mxu0 %v10934_v12  ;;  %v11030_v12 = vld [vmem:[%s12476_s28 + $0x1540] ss:$16 sps:$4 sm:$0xff]  }
 0x162   : > { %7812 = vmatpush2.bf16.msra.mxu1 %v10937_v13  ;;  %7770 = vmatprep.subr.bf16.mxu0 %v10942_v14  ;;  %v11033_v13 = vld [vmem:[%s12476_s28 + $0x1740] ss:$16 sps:$4 sm:$0xff]   ;;  %v11038_v14 = vld [vmem:[%s12476_s28 + $0x1524] ss:$16 sps:$4 sm:$0xff]  }
 0x163   : > { %7813 = vmatprep.subr.bf16.mxu1 %v10945_v15  ;;  %v11041_v15 = vld [vmem:[%s12476_s28 + $0x1724] ss:$16 sps:$4 sm:$0xff]  }
 0x165   : > { %7771 = vmatpush2.bf16.msra.mxu0 %v10940_v16  ;;  %v11036_v16 = vld [vmem:[%s12476_s28 + $0x1520] ss:$16 sps:$4 sm:$0xff]  }
 0x166   : > { %7814 = vmatpush2.bf16.msra.mxu1 %v10943_v17  ;;  %7826 = vmatprep.subr.bf16.mxu0 %v10954_v20  ;;  %v11039_v17 = vld [vmem:[%s12476_s28 + $0x1720] ss:$16 sps:$4 sm:$0xff]  }
 0x167   : > { %7869 = vmatprep.subr.bf16.mxu1 %v10957_v21  ;;  %v11042_v20 = vld [vmem:[%s12476_s28 + $0x1500] ss:$16 sps:$4 sm:$0xff]  }
 0x168   : > { %7773 = vmatmul.mubr.bf16.vlgmr.msra.gmra.mxu0 %v10946_v18  ;;  %v11044_v18 = vld [vmem:[%s12476_s28 + $0x1504] ss:$16 sps:$4 sm:$0xff]   ;;  %v11045_v21 = vld [vmem:[%s12476_s28 + $0x1700] ss:$16 sps:$4 sm:$0xff]  }
 0x169   : > { %7816 = vmatmul.mubr.bf16.vlgmr.msra.gmra.mxu1 %v10949_v19  ;;  %7827 = vmatpush1.bf16.msra.mxu0 %v10952_v22  ;;  %v11047_v19 = vld [vmem:[%s12476_s28 + $0x1704] ss:$16 sps:$4 sm:$0xff]   ;;  %v11048_v22 = vld [vmem:[%s14077_s0 + $0x50] ss:$144 sps:$4 sm:$0xff]  }
 0x16a   : > { %7870 = vmatpush1.bf16.msra.mxu1 %v10955_v23  ;;  %7828 = vmatprep.subr.bf16.mxu0 %v10960_v24  ;;  %v11051_v23 = vld [vmem:[%s14077_s0 + $0x58] ss:$144 sps:$4 sm:$0xff]   ;;  %v11056_v24 = vld [vmem:[%s12476_s28 + $0x18e4] ss:$16 sps:$4 sm:$0xff]  }
 0x16b   : > { %7871 = vmatprep.subr.bf16.mxu1 %v10963_v25  ;;  %7858 = vmatprep.mubr.bf16.mxu0 %v11050_v28  ;;  %v11059_v25 = vld [vmem:[%s12476_s28 + $0x1ae4] ss:$16 sps:$4 sm:$0xff]  }
 0x16c   : > { %7901 = vmatprep.mubr.bf16.mxu1 %v11053_v29  ;;  %v11062_v28 = vld [vmem:[%s12476_s28 + $0x18c4] ss:$16 sps:$4 sm:$0xff]  }
 0x16d   : > { %7829 = vmatpush1.bf16.msra.mxu0 %v10958_v26  ;;  %v11054_v26 = vld [vmem:[%s12476_s28 + $0x18e0] ss:$16 sps:$4 sm:$0xff]   ;;  %v11065_v29 = vld [vmem:[%s12476_s28 + $0x1ac4] ss:$16 sps:$4 sm:$0xff]  }
 0x16e   : > { %7872 = vmatpush1.bf16.msra.mxu1 %v10961_v27  ;;  %7830 = vmatprep.subr.bf16.mxu0 %v10966_v30  ;;  %v11057_v27 = vld [vmem:[%s12476_s28 + $0x1ae0] ss:$16 sps:$4 sm:$0xff]  }
 0x16f   : > { %7873 = vmatprep.subr.bf16.mxu1 %v10969_v31  ;;  %v11060_v30 = vld [vmem:[%s12476_s28 + $0x18c0] ss:$16 sps:$4 sm:$0xff]  }
 0x170   : > { %v11063_v31 = vld [vmem:[%s12476_s28 + $0x1ac0] ss:$16 sps:$4 sm:$0xff]  }
 0x171   : > { %7831 = vmatpush1.bf16.msra.mxu0 %v10964_v32  ;;  %v11152_v32 = vld [vmem:[%s14077_s0 + $0x64] ss:$144 sps:$4 sm:$0xff]  }
 0x172   : > { %7874 = vmatpush1.bf16.msra.mxu1 %v10967_v33  ;;  %7832 = vmatprep.subr.bf16.mxu0 %v10972_v34  ;;  %v11155_v33 = vld [vmem:[%s14077_s0 + $0x6c] ss:$144 sps:$4 sm:$0xff]   ;;  %v11068_v34 = vld [vmem:[%s12476_s28 + $0x18a4] ss:$16 sps:$4 sm:$0xff]  }
 0x173   : > { %7875 = vmatprep.subr.bf16.mxu1 %v10975_v35  ;;  %v11071_v35 = vld [vmem:[%s12476_s28 + $0x1aa4] ss:$16 sps:$4 sm:$0xff]  }
 0x175   : > { %7833 = vmatpush1.bf16.msra.mxu0 %v10970_v36  ;;  %v11066_v36 = vld [vmem:[%s12476_s28 + $0x18a0] ss:$16 sps:$4 sm:$0xff]  }
 0x176   : > { %7876 = vmatpush1.bf16.msra.mxu1 %v10973_v37  ;;  %7834 = vmatprep.subr.bf16.mxu0 %v10978_v38  ;;  %v11069_v37 = vld [vmem:[%s12476_s28 + $0x1aa0] ss:$16 sps:$4 sm:$0xff]   ;;  %v11074_v38 = vld [vmem:[%s12476_s28 + $0x1884] ss:$16 sps:$4 sm:$0xff]  }
 0x177   : > { %7877 = vmatprep.subr.bf16.mxu1 %v10981_v39  ;;  %v11077_v39 = vld [vmem:[%s12476_s28 + $0x1a84] ss:$16 sps:$4 sm:$0xff]  }
 0x179   : > { %7835 = vmatpush1.bf16.msra.mxu0 %v10976_v40  ;;  %v11072_v40 = vld [vmem:[%s12476_s28 + $0x1880] ss:$16 sps:$4 sm:$0xff]  }
 0x17a   : > { %7878 = vmatpush1.bf16.msra.mxu1 %v10979_v41  ;;  %7836 = vmatprep.subr.bf16.mxu0 %v10984_v42  ;;  %v11075_v41 = vld [vmem:[%s12476_s28 + $0x1a80] ss:$16 sps:$4 sm:$0xff]   ;;  %v11080_v42 = vld [vmem:[%s12476_s28 + $0x1864] ss:$16 sps:$4 sm:$0xff]  }
 0x17b   : > { %7879 = vmatprep.subr.bf16.mxu1 %v10987_v43  ;;  %v11083_v43 = vld [vmem:[%s12476_s28 + $0x1a64] ss:$16 sps:$4 sm:$0xff]  }
 0x17d   : > { %7837 = vmatpush1.bf16.msra.mxu0 %v10982_v44  ;;  %v11078_v44 = vld [vmem:[%s12476_s28 + $0x1860] ss:$16 sps:$4 sm:$0xff]  }
 0x17e   : > { %7880 = vmatpush1.bf16.msra.mxu1 %v10985_v45  ;;  %7838 = vmatprep.subr.bf16.mxu0 %v10990_v46  ;;  %v11081_v45 = vld [vmem:[%s12476_s28 + $0x1a60] ss:$16 sps:$4 sm:$0xff]   ;;  %v11086_v46 = vld [vmem:[%s12476_s28 + $0x1844] ss:$16 sps:$4 sm:$0xff]  }
 0x17f   : > { %7881 = vmatprep.subr.bf16.mxu1 %v10993_v47  ;;  %v11089_v47 = vld [vmem:[%s12476_s28 + $0x1a44] ss:$16 sps:$4 sm:$0xff]  }
 0x181   : > { %7839 = vmatpush1.bf16.msra.mxu0 %v10988_v48  ;;  %v11084_v48 = vld [vmem:[%s12476_s28 + $0x1840] ss:$16 sps:$4 sm:$0xff]  }
 0x182   : > { %7882 = vmatpush1.bf16.msra.mxu1 %v10991_v49  ;;  %7840 = vmatprep.subr.bf16.mxu0 %v10996_v50  ;;  %v11087_v49 = vld [vmem:[%s12476_s28 + $0x1a40] ss:$16 sps:$4 sm:$0xff]   ;;  %v11092_v50 = vld [vmem:[%s12476_s28 + $0x1824] ss:$16 sps:$4 sm:$0xff]  }
 0x183   : > { %7883 = vmatprep.subr.bf16.mxu1 %v10999_v51  ;;  %v11095_v51 = vld [vmem:[%s12476_s28 + $0x1a24] ss:$16 sps:$4 sm:$0xff]  }
 0x185   : > { %7841 = vmatpush1.bf16.msra.mxu0 %v10994_v52  ;;  %v11090_v52 = vld [vmem:[%s12476_s28 + $0x1820] ss:$16 sps:$4 sm:$0xff]  }
 0x186   : > { %7884 = vmatpush1.bf16.msra.mxu1 %v10997_v53  ;;  %7842 = vmatprep.subr.bf16.mxu0 %v11002_v54  ;;  %v11093_v53 = vld [vmem:[%s12476_s28 + $0x1a20] ss:$16 sps:$4 sm:$0xff]   ;;  %v11098_v54 = vld [vmem:[%s12476_s28 + $0x1804] ss:$16 sps:$4 sm:$0xff]  }
 0x187   : > { %7885 = vmatprep.subr.bf16.mxu1 %v11005_v55  ;;  %v11101_v55 = vld [vmem:[%s12476_s28 + $0x1a04] ss:$16 sps:$4 sm:$0xff]  }
 0x189   : > { %7843 = vmatpush2.bf16.msra.mxu0 %v11000_v56  ;;  %v11096_v56 = vld [vmem:[%s12476_s28 + $0x1800] ss:$16 sps:$4 sm:$0xff]  }
 0x18a   : > { %7886 = vmatpush2.bf16.msra.mxu1 %v11003_v57  ;;  %7844 = vmatprep.subr.bf16.mxu0 %v11008_v58  ;;  %v11099_v57 = vld [vmem:[%s12476_s28 + $0x1a00] ss:$16 sps:$4 sm:$0xff]   ;;  %v11104_v58 = vld [vmem:[%s12476_s28 + $0x19e4] ss:$16 sps:$4 sm:$0xff]  }
 0x18b   : > { %7887 = vmatprep.subr.bf16.mxu1 %v11011_v59  ;;  %v11107_v59 = vld [vmem:[%s12476_s28 + $0x1be4] ss:$16 sps:$4 sm:$0xff]  }
 0x18d   : > { %7845 = vmatpush2.bf16.msra.mxu0 %v11006_v60  ;;  %v11102_v60 = vld [vmem:[%s12476_s28 + $0x19e0] ss:$16 sps:$4 sm:$0xff]  }
 0x18e   : > { %7888 = vmatpush2.bf16.msra.mxu1 %v11009_v61  ;;  %7846 = vmatprep.subr.bf16.mxu0 %v11014_v62  ;;  %v11105_v61 = vld [vmem:[%s12476_s28 + $0x1be0] ss:$16 sps:$4 sm:$0xff]   ;;  %v11110_v62 = vld [vmem:[%s12476_s28 + $0x19c4] ss:$16 sps:$4 sm:$0xff]  }
 0x18f   : > { %7889 = vmatprep.subr.bf16.mxu1 %v11017_v63  ;;  %v11113_v63 = vld [vmem:[%s12476_s28 + $0x1bc4] ss:$16 sps:$4 sm:$0xff]  }
 0x191   : > { %7847 = vmatpush2.bf16.msra.mxu0 %v11012_v0  ;;  %v11108_v0 = vld [vmem:[%s12476_s28 + $0x19c0] ss:$16 sps:$4 sm:$0xff]  }
 0x192   : > { %7890 = vmatpush2.bf16.msra.mxu1 %v11015_v1  ;;  %7848 = vmatprep.subr.bf16.mxu0 %v11020_v2  ;;  %v11111_v1 = vld [vmem:[%s12476_s28 + $0x1bc0] ss:$16 sps:$4 sm:$0xff]   ;;  %v11116_v2 = vld [vmem:[%s12476_s28 + $0x19a4] ss:$16 sps:$4 sm:$0xff]  }
 0x193   : > { %7891 = vmatprep.subr.bf16.mxu1 %v11023_v3  ;;  %v11119_v3 = vld [vmem:[%s12476_s28 + $0x1ba4] ss:$16 sps:$4 sm:$0xff]  }
 0x195   : > { %7849 = vmatpush2.bf16.msra.mxu0 %v11018_v4  ;;  %v11114_v4 = vld [vmem:[%s12476_s28 + $0x19a0] ss:$16 sps:$4 sm:$0xff]  }
 0x196   : > { %7892 = vmatpush2.bf16.msra.mxu1 %v11021_v5  ;;  %7850 = vmatprep.subr.bf16.mxu0 %v11026_v6  ;;  %v11117_v5 = vld [vmem:[%s12476_s28 + $0x1ba0] ss:$16 sps:$4 sm:$0xff]   ;;  %v11122_v6 = vld [vmem:[%s12476_s28 + $0x1984] ss:$16 sps:$4 sm:$0xff]  }
 0x197   : > { %7893 = vmatprep.subr.bf16.mxu1 %v11029_v7  ;;  %v11125_v7 = vld [vmem:[%s12476_s28 + $0x1b84] ss:$16 sps:$4 sm:$0xff]  }
 0x199   : > { %7851 = vmatpush2.bf16.msra.mxu0 %v11024_v8  ;;  %v11120_v8 = vld [vmem:[%s12476_s28 + $0x1980] ss:$16 sps:$4 sm:$0xff]  }
 0x19a   : > { %7894 = vmatpush2.bf16.msra.mxu1 %v11027_v9  ;;  %7852 = vmatprep.subr.bf16.mxu0 %v11032_v10  ;;  %v11123_v9 = vld [vmem:[%s12476_s28 + $0x1b80] ss:$16 sps:$4 sm:$0xff]   ;;  %v11128_v10 = vld [vmem:[%s12476_s28 + $0x1964] ss:$16 sps:$4 sm:$0xff]  }
 0x19b   : > { %7895 = vmatprep.subr.bf16.mxu1 %v11035_v11  ;;  %v11131_v11 = vld [vmem:[%s12476_s28 + $0x1b64] ss:$16 sps:$4 sm:$0xff]  }
 0x19d   : > { %7853 = vmatpush2.bf16.msra.mxu0 %v11030_v12  ;;  %v11126_v12 = vld [vmem:[%s12476_s28 + $0x1960] ss:$16 sps:$4 sm:$0xff]  }
 0x19e   : > { %7896 = vmatpush2.bf16.msra.mxu1 %v11033_v13  ;;  %7854 = vmatprep.subr.bf16.mxu0 %v11038_v14  ;;  %v11129_v13 = vld [vmem:[%s12476_s28 + $0x1b60] ss:$16 sps:$4 sm:$0xff]   ;;  %v11134_v14 = vld [vmem:[%s12476_s28 + $0x1944] ss:$16 sps:$4 sm:$0xff]  }
 0x19f   : > { %7897 = vmatprep.subr.bf16.mxu1 %v11041_v15  ;;  %v11137_v15 = vld [vmem:[%s12476_s28 + $0x1b44] ss:$16 sps:$4 sm:$0xff]  }
 0x1a1   : > { %7855 = vmatpush2.bf16.msra.mxu0 %v11036_v16  ;;  %v11132_v16 = vld [vmem:[%s12476_s28 + $0x1940] ss:$16 sps:$4 sm:$0xff]  }
 0x1a2   : > { %7898 = vmatpush2.bf16.msra.mxu1 %v11039_v17  ;;  %7856 = vmatprep.subr.bf16.mxu0 %v11044_v18  ;;  %v11135_v17 = vld [vmem:[%s12476_s28 + $0x1b40] ss:$16 sps:$4 sm:$0xff]   ;;  %v11140_v18 = vld [vmem:[%s12476_s28 + $0x1924] ss:$16 sps:$4 sm:$0xff]  }
 0x1a3   : > { %7899 = vmatprep.subr.bf16.mxu1 %v11047_v19  ;;  %v11143_v19 = vld [vmem:[%s12476_s28 + $0x1b24] ss:$16 sps:$4 sm:$0xff]  }
 0x1a5   : > { %7857 = vmatpush2.bf16.msra.mxu0 %v11042_v20  ;;  %v11138_v20 = vld [vmem:[%s12476_s28 + $0x1920] ss:$16 sps:$4 sm:$0xff]  }
 0x1a6   : > { %7900 = vmatpush2.bf16.msra.mxu1 %v11045_v21  ;;  %7912 = vmatprep.subr.bf16.mxu0 %v11056_v24  ;;  %v11141_v21 = vld [vmem:[%s12476_s28 + $0x1b20] ss:$16 sps:$4 sm:$0xff]  }
 0x1a7   : > { %7955 = vmatprep.subr.bf16.mxu1 %v11059_v25  ;;  %v11144_v24 = vld [vmem:[%s12476_s28 + $0x1900] ss:$16 sps:$4 sm:$0xff]  }
 0x1a8   : > { %7859 = vmatmul.mubr.bf16.vlgmr.msra.gmra.mxu0 %v11048_v22  ;;  %v11146_v22 = vld [vmem:[%s12476_s28 + $0x1904] ss:$16 sps:$4 sm:$0xff]   ;;  %v11147_v25 = vld [vmem:[%s12476_s28 + $0x1b00] ss:$16 sps:$4 sm:$0xff]  }
 0x1a9   : > { %7902 = vmatmul.mubr.bf16.vlgmr.msra.gmra.mxu1 %v11051_v23  ;;  %7913 = vmatpush1.bf16.msra.mxu0 %v11054_v26  ;;  %v11149_v23 = vld [vmem:[%s12476_s28 + $0x1b04] ss:$16 sps:$4 sm:$0xff]   ;;  %v11150_v26 = vld [vmem:[%s14077_s0 + $0x60] ss:$144 sps:$4 sm:$0xff]  }
 0x1aa   : > { %7956 = vmatpush1.bf16.msra.mxu1 %v11057_v27  ;;  %7914 = vmatprep.subr.bf16.mxu0 %v11062_v28  ;;  %v11153_v27 = vld [vmem:[%s14077_s0 + $0x68] ss:$144 sps:$4 sm:$0xff]   ;;  %v11158_v28 = vld [vmem:[%s12476_s28 + $0x1ce4] ss:$16 sps:$4 sm:$0xff]  }
 0x1ab   : > { %7957 = vmatprep.subr.bf16.mxu1 %v11065_v29  ;;  %7944 = vmatprep.mubr.bf16.mxu0 %v11152_v32  ;;  %v11161_v29 = vld [vmem:[%s12476_s28 + $0x1ee4] ss:$16 sps:$4 sm:$0xff]  }
 0x1ac   : > { %7987 = vmatprep.mubr.bf16.mxu1 %v11155_v33  ;;  %v11164_v32 = vld [vmem:[%s12476_s28 + $0x1cc4] ss:$16 sps:$4 sm:$0xff]  }
 0x1ad   : > { %7915 = vmatpush1.bf16.msra.mxu0 %v11060_v30  ;;  %v11156_v30 = vld [vmem:[%s12476_s28 + $0x1ce0] ss:$16 sps:$4 sm:$0xff]   ;;  %v11167_v33 = vld [vmem:[%s12476_s28 + $0x1ec4] ss:$16 sps:$4 sm:$0xff]  }
 0x1ae   : > { %7958 = vmatpush1.bf16.msra.mxu1 %v11063_v31  ;;  %7916 = vmatprep.subr.bf16.mxu0 %v11068_v34  ;;  %v11159_v31 = vld [vmem:[%s12476_s28 + $0x1ee0] ss:$16 sps:$4 sm:$0xff]  }
 0x1af   : > { %7959 = vmatprep.subr.bf16.mxu1 %v11071_v35  ;;  %v11162_v34 = vld [vmem:[%s12476_s28 + $0x1cc0] ss:$16 sps:$4 sm:$0xff]  }
 0x1b0   : > { %v11165_v35 = vld [vmem:[%s12476_s28 + $0x1ec0] ss:$16 sps:$4 sm:$0xff]  }
 0x1b1   : > { %7917 = vmatpush1.bf16.msra.mxu0 %v11066_v36  ;;  %v11254_v36 = vld [vmem:[%s14077_s0 + $0x74] ss:$144 sps:$4 sm:$0xff]  }
 0x1b2   : > { %7960 = vmatpush1.bf16.msra.mxu1 %v11069_v37  ;;  %7918 = vmatprep.subr.bf16.mxu0 %v11074_v38  ;;  %v11257_v37 = vld [vmem:[%s14077_s0 + $0x7c] ss:$144 sps:$4 sm:$0xff]   ;;  %v11170_v38 = vld [vmem:[%s12476_s28 + $0x1ca4] ss:$16 sps:$4 sm:$0xff]  }
 0x1b3   : > { %7961 = vmatprep.subr.bf16.mxu1 %v11077_v39  ;;  %v11173_v39 = vld [vmem:[%s12476_s28 + $0x1ea4] ss:$16 sps:$4 sm:$0xff]  }
 0x1b5   : > { %7919 = vmatpush1.bf16.msra.mxu0 %v11072_v40  ;;  %v11168_v40 = vld [vmem:[%s12476_s28 + $0x1ca0] ss:$16 sps:$4 sm:$0xff]  }
 0x1b6   : > { %7962 = vmatpush1.bf16.msra.mxu1 %v11075_v41  ;;  %7920 = vmatprep.subr.bf16.mxu0 %v11080_v42  ;;  %v11171_v41 = vld [vmem:[%s12476_s28 + $0x1ea0] ss:$16 sps:$4 sm:$0xff]   ;;  %v11176_v42 = vld [vmem:[%s12476_s28 + $0x1c84] ss:$16 sps:$4 sm:$0xff]  }
 0x1b7   : > { %7963 = vmatprep.subr.bf16.mxu1 %v11083_v43  ;;  %v11179_v43 = vld [vmem:[%s12476_s28 + $0x1e84] ss:$16 sps:$4 sm:$0xff]  }
 0x1b9   : > { %7921 = vmatpush1.bf16.msra.mxu0 %v11078_v44  ;;  %v11174_v44 = vld [vmem:[%s12476_s28 + $0x1c80] ss:$16 sps:$4 sm:$0xff]  }
 0x1ba   : > { %7964 = vmatpush1.bf16.msra.mxu1 %v11081_v45  ;;  %7922 = vmatprep.subr.bf16.mxu0 %v11086_v46  ;;  %v11177_v45 = vld [vmem:[%s12476_s28 + $0x1e80] ss:$16 sps:$4 sm:$0xff]   ;;  %v11182_v46 = vld [vmem:[%s12476_s28 + $0x1c64] ss:$16 sps:$4 sm:$0xff]  }
 0x1bb   : > { %7965 = vmatprep.subr.bf16.mxu1 %v11089_v47  ;;  %v11185_v47 = vld [vmem:[%s12476_s28 + $0x1e64] ss:$16 sps:$4 sm:$0xff]  }
 0x1bd   : > { %7923 = vmatpush1.bf16.msra.mxu0 %v11084_v48  ;;  %v11180_v48 = vld [vmem:[%s12476_s28 + $0x1c60] ss:$16 sps:$4 sm:$0xff]  }
 0x1be   : > { %7966 = vmatpush1.bf16.msra.mxu1 %v11087_v49  ;;  %7924 = vmatprep.subr.bf16.mxu0 %v11092_v50  ;;  %v11183_v49 = vld [vmem:[%s12476_s28 + $0x1e60] ss:$16 sps:$4 sm:$0xff]   ;;  %v11188_v50 = vld [vmem:[%s12476_s28 + $0x1c44] ss:$16 sps:$4 sm:$0xff]  }
 0x1bf   : > { %7967 = vmatprep.subr.bf16.mxu1 %v11095_v51  ;;  %v11191_v51 = vld [vmem:[%s12476_s28 + $0x1e44] ss:$16 sps:$4 sm:$0xff]  }
 0x1c1   : > { %7925 = vmatpush1.bf16.msra.mxu0 %v11090_v52  ;;  %v11186_v52 = vld [vmem:[%s12476_s28 + $0x1c40] ss:$16 sps:$4 sm:$0xff]  }
 0x1c2   : > { %7968 = vmatpush1.bf16.msra.mxu1 %v11093_v53  ;;  %7926 = vmatprep.subr.bf16.mxu0 %v11098_v54  ;;  %v11189_v53 = vld [vmem:[%s12476_s28 + $0x1e40] ss:$16 sps:$4 sm:$0xff]   ;;  %v11194_v54 = vld [vmem:[%s12476_s28 + $0x1c24] ss:$16 sps:$4 sm:$0xff]  }
 0x1c3   : > { %7969 = vmatprep.subr.bf16.mxu1 %v11101_v55  ;;  %v11197_v55 = vld [vmem:[%s12476_s28 + $0x1e24] ss:$16 sps:$4 sm:$0xff]  }
 0x1c5   : > { %7927 = vmatpush1.bf16.msra.mxu0 %v11096_v56  ;;  %v11192_v56 = vld [vmem:[%s12476_s28 + $0x1c20] ss:$16 sps:$4 sm:$0xff]  }
 0x1c6   : > { %7970 = vmatpush1.bf16.msra.mxu1 %v11099_v57  ;;  %7928 = vmatprep.subr.bf16.mxu0 %v11104_v58  ;;  %v11195_v57 = vld [vmem:[%s12476_s28 + $0x1e20] ss:$16 sps:$4 sm:$0xff]   ;;  %v11200_v58 = vld [vmem:[%s12476_s28 + $0x1c04] ss:$16 sps:$4 sm:$0xff]  }
 0x1c7   : > { %7971 = vmatprep.subr.bf16.mxu1 %v11107_v59  ;;  %v11203_v59 = vld [vmem:[%s12476_s28 + $0x1e04] ss:$16 sps:$4 sm:$0xff]  }
 0x1c9   : > { %7929 = vmatpush2.bf16.msra.mxu0 %v11102_v60  ;;  %v11198_v60 = vld [vmem:[%s12476_s28 + $0x1c00] ss:$16 sps:$4 sm:$0xff]  }
 0x1ca   : > { %7972 = vmatpush2.bf16.msra.mxu1 %v11105_v61  ;;  %7930 = vmatprep.subr.bf16.mxu0 %v11110_v62  ;;  %v11201_v61 = vld [vmem:[%s12476_s28 + $0x1e00] ss:$16 sps:$4 sm:$0xff]   ;;  %v11206_v62 = vld [vmem:[%s12476_s28 + $0x1de4] ss:$16 sps:$4 sm:$0xff]  }
 0x1cb   : > { %7973 = vmatprep.subr.bf16.mxu1 %v11113_v63  ;;  %v11209_v63 = vld [vmem:[%s12476_s28 + $0x1fe4] ss:$16 sps:$4 sm:$0xff]  }
 0x1cd   : > { %7931 = vmatpush2.bf16.msra.mxu0 %v11108_v0  ;;  %v11204_v0 = vld [vmem:[%s12476_s28 + $0x1de0] ss:$16 sps:$4 sm:$0xff]  }
 0x1ce   : > { %7974 = vmatpush2.bf16.msra.mxu1 %v11111_v1  ;;  %7932 = vmatprep.subr.bf16.mxu0 %v11116_v2  ;;  %v11207_v1 = vld [vmem:[%s12476_s28 + $0x1fe0] ss:$16 sps:$4 sm:$0xff]   ;;  %v11212_v2 = vld [vmem:[%s12476_s28 + $0x1dc4] ss:$16 sps:$4 sm:$0xff]  }
 0x1cf   : > { %7975 = vmatprep.subr.bf16.mxu1 %v11119_v3  ;;  %v11215_v3 = vld [vmem:[%s12476_s28 + $0x1fc4] ss:$16 sps:$4 sm:$0xff]  }
 0x1d1   : > { %7933 = vmatpush2.bf16.msra.mxu0 %v11114_v4  ;;  %v11210_v4 = vld [vmem:[%s12476_s28 + $0x1dc0] ss:$16 sps:$4 sm:$0xff]  }
 0x1d2   : > { %7976 = vmatpush2.bf16.msra.mxu1 %v11117_v5  ;;  %7934 = vmatprep.subr.bf16.mxu0 %v11122_v6  ;;  %v11213_v5 = vld [vmem:[%s12476_s28 + $0x1fc0] ss:$16 sps:$4 sm:$0xff]   ;;  %v11218_v6 = vld [vmem:[%s12476_s28 + $0x1da4] ss:$16 sps:$4 sm:$0xff]  }
 0x1d3   : > { %7977 = vmatprep.subr.bf16.mxu1 %v11125_v7  ;;  %v11221_v7 = vld [vmem:[%s12476_s28 + $0x1fa4] ss:$16 sps:$4 sm:$0xff]  }
 0x1d5   : > { %7935 = vmatpush2.bf16.msra.mxu0 %v11120_v8  ;;  %v11216_v8 = vld [vmem:[%s12476_s28 + $0x1da0] ss:$16 sps:$4 sm:$0xff]  }
 0x1d6   : > { %7978 = vmatpush2.bf16.msra.mxu1 %v11123_v9  ;;  %7936 = vmatprep.subr.bf16.mxu0 %v11128_v10  ;;  %v11219_v9 = vld [vmem:[%s12476_s28 + $0x1fa0] ss:$16 sps:$4 sm:$0xff]   ;;  %v11224_v10 = vld [vmem:[%s12476_s28 + $0x1d84] ss:$16 sps:$4 sm:$0xff]  }
 0x1d7   : > { %7979 = vmatprep.subr.bf16.mxu1 %v11131_v11  ;;  %v11227_v11 = vld [vmem:[%s12476_s28 + $0x1f84] ss:$16 sps:$4 sm:$0xff]  }
 0x1d9   : > { %7937 = vmatpush2.bf16.msra.mxu0 %v11126_v12  ;;  %v11222_v12 = vld [vmem:[%s12476_s28 + $0x1d80] ss:$16 sps:$4 sm:$0xff]  }
 0x1da   : > { %7980 = vmatpush2.bf16.msra.mxu1 %v11129_v13  ;;  %7938 = vmatprep.subr.bf16.mxu0 %v11134_v14  ;;  %v11225_v13 = vld [vmem:[%s12476_s28 + $0x1f80] ss:$16 sps:$4 sm:$0xff]   ;;  %v11230_v14 = vld [vmem:[%s12476_s28 + $0x1d64] ss:$16 sps:$4 sm:$0xff]  }
 0x1db   : > { %7981 = vmatprep.subr.bf16.mxu1 %v11137_v15  ;;  %v11233_v15 = vld [vmem:[%s12476_s28 + $0x1f64] ss:$16 sps:$4 sm:$0xff]  }
 0x1dd   : > { %7939 = vmatpush2.bf16.msra.mxu0 %v11132_v16  ;;  %v11228_v16 = vld [vmem:[%s12476_s28 + $0x1d60] ss:$16 sps:$4 sm:$0xff]  }
 0x1de   : > { %7982 = vmatpush2.bf16.msra.mxu1 %v11135_v17  ;;  %7940 = vmatprep.subr.bf16.mxu0 %v11140_v18  ;;  %v11231_v17 = vld [vmem:[%s12476_s28 + $0x1f60] ss:$16 sps:$4 sm:$0xff]   ;;  %v11236_v18 = vld [vmem:[%s12476_s28 + $0x1d44] ss:$16 sps:$4 sm:$0xff]  }
 0x1df   : > { %7983 = vmatprep.subr.bf16.mxu1 %v11143_v19  ;;  %v11239_v19 = vld [vmem:[%s12476_s28 + $0x1f44] ss:$16 sps:$4 sm:$0xff]  }
 0x1e1   : > { %7941 = vmatpush2.bf16.msra.mxu0 %v11138_v20  ;;  %v11234_v20 = vld [vmem:[%s12476_s28 + $0x1d40] ss:$16 sps:$4 sm:$0xff]  }
 0x1e2   : > { %7984 = vmatpush2.bf16.msra.mxu1 %v11141_v21  ;;  %7942 = vmatprep.subr.bf16.mxu0 %v11146_v22  ;;  %v11237_v21 = vld [vmem:[%s12476_s28 + $0x1f40] ss:$16 sps:$4 sm:$0xff]   ;;  %v11242_v22 = vld [vmem:[%s12476_s28 + $0x1d24] ss:$16 sps:$4 sm:$0xff]  }
 0x1e3   : > { %7985 = vmatprep.subr.bf16.mxu1 %v11149_v23  ;;  %v11245_v23 = vld [vmem:[%s12476_s28 + $0x1f24] ss:$16 sps:$4 sm:$0xff]  }
 0x1e5   : > { %7943 = vmatpush2.bf16.msra.mxu0 %v11144_v24  ;;  %v11240_v24 = vld [vmem:[%s12476_s28 + $0x1d20] ss:$16 sps:$4 sm:$0xff]  }
 0x1e6   : > { %7986 = vmatpush2.bf16.msra.mxu1 %v11147_v25  ;;  %7998 = vmatprep.subr.bf16.mxu0 %v11158_v28  ;;  %v11243_v25 = vld [vmem:[%s12476_s28 + $0x1f20] ss:$16 sps:$4 sm:$0xff]  }
 0x1e7   : > { %8041 = vmatprep.subr.bf16.mxu1 %v11161_v29  ;;  %v11246_v28 = vld [vmem:[%s12476_s28 + $0x1d00] ss:$16 sps:$4 sm:$0xff]  }
 0x1e8   : > { %7945 = vmatmul.mubr.bf16.vlgmr.msra.gmra.mxu0 %v11150_v26  ;;  %v11248_v26 = vld [vmem:[%s12476_s28 + $0x1d04] ss:$16 sps:$4 sm:$0xff]   ;;  %v11249_v29 = vld [vmem:[%s12476_s28 + $0x1f00] ss:$16 sps:$4 sm:$0xff]  }
 0x1e9   : > { %7988 = vmatmul.mubr.bf16.vlgmr.msra.gmra.mxu1 %v11153_v27  ;;  %7999 = vmatpush1.bf16.msra.mxu0 %v11156_v30  ;;  %v11251_v27 = vld [vmem:[%s12476_s28 + $0x1f04] ss:$16 sps:$4 sm:$0xff]   ;;  %v11252_v30 = vld [vmem:[%s14077_s0 + $0x70] ss:$144 sps:$4 sm:$0xff]  }
 0x1ea   : > { %8042 = vmatpush1.bf16.msra.mxu1 %v11159_v31  ;;  %8000 = vmatprep.subr.bf16.mxu0 %v11164_v32  ;;  %v11255_v31 = vld [vmem:[%s14077_s0 + $0x78] ss:$144 sps:$4 sm:$0xff]   ;;  %v11260_v32 = vld [vmem:[%s12476_s28 + $0x20e4] ss:$16 sps:$4 sm:$0xff]  }
 0x1eb   : > { %8043 = vmatprep.subr.bf16.mxu1 %v11167_v33  ;;  %8030 = vmatprep.mubr.bf16.mxu0 %v11254_v36  ;;  %v11263_v33 = vld [vmem:[%s12476_s28 + $0x22e4] ss:$16 sps:$4 sm:$0xff]  }
 0x1ec   : > { %8073 = vmatprep.mubr.bf16.mxu1 %v11257_v37  ;;  %v11266_v36 = vld [vmem:[%s12476_s28 + $0x20c4] ss:$16 sps:$4 sm:$0xff]  }
 0x1ed   : > { %8001 = vmatpush1.bf16.msra.mxu0 %v11162_v34  ;;  %v11258_v34 = vld [vmem:[%s12476_s28 + $0x20e0] ss:$16 sps:$4 sm:$0xff]   ;;  %v11269_v37 = vld [vmem:[%s12476_s28 + $0x22c4] ss:$16 sps:$4 sm:$0xff]  }
 0x1ee   : > { %8044 = vmatpush1.bf16.msra.mxu1 %v11165_v35  ;;  %8002 = vmatprep.subr.bf16.mxu0 %v11170_v38  ;;  %v11261_v35 = vld [vmem:[%s12476_s28 + $0x22e0] ss:$16 sps:$4 sm:$0xff]  }
 0x1ef   : > { %8045 = vmatprep.subr.bf16.mxu1 %v11173_v39  ;;  %v11264_v38 = vld [vmem:[%s12476_s28 + $0x20c0] ss:$16 sps:$4 sm:$0xff]  }
 0x1f0   : > { %v11267_v39 = vld [vmem:[%s12476_s28 + $0x22c0] ss:$16 sps:$4 sm:$0xff]  }
 0x1f1   : > { %8003 = vmatpush1.bf16.msra.mxu0 %v11168_v40  ;;  %v11356_v40 = vld [vmem:[%s14077_s0 + $0x84] ss:$144 sps:$4 sm:$0xff]  }
 0x1f2   : > { %8046 = vmatpush1.bf16.msra.mxu1 %v11171_v41  ;;  %8004 = vmatprep.subr.bf16.mxu0 %v11176_v42  ;;  %v11359_v41 = vld [vmem:[%s14077_s0 + $0x8c] ss:$144 sps:$4 sm:$0xff]   ;;  %v11272_v42 = vld [vmem:[%s12476_s28 + $0x20a4] ss:$16 sps:$4 sm:$0xff]  }
 0x1f3   : > { %8047 = vmatprep.subr.bf16.mxu1 %v11179_v43  ;;  %v11275_v43 = vld [vmem:[%s12476_s28 + $0x22a4] ss:$16 sps:$4 sm:$0xff]  }
 0x1f5   : > { %8005 = vmatpush1.bf16.msra.mxu0 %v11174_v44  ;;  %v11270_v44 = vld [vmem:[%s12476_s28 + $0x20a0] ss:$16 sps:$4 sm:$0xff]  }
 0x1f6   : > { %8048 = vmatpush1.bf16.msra.mxu1 %v11177_v45  ;;  %8006 = vmatprep.subr.bf16.mxu0 %v11182_v46  ;;  %v11273_v45 = vld [vmem:[%s12476_s28 + $0x22a0] ss:$16 sps:$4 sm:$0xff]   ;;  %v11278_v46 = vld [vmem:[%s12476_s28 + $0x2084] ss:$16 sps:$4 sm:$0xff]  }
 0x1f7   : > { %8049 = vmatprep.subr.bf16.mxu1 %v11185_v47  ;;  %v11281_v47 = vld [vmem:[%s12476_s28 + $0x2284] ss:$16 sps:$4 sm:$0xff]  }
 0x1f9   : > { %8007 = vmatpush1.bf16.msra.mxu0 %v11180_v48  ;;  %v11276_v48 = vld [vmem:[%s12476_s28 + $0x2080] ss:$16 sps:$4 sm:$0xff]  }
 0x1fa   : > { %8050 = vmatpush1.bf16.msra.mxu1 %v11183_v49  ;;  %8008 = vmatprep.subr.bf16.mxu0 %v11188_v50  ;;  %v11279_v49 = vld [vmem:[%s12476_s28 + $0x2280] ss:$16 sps:$4 sm:$0xff]   ;;  %v11284_v50 = vld [vmem:[%s12476_s28 + $0x2064] ss:$16 sps:$4 sm:$0xff]  }
 0x1fb   : > { %8051 = vmatprep.subr.bf16.mxu1 %v11191_v51  ;;  %v11287_v51 = vld [vmem:[%s12476_s28 + $0x2264] ss:$16 sps:$4 sm:$0xff]  }
 0x1fd   : > { %8009 = vmatpush1.bf16.msra.mxu0 %v11186_v52  ;;  %v11282_v52 = vld [vmem:[%s12476_s28 + $0x2060] ss:$16 sps:$4 sm:$0xff]  }
 0x1fe   : > { %8052 = vmatpush1.bf16.msra.mxu1 %v11189_v53  ;;  %8010 = vmatprep.subr.bf16.mxu0 %v11194_v54  ;;  %v11285_v53 = vld [vmem:[%s12476_s28 + $0x2260] ss:$16 sps:$4 sm:$0xff]   ;;  %v11290_v54 = vld [vmem:[%s12476_s28 + $0x2044] ss:$16 sps:$4 sm:$0xff]  }
 0x1ff   : > { %8053 = vmatprep.subr.bf16.mxu1 %v11197_v55  ;;  %v11293_v55 = vld [vmem:[%s12476_s28 + $0x2244] ss:$16 sps:$4 sm:$0xff]  }
 0x201   : > { %8011 = vmatpush1.bf16.msra.mxu0 %v11192_v56  ;;  %v11288_v56 = vld [vmem:[%s12476_s28 + $0x2040] ss:$16 sps:$4 sm:$0xff]  }
 0x202   : > { %8054 = vmatpush1.bf16.msra.mxu1 %v11195_v57  ;;  %8012 = vmatprep.subr.bf16.mxu0 %v11200_v58  ;;  %v11291_v57 = vld [vmem:[%s12476_s28 + $0x2240] ss:$16 sps:$4 sm:$0xff]   ;;  %v11296_v58 = vld [vmem:[%s12476_s28 + $0x2024] ss:$16 sps:$4 sm:$0xff]  }
 0x203   : > { %8055 = vmatprep.subr.bf16.mxu1 %v11203_v59  ;;  %v11299_v59 = vld [vmem:[%s12476_s28 + $0x2224] ss:$16 sps:$4 sm:$0xff]  }
 0x205   : > { %8013 = vmatpush1.bf16.msra.mxu0 %v11198_v60  ;;  %v11294_v60 = vld [vmem:[%s12476_s28 + $0x2020] ss:$16 sps:$4 sm:$0xff]  }
 0x206   : > { %8056 = vmatpush1.bf16.msra.mxu1 %v11201_v61  ;;  %8014 = vmatprep.subr.bf16.mxu0 %v11206_v62  ;;  %v11297_v61 = vld [vmem:[%s12476_s28 + $0x2220] ss:$16 sps:$4 sm:$0xff]   ;;  %v11302_v62 = vld [vmem:[%s12476_s28 + $0x2004] ss:$16 sps:$4 sm:$0xff]  }
 0x207   : > { %8057 = vmatprep.subr.bf16.mxu1 %v11209_v63  ;;  %v11305_v63 = vld [vmem:[%s12476_s28 + $0x2204] ss:$16 sps:$4 sm:$0xff]  }
 0x209   : > { %8015 = vmatpush2.bf16.msra.mxu0 %v11204_v0  ;;  %v11300_v0 = vld [vmem:[%s12476_s28 + $0x2000] ss:$16 sps:$4 sm:$0xff]  }
 0x20a   : > { %8058 = vmatpush2.bf16.msra.mxu1 %v11207_v1  ;;  %8016 = vmatprep.subr.bf16.mxu0 %v11212_v2  ;;  %v11303_v1 = vld [vmem:[%s12476_s28 + $0x2200] ss:$16 sps:$4 sm:$0xff]   ;;  %v11308_v2 = vld [vmem:[%s12476_s28 + $0x21e4] ss:$16 sps:$4 sm:$0xff]  }
 0x20b   : > { %8059 = vmatprep.subr.bf16.mxu1 %v11215_v3  ;;  %v11311_v3 = vld [vmem:[%s12476_s28 + $0x23e4] ss:$16 sps:$4 sm:$0xff]  }
 0x20d   : > { %8017 = vmatpush2.bf16.msra.mxu0 %v11210_v4  ;;  %v11306_v4 = vld [vmem:[%s12476_s28 + $0x21e0] ss:$16 sps:$4 sm:$0xff]  }
 0x20e   : > { %8060 = vmatpush2.bf16.msra.mxu1 %v11213_v5  ;;  %8018 = vmatprep.subr.bf16.mxu0 %v11218_v6  ;;  %v11309_v5 = vld [vmem:[%s12476_s28 + $0x23e0] ss:$16 sps:$4 sm:$0xff]   ;;  %v11314_v6 = vld [vmem:[%s12476_s28 + $0x21c4] ss:$16 sps:$4 sm:$0xff]  }
 0x20f   : > { %8061 = vmatprep.subr.bf16.mxu1 %v11221_v7  ;;  %v11317_v7 = vld [vmem:[%s12476_s28 + $0x23c4] ss:$16 sps:$4 sm:$0xff]  }
 0x211   : > { %8019 = vmatpush2.bf16.msra.mxu0 %v11216_v8  ;;  %v11312_v8 = vld [vmem:[%s12476_s28 + $0x21c0] ss:$16 sps:$4 sm:$0xff]  }
 0x212   : > { %8062 = vmatpush2.bf16.msra.mxu1 %v11219_v9  ;;  %8020 = vmatprep.subr.bf16.mxu0 %v11224_v10  ;;  %v11315_v9 = vld [vmem:[%s12476_s28 + $0x23c0] ss:$16 sps:$4 sm:$0xff]   ;;  %v11320_v10 = vld [vmem:[%s12476_s28 + $0x21a4] ss:$16 sps:$4 sm:$0xff]  }
 0x213   : > { %8063 = vmatprep.subr.bf16.mxu1 %v11227_v11  ;;  %v11323_v11 = vld [vmem:[%s12476_s28 + $0x23a4] ss:$16 sps:$4 sm:$0xff]  }
 0x215   : > { %8021 = vmatpush2.bf16.msra.mxu0 %v11222_v12  ;;  %v11318_v12 = vld [vmem:[%s12476_s28 + $0x21a0] ss:$16 sps:$4 sm:$0xff]  }
 0x216   : > { %8064 = vmatpush2.bf16.msra.mxu1 %v11225_v13  ;;  %8022 = vmatprep.subr.bf16.mxu0 %v11230_v14  ;;  %v11321_v13 = vld [vmem:[%s12476_s28 + $0x23a0] ss:$16 sps:$4 sm:$0xff]   ;;  %v11326_v14 = vld [vmem:[%s12476_s28 + $0x2184] ss:$16 sps:$4 sm:$0xff]  }
 0x217   : > { %8065 = vmatprep.subr.bf16.mxu1 %v11233_v15  ;;  %v11329_v15 = vld [vmem:[%s12476_s28 + $0x2384] ss:$16 sps:$4 sm:$0xff]  }
 0x219   : > { %8023 = vmatpush2.bf16.msra.mxu0 %v11228_v16  ;;  %v11324_v16 = vld [vmem:[%s12476_s28 + $0x2180] ss:$16 sps:$4 sm:$0xff]  }
 0x21a   : > { %8066 = vmatpush2.bf16.msra.mxu1 %v11231_v17  ;;  %8024 = vmatprep.subr.bf16.mxu0 %v11236_v18  ;;  %v11327_v17 = vld [vmem:[%s12476_s28 + $0x2380] ss:$16 sps:$4 sm:$0xff]   ;;  %v11332_v18 = vld [vmem:[%s12476_s28 + $0x2164] ss:$16 sps:$4 sm:$0xff]  }
 0x21b   : > { %8067 = vmatprep.subr.bf16.mxu1 %v11239_v19  ;;  %v11335_v19 = vld [vmem:[%s12476_s28 + $0x2364] ss:$16 sps:$4 sm:$0xff]  }
 0x21d   : > { %8025 = vmatpush2.bf16.msra.mxu0 %v11234_v20  ;;  %v11330_v20 = vld [vmem:[%s12476_s28 + $0x2160] ss:$16 sps:$4 sm:$0xff]  }
 0x21e   : > { %8068 = vmatpush2.bf16.msra.mxu1 %v11237_v21  ;;  %8026 = vmatprep.subr.bf16.mxu0 %v11242_v22  ;;  %v11333_v21 = vld [vmem:[%s12476_s28 + $0x2360] ss:$16 sps:$4 sm:$0xff]   ;;  %v11338_v22 = vld [vmem:[%s12476_s28 + $0x2144] ss:$16 sps:$4 sm:$0xff]  }
 0x21f   : > { %8069 = vmatprep.subr.bf16.mxu1 %v11245_v23  ;;  %v11341_v23 = vld [vmem:[%s12476_s28 + $0x2344] ss:$16 sps:$4 sm:$0xff]  }
 0x221   : > { %8027 = vmatpush2.bf16.msra.mxu0 %v11240_v24  ;;  %v11336_v24 = vld [vmem:[%s12476_s28 + $0x2140] ss:$16 sps:$4 sm:$0xff]  }
 0x222   : > { %8070 = vmatpush2.bf16.msra.mxu1 %v11243_v25  ;;  %8028 = vmatprep.subr.bf16.mxu0 %v11248_v26  ;;  %v11339_v25 = vld [vmem:[%s12476_s28 + $0x2340] ss:$16 sps:$4 sm:$0xff]   ;;  %v11344_v26 = vld [vmem:[%s12476_s28 + $0x2124] ss:$16 sps:$4 sm:$0xff]  }
 0x223   : > { %8071 = vmatprep.subr.bf16.mxu1 %v11251_v27  ;;  %v11347_v27 = vld [vmem:[%s12476_s28 + $0x2324] ss:$16 sps:$4 sm:$0xff]  }
 0x225   : > { %8029 = vmatpush2.bf16.msra.mxu0 %v11246_v28  ;;  %v11342_v28 = vld [vmem:[%s12476_s28 + $0x2120] ss:$16 sps:$4 sm:$0xff]  }
 0x226   : > { %8072 = vmatpush2.bf16.msra.mxu1 %v11249_v29  ;;  %8084 = vmatprep.subr.bf16.mxu0 %v11260_v32  ;;  %v11345_v29 = vld [vmem:[%s12476_s28 + $0x2320] ss:$16 sps:$4 sm:$0xff]  }
 0x227   : > { %8127 = vmatprep.subr.bf16.mxu1 %v11263_v33  ;;  %v11348_v32 = vld [vmem:[%s12476_s28 + $0x2100] ss:$16 sps:$4 sm:$0xff]  }
 0x228   : > { %8031 = vmatmul.mubr.bf16.vlgmr.msra.gmra.mxu0 %v11252_v30  ;;  %v11350_v30 = vld [vmem:[%s12476_s28 + $0x2104] ss:$16 sps:$4 sm:$0xff]   ;;  %v11351_v33 = vld [vmem:[%s12476_s28 + $0x2300] ss:$16 sps:$4 sm:$0xff]  }
 0x229   : > { %8074 = vmatmul.mubr.bf16.vlgmr.msra.gmra.mxu1 %v11255_v31  ;;  %8085 = vmatpush1.bf16.msra.mxu0 %v11258_v34  ;;  %v11353_v31 = vld [vmem:[%s12476_s28 + $0x2304] ss:$16 sps:$4 sm:$0xff]   ;;  %v11354_v34 = vld [vmem:[%s14077_s0 + $0x80] ss:$144 sps:$4 sm:$0xff]  }
 0x22a   : > { %8128 = vmatpush1.bf16.msra.mxu1 %v11261_v35  ;;  %8086 = vmatprep.subr.bf16.mxu0 %v11266_v36  ;;  %v11357_v35 = vld [vmem:[%s14077_s0 + $0x88] ss:$144 sps:$4 sm:$0xff]   ;;  %v11362_v36 = vld [vmem:[%s12476_s28 + $0xec] ss:$16 sps:$4 sm:$0xff]  }
 0x22b   : > { %8129 = vmatprep.subr.bf16.mxu1 %v11269_v37  ;;  %8116 = vmatprep.mubr.bf16.mxu0 %v11356_v40  ;;  %v11365_v37 = vld [vmem:[%s12476_s28 + $0x2ec] ss:$16 sps:$4 sm:$0xff]  }
 0x22c   : > { %8159 = vmatprep.mubr.bf16.mxu1 %v11359_v41  ;;  %v11368_v40 = vld [vmem:[%s12476_s28 + $0xcc] ss:$16 sps:$4 sm:$0xff]  }
 0x22d   : > { %8087 = vmatpush1.bf16.msra.mxu0 %v11264_v38  ;;  %v11360_v38 = vld [vmem:[%s12476_s28 + $0xe8] ss:$16 sps:$4 sm:$0xff]   ;;  %v11371_v41 = vld [vmem:[%s12476_s28 + $0x2cc] ss:$16 sps:$4 sm:$0xff]  }
 0x22e   : > { %8130 = vmatpush1.bf16.msra.mxu1 %v11267_v39  ;;  %8088 = vmatprep.subr.bf16.mxu0 %v11272_v42  ;;  %v11363_v39 = vld [vmem:[%s12476_s28 + $0x2e8] ss:$16 sps:$4 sm:$0xff]  }
 0x22f   : > { %8131 = vmatprep.subr.bf16.mxu1 %v11275_v43  ;;  %v11366_v42 = vld [vmem:[%s12476_s28 + $0xc8] ss:$16 sps:$4 sm:$0xff]  }
 0x230   : > { %v11369_v43 = vld [vmem:[%s12476_s28 + $0x2c8] ss:$16 sps:$4 sm:$0xff]  }
 0x231   : > { %8089 = vmatpush1.bf16.msra.mxu0 %v11270_v44  ;;  %v11374_v44 = vld [vmem:[%s12476_s28 + $0xac] ss:$16 sps:$4 sm:$0xff]  }
 0x232   : > { %8132 = vmatpush1.bf16.msra.mxu1 %v11273_v45  ;;  %8090 = vmatprep.subr.bf16.mxu0 %v11278_v46  ;;  %v11377_v45 = vld [vmem:[%s12476_s28 + $0x2ac] ss:$16 sps:$4 sm:$0xff]   ;;  %v11372_v46 = vld [vmem:[%s12476_s28 + $0xa8] ss:$16 sps:$4 sm:$0xff]  }
 0x233   : > { %8133 = vmatprep.subr.bf16.mxu1 %v11281_v47  ;;  %v11375_v47 = vld [vmem:[%s12476_s28 + $0x2a8] ss:$16 sps:$4 sm:$0xff]  }
 0x235   : > { %8091 = vmatpush1.bf16.msra.mxu0 %v11276_v48  ;;  %v12256_v48 = vld [vmem:[%s14077_s0 + $0x4] ss:$144 sps:$4 sm:$0xff]  }
 0x236   : > { %8134 = vmatpush1.bf16.msra.mxu1 %v11279_v49  ;;  %8092 = vmatprep.subr.bf16.mxu0 %v11284_v50  ;;  %v12257_v49 = vld [vmem:[%s14077_s0 + $0xc] ss:$144 sps:$4 sm:$0xff]  }
 0x237   : > { %8135 = vmatprep.subr.bf16.mxu1 %v11287_v51  ;;  %v11380_v50 = vld [vmem:[%s12476_s28 + $0x8c] ss:$16 sps:$4 sm:$0xff]  }
 0x238   : > { %v11383_v51 = vld [vmem:[%s12476_s28 + $0x28c] ss:$16 sps:$4 sm:$0xff]  }
 0x239   : > { %8093 = vmatpush1.bf16.msra.mxu0 %v11282_v52  ;;  %v11378_v52 = vld [vmem:[%s12476_s28 + $0x88] ss:$16 sps:$4 sm:$0xff]  }
 0x23a   : > { %8136 = vmatpush1.bf16.msra.mxu1 %v11285_v53  ;;  %8094 = vmatprep.subr.bf16.mxu0 %v11290_v54  ;;  %v11381_v53 = vld [vmem:[%s12476_s28 + $0x288] ss:$16 sps:$4 sm:$0xff]   ;;  %v11386_v54 = vld [vmem:[%s12476_s28 + $0x6c] ss:$16 sps:$4 sm:$0xff]  }
 0x23b   : > { %8137 = vmatprep.subr.bf16.mxu1 %v11293_v55  ;;  %v11389_v55 = vld [vmem:[%s12476_s28 + $0x26c] ss:$16 sps:$4 sm:$0xff]  }
 0x23d   : > { %8095 = vmatpush1.bf16.msra.mxu0 %v11288_v56  ;;  %v11384_v56 = vld [vmem:[%s12476_s28 + $0x68] ss:$16 sps:$4 sm:$0xff]  }
 0x23e   : > { %8138 = vmatpush1.bf16.msra.mxu1 %v11291_v57  ;;  %8096 = vmatprep.subr.bf16.mxu0 %v11296_v58  ;;  %v11387_v57 = vld [vmem:[%s12476_s28 + $0x268] ss:$16 sps:$4 sm:$0xff]   ;;  %v11392_v58 = vld [vmem:[%s12476_s28 + $0x4c] ss:$16 sps:$4 sm:$0xff]  }
 0x23f   : > { %8139 = vmatprep.subr.bf16.mxu1 %v11299_v59  ;;  %v11395_v59 = vld [vmem:[%s12476_s28 + $0x24c] ss:$16 sps:$4 sm:$0xff]  }
 0x241   : > { %8097 = vmatpush1.bf16.msra.mxu0 %v11294_v60  ;;  %v11390_v60 = vld [vmem:[%s12476_s28 + $0x48] ss:$16 sps:$4 sm:$0xff]  }
 0x242   : > { %8140 = vmatpush1.bf16.msra.mxu1 %v11297_v61  ;;  %8098 = vmatprep.subr.bf16.mxu0 %v11302_v62  ;;  %v11393_v61 = vld [vmem:[%s12476_s28 + $0x248] ss:$16 sps:$4 sm:$0xff]   ;;  %v11398_v62 = vld [vmem:[%s12476_s28 + $0x2c] ss:$16 sps:$4 sm:$0xff]  }
 0x243   : > { %8141 = vmatprep.subr.bf16.mxu1 %v11305_v63  ;;  %v11401_v63 = vld [vmem:[%s12476_s28 + $0x22c] ss:$16 sps:$4 sm:$0xff]  }
 0x245   : > { %8099 = vmatpush1.bf16.msra.mxu0 %v11300_v0  ;;  %v11396_v0 = vld [vmem:[%s12476_s28 + $0x28] ss:$16 sps:$4 sm:$0xff]  }
 0x246   : > { %8142 = vmatpush1.bf16.msra.mxu1 %v11303_v1  ;;  %8100 = vmatprep.subr.bf16.mxu0 %v11308_v2  ;;  %v11399_v1 = vld [vmem:[%s12476_s28 + $0x228] ss:$16 sps:$4 sm:$0xff]   ;;  %v11404_v2 = vld [vmem:[%s12476_s28 + $0xc] ss:$16 sps:$4 sm:$0xff]  }
 0x247   : > { %8143 = vmatprep.subr.bf16.mxu1 %v11311_v3  ;;  %v11407_v3 = vld [vmem:[%s12476_s28 + $0x20c] ss:$16 sps:$4 sm:$0xff]  }
 0x249   : > { %8101 = vmatpush2.bf16.msra.mxu0 %v11306_v4  ;;  %v11402_v4 = vld [vmem:[%s12476_s28 + $0x8] ss:$16 sps:$4 sm:$0xff]  }
 0x24a   : > { %8144 = vmatpush2.bf16.msra.mxu1 %v11309_v5  ;;  %8102 = vmatprep.subr.bf16.mxu0 %v11314_v6  ;;  %v11405_v5 = vld [vmem:[%s12476_s28 + $0x208] ss:$16 sps:$4 sm:$0xff]   ;;  %v11410_v6 = vld [vmem:[%s12476_s28 + $0x1ec] ss:$16 sps:$4 sm:$0xff]  }
 0x24b   : > { %8145 = vmatprep.subr.bf16.mxu1 %v11317_v7  ;;  %v11413_v7 = vld [vmem:[%s12476_s28 + $0x3ec] ss:$16 sps:$4 sm:$0xff]  }
 0x24d   : > { %8103 = vmatpush2.bf16.msra.mxu0 %v11312_v8  ;;  %v11408_v8 = vld [vmem:[%s12476_s28 + $0x1e8] ss:$16 sps:$4 sm:$0xff]  }
 0x24e   : > { %8146 = vmatpush2.bf16.msra.mxu1 %v11315_v9  ;;  %8104 = vmatprep.subr.bf16.mxu0 %v11320_v10  ;;  %v11411_v9 = vld [vmem:[%s12476_s28 + $0x3e8] ss:$16 sps:$4 sm:$0xff]   ;;  %v11416_v10 = vld [vmem:[%s12476_s28 + $0x1cc] ss:$16 sps:$4 sm:$0xff]  }
 0x24f   : > { %8147 = vmatprep.subr.bf16.mxu1 %v11323_v11  ;;  %v11419_v11 = vld [vmem:[%s12476_s28 + $0x3cc] ss:$16 sps:$4 sm:$0xff]  }
 0x251   : > { %8105 = vmatpush2.bf16.msra.mxu0 %v11318_v12  ;;  %v11414_v12 = vld [vmem:[%s12476_s28 + $0x1c8] ss:$16 sps:$4 sm:$0xff]  }
 0x252   : > { %8148 = vmatpush2.bf16.msra.mxu1 %v11321_v13  ;;  %8106 = vmatprep.subr.bf16.mxu0 %v11326_v14  ;;  %v11417_v13 = vld [vmem:[%s12476_s28 + $0x3c8] ss:$16 sps:$4 sm:$0xff]   ;;  %v11422_v14 = vld [vmem:[%s12476_s28 + $0x1ac] ss:$16 sps:$4 sm:$0xff]  }
 0x253   : > { %8149 = vmatprep.subr.bf16.mxu1 %v11329_v15  ;;  %v11425_v15 = vld [vmem:[%s12476_s28 + $0x3ac] ss:$16 sps:$4 sm:$0xff]  }
 0x255   : > { %8107 = vmatpush2.bf16.msra.mxu0 %v11324_v16  ;;  %v11420_v16 = vld [vmem:[%s12476_s28 + $0x1a8] ss:$16 sps:$4 sm:$0xff]  }
 0x256   : > { %8150 = vmatpush2.bf16.msra.mxu1 %v11327_v17  ;;  %8108 = vmatprep.subr.bf16.mxu0 %v11332_v18  ;;  %v11423_v17 = vld [vmem:[%s12476_s28 + $0x3a8] ss:$16 sps:$4 sm:$0xff]   ;;  %v11428_v18 = vld [vmem:[%s12476_s28 + $0x18c] ss:$16 sps:$4 sm:$0xff]  }
 0x257   : > { %8151 = vmatprep.subr.bf16.mxu1 %v11335_v19  ;;  %v11431_v19 = vld [vmem:[%s12476_s28 + $0x38c] ss:$16 sps:$4 sm:$0xff]  }
 0x259   : > { %8109 = vmatpush2.bf16.msra.mxu0 %v11330_v20  ;;  %v11426_v20 = vld [vmem:[%s12476_s28 + $0x188] ss:$16 sps:$4 sm:$0xff]  }
 0x25a   : > { %8152 = vmatpush2.bf16.msra.mxu1 %v11333_v21  ;;  %8110 = vmatprep.subr.bf16.mxu0 %v11338_v22  ;;  %v11429_v21 = vld [vmem:[%s12476_s28 + $0x388] ss:$16 sps:$4 sm:$0xff]   ;;  %v11434_v22 = vld [vmem:[%s12476_s28 + $0x16c] ss:$16 sps:$4 sm:$0xff]  }
 0x25b   : > { %8153 = vmatprep.subr.bf16.mxu1 %v11341_v23  ;;  %v11437_v23 = vld [vmem:[%s12476_s28 + $0x36c] ss:$16 sps:$4 sm:$0xff]  }
 0x25d   : > { %8111 = vmatpush2.bf16.msra.mxu0 %v11336_v24  ;;  %v11432_v24 = vld [vmem:[%s12476_s28 + $0x168] ss:$16 sps:$4 sm:$0xff]  }
 0x25e   : > { %8154 = vmatpush2.bf16.msra.mxu1 %v11339_v25  ;;  %8112 = vmatprep.subr.bf16.mxu0 %v11344_v26  ;;  %v11435_v25 = vld [vmem:[%s12476_s28 + $0x368] ss:$16 sps:$4 sm:$0xff]   ;;  %v11440_v26 = vld [vmem:[%s12476_s28 + $0x14c] ss:$16 sps:$4 sm:$0xff]  }
 0x25f   : > { %8155 = vmatprep.subr.bf16.mxu1 %v11347_v27  ;;  %v11443_v27 = vld [vmem:[%s12476_s28 + $0x34c] ss:$16 sps:$4 sm:$0xff]  }
 0x261   : > { %8113 = vmatpush2.bf16.msra.mxu0 %v11342_v28  ;;  %v11438_v28 = vld [vmem:[%s12476_s28 + $0x148] ss:$16 sps:$4 sm:$0xff]  }
 0x262   : > { %8156 = vmatpush2.bf16.msra.mxu1 %v11345_v29  ;;  %8114 = vmatprep.subr.bf16.mxu0 %v11350_v30  ;;  %v11441_v29 = vld [vmem:[%s12476_s28 + $0x348] ss:$16 sps:$4 sm:$0xff]   ;;  %v11446_v30 = vld [vmem:[%s12476_s28 + $0x12c] ss:$16 sps:$4 sm:$0xff]  }
 0x263   : > { %8157 = vmatprep.subr.bf16.mxu1 %v11353_v31  ;;  %v11449_v31 = vld [vmem:[%s12476_s28 + $0x32c] ss:$16 sps:$4 sm:$0xff]  }
 0x265   : > { %8115 = vmatpush2.bf16.msra.mxu0 %v11348_v32  ;;  %v11444_v32 = vld [vmem:[%s12476_s28 + $0x128] ss:$16 sps:$4 sm:$0xff]  }
 0x266   : > { %8158 = vmatpush2.bf16.msra.mxu1 %v11351_v33  ;;  %8170 = vmatprep.subr.bf16.mxu0 %v11362_v36  ;;  %v11447_v33 = vld [vmem:[%s12476_s28 + $0x328] ss:$16 sps:$4 sm:$0xff]  }
 0x267   : > { %8213 = vmatprep.subr.bf16.mxu1 %v11365_v37  ;;  %v11450_v36 = vld [vmem:[%s12476_s28 + $0x108] ss:$16 sps:$4 sm:$0xff]  }
 0x268   : > { %8117 = vmatmul.mubr.bf16.vlgmr.msra.gmra.mxu0 %v11354_v34  ;;  %v11452_v34 = vld [vmem:[%s12476_s28 + $0x10c] ss:$16 sps:$4 sm:$0xff]   ;;  %v11453_v37 = vld [vmem:[%s12476_s28 + $0x308] ss:$16 sps:$4 sm:$0xff]  }
 0x269   : > { %8160 = vmatmul.mubr.bf16.vlgmr.msra.gmra.mxu1 %v11357_v35  ;;  %8171 = vmatpush1.bf16.msra.mxu0 %v11360_v38  ;;  %v11455_v35 = vld [vmem:[%s12476_s28 + $0x30c] ss:$16 sps:$4 sm:$0xff]  }
 0x26a   : > { %8214 = vmatpush1.bf16.msra.mxu1 %v11363_v39  ;;  %8172 = vmatprep.subr.bf16.mxu0 %v11368_v40  ;;  %v11458_v38 = vld [vmem:[%s12476_s28 + $0x4ec] ss:$16 sps:$4 sm:$0xff]   ;;  %v11456_v40 = vld [vmem:[%s12476_s28 + $0x4e8] ss:$16 sps:$4 sm:$0xff]  }
 0x26b   : > { %8215 = vmatprep.subr.bf16.mxu1 %v11371_v41  ;;  %8202 = vmatprep.mubr.bf16.mxu0 %v12256_v48  ;;  %v11461_v39 = vld [vmem:[%s12476_s28 + $0x6ec] ss:$16 sps:$4 sm:$0xff]   ;;  %v11459_v41 = vld [vmem:[%s12476_s28 + $0x6e8] ss:$16 sps:$4 sm:$0xff]  }
 0x26c   : > { %8245 = vmatprep.mubr.bf16.mxu1 %v12257_v49  ;;  %v11470_v48 = vld [vmem:[%s12476_s28 + $0x4ac] ss:$16 sps:$4 sm:$0xff]  }
 0x26d   : > { %8173 = vmatpush1.bf16.msra.mxu0 %v11366_v42  ;;  %v11464_v42 = vld [vmem:[%s12476_s28 + $0x4cc] ss:$16 sps:$4 sm:$0xff]  }
 0x26e   : > { %8216 = vmatpush1.bf16.msra.mxu1 %v11369_v43  ;;  %8174 = vmatprep.subr.bf16.mxu0 %v11374_v44  ;;  %v11467_v43 = vld [vmem:[%s12476_s28 + $0x6cc] ss:$16 sps:$4 sm:$0xff]   ;;  %v11462_v44 = vld [vmem:[%s12476_s28 + $0x4c8] ss:$16 sps:$4 sm:$0xff]  }
 0x26f   : > { %8217 = vmatprep.subr.bf16.mxu1 %v11377_v45  ;;  %v11465_v45 = vld [vmem:[%s12476_s28 + $0x6c8] ss:$16 sps:$4 sm:$0xff]   ;;  %v11473_v49 = vld [vmem:[%s12476_s28 + $0x6ac] ss:$16 sps:$4 sm:$0xff]  }
 0x271   : > { %8175 = vmatpush1.bf16.msra.mxu0 %v11372_v46  ;;  %v12258_v46 = vld [vmem:[%s14077_s0] ss:$144 sps:$4 sm:$0xff]  }
 0x272   : > { %8218 = vmatpush1.bf16.msra.mxu1 %v11375_v47  ;;  %8176 = vmatprep.subr.bf16.mxu0 %v11380_v50  ;;  %v12259_v47 = vld [vmem:[%s14077_s0 + $0x8] ss:$144 sps:$4 sm:$0xff]  }
 0x273   : > { %8219 = vmatprep.subr.bf16.mxu1 %v11383_v51  ;;  %v11468_v50 = vld [vmem:[%s12476_s28 + $0x4a8] ss:$16 sps:$4 sm:$0xff]  }
 0x274   : > { %v11471_v51 = vld [vmem:[%s12476_s28 + $0x6a8] ss:$16 sps:$4 sm:$0xff]  }
 0x275   : > { %8177 = vmatpush1.bf16.msra.mxu0 %v11378_v52  ;;  %v12260_v52 = vld [vmem:[%s14077_s0 + $0x14] ss:$144 sps:$4 sm:$0xff]  }
 0x276   : > { %8220 = vmatpush1.bf16.msra.mxu1 %v11381_v53  ;;  %8178 = vmatprep.subr.bf16.mxu0 %v11386_v54  ;;  %v12261_v53 = vld [vmem:[%s14077_s0 + $0x1c] ss:$144 sps:$4 sm:$0xff]  }
 0x277   : > { %8221 = vmatprep.subr.bf16.mxu1 %v11389_v55  ;;  %v11476_v54 = vld [vmem:[%s12476_s28 + $0x48c] ss:$16 sps:$4 sm:$0xff]  }
 0x278   : > { %v11479_v55 = vld [vmem:[%s12476_s28 + $0x68c] ss:$16 sps:$4 sm:$0xff]  }
 0x279   : > { %8179 = vmatpush1.bf16.msra.mxu0 %v11384_v56  ;;  %v11474_v56 = vld [vmem:[%s12476_s28 + $0x488] ss:$16 sps:$4 sm:$0xff]  }
 0x27a   : > { %8222 = vmatpush1.bf16.msra.mxu1 %v11387_v57  ;;  %8180 = vmatprep.subr.bf16.mxu0 %v11392_v58  ;;  %v11477_v57 = vld [vmem:[%s12476_s28 + $0x688] ss:$16 sps:$4 sm:$0xff]   ;;  %v11482_v58 = vld [vmem:[%s12476_s28 + $0x46c] ss:$16 sps:$4 sm:$0xff]  }
 0x27b   : > { %8223 = vmatprep.subr.bf16.mxu1 %v11395_v59  ;;  %v11485_v59 = vld [vmem:[%s12476_s28 + $0x66c] ss:$16 sps:$4 sm:$0xff]  }
 0x27d   : > { %8181 = vmatpush1.bf16.msra.mxu0 %v11390_v60  ;;  %v11480_v60 = vld [vmem:[%s12476_s28 + $0x468] ss:$16 sps:$4 sm:$0xff]  }
 0x27e   : > { %8224 = vmatpush1.bf16.msra.mxu1 %v11393_v61  ;;  %8182 = vmatprep.subr.bf16.mxu0 %v11398_v62  ;;  %v11483_v61 = vld [vmem:[%s12476_s28 + $0x668] ss:$16 sps:$4 sm:$0xff]   ;;  %v11488_v62 = vld [vmem:[%s12476_s28 + $0x44c] ss:$16 sps:$4 sm:$0xff]  }
 0x27f   : > { %8225 = vmatprep.subr.bf16.mxu1 %v11401_v63  ;;  %v11491_v63 = vld [vmem:[%s12476_s28 + $0x64c] ss:$16 sps:$4 sm:$0xff]  }
 0x281   : > { %8183 = vmatpush1.bf16.msra.mxu0 %v11396_v0  ;;  %v11486_v0 = vld [vmem:[%s12476_s28 + $0x448] ss:$16 sps:$4 sm:$0xff]  }
 0x282   : > { %8226 = vmatpush1.bf16.msra.mxu1 %v11399_v1  ;;  %8184 = vmatprep.subr.bf16.mxu0 %v11404_v2  ;;  %v11489_v1 = vld [vmem:[%s12476_s28 + $0x648] ss:$16 sps:$4 sm:$0xff]   ;;  %v13272_v2 = vpop.f32.mrf.mxu0 }
 0x283   : > { %8227 = vmatprep.subr.bf16.mxu1 %v11407_v3  ;;  %v13274_v3 = vpop.f32.mrf.mxu1 }
 0x285   : > { %8185 = vmatpush1.bf16.msra.mxu0 %v11402_v4  ;;  %v11494_v4 = vld [vmem:[%s12476_s28 + $0x42c] ss:$16 sps:$4 sm:$0xff]  }
 0x286   : > { %8228 = vmatpush1.bf16.msra.mxu1 %v11405_v5  ;;  %8186 = vmatprep.subr.bf16.mxu0 %v11410_v6  ;;  %v11497_v5 = vld [vmem:[%s12476_s28 + $0x62c] ss:$16 sps:$4 sm:$0xff]   ;;  %v11492_v6 = vld [vmem:[%s12476_s28 + $0x428] ss:$16 sps:$4 sm:$0xff]  }
 0x287   : > { %8229 = vmatprep.subr.bf16.mxu1 %v11413_v7  ;;  %v11495_v7 = vld [vmem:[%s12476_s28 + $0x628] ss:$16 sps:$4 sm:$0xff]  }
 0x289   : > { %8187 = vmatpush2.bf16.msra.mxu0 %v11408_v8  ;;  %v13280_v8 = vpop.f32.mrf.mxu0 }
 0x28a   : > { %8230 = vmatpush2.bf16.msra.mxu1 %v11411_v9  ;;  %8188 = vmatprep.subr.bf16.mxu0 %v11416_v10  ;;  %v13282_v9 = vpop.f32.mrf.mxu1  ;;  %v11500_v10 = vld [vmem:[%s12476_s28 + $0x40c] ss:$16 sps:$4 sm:$0xff]  }
 0x28b   : > { %8231 = vmatprep.subr.bf16.mxu1 %v11419_v11  ;;  %v11503_v11 = vld [vmem:[%s12476_s28 + $0x60c] ss:$16 sps:$4 sm:$0xff]  }
 0x28d   : > { %8189 = vmatpush2.bf16.msra.mxu0 %v11414_v12  ;;  %v11498_v12 = vld [vmem:[%s12476_s28 + $0x408] ss:$16 sps:$4 sm:$0xff]  }
 0x28e   : > { %8232 = vmatpush2.bf16.msra.mxu1 %v11417_v13  ;;  %8190 = vmatprep.subr.bf16.mxu0 %v11422_v14  ;;  %v11501_v13 = vld [vmem:[%s12476_s28 + $0x608] ss:$16 sps:$4 sm:$0xff]   ;;  %v13288_v14 = vpop.f32.mrf.mxu0 }
 0x28f   : > { %8233 = vmatprep.subr.bf16.mxu1 %v11425_v15  ;;  %v13290_v15 = vpop.f32.mrf.mxu1 }
 0x291   : > { %8191 = vmatpush2.bf16.msra.mxu0 %v11420_v16  ;;  %v11506_v16 = vld [vmem:[%s12476_s28 + $0x5ec] ss:$16 sps:$4 sm:$0xff]  }
 0x292   : > { %8234 = vmatpush2.bf16.msra.mxu1 %v11423_v17  ;;  %8192 = vmatprep.subr.bf16.mxu0 %v11428_v18  ;;  %v11509_v17 = vld [vmem:[%s12476_s28 + $0x7ec] ss:$16 sps:$4 sm:$0xff]   ;;  %v11504_v18 = vld [vmem:[%s12476_s28 + $0x5e8] ss:$16 sps:$4 sm:$0xff]  }
 0x293   : > { %8235 = vmatprep.subr.bf16.mxu1 %v11431_v19  ;;  %v11507_v19 = vld [vmem:[%s12476_s28 + $0x7e8] ss:$16 sps:$4 sm:$0xff]  }
 0x295   : > { %8193 = vmatpush2.bf16.msra.mxu0 %v11426_v20  ;;  %v13296_v20 = vpop.f32.mrf.mxu0 }
 0x296   : > { %8236 = vmatpush2.bf16.msra.mxu1 %v11429_v21  ;;  %8194 = vmatprep.subr.bf16.mxu0 %v11434_v22  ;;  %v13298_v21 = vpop.f32.mrf.mxu1 }
 0x297   : > { %8237 = vmatprep.subr.bf16.mxu1 %v11437_v23  ;;  %v13300_v22 = vpop.f32.mrf.mxu0 }
 0x298   : > { %v13302_v23 = vpop.f32.mrf.mxu1 }
 0x299   : > { %8195 = vmatpush2.bf16.msra.mxu0 %v11432_v24  ;;  %v11512_v24 = vld [vmem:[%s12476_s28 + $0x5cc] ss:$16 sps:$4 sm:$0xff]  }
 0x29a   : > { %8238 = vmatpush2.bf16.msra.mxu1 %v11435_v25  ;;  %8196 = vmatprep.subr.bf16.mxu0 %v11440_v26  ;;  %v11515_v25 = vld [vmem:[%s12476_s28 + $0x7cc] ss:$16 sps:$4 sm:$0xff]   ;;  %v11510_v26 = vld [vmem:[%s12476_s28 + $0x5c8] ss:$16 sps:$4 sm:$0xff]  }
 0x29b   : > { %8239 = vmatprep.subr.bf16.mxu1 %v11443_v27  ;;  %v11513_v27 = vld [vmem:[%s12476_s28 + $0x7c8] ss:$16 sps:$4 sm:$0xff]  }
 0x29d   : > { %8197 = vmatpush2.bf16.msra.mxu0 %v11438_v28  ;;  %v13308_v28 = vpop.f32.mrf.mxu0 }
 0x29e   : > { %8240 = vmatpush2.bf16.msra.mxu1 %v11441_v29  ;;  %8198 = vmatprep.subr.bf16.mxu0 %v11446_v30  ;;  %v13310_v29 = vpop.f32.mrf.mxu1  ;;  %v11518_v30 = vld [vmem:[%s12476_s28 + $0x5ac] ss:$16 sps:$4 sm:$0xff]  }
 0x29f   : > { %8241 = vmatprep.subr.bf16.mxu1 %v11449_v31  ;;  %v11521_v31 = vld [vmem:[%s12476_s28 + $0x7ac] ss:$16 sps:$4 sm:$0xff]  }
 0x2a1   : > { %8199 = vmatpush2.bf16.msra.mxu0 %v11444_v32  ;;  %v11516_v32 = vld [vmem:[%s12476_s28 + $0x5a8] ss:$16 sps:$4 sm:$0xff]  }
 0x2a2   : > { %8242 = vmatpush2.bf16.msra.mxu1 %v11447_v33  ;;  %8200 = vmatprep.subr.bf16.mxu0 %v11452_v34  ;;  %v11519_v33 = vld [vmem:[%s12476_s28 + $0x7a8] ss:$16 sps:$4 sm:$0xff]   ;;  %v13316_v34 = vpop.f32.mrf.mxu0 }
 0x2a3   : > { %8243 = vmatprep.subr.bf16.mxu1 %v11455_v35  ;;  %v13318_v35 = vpop.f32.mrf.mxu1 }
 0x2a5   : > { %8201 = vmatpush2.bf16.msra.mxu0 %v11450_v36  ;;  %v11524_v36 = vld [vmem:[%s12476_s28 + $0x58c] ss:$16 sps:$4 sm:$0xff]  }
 0x2a6   : > { %8244 = vmatpush2.bf16.msra.mxu1 %v11453_v37  ;;  %8256 = vmatprep.subr.bf16.mxu0 %v11458_v38  ;;  %v11527_v37 = vld [vmem:[%s12476_s28 + $0x78c] ss:$16 sps:$4 sm:$0xff]   ;;  %v11522_v38 = vld [vmem:[%s12476_s28 + $0x588] ss:$16 sps:$4 sm:$0xff]  }
 0x2a7   : > { %8299 = vmatprep.subr.bf16.mxu1 %v11461_v39  ;;  %v11525_v39 = vld [vmem:[%s12476_s28 + $0x788] ss:$16 sps:$4 sm:$0xff]  }
 0x2a8   : > { %8203 = vmatmul.mubr.bf16.vlgmr.msra.gmra.mxu0 %v12258_v46  ;;  %v11528_v46 = vld [vmem:[%s12476_s28 + $0x568] ss:$16 sps:$4 sm:$0xff]  }
 0x2a9   : > { %8246 = vmatmul.mubr.bf16.vlgmr.msra.gmra.mxu1 %v12259_v47  ;;  %8257 = vmatpush1.bf16.msra.mxu0 %v11456_v40  ;;  %v13324_v40 = vpop.f32.mrf.mxu0  ;;  %v11531_v47 = vld [vmem:[%s12476_s28 + $0x768] ss:$16 sps:$4 sm:$0xff]  }
 0x2aa   : > { %8300 = vmatpush1.bf16.msra.mxu1 %v11459_v41  ;;  %8258 = vmatprep.subr.bf16.mxu0 %v11464_v42  ;;  %v13326_v41 = vpop.f32.mrf.mxu1  ;;  %v11530_v42 = vld [vmem:[%s12476_s28 + $0x56c] ss:$16 sps:$4 sm:$0xff]  }
 0x2ab   : > { %8301 = vmatprep.subr.bf16.mxu1 %v11467_v43  ;;  %8288 = vmatprep.mubr.bf16.mxu0 %v12260_v52  ;;  %v11533_v43 = vld [vmem:[%s12476_s28 + $0x76c] ss:$16 sps:$4 sm:$0xff]   ;;  %v11534_v52 = vld [vmem:[%s12476_s28 + $0x548] ss:$16 sps:$4 sm:$0xff]  }
 0x2ac   : > { %8331 = vmatprep.mubr.bf16.mxu1 %v12261_v53  ;;  %v11537_v53 = vld [vmem:[%s12476_s28 + $0x748] ss:$16 sps:$4 sm:$0xff]  }
 0x2ad   : > { %8259 = vmatpush1.bf16.msra.mxu0 %v11462_v44  ;;  %v13330_v44 = vpop.f32.mrf.mxu0 }
 0x2ae   : > { %8302 = vmatpush1.bf16.msra.mxu1 %v11465_v45  ;;  %8260 = vmatprep.subr.bf16.mxu0 %v11470_v48  ;;  %v13332_v45 = vpop.f32.mrf.mxu1  ;;  %v11536_v48 = vld [vmem:[%s12476_s28 + $0x54c] ss:$16 sps:$4 sm:$0xff]  }
 0x2af   : > { %8303 = vmatprep.subr.bf16.mxu1 %v11473_v49  ;;  %v11539_v49 = vld [vmem:[%s12476_s28 + $0x74c] ss:$16 sps:$4 sm:$0xff]  }
 0x2b1   : > { %8261 = vmatpush1.bf16.msra.mxu0 %v11468_v50  ;;  %v13338_v50 = vpop.f32.mrf.mxu0 }
 0x2b2   : > { %8304 = vmatpush1.bf16.msra.mxu1 %v11471_v51  ;;  %8262 = vmatprep.subr.bf16.mxu0 %v11476_v54  ;;  %v13340_v51 = vpop.f32.mrf.mxu1  ;;  %v11542_v54 = vld [vmem:[%s12476_s28 + $0x52c] ss:$16 sps:$4 sm:$0xff]  }
 0x2b3   : > { %8305 = vmatprep.subr.bf16.mxu1 %v11479_v55  ;;  %v11545_v55 = vld [vmem:[%s12476_s28 + $0x72c] ss:$16 sps:$4 sm:$0xff]  }
 0x2b5   : > { %8263 = vmatpush1.bf16.msra.mxu0 %v11474_v56  ;;  %v13346_v56 = vpop.f32.mrf.mxu0 }
 0x2b6   : > { %8306 = vmatpush1.bf16.msra.mxu1 %v11477_v57  ;;  %8264 = vmatprep.subr.bf16.mxu0 %v11482_v58  ;;  %v13348_v57 = vpop.f32.mrf.mxu1  ;;  %v11540_v58 = vld [vmem:[%s12476_s28 + $0x528] ss:$16 sps:$4 sm:$0xff]  }
 0x2b7   : > { %8307 = vmatprep.subr.bf16.mxu1 %v11485_v59  ;;  %v11543_v59 = vld [vmem:[%s12476_s28 + $0x728] ss:$16 sps:$4 sm:$0xff]  }
 0x2b9   : > { %8265 = vmatpush1.bf16.msra.mxu0 %v11480_v60  ;;  %v11548_v60 = vld [vmem:[%s12476_s28 + $0x50c] ss:$16 sps:$4 sm:$0xff]  }
 0x2ba   : > { %8308 = vmatpush1.bf16.msra.mxu1 %v11483_v61  ;;  %8266 = vmatprep.subr.bf16.mxu0 %v11488_v62  ;;  %v11551_v61 = vld [vmem:[%s12476_s28 + $0x70c] ss:$16 sps:$4 sm:$0xff]   ;;  %v13354_v62 = vpop.f32.mrf.mxu0 }
 0x2bb   : > { %8309 = vmatprep.subr.bf16.mxu1 %v11491_v63  ;;  %v13356_v63 = vpop.f32.mrf.mxu1 }
 0x2bd   : > { %8267 = vmatpush1.bf16.msra.mxu0 %v11486_v0  ;;  %v11546_v0 = vld [vmem:[%s12476_s28 + $0x508] ss:$16 sps:$4 sm:$0xff]  }
 0x2be   : > { %8310 = vmatpush1.bf16.msra.mxu1 %v11489_v1  ;;  %8268 = vmatprep.subr.bf16.mxu0 %v11494_v4  ;;  %v11549_v1 = vld [vmem:[%s12476_s28 + $0x708] ss:$16 sps:$4 sm:$0xff]   ;;  %v13360_v4 = vpop.f32.mrf.mxu0 }
 0x2bf   : > { %8311 = vmatprep.subr.bf16.mxu1 %v11497_v5  ;;  %v13362_v5 = vpop.f32.mrf.mxu1 }
 0x2c1   : > { %8269 = vmatpush1.bf16.msra.mxu0 %v11492_v6  ;;  %v11554_v6 = vld [vmem:[%s12476_s28 + $0x8ec] ss:$16 sps:$4 sm:$0xff]  }
 0x2c2   : > { %8312 = vmatpush1.bf16.msra.mxu1 %v11495_v7  ;;  %8270 = vmatprep.subr.bf16.mxu0 %v11500_v10  ;;  %v11557_v7 = vld [vmem:[%s12476_s28 + $0xaec] ss:$16 sps:$4 sm:$0xff]   ;;  %v11552_v10 = vld [vmem:[%s12476_s28 + $0x8e8] ss:$16 sps:$4 sm:$0xff]  }
 0x2c3   : > { %8313 = vmatprep.subr.bf16.mxu1 %v11503_v11  ;;  %v11555_v11 = vld [vmem:[%s12476_s28 + $0xae8] ss:$16 sps:$4 sm:$0xff]  }
 0x2c5   : > { %8271 = vmatpush1.bf16.msra.mxu0 %v11498_v12  ;;  %v13369_v12 = vpop.f32.mrf.mxu0 }
 0x2c6   : > { %8314 = vmatpush1.bf16.msra.mxu1 %v11501_v13  ;;  %8272 = vmatprep.subr.bf16.mxu0 %v11506_v16  ;;  %v13371_v13 = vpop.f32.mrf.mxu1  ;;  %v11560_v16 = vld [vmem:[%s12476_s28 + $0x8cc] ss:$16 sps:$4 sm:$0xff]  }
 0x2c7   : > { %8315 = vmatprep.subr.bf16.mxu1 %v11509_v17  ;;  %v11563_v17 = vld [vmem:[%s12476_s28 + $0xacc] ss:$16 sps:$4 sm:$0xff]  }
 0x2c9   : > { %8273 = vmatpush2.bf16.msra.mxu0 %v11504_v18  ;;  %v12262_v18 = vld [vmem:[%s14077_s0 + $0x10] ss:$144 sps:$4 sm:$0xff]  }
 0x2ca   : > { %8316 = vmatpush2.bf16.msra.mxu1 %v11507_v19  ;;  %8274 = vmatprep.subr.bf16.mxu0 %v11512_v24  ;;  %v12263_v19 = vld [vmem:[%s14077_s0 + $0x18] ss:$144 sps:$4 sm:$0xff]   ;;  %v1436_v24 = vlaneseq }
 0x2cb   : > { %8317 = vmatprep.subr.bf16.mxu1 %v11515_v25  ;;  %v11558_v25 = vld [vmem:[%s12476_s28 + $0x8c8] ss:$16 sps:$4 sm:$0xff]  }
 0x2cd   : > { %8275 = vmatpush2.bf16.msra.mxu0 %v11510_v26  ;;  %v11561_v26 = vld [vmem:[%s12476_s28 + $0xac8] ss:$16 sps:$4 sm:$0xff]  }
 0x2ce   : > { %8318 = vmatpush2.bf16.msra.mxu1 %v11513_v27  ;;  %8276 = vmatprep.subr.bf16.mxu0 %v11518_v30  ;;  %v13387_v27 = vpop.f32.mrf.mxu0  ;;  %v13389_v30 = vpop.f32.mrf.mxu1 }
 0x2cf   : > { %8319 = vmatprep.subr.bf16.mxu1 %v11521_v31  ;;  %v11566_v31 = vld [vmem:[%s12476_s28 + $0x8ac] ss:$16 sps:$4 sm:$0xff]  }
 0x2d1   : > { %8277 = vmatpush2.bf16.msra.mxu0 %v11516_v32  ;;  %v11569_v32 = vld [vmem:[%s12476_s28 + $0xaac] ss:$16 sps:$4 sm:$0xff]  }
 0x2d2   : > { %8320 = vmatpush2.bf16.msra.mxu1 %v11519_v33  ;;  %8278 = vmatprep.subr.bf16.mxu0 %v11524_v36  ;;  %v12264_v33 = vld [vmem:[%s14077_s0 + $0x24] ss:$144 sps:$4 sm:$0xff]   ;;  %v12265_v36 = vld [vmem:[%s14077_s0 + $0x2c] ss:$144 sps:$4 sm:$0xff]  }
 0x2d3   : > { %8321 = vmatprep.subr.bf16.mxu1 %v11527_v37  ;;  %v13401_v37 = vshrl.u32 %v1436_v24, 7  ;;  %v11582_v24 = vld [vmem:[%s12476_s28 + $0x848] ss:$16 sps:$4 sm:$0xff]  }
 0x2d5   : > { %8279 = vmatpush2.bf16.msra.mxu0 %v11522_v38  ;;  %v11564_v38 = vld [vmem:[%s12476_s28 + $0x8a8] ss:$16 sps:$4 sm:$0xff]  }
 0x2d6   : > { %8322 = vmatpush2.bf16.msra.mxu1 %v11525_v39  ;;  %8280 = vmatprep.subr.bf16.mxu0 %v11530_v42  ;;  %v11567_v39 = vld [vmem:[%s12476_s28 + $0xaa8] ss:$16 sps:$4 sm:$0xff]   ;;  %v13405_v42 = vpop.f32.mrf.mxu0 }
 0x2d7   : > { %8323 = vmatprep.subr.bf16.mxu1 %v11533_v43  ;;  %v13407_v43 = vpop.f32.mrf.mxu1 }
 0x2d9   : > { %8281 = vmatpush2.bf16.msra.mxu0 %v11528_v46  ;;  %v11572_v46 = vld [vmem:[%s12476_s28 + $0x88c] ss:$16 sps:$4 sm:$0xff]  }
 0x2da   : > { %8324 = vmatpush2.bf16.msra.mxu1 %v11531_v47  ;;  %8282 = vmatprep.subr.bf16.mxu0 %v11536_v48  ;;  %v11575_v47 = vld [vmem:[%s12476_s28 + $0xa8c] ss:$16 sps:$4 sm:$0xff]   ;;  %v13416_v48 = vpop.f32.mrf.mxu0 }
 0x2db   : > { %8325 = vmatprep.subr.bf16.mxu1 %v11539_v49  ;;  %v13418_v49 = vpop.f32.mrf.mxu1 }
 0x2dd   : > { %8283 = vmatpush2.bf16.msra.mxu0 %v11534_v52  ;;  %v1438_v52 = vsub.s32 0, %v13401_v37 }
 0x2de   : > { %8326 = vmatpush2.bf16.msra.mxu1 %v11537_v53  ;;  %8284 = vmatprep.subr.bf16.mxu0 %v11542_v54  ;;  %v11570_v53 = vld [vmem:[%s12476_s28 + $0x888] ss:$16 sps:$4 sm:$0xff]  }
 0x2df   : > { %8327 = vmatprep.subr.bf16.mxu1 %v11545_v55  ;;  %v11573_v54 = vld [vmem:[%s12476_s28 + $0xa88] ss:$16 sps:$4 sm:$0xff]   ;;  %v1434_v55 = vld [vmem:[%s13414_s12] sm:$0xf] }
 0x2e1   : > { %8285 = vmatpush2.bf16.msra.mxu0 %v11540_v58  ;;  %v11578_v58 = vld [vmem:[%s12476_s28 + $0x86c] ss:$16 sps:$4 sm:$0xff]  }
 0x2e2   : > { %8328 = vmatpush2.bf16.msra.mxu1 %v11543_v59  ;;  %8286 = vmatprep.subr.bf16.mxu0 %v11548_v60  ;;  %v11581_v59 = vld [vmem:[%s12476_s28 + $0xa6c] ss:$16 sps:$4 sm:$0xff]   ;;  %v1442_v60 = vsub.s32 1, %v13401_v37 }
 0x2e3   : > { %8329 = vmatprep.subr.bf16.mxu1 %v11551_v61  ;;  %v13427_v61 = vpop.f32.mrf.mxu0 }
 0x2e5   : > { %8287 = vmatpush2.bf16.msra.mxu0 %v11546_v0  ;;  %v13429_v0 = vpop.f32.mrf.mxu1 }
 0x2e6   : > { %8330 = vmatpush2.bf16.msra.mxu1 %v11549_v1  ;;  %8342 = vmatprep.subr.bf16.mxu0 %v11554_v6  ;;  %v1439_v1 = vrot.slane %v1434_v55, %v1438_v52  ;;  %v11576_v6 = vld [vmem:[%s12476_s28 + $0x868] ss:$16 sps:$4 sm:$0xff]  }
 0x2e7   : > { %8385 = vmatprep.subr.bf16.mxu1 %v11557_v7  ;;  %v11579_v7 = vld [vmem:[%s12476_s28 + $0xa68] ss:$16 sps:$4 sm:$0xff]  }
 0x2e8   : > { %8289 = vmatmul.mubr.bf16.vlgmr.msra.gmra.mxu0 %v12262_v18  ;;  %v13437_v18 = vpop.f32.mrf.mxu1 }
 0x2e9   : > { %8332 = vmatmul.mubr.bf16.vlgmr.msra.gmra.mxu1 %v12263_v19  ;;  %8343 = vmatpush1.bf16.msra.mxu0 %v11552_v10  ;;  %v11584_v10 = vld [vmem:[%s12476_s28 + $0x84c] ss:$16 sps:$4 sm:$0xff]   ;;  %v7431_v19 = vadd.f32 %v13272_v2, %v1439_v1 }
 0x2ea   : > { %8386 = vmatpush1.bf16.msra.mxu1 %v11555_v11  ;;  %8344 = vmatprep.subr.bf16.mxu0 %v11560_v16  ;;  %v11587_v11 = vld [vmem:[%s12476_s28 + $0xa4c] ss:$16 sps:$4 sm:$0xff]   ;;  %v1443_v16 = vrot.slane %v1434_v55, %v1442_v60  ;;  %v11597_v60 = vld [vmem:[%s12476_s28 + $0xa08] ss:$16 sps:$4 sm:$0xff]  }
 0x2eb   : > { %8387 = vmatprep.subr.bf16.mxu1 %v11563_v17  ;;  %8374 = vmatprep.mubr.bf16.mxu0 %v12264_v33  ;;  %v13435_v17 = vpop.f32.mrf.mxu0  ;;  %v7474_v2 = vadd.f32 %v13274_v3, %v7431_v19  ;;  %v11603_v19 = vld [vmem:[%s12476_s28 + $0xbe8] ss:$16 sps:$4 sm:$0xff]  }
 0x2ec   : > { %8417 = vmatprep.mubr.bf16.mxu1 %v12265_v36  ;;  %v13447_v36 = vpop.f32.mrf.mxu1 }
 0x2ed   : > { %8345 = vmatpush1.bf16.msra.mxu0 %v11558_v25  ;;  %v11585_v25 = vld [vmem:[%s12476_s28 + $0xa48] ss:$16 sps:$4 sm:$0xff]   ;;  %v13445_v33 = vpop.f32.mrf.mxu0 }
 0x2ee   : > { %8388 = vmatpush1.bf16.msra.mxu1 %v11561_v26  ;;  %8346 = vmatprep.subr.bf16.mxu0 %v11566_v31  ;;  %v11590_v26 = vld [vmem:[%s12476_s28 + $0x82c] ss:$16 sps:$4 sm:$0xff]   ;;  %v13455_v52 = vpop.f32.mrf.mxu1 }
 0x2ef   : > { %8389 = vmatprep.subr.bf16.mxu1 %v11569_v32  ;;  %v11593_v31 = vld [vmem:[%s12476_s28 + $0xa2c] ss:$16 sps:$4 sm:$0xff]   ;;  %v7433_v32 = vadd.f32 %v13280_v8, %v1443_v16 }
 0x2f0   : > { %v11596_v8 = vld [vmem:[%s12476_s28 + $0x80c] ss:$16 sps:$4 sm:$0xff]  }
 0x2f1   : > { %8347 = vmatpush1.bf16.msra.mxu0 %v11564_v38  ;;  %v7435_v38 = vadd.f32 %v13288_v14, %v1439_v1  ;;  %v7476_v3 = vadd.f32 %v13282_v9, %v7433_v32  ;;  %v7437_v14 = vadd.f32 %v13296_v20, %v1443_v16  ;;  %v11602_v9 = vld [vmem:[%s12476_s28 + $0x9ec] ss:$16 sps:$4 sm:$0xff]   ;;  %v11600_v16 = vld [vmem:[%s12476_s28 + $0x9e8] ss:$16 sps:$4 sm:$0xff]  }
 0x2f2   : > { %8390 = vmatpush1.bf16.msra.mxu1 %v11567_v39  ;;  %8348 = vmatprep.subr.bf16.mxu0 %v11572_v46  ;;  %v11588_v39 = vld [vmem:[%s12476_s28 + $0x828] ss:$16 sps:$4 sm:$0xff]   ;;  %v11605_v20 = vld [vmem:[%s12476_s28 + $0xbec] ss:$16 sps:$4 sm:$0xff]  }
 0x2f3   : > { %8391 = vmatprep.subr.bf16.mxu1 %v11575_v47  ;;  %v11591_v46 = vld [vmem:[%s12476_s28 + $0xa28] ss:$16 sps:$4 sm:$0xff]   ;;  %v13453_v47 = vpop.f32.mrf.mxu0  ;;  %v7478_v55 = vadd.f32 %v13290_v15, %v7435_v38  ;;  %v7480_v15 = vadd.f32 %v13298_v21, %v7437_v14  ;;  %v11608_v21 = vld [vmem:[%s12476_s28 + $0x9cc] ss:$16 sps:$4 sm:$0xff]  }
 0x2f4   : > { %v11609_v32 = vld [vmem:[%s12476_s28 + $0xbc8] ss:$16 sps:$4 sm:$0xff]  }
 0x2f5   : > { %8349 = vmatpush1.bf16.msra.mxu0 %v11570_v53  ;;  %v11599_v53 = vld [vmem:[%s12476_s28 + $0xa0c] ss:$16 sps:$4 sm:$0xff]   ;;  %v13466_v1 = vpop.f32.mrf.mxu0  ;;  %v11615_v14 = vld [vmem:[%s12476_s28 + $0xba8] ss:$16 sps:$4 sm:$0xff]  }
 0x2f6   : > { %8392 = vmatpush1.bf16.msra.mxu1 %v11573_v54  ;;  %8350 = vmatprep.subr.bf16.mxu0 %v11578_v58  ;;  %v7517_v54 = vadd.f32 %v13300_v22, %v7474_v2  ;;  %v7519_v58 = vadd.f32 %v13308_v28, %v7476_v3  ;;  %v7521_v28 = vadd.f32 %v13316_v34, %v7478_v55  ;;  %v11612_v3 = vld [vmem:[%s12476_s28 + $0x9a8] ss:$16 sps:$4 sm:$0xff]  }
 0x2f7   : > { %8393 = vmatprep.subr.bf16.mxu1 %v11581_v59  ;;  %v11594_v59 = vld [vmem:[%s12476_s28 + $0x808] ss:$16 sps:$4 sm:$0xff]  }
 0x2f8   : > { %v7560_v22 = vadd.f32 %v13302_v23, %v7517_v54  ;;  %v11611_v23 = vld [vmem:[%s12476_s28 + $0xbcc] ss:$16 sps:$4 sm:$0xff]  }
 0x2f9   : > { %8351 = vmatpush1.bf16.msra.mxu0 %v11576_v6  ;;  %v13468_v6 = vpop.f32.mrf.mxu1 }
 0x2fa   : > { %8394 = vmatpush1.bf16.msra.mxu1 %v11579_v7  ;;  %8352 = vmatprep.subr.bf16.mxu0 %v11584_v10  ;;  %v7562_v7 = vadd.f32 %v13310_v29, %v7519_v58  ;;  %v7523_v10 = vadd.f32 %v13324_v40, %v7480_v15  ;;  %v7564_v29 = vadd.f32 %v13318_v35, %v7521_v28  ;;  %v11614_v35 = vld [vmem:[%s12476_s28 + $0x9ac] ss:$16 sps:$4 sm:$0xff]  }
 0x2fb   : > { %8395 = vmatprep.subr.bf16.mxu1 %v11587_v11  ;;  %v7603_v11 = vadd.f32 %v13330_v44, %v7560_v22 }
 0x2fc   : > { %v7605_v34 = vadd.f32 %v13338_v50, %v7562_v7  ;;  %v7566_v40 = vadd.f32 %v13326_v41, %v7523_v10  ;;  %v11617_v41 = vld [vmem:[%s12476_s28 + $0xbac] ss:$16 sps:$4 sm:$0xff]   ;;  %v11624_v7 = vld [vmem:[%s12476_s28 + $0x968] ss:$16 sps:$4 sm:$0xff]  }
 0x2fd   : > { %8353 = vmatpush1.bf16.msra.mxu0 %v11582_v24  ;;  %v13480_v24 = vpop.f32.mrf.mxu0  ;;  %v7646_v44 = vadd.f32 %v13332_v45, %v7603_v11  ;;  %v11627_v10 = vld [vmem:[%s12476_s28 + $0xb68] ss:$16 sps:$4 sm:$0xff]   ;;  %v11635_v11 = vld [vmem:[%s12476_s28 + $0xb4c] ss:$16 sps:$4 sm:$0xff]  }
 0x2fe   : > { %8396 = vmatpush1.bf16.msra.mxu1 %v11585_v25  ;;  %8354 = vmatprep.subr.bf16.mxu0 %v11590_v26  ;;  %v13482_v25 = vpop.f32.mrf.mxu1  ;;  %v7607_v26 = vadd.f32 %v13346_v56, %v7564_v29  ;;  %v7648_v45 = vadd.f32 %v13340_v51, %v7605_v34  ;;  %v7609_v50 = vadd.f32 %v13354_v62, %v7566_v40  ;;  %v11620_v51 = vld [vmem:[%s12476_s28 + $0x98c] ss:$16 sps:$4 sm:$0xff]   ;;  %v11633_v29 = vld [vmem:[%s12476_s28 + $0xb48] ss:$16 sps:$4 sm:$0xff]  }
 0x2ff   : > { %8397 = vmatprep.subr.bf16.mxu1 %v11593_v31  ;;  %v11606_v31 = vld [vmem:[%s12476_s28 + $0x9c8] ss:$16 sps:$4 sm:$0xff]   ;;  %v13493_v2 = vpop.f32.mrf.mxu0  ;;  %v7689_v56 = vadd.f32 %v13360_v4, %v7646_v44  ;;  %v11623_v62 = vld [vmem:[%s12476_s28 + $0xb8c] ss:$16 sps:$4 sm:$0xff]  }
 0x300   : > { %v13495_v38 = vpop.f32.mrf.mxu1  ;;  %v7652_v4 = vadd.f32 %v13356_v63, %v7609_v50  ;;  %v11626_v63 = vld [vmem:[%s12476_s28 + $0x96c] ss:$16 sps:$4 sm:$0xff]  }
 0x301   : > { %8355 = vmatpush1.bf16.msra.mxu0 %v11588_v39  ;;  %v13502_v39 = vpop.f32.mrf.mxu0  ;;  %v7732_v54 = vadd.f32 %v13362_v5, %v7689_v56  ;;  %v11629_v5 = vld [vmem:[%s12476_s28 + $0xb6c] ss:$16 sps:$4 sm:$0xff]  }
 0x302   : > { %8398 = vmatpush1.bf16.msra.mxu1 %v11591_v46  ;;  %8356 = vmatprep.subr.bf16.mxu0 %v11596_v8  ;;  %v13504_v46 = vpop.f32.mrf.mxu1  ;;  %v7650_v8 = vadd.f32 %v13348_v57, %v7607_v26 }
 0x303   : > { %8399 = vmatprep.subr.bf16.mxu1 %v11599_v53  ;;  %v7691_v53 = vadd.f32 %v13369_v12, %v7648_v45  ;;  %v7948_v55 = vpop.f32.mrf.mxu0 }
 0x304   : > { %v7693_v57 = vadd.f32 %v13387_v27, %v7650_v8  ;;  %v13515_v12 = vpop.f32.mrf.mxu1  ;;  %v11645_v8 = vld [vmem:[%s12476_s28 + $0xb08] ss:$16 sps:$4 sm:$0xff]  }
 0x305   : > { %8357 = vmatpush1.bf16.msra.mxu0 %v11594_v59  ;;  %v7734_v58 = vadd.f32 %v13371_v13, %v7691_v53  ;;  %v7695_v59 = vadd.f32 %v13405_v42, %v7652_v4  ;;  %v7950_v15 = vpop.f32.mrf.mxu0 }
 0x306   : > { %8400 = vmatpush1.bf16.msra.mxu1 %v11597_v60  ;;  %8358 = vmatprep.subr.bf16.mxu0 %v11602_v9  ;;  %v7775_v60 = vadd.f32 %v13416_v48, %v7732_v54  ;;  %v11618_v9 = vld [vmem:[%s12476_s28 + $0x988] ss:$16 sps:$4 sm:$0xff]   ;;  %v7736_v27 = vadd.f32 %v13389_v30, %v7693_v57  ;;  %v13526_v42 = vpop.f32.mrf.mxu1  ;;  %v11632_v30 = vld [vmem:[%s12476_s28 + $0x94c] ss:$16 sps:$4 sm:$0xff]  }
 0x307   : > { %8401 = vmatprep.subr.bf16.mxu1 %v11605_v20  ;;  %v11621_v20 = vld [vmem:[%s12476_s28 + $0xb88] ss:$16 sps:$4 sm:$0xff]   ;;  %v7777_v13 = vadd.f32 %v13427_v61, %v7734_v58  ;;  %v7738_v48 = vadd.f32 %v13407_v43, %v7695_v59  ;;  %v11656_v59 = vld [vmem:[%s12476_s28 + $0xccc] ss:$16 sps:$4 sm:$0xff]  }
 0x308   : > { %v7818_v22 = vadd.f32 %v13418_v49, %v7775_v60  ;;  %v7779_v28 = vadd.f32 %v13435_v17, %v7736_v27  ;;  %v7995_v17 = vpop.f32.mrf.mxu1  ;;  %v11648_v54 = vld [vmem:[%s12476_s28 + $0xce8] ss:$16 sps:$4 sm:$0xff]   ;;  %v11659_v60 = vld [vmem:[%s12476_s28 + $0xecc] ss:$16 sps:$4 sm:$0xff]   ;;  %v12266_v27 = vld [vmem:[%s14077_s0 + $0x20] ss:$144 sps:$4 sm:$0xff]  }
 0x309   : > { %8359 = vmatpush2.bf16.msra.mxu0 %v11600_v16  ;;  %v7820_v61 = vadd.f32 %v13429_v0, %v7777_v13  ;;  %v7781_v43 = vadd.f32 %v13445_v33, %v7738_v48  ;;  %v7952_v16 = vpop.f32.mrf.mxu0  ;;  %v11638_v0 = vld [vmem:[%s12476_s28 + $0x92c] ss:$16 sps:$4 sm:$0xff]   ;;  %v11651_v57 = vld [vmem:[%s12476_s28 + $0xee8] ss:$16 sps:$4 sm:$0xff]  }
 0x30a   : > { %8402 = vmatpush2.bf16.msra.mxu1 %v11603_v19  ;;  %8360 = vmatprep.subr.bf16.mxu0 %v11608_v21  ;;  %v7861_v49 = vadd.f32 %v13453_v47, %v7818_v22  ;;  %v7822_v19 = vadd.f32 %v13437_v18, %v7779_v28  ;;  %v8075_v40 = vpop.f32.mrf.mxu1  ;;  %v11641_v33 = vld [vmem:[%s12476_s28 + $0xb2c] ss:$16 sps:$4 sm:$0xff]   ;;  %v12267_v13 = vld [vmem:[%s14077_s0 + $0x28] ss:$144 sps:$4 sm:$0xff]  }
 0x30b   : > { %8403 = vmatprep.subr.bf16.mxu1 %v11611_v23  ;;  %v7863_v21 = vadd.f32 %v13466_v1, %v7820_v61  ;;  %v11630_v23 = vld [vmem:[%s12476_s28 + $0x948] ss:$16 sps:$4 sm:$0xff]   ;;  %v8032_v34 = vpop.f32.mrf.mxu0  ;;  %v7824_v47 = vadd.f32 %v13447_v36, %v7781_v43  ;;  %v11644_v36 = vld [vmem:[%s12476_s28 + $0x90c] ss:$16 sps:$4 sm:$0xff]  }
 0x30c   : > { %v7904_v18 = vadd.f32 %v13455_v52, %v7861_v49  ;;  %v7865_v1 = vadd.f32 %v13480_v24, %v7822_v19  ;;  %v8077_v45 = vpop.f32.mrf.mxu1  ;;  %v11647_v52 = vld [vmem:[%s12476_s28 + $0xb0c] ss:$16 sps:$4 sm:$0xff]   ;;  %v11654_v22 = vld [vmem:[%s12476_s28 + $0xcc8] ss:$16 sps:$4 sm:$0xff]  }
 0x30d   : > { %8361 = vmatpush2.bf16.msra.mxu0 %v11606_v31  ;;  %v7906_v44 = vadd.f32 %v13468_v6, %v7863_v21  ;;  %v7867_v26 = vadd.f32 %v13493_v2, %v7824_v47  ;;  %v11657_v28 = vld [vmem:[%s12476_s28 + $0xec8] ss:$16 sps:$4 sm:$0xff]  }
 0x30e   : > { %8404 = vmatpush2.bf16.msra.mxu1 %v11609_v32  ;;  %8362 = vmatprep.subr.bf16.mxu0 %v11614_v35  ;;  %v7947_v31 = vadd.f32 %v13502_v39, %v7904_v18  ;;  %v11636_v32 = vld [vmem:[%s12476_s28 + $0x928] ss:$16 sps:$4 sm:$0xff]   ;;  %v7908_v6 = vadd.f32 %v13482_v25, %v7865_v1  ;;  %v11653_v25 = vld [vmem:[%s12476_s28 + $0xeec] ss:$16 sps:$4 sm:$0xff]  }
 0x30f   : > { %8405 = vmatprep.subr.bf16.mxu1 %v11617_v41  ;;  %v11639_v35 = vld [vmem:[%s12476_s28 + $0xb28] ss:$16 sps:$4 sm:$0xff]   ;;  %v8034_v41 = vpop.f32.mrf.mxu0  ;;  %v7949_v24 = vadd.f32 %v7948_v55, %v7906_v44  ;;  %v7910_v2 = vadd.f32 %v13495_v38, %v7867_v26  ;;  %v11668_v18 = vld [vmem:[%s12476_s28 + $0xc8c] ss:$16 sps:$4 sm:$0xff]  }
 0x310   : > { %v7990_v50 = vadd.f32 %v13504_v46, %v7947_v31  ;;  %v7951_v56 = vadd.f32 %v7950_v15, %v7908_v6  ;;  %v11642_v39 = vld [vmem:[%s12476_s28 + $0x908] ss:$16 sps:$4 sm:$0xff]   ;;  %v11671_v1 = vld [vmem:[%s12476_s28 + $0xe8c] ss:$16 sps:$4 sm:$0xff]  }
 0x311   : > { %8363 = vmatpush2.bf16.msra.mxu0 %v11612_v3  ;;  %v8036_v53 = vpop.f32.mrf.mxu0  ;;  %v8079_v3 = vpop.f32.mrf.mxu1  ;;  %v7953_v38 = vadd.f32 %v7952_v16, %v7910_v2  ;;  %v12268_v16 = vld [vmem:[%s14077_s0 + $0x34] ss:$144 sps:$4 sm:$0xff]   ;;  %v11677_v6 = vld [vmem:[%s12476_s28 + $0xe6c] ss:$16 sps:$4 sm:$0xff]   ;;  %v11672_v2 = vld [vmem:[%s12476_s28 + $0xc68] ss:$16 sps:$4 sm:$0xff]  }
 0x312   : > { %8406 = vmatpush2.bf16.msra.mxu1 %v11615_v14  ;;  %8364 = vmatprep.subr.bf16.mxu0 %v11620_v51  ;;  %v11650_v14 = vld [vmem:[%s12476_s28 + $0xcec] ss:$16 sps:$4 sm:$0xff]   ;;  %v7992_v51 = vadd.f32 %v13515_v12, %v7949_v24  ;;  %v7994_v46 = vadd.f32 %v13526_v42, %v7951_v56 }
 0x313   : > { %8407 = vmatprep.subr.bf16.mxu1 %v11623_v62  ;;  %v8033_v62 = vadd.f32 %v8032_v34, %v7990_v50  ;;  %v8038_v55 = vpop.f32.mrf.mxu0  ;;  %v8081_v58 = vpop.f32.mrf.mxu1  ;;  %v11675_v50 = vld [vmem:[%s12476_s28 + $0xe68] ss:$16 sps:$4 sm:$0xff]   ;;  %v11680_v56 = vld [vmem:[%s12476_s28 + $0xc4c] ss:$16 sps:$4 sm:$0xff]  }
 0x314   : > { %v8035_v4 = vadd.f32 %v8034_v41, %v7992_v51  ;;  %v8037_v12 = vadd.f32 %v8036_v53, %v7994_v46  ;;  %v11681_v53 = vld [vmem:[%s12476_s28 + $0xe48] ss:$16 sps:$4 sm:$0xff]  }
 0x315   : > { %8365 = vmatpush2.bf16.msra.mxu0 %v11618_v9  ;;  %v7996_v9 = vadd.f32 %v7995_v17, %v7953_v38  ;;  %v12269_v17 = vld [vmem:[%s14077_s0 + $0x3c] ss:$144 sps:$4 sm:$0xff]   ;;  %v11684_v38 = vld [vmem:[%s12476_s28 + $0xc28] ss:$16 sps:$4 sm:$0xff]  }
 0x316   : > { %8408 = vmatpush2.bf16.msra.mxu1 %v11621_v20  ;;  %8366 = vmatprep.subr.bf16.mxu0 %v11626_v63  ;;  %v8076_v20 = vadd.f32 %v8075_v40, %v8033_v62  ;;  %v8078_v15 = vadd.f32 %v8077_v45, %v8035_v4  ;;  %v8080_v61 = vadd.f32 %v8079_v3, %v8037_v12  ;;  %v11666_v45 = vld [vmem:[%s12476_s28 + $0xc88] ss:$16 sps:$4 sm:$0xff]   ;;  %v11686_v3 = vld [vmem:[%s12476_s28 + $0xc2c] ss:$16 sps:$4 sm:$0xff]  }
 0x317   : > { %8409 = vmatprep.subr.bf16.mxu1 %v11629_v5  ;;  %v8039_v42 = vadd.f32 %v8038_v55, %v7996_v9  ;;  %v11687_v62 = vld [vmem:[%s12476_s28 + $0xe28] ss:$16 sps:$4 sm:$0xff]   ;;  %v11692_v4 = vld [vmem:[%s12476_s28 + $0xc0c] ss:$16 sps:$4 sm:$0xff]  }
 0x318   : > { %v11701_v12 = vld [vmem:[%s12476_s28 + $0xfec] ss:$16 sps:$4 sm:$0xff]  }
 0x319   : > { %8367 = vmatpush2.bf16.msra.mxu0 %v11624_v7 }
 0x31a   : > { %8410 = vmatpush2.bf16.msra.mxu1 %v11627_v10  ;;  %8368 = vmatprep.subr.bf16.mxu0 %v11632_v30  ;;  %v11662_v30 = vld [vmem:[%s12476_s28 + $0xcac] ss:$16 sps:$4 sm:$0xff]  }
 0x31b   : > { %8411 = vmatprep.subr.bf16.mxu1 %v11635_v11  ;;  %v11665_v11 = vld [vmem:[%s12476_s28 + $0xeac] ss:$16 sps:$4 sm:$0xff]  }
 0x31d   : > { %8369 = vmatpush2.bf16.msra.mxu0 %v11630_v23  ;;  %v8082_v23 = vadd.f32 %v8081_v58, %v8039_v42  ;;  %v11702_v42 = vld [vmem:[%s12476_s28 + $0xdc8] ss:$16 sps:$4 sm:$0xff]  }
 0x31e   : > { %8412 = vmatpush2.bf16.msra.mxu1 %v11633_v29  ;;  %8370 = vmatprep.subr.bf16.mxu0 %v11638_v0  ;;  %v11660_v0 = vld [vmem:[%s12476_s28 + $0xca8] ss:$16 sps:$4 sm:$0xff]  }
 0x31f   : > { %8413 = vmatprep.subr.bf16.mxu1 %v11641_v33  ;;  %v11663_v33 = vld [vmem:[%s12476_s28 + $0xea8] ss:$16 sps:$4 sm:$0xff]  }
 0x321   : > { %8371 = vmatpush2.bf16.msra.mxu0 %v11636_v32 }
 0x322   : > { %8414 = vmatpush2.bf16.msra.mxu1 %v11639_v35  ;;  %8372 = vmatprep.subr.bf16.mxu0 %v11644_v36  ;;  %v11669_v36 = vld [vmem:[%s12476_s28 + $0xe88] ss:$16 sps:$4 sm:$0xff]  }
 0x323   : > { %8415 = vmatprep.subr.bf16.mxu1 %v11647_v52  ;;  %v11674_v52 = vld [vmem:[%s12476_s28 + $0xc6c] ss:$16 sps:$4 sm:$0xff]  }
 0x325   : > { %8373 = vmatpush2.bf16.msra.mxu0 %v11642_v39  ;;  %v11683_v39 = vld [vmem:[%s12476_s28 + $0xe4c] ss:$16 sps:$4 sm:$0xff]  }
 0x326   : > { %8416 = vmatpush2.bf16.msra.mxu1 %v11645_v8  ;;  %8428 = vmatprep.subr.bf16.mxu0 %v11650_v14  ;;  %v11678_v8 = vld [vmem:[%s12476_s28 + $0xc48] ss:$16 sps:$4 sm:$0xff]   ;;  %v11689_v14 = vld [vmem:[%s12476_s28 + $0xe2c] ss:$16 sps:$4 sm:$0xff]  }
 0x327   : > { %8471 = vmatprep.subr.bf16.mxu1 %v11653_v25 }
 0x328   : > { %v8118_v63 = vpop.f32.mrf.mxu0  ;;  %8375 = vmatmul.mubr.bf16.vlgmr.msra.gmra.mxu0 %v12266_v27  ;;  %v11699_v27 = vld [vmem:[%s12476_s28 + $0xfe8] ss:$16 sps:$4 sm:$0xff]  }
 0x329   : > { %v8161_v5 = vpop.f32.mrf.mxu1  ;;  %8418 = vmatmul.mubr.bf16.vlgmr.msra.gmra.mxu1 %v12267_v13  ;;  %v8119_v48 = vadd.f32 %v8118_v63, %v8076_v20  ;;  %8429 = vmatpush1.bf16.msra.mxu0 %v11648_v54  ;;  %v11695_v54 = vld [vmem:[%s12476_s28 + $0xe0c] ss:$16 sps:$4 sm:$0xff]  }
 0x32a   : > { %8472 = vmatpush1.bf16.msra.mxu1 %v11651_v57  ;;  %v8120_v7 = vpop.f32.mrf.mxu0  ;;  %8430 = vmatprep.subr.bf16.mxu0 %v11656_v59  ;;  %v11690_v59 = vld [vmem:[%s12476_s28 + $0xc08] ss:$16 sps:$4 sm:$0xff]   ;;  %v11698_v20 = vld [vmem:[%s12476_s28 + $0xdec] ss:$16 sps:$4 sm:$0xff]  }
 0x32b   : > { %v8163_v10 = vpop.f32.mrf.mxu1  ;;  %8473 = vmatprep.subr.bf16.mxu1 %v11659_v60  ;;  %v13577_v43 = vadd.f32 %v8161_v5, %v8119_v48  ;;  %v8121_v49 = vadd.f32 %v8120_v7, %v8078_v15  ;;  %8460 = vmatprep.mubr.bf16.mxu0 %v12268_v16  ;;  %v11693_v60 = vld [vmem:[%s12476_s28 + $0xe08] ss:$16 sps:$4 sm:$0xff]   ;;  %v11704_v13 = vld [vmem:[%s12476_s28 + $0xdcc] ss:$16 sps:$4 sm:$0xff]  }
 0x32c   : > { %8503 = vmatprep.mubr.bf16.mxu1 %v12269_v17  ;;  %v8122_v19 = vpop.f32.mrf.mxu0  ;;  %v11696_v5 = vld [vmem:[%s12476_s28 + $0xde8] ss:$16 sps:$4 sm:$0xff]   ;;  %v11707_v15 = vld [vmem:[%s12476_s28 + $0xfcc] ss:$16 sps:$4 sm:$0xff]  }
 0x32d   : > { %v8165_v21 = vpop.f32.mrf.mxu1  ;;  %v10359_v29 = vmul.f32 -1.442695, %v13577_v43  ;;  %v13586_v34 = vadd.f32 %v8163_v10, %v8121_v49  ;;  %v8123_v40 = vadd.f32 %v8122_v19, %v8080_v61  ;;  %8431 = vmatpush1.bf16.msra.mxu0 %v11654_v22  ;;  %v11705_v48 = vld [vmem:[%s12476_s28 + $0xfc8] ss:$16 sps:$4 sm:$0xff]   ;;  %v11710_v22 = vld [vmem:[%s12476_s28 + $0xdac] ss:$16 sps:$4 sm:$0xff]  }
 0x32e   : > { %8474 = vmatpush1.bf16.msra.mxu1 %v11657_v28  ;;  %v8124_v47 = vpop.f32.mrf.mxu0  ;;  %8432 = vmatprep.subr.bf16.mxu0 %v11662_v30  ;;  %v11713_v28 = vld [vmem:[%s12476_s28 + $0xfac] ss:$16 sps:$4 sm:$0xff]   ;;  %v11708_v10 = vld [vmem:[%s12476_s28 + $0xda8] ss:$16 sps:$4 sm:$0xff]  }
 0x32f   : > { %8475 = vmatprep.subr.bf16.mxu1 %v11665_v11  ;;  %12224 = vpow2.f32 %v10359_v29  ;;  %v10360_v44 = vmul.f32 -1.442695, %v13586_v34  ;;  %v13593_v26 = vadd.f32 %v8165_v21, %v8123_v40  ;;  %v8125_v31 = vadd.f32 %v8124_v47, %v8082_v23  ;;  %v8167_v32 = vpop.f32.mrf.mxu1  ;;  %v11711_v30 = vld [vmem:[%s12476_s28 + $0xfa8] ss:$16 sps:$4 sm:$0xff]   ;;  %v11716_v61 = vld [vmem:[%s12476_s28 + $0xd8c] ss:$16 sps:$4 sm:$0xff]  }
 0x330   : > { %v11719_v49 = vld [vmem:[%s12476_s28 + $0xf8c] ss:$16 sps:$4 sm:$0xff]   ;;  %v11714_v23 = vld [vmem:[%s12476_s28 + $0xd88] ss:$16 sps:$4 sm:$0xff]  }
 0x331   : > { %12226 = vpow2.f32 %v10360_v44  ;;  %v10363_v35 = vmul.f32 -1.442695, %v13593_v26  ;;  %v13596_v41 = vadd.f32 %v8167_v32, %v8125_v31  ;;  %8433 = vmatpush1.bf16.msra.mxu0 %v11660_v0  ;;  %v11717_v29 = vld [vmem:[%s12476_s28 + $0xf88] ss:$16 sps:$4 sm:$0xff]   ;;  %v11722_v0 = vld [vmem:[%s12476_s28 + $0xd6c] ss:$16 sps:$4 sm:$0xff]  }
 0x332   : > { %8476 = vmatpush1.bf16.msra.mxu1 %v11663_v33  ;;  %8434 = vmatprep.subr.bf16.mxu0 %v11668_v18  ;;  %v11725_v33 = vld [vmem:[%s12476_s28 + $0xf6c] ss:$16 sps:$4 sm:$0xff]   ;;  %v11720_v18 = vld [vmem:[%s12476_s28 + $0xd68] ss:$16 sps:$4 sm:$0xff]  }
 0x333   : > { %8477 = vmatprep.subr.bf16.mxu1 %v11671_v1  ;;  %12228 = vpow2.f32 %v10363_v35  ;;  %v10364_v24 = vmul.f32 -1.442695, %v13596_v41  ;;  %v11723_v1 = vld [vmem:[%s12476_s28 + $0xf68] ss:$16 sps:$4 sm:$0xff]   ;;  %v11728_v44 = vld [vmem:[%s12476_s28 + $0xd4c] ss:$16 sps:$4 sm:$0xff]  }
 0x334   : > { %v11731_v31 = vld [vmem:[%s12476_s28 + $0xf4c] ss:$16 sps:$4 sm:$0xff]   ;;  %v11729_v32 = vld [vmem:[%s12476_s28 + $0xf48] ss:$16 sps:$4 sm:$0xff]  }
 0x335   : > { %12230 = vpow2.f32 %v10364_v24  ;;  %8435 = vmatpush1.bf16.msra.mxu0 %v11666_v45  ;;  %v11734_v35 = vld [vmem:[%s12476_s28 + $0xd2c] ss:$16 sps:$4 sm:$0xff]   ;;  %v11732_v45 = vld [vmem:[%s12476_s28 + $0xd28] ss:$16 sps:$4 sm:$0xff]  }
 0x336   : > { %8478 = vmatpush1.bf16.msra.mxu1 %v11669_v36  ;;  %8436 = vmatprep.subr.bf16.mxu0 %v11674_v52  ;;  %v11735_v36 = vld [vmem:[%s12476_s28 + $0xf28] ss:$16 sps:$4 sm:$0xff]   ;;  %v11740_v52 = vld [vmem:[%s12476_s28 + $0xd0c] ss:$16 sps:$4 sm:$0xff]  }
 0x337   : > { %8479 = vmatprep.subr.bf16.mxu1 %v11677_v6  ;;  %v11743_v6 = vld [vmem:[%s12476_s28 + $0xf0c] ss:$16 sps:$4 sm:$0xff]   ;;  %v11738_v24 = vld [vmem:[%s12476_s28 + $0xd08] ss:$16 sps:$4 sm:$0xff]  }
 0x339   : > { %8437 = vmatpush1.bf16.msra.mxu0 %v11672_v2  ;;  %v11741_v2 = vld [vmem:[%s12476_s28 + $0xf08] ss:$16 sps:$4 sm:$0xff]  }
 0x33a   : > { %8480 = vmatpush1.bf16.msra.mxu1 %v11675_v50  ;;  %8438 = vmatprep.subr.bf16.mxu0 %v11680_v56  ;;  %v11746_v50 = vld [vmem:[%s12476_s28 + $0x10ec] ss:$16 sps:$4 sm:$0xff]  }
 0x33b   : > { %8481 = vmatprep.subr.bf16.mxu1 %v11683_v39  ;;  %v11749_v56 = vld [vmem:[%s12476_s28 + $0x12ec] ss:$16 sps:$4 sm:$0xff]   ;;  %v11744_v39 = vld [vmem:[%s12476_s28 + $0x10e8] ss:$16 sps:$4 sm:$0xff]  }
 0x33c   : > { %v12225_v25 = vpop.eup %12224 }
 0x33d   : > { %v8968_v51 = vadd.f32 1.0, %v12225_v25  ;;  %8439 = vmatpush1.bf16.msra.mxu0 %v11678_v8  ;;  %v11747_v8 = vld [vmem:[%s12476_s28 + $0x12e8] ss:$16 sps:$4 sm:$0xff]  }
 0x33e   : > { %8482 = vmatpush1.bf16.msra.mxu1 %v11681_v53  ;;  %v12227_v46 = vpop.eup %12226  ;;  %8440 = vmatprep.subr.bf16.mxu0 %v11686_v3  ;;  %v11752_v53 = vld [vmem:[%s12476_s28 + $0x10cc] ss:$16 sps:$4 sm:$0xff]   ;;  %v12271_v25 = vld [vmem:[%s14077_s0 + $0x38] ss:$144 sps:$4 sm:$0xff]  }
 0x33f   : > { %8483 = vmatprep.subr.bf16.mxu1 %v11689_v14  ;;  %12232 = vrcp.f32 %v8968_v51  ;;  %v8969_v57 = vadd.f32 1.0, %v12227_v46  ;;  %v11755_v3 = vld [vmem:[%s12476_s28 + $0x12cc] ss:$16 sps:$4 sm:$0xff]   ;;  %v12270_v14 = vld [vmem:[%s14077_s0 + $0x30] ss:$144 sps:$4 sm:$0xff]  }
 0x340   : > { %v12229_v55 = vpop.eup %12228  ;;  %v11750_v51 = vld [vmem:[%s12476_s28 + $0x10c8] ss:$16 sps:$4 sm:$0xff]   ;;  %v11761_v46 = vld [vmem:[%s12476_s28 + $0x12ac] ss:$16 sps:$4 sm:$0xff]  }
 0x341   : > { %12234 = vrcp.f32 %v8969_v57  ;;  %v8972_v58 = vadd.f32 1.0, %v12229_v55  ;;  %8441 = vmatpush1.bf16.msra.mxu0 %v11684_v38  ;;  %v11753_v38 = vld [vmem:[%s12476_s28 + $0x12c8] ss:$16 sps:$4 sm:$0xff]  }
 0x342   : > { %8484 = vmatpush1.bf16.msra.mxu1 %v11687_v62  ;;  %v12231_v9 = vpop.eup %12230  ;;  %8442 = vmatprep.subr.bf16.mxu0 %v11692_v4  ;;  %v11758_v62 = vld [vmem:[%s12476_s28 + $0x10ac] ss:$16 sps:$4 sm:$0xff]   ;;  %v12272_v4 = vld [vmem:[%s14077_s0 + $0x44] ss:$144 sps:$4 sm:$0xff]   ;;  %v11756_v57 = vld [vmem:[%s12476_s28 + $0x10a8] ss:$16 sps:$4 sm:$0xff]  }
 0x343   : > { %8485 = vmatprep.subr.bf16.mxu1 %v11695_v54  ;;  %12236 = vrcp.f32 %v8972_v58  ;;  %v8973_v63 = vadd.f32 1.0, %v12231_v9  ;;  %v12273_v54 = vld [vmem:[%s14077_s0 + $0x4c] ss:$144 sps:$4 sm:$0xff]   ;;  %v11759_v55 = vld [vmem:[%s12476_s28 + $0x12a8] ss:$16 sps:$4 sm:$0xff]  }
 0x344   : > { %v11764_v58 = vld [vmem:[%s12476_s28 + $0x108c] ss:$16 sps:$4 sm:$0xff]   ;;  %v11765_v9 = vld [vmem:[%s12476_s28 + $0x1288] ss:$16 sps:$4 sm:$0xff]  }
 0x345   : > { %12238 = vrcp.f32 %v8973_v63  ;;  %8443 = vmatpush1.bf16.msra.mxu0 %v11690_v59  ;;  %v11767_v59 = vld [vmem:[%s12476_s28 + $0x128c] ss:$16 sps:$4 sm:$0xff]   ;;  %v11768_v63 = vld [vmem:[%s12476_s28 + $0x1068] ss:$16 sps:$4 sm:$0xff]  }
 0x346   : > { %8486 = vmatpush1.bf16.msra.mxu1 %v11693_v60  ;;  %8444 = vmatprep.subr.bf16.mxu0 %v11698_v20  ;;  %v11762_v60 = vld [vmem:[%s12476_s28 + $0x1088] ss:$16 sps:$4 sm:$0xff]   ;;  %v11770_v20 = vld [vmem:[%s12476_s28 + $0x106c] ss:$16 sps:$4 sm:$0xff]  }
 0x347   : > { %8487 = vmatprep.subr.bf16.mxu1 %v11701_v12  ;;  %v11773_v12 = vld [vmem:[%s12476_s28 + $0x126c] ss:$16 sps:$4 sm:$0xff]  }
 0x349   : > { %8445 = vmatpush2.bf16.msra.mxu0 %v11696_v5  ;;  %v11771_v5 = vld [vmem:[%s12476_s28 + $0x1268] ss:$16 sps:$4 sm:$0xff]  }
 0x34a   : > { %8488 = vmatpush2.bf16.msra.mxu1 %v11699_v27  ;;  %8446 = vmatprep.subr.bf16.mxu0 %v11704_v13  ;;  %v11776_v27 = vld [vmem:[%s12476_s28 + $0x104c] ss:$16 sps:$4 sm:$0xff]  }
 0x34b   : > { %8489 = vmatprep.subr.bf16.mxu1 %v11707_v15  ;;  %v11779_v13 = vld [vmem:[%s12476_s28 + $0x124c] ss:$16 sps:$4 sm:$0xff]   ;;  %v11774_v15 = vld [vmem:[%s12476_s28 + $0x1048] ss:$16 sps:$4 sm:$0xff]  }
 0x34c   : > { %v12233_v7 = vpop.eup %12232 }
 0x34d   : > { %8447 = vmatpush2.bf16.msra.mxu0 %v11702_v42  ;;  %v8992_v16 = vmul.f32 %v12233_v7, %v13577_v43  ;;  %v11777_v42 = vld [vmem:[%s12476_s28 + $0x1248] ss:$16 sps:$4 sm:$0xff]  }
 0x34e   : > { %8490 = vmatpush2.bf16.msra.mxu1 %v11705_v48  ;;  %v12235_v11 = vpop.eup %12234  ;;  %8448 = vmatprep.subr.bf16.mxu0 %v11710_v22  ;;  %v11782_v48 = vld [vmem:[%s12476_s28 + $0x102c] ss:$16 sps:$4 sm:$0xff]   ;;  %v11783_v7 = vld [vmem:[%s12476_s28 + $0x1228] ss:$16 sps:$4 sm:$0xff]  }
 0x34f   : > { %8491 = vmatprep.subr.bf16.mxu1 %v11713_v28  ;;  %v8993_v17 = vmul.f32 %v12235_v11, %v13586_v34  ;;  %v11785_v22 = vld [vmem:[%s12476_s28 + $0x122c] ss:$16 sps:$4 sm:$0xff]   ;;  %v11780_v28 = vld [vmem:[%s12476_s28 + $0x1028] ss:$16 sps:$4 sm:$0xff]  }
 0x350   : > { %v12237_v19 = vpop.eup %12236  ;;  %v11786_v11 = vld [vmem:[%s12476_s28 + $0x1008] ss:$16 sps:$4 sm:$0xff]  }
 0x351   : > { %v10377_v21 = vpack.c.bf16 %v8993_v17, %v8992_v16  ;;  %8449 = vmatpush2.bf16.msra.mxu0 %v11708_v10  ;;  %v8996_v43 = vmul.f32 %v12237_v19, %v13593_v26  ;;  %v11726_v26 = vld [vmem:[%s12476_s28 + $0xd48] ss:$16 sps:$4 sm:$0xff]   ;;  %v11788_v10 = vld [vmem:[%s12476_s28 + $0x100c] ss:$16 sps:$4 sm:$0xff]  }
 0x352   : > { %8492 = vmatpush2.bf16.msra.mxu1 %v11711_v30  ;;  %v12239_v40 = vpop.eup %12238  ;;  %8450 = vmatprep.subr.bf16.mxu0 %v11716_v61  ;;  %v11791_v30 = vld [vmem:[%s12476_s28 + $0x120c] ss:$16 sps:$4 sm:$0xff]   ;;  %v11789_v61 = vld [vmem:[%s12476_s28 + $0x1208] ss:$16 sps:$4 sm:$0xff]  }
 0x353   : > { %8493 = vmatprep.subr.bf16.mxu1 %v11719_v49  ;;  %9024 = vst [vmem:[%s13638_s22] sm:$0xff] %v10377_v21  ;;  %v8997_v34 = vmul.f32 %v12239_v40, %v13596_v41  ;;  %v11737_v41 = vld [vmem:[%s12476_s28 + $0xf2c] ss:$16 sps:$4 sm:$0xff]   ;;  %v11792_v17 = vld [vmem:[%s12476_s28 + $0x11e8] ss:$16 sps:$4 sm:$0xff]  }
 0x354   : > { %v11794_v49 = vld [vmem:[%s12476_s28 + $0x11ec] ss:$16 sps:$4 sm:$0xff]   ;;  %v11795_v19 = vld [vmem:[%s12476_s28 + $0x13e8] ss:$16 sps:$4 sm:$0xff]  }
 0x355   : > { %v10379_v47 = vpack.c.bf16 %v8997_v34, %v8996_v43  ;;  %8451 = vmatpush2.bf16.msra.mxu0 %v11714_v23  ;;  %v11797_v16 = vld [vmem:[%s12476_s28 + $0x13ec] ss:$16 sps:$4 sm:$0xff]   ;;  %v11801_v40 = vld [vmem:[%s12476_s28 + $0x13c8] ss:$16 sps:$4 sm:$0xff]  }
 0x356   : > { %8494 = vmatpush2.bf16.msra.mxu1 %v11717_v29  ;;  %8452 = vmatprep.subr.bf16.mxu0 %v11722_v0  ;;  %v11800_v21 = vld [vmem:[%s12476_s28 + $0x11cc] ss:$16 sps:$4 sm:$0xff]   ;;  %v11798_v29 = vld [vmem:[%s12476_s28 + $0x11c8] ss:$16 sps:$4 sm:$0xff]  }
 0x357   : > { %8495 = vmatprep.subr.bf16.mxu1 %v11725_v33  ;;  %9026 = vst [vmem:[%s13638_s22 + $0x10] sm:$0xff] %v10379_v47  ;;  %v11803_v23 = vld [vmem:[%s12476_s28 + $0x13cc] ss:$16 sps:$4 sm:$0xff]   ;;  %v11804_v43 = vld [vmem:[%s12476_s28 + $0x11a8] ss:$16 sps:$4 sm:$0xff]  }
 0x358   : > { %v11806_v0 = vld [vmem:[%s12476_s28 + $0x11ac] ss:$16 sps:$4 sm:$0xff]   ;;  %v11807_v34 = vld [vmem:[%s12476_s28 + $0x13a8] ss:$16 sps:$4 sm:$0xff]  }
 0x359   : > { %8453 = vmatpush2.bf16.msra.mxu0 %v11720_v18  ;;  %v11809_v33 = vld [vmem:[%s12476_s28 + $0x13ac] ss:$16 sps:$4 sm:$0xff]  }
 0x35a   : > { %8496 = vmatpush2.bf16.msra.mxu1 %v11723_v1  ;;  %8454 = vmatprep.subr.bf16.mxu0 %v11728_v44  ;;  %v11812_v47 = vld [vmem:[%s12476_s28 + $0x118c] ss:$16 sps:$4 sm:$0xff]   ;;  %v11810_v1 = vld [vmem:[%s12476_s28 + $0x1188] ss:$16 sps:$4 sm:$0xff]  }
 0x35b   : > { %8497 = vmatprep.subr.bf16.mxu1 %v11731_v31  ;;  %v11815_v18 = vld [vmem:[%s12476_s28 + $0x138c] ss:$16 sps:$4 sm:$0xff]   ;;  %v11813_v44 = vld [vmem:[%s12476_s28 + $0x1388] ss:$16 sps:$4 sm:$0xff]  }
 0x35c   : > { %v11818_v31 = vld [vmem:[%s12476_s28 + $0x116c] ss:$16 sps:$4 sm:$0xff]  }
 0x35d   : > { %8455 = vmatpush2.bf16.msra.mxu0 %v11726_v26  ;;  %v11821_v26 = vld [vmem:[%s12476_s28 + $0x136c] ss:$16 sps:$4 sm:$0xff]  }
 0x35e   : > { %8498 = vmatpush2.bf16.msra.mxu1 %v11729_v32  ;;  %8456 = vmatprep.subr.bf16.mxu0 %v11734_v35  ;;  %v11816_v32 = vld [vmem:[%s12476_s28 + $0x1168] ss:$16 sps:$4 sm:$0xff]  }
 0x35f   : > { %8499 = vmatprep.subr.bf16.mxu1 %v11737_v41  ;;  %v11819_v35 = vld [vmem:[%s12476_s28 + $0x1368] ss:$16 sps:$4 sm:$0xff]   ;;  %v11824_v41 = vld [vmem:[%s12476_s28 + $0x114c] ss:$16 sps:$4 sm:$0xff]  }
 0x361   : > { %8457 = vmatpush2.bf16.msra.mxu0 %v11732_v45  ;;  %v11827_v45 = vld [vmem:[%s12476_s28 + $0x134c] ss:$16 sps:$4 sm:$0xff]  }
 0x362   : > { %8500 = vmatpush2.bf16.msra.mxu1 %v11735_v36  ;;  %8458 = vmatprep.subr.bf16.mxu0 %v11740_v52  ;;  %v11822_v36 = vld [vmem:[%s12476_s28 + $0x1148] ss:$16 sps:$4 sm:$0xff]  }
 0x363   : > { %8501 = vmatprep.subr.bf16.mxu1 %v11743_v6  ;;  %v11825_v52 = vld [vmem:[%s12476_s28 + $0x1348] ss:$16 sps:$4 sm:$0xff]   ;;  %v11830_v6 = vld [vmem:[%s12476_s28 + $0x112c] ss:$16 sps:$4 sm:$0xff]  }
 0x365   : > { %8459 = vmatpush2.bf16.msra.mxu0 %v11738_v24  ;;  %v11833_v24 = vld [vmem:[%s12476_s28 + $0x132c] ss:$16 sps:$4 sm:$0xff]  }
 0x366   : > { %8502 = vmatpush2.bf16.msra.mxu1 %v11741_v2  ;;  %8514 = vmatprep.subr.bf16.mxu0 %v11746_v50  ;;  %v11828_v2 = vld [vmem:[%s12476_s28 + $0x1128] ss:$16 sps:$4 sm:$0xff]  }
 0x367   : > { %8557 = vmatprep.subr.bf16.mxu1 %v11749_v56  ;;  %v11831_v50 = vld [vmem:[%s12476_s28 + $0x1328] ss:$16 sps:$4 sm:$0xff]   ;;  %v11836_v56 = vld [vmem:[%s12476_s28 + $0x110c] ss:$16 sps:$4 sm:$0xff]  }
 0x368   : > { %8461 = vmatmul.mubr.bf16.vlgmr.msra.gmra.mxu0 %v12270_v14  ;;  %v11845_v14 = vld [vmem:[%s12476_s28 + $0x16ec] ss:$16 sps:$4 sm:$0xff]  }
 0x369   : > { %8504 = vmatmul.mubr.bf16.vlgmr.msra.gmra.mxu1 %v12271_v25  ;;  %8515 = vmatpush1.bf16.msra.mxu0 %v11744_v39  ;;  %v11839_v39 = vld [vmem:[%s12476_s28 + $0x130c] ss:$16 sps:$4 sm:$0xff]   ;;  %v11840_v25 = vld [vmem:[%s12476_s28 + $0x14e8] ss:$16 sps:$4 sm:$0xff]  }
 0x36a   : > { %8558 = vmatpush1.bf16.msra.mxu1 %v11747_v8  ;;  %8516 = vmatprep.subr.bf16.mxu0 %v11752_v53  ;;  %v11834_v8 = vld [vmem:[%s12476_s28 + $0x1108] ss:$16 sps:$4 sm:$0xff]  }
 0x36b   : > { %8559 = vmatprep.subr.bf16.mxu1 %v11755_v3  ;;  %8546 = vmatprep.mubr.bf16.mxu0 %v12272_v4  ;;  %v11837_v53 = vld [vmem:[%s12476_s28 + $0x1308] ss:$16 sps:$4 sm:$0xff]   ;;  %v11842_v3 = vld [vmem:[%s12476_s28 + $0x14ec] ss:$16 sps:$4 sm:$0xff]  }
 0x36c   : > { %8589 = vmatprep.mubr.bf16.mxu1 %v12273_v54  ;;  %v12275_v4 = vld [vmem:[%s14077_s0 + $0x48] ss:$144 sps:$4 sm:$0xff]  }
 0x36d   : > { %8517 = vmatpush1.bf16.msra.mxu0 %v11750_v51  ;;  %v11843_v51 = vld [vmem:[%s12476_s28 + $0x16e8] ss:$16 sps:$4 sm:$0xff]  }
 0x36e   : > { %8560 = vmatpush1.bf16.msra.mxu1 %v11753_v38  ;;  %8518 = vmatprep.subr.bf16.mxu0 %v11758_v62  ;;  %v11848_v38 = vld [vmem:[%s12476_s28 + $0x14cc] ss:$16 sps:$4 sm:$0xff]   ;;  %v11846_v54 = vld [vmem:[%s12476_s28 + $0x14c8] ss:$16 sps:$4 sm:$0xff]  }
 0x36f   : > { %8561 = vmatprep.subr.bf16.mxu1 %v11761_v46  ;;  %v11851_v62 = vld [vmem:[%s12476_s28 + $0x16cc] ss:$16 sps:$4 sm:$0xff]   ;;  %v12274_v46 = vld [vmem:[%s14077_s0 + $0x40] ss:$144 sps:$4 sm:$0xff]  }
 0x371   : > { %8519 = vmatpush1.bf16.msra.mxu0 %v11756_v57  ;;  %v11849_v57 = vld [vmem:[%s12476_s28 + $0x16c8] ss:$16 sps:$4 sm:$0xff]  }
 0x372   : > { %8562 = vmatpush1.bf16.msra.mxu1 %v11759_v55  ;;  %8520 = vmatprep.subr.bf16.mxu0 %v11764_v58  ;;  %v11854_v55 = vld [vmem:[%s12476_s28 + $0x14ac] ss:$16 sps:$4 sm:$0xff]  }
 0x373   : > { %8563 = vmatprep.subr.bf16.mxu1 %v11767_v59  ;;  %v11857_v58 = vld [vmem:[%s12476_s28 + $0x16ac] ss:$16 sps:$4 sm:$0xff]   ;;  %v12276_v59 = vld [vmem:[%s14077_s0 + $0x54] ss:$144 sps:$4 sm:$0xff]  }
 0x375   : > { %8521 = vmatpush1.bf16.msra.mxu0 %v11762_v60  ;;  %v12277_v60 = vld [vmem:[%s14077_s0 + $0x5c] ss:$144 sps:$4 sm:$0xff]  }
 0x376   : > { %8564 = vmatpush1.bf16.msra.mxu1 %v11765_v9  ;;  %8522 = vmatprep.subr.bf16.mxu0 %v11770_v20  ;;  %v11852_v9 = vld [vmem:[%s12476_s28 + $0x14a8] ss:$16 sps:$4 sm:$0xff]  }
 0x377   : > { %8565 = vmatprep.subr.bf16.mxu1 %v11773_v12  ;;  %v11855_v20 = vld [vmem:[%s12476_s28 + $0x16a8] ss:$16 sps:$4 sm:$0xff]   ;;  %v11860_v12 = vld [vmem:[%s12476_s28 + $0x148c] ss:$16 sps:$4 sm:$0xff]  }
 0x379   : > { %8523 = vmatpush1.bf16.msra.mxu0 %v11768_v63  ;;  %v11863_v63 = vld [vmem:[%s12476_s28 + $0x168c] ss:$16 sps:$4 sm:$0xff]  }
 0x37a   : > { %8566 = vmatpush1.bf16.msra.mxu1 %v11771_v5  ;;  %8524 = vmatprep.subr.bf16.mxu0 %v11776_v27  ;;  %v11858_v5 = vld [vmem:[%s12476_s28 + $0x1488] ss:$16 sps:$4 sm:$0xff]  }
 0x37b   : > { %8567 = vmatprep.subr.bf16.mxu1 %v11779_v13  ;;  %v11861_v27 = vld [vmem:[%s12476_s28 + $0x1688] ss:$16 sps:$4 sm:$0xff]   ;;  %v11866_v13 = vld [vmem:[%s12476_s28 + $0x146c] ss:$16 sps:$4 sm:$0xff]  }
 0x37d   : > { %8525 = vmatpush1.bf16.msra.mxu0 %v11774_v15  ;;  %v11869_v15 = vld [vmem:[%s12476_s28 + $0x166c] ss:$16 sps:$4 sm:$0xff]  }
 0x37e   : > { %8568 = vmatpush1.bf16.msra.mxu1 %v11777_v42  ;;  %8526 = vmatprep.subr.bf16.mxu0 %v11782_v48  ;;  %v11864_v42 = vld [vmem:[%s12476_s28 + $0x1468] ss:$16 sps:$4 sm:$0xff]  }
 0x37f   : > { %8569 = vmatprep.subr.bf16.mxu1 %v11785_v22  ;;  %v11867_v48 = vld [vmem:[%s12476_s28 + $0x1668] ss:$16 sps:$4 sm:$0xff]   ;;  %v11872_v22 = vld [vmem:[%s12476_s28 + $0x144c] ss:$16 sps:$4 sm:$0xff]  }
 0x381   : > { %8527 = vmatpush1.bf16.msra.mxu0 %v11780_v28  ;;  %v11875_v28 = vld [vmem:[%s12476_s28 + $0x164c] ss:$16 sps:$4 sm:$0xff]  }
 0x382   : > { %8570 = vmatpush1.bf16.msra.mxu1 %v11783_v7  ;;  %8528 = vmatprep.subr.bf16.mxu0 %v11788_v10  ;;  %v11870_v7 = vld [vmem:[%s12476_s28 + $0x1448] ss:$16 sps:$4 sm:$0xff]  }
 0x383   : > { %8571 = vmatprep.subr.bf16.mxu1 %v11791_v30  ;;  %v11873_v10 = vld [vmem:[%s12476_s28 + $0x1648] ss:$16 sps:$4 sm:$0xff]   ;;  %v11878_v30 = vld [vmem:[%s12476_s28 + $0x142c] ss:$16 sps:$4 sm:$0xff]  }
 0x385   : > { %8529 = vmatpush1.bf16.msra.mxu0 %v11786_v11  ;;  %v11881_v11 = vld [vmem:[%s12476_s28 + $0x162c] ss:$16 sps:$4 sm:$0xff]  }
 0x386   : > { %8572 = vmatpush1.bf16.msra.mxu1 %v11789_v61  ;;  %8530 = vmatprep.subr.bf16.mxu0 %v11794_v49  ;;  %v11876_v61 = vld [vmem:[%s12476_s28 + $0x1428] ss:$16 sps:$4 sm:$0xff]  }
 0x387   : > { %8573 = vmatprep.subr.bf16.mxu1 %v11797_v16  ;;  %v11879_v49 = vld [vmem:[%s12476_s28 + $0x1628] ss:$16 sps:$4 sm:$0xff]   ;;  %v11884_v16 = vld [vmem:[%s12476_s28 + $0x140c] ss:$16 sps:$4 sm:$0xff]  }
 0x389   : > { %8531 = vmatpush2.bf16.msra.mxu0 %v11792_v17  ;;  %v11887_v17 = vld [vmem:[%s12476_s28 + $0x160c] ss:$16 sps:$4 sm:$0xff]  }
 0x38a   : > { %8574 = vmatpush2.bf16.msra.mxu1 %v11795_v19  ;;  %8532 = vmatprep.subr.bf16.mxu0 %v11800_v21  ;;  %v11882_v19 = vld [vmem:[%s12476_s28 + $0x1408] ss:$16 sps:$4 sm:$0xff]  }
 0x38b   : > { %8575 = vmatprep.subr.bf16.mxu1 %v11803_v23  ;;  %v11885_v21 = vld [vmem:[%s12476_s28 + $0x1608] ss:$16 sps:$4 sm:$0xff]   ;;  %v11890_v23 = vld [vmem:[%s12476_s28 + $0x15ec] ss:$16 sps:$4 sm:$0xff]  }
 0x38d   : > { %8533 = vmatpush2.bf16.msra.mxu0 %v11798_v29  ;;  %v11893_v29 = vld [vmem:[%s12476_s28 + $0x17ec] ss:$16 sps:$4 sm:$0xff]  }
 0x38e   : > { %8576 = vmatpush2.bf16.msra.mxu1 %v11801_v40  ;;  %8534 = vmatprep.subr.bf16.mxu0 %v11806_v0  ;;  %v11888_v40 = vld [vmem:[%s12476_s28 + $0x15e8] ss:$16 sps:$4 sm:$0xff]  }
 0x38f   : > { %8577 = vmatprep.subr.bf16.mxu1 %v11809_v33  ;;  %v11891_v0 = vld [vmem:[%s12476_s28 + $0x17e8] ss:$16 sps:$4 sm:$0xff]   ;;  %v11896_v33 = vld [vmem:[%s12476_s28 + $0x15cc] ss:$16 sps:$4 sm:$0xff]  }
 0x391   : > { %8535 = vmatpush2.bf16.msra.mxu0 %v11804_v43  ;;  %v11899_v43 = vld [vmem:[%s12476_s28 + $0x17cc] ss:$16 sps:$4 sm:$0xff]  }
 0x392   : > { %8578 = vmatpush2.bf16.msra.mxu1 %v11807_v34  ;;  %8536 = vmatprep.subr.bf16.mxu0 %v11812_v47  ;;  %v11894_v34 = vld [vmem:[%s12476_s28 + $0x15c8] ss:$16 sps:$4 sm:$0xff]  }
 0x393   : > { %8579 = vmatprep.subr.bf16.mxu1 %v11815_v18  ;;  %v11897_v47 = vld [vmem:[%s12476_s28 + $0x17c8] ss:$16 sps:$4 sm:$0xff]   ;;  %v11902_v18 = vld [vmem:[%s12476_s28 + $0x15ac] ss:$16 sps:$4 sm:$0xff]  }
 0x395   : > { %8537 = vmatpush2.bf16.msra.mxu0 %v11810_v1  ;;  %v11905_v1 = vld [vmem:[%s12476_s28 + $0x17ac] ss:$16 sps:$4 sm:$0xff]  }
 0x396   : > { %8580 = vmatpush2.bf16.msra.mxu1 %v11813_v44  ;;  %8538 = vmatprep.subr.bf16.mxu0 %v11818_v31  ;;  %v11900_v44 = vld [vmem:[%s12476_s28 + $0x15a8] ss:$16 sps:$4 sm:$0xff]  }
 0x397   : > { %8581 = vmatprep.subr.bf16.mxu1 %v11821_v26  ;;  %v11903_v31 = vld [vmem:[%s12476_s28 + $0x17a8] ss:$16 sps:$4 sm:$0xff]   ;;  %v11908_v26 = vld [vmem:[%s12476_s28 + $0x158c] ss:$16 sps:$4 sm:$0xff]  }
 0x399   : > { %8539 = vmatpush2.bf16.msra.mxu0 %v11816_v32  ;;  %v11911_v32 = vld [vmem:[%s12476_s28 + $0x178c] ss:$16 sps:$4 sm:$0xff]  }
 0x39a   : > { %8582 = vmatpush2.bf16.msra.mxu1 %v11819_v35  ;;  %8540 = vmatprep.subr.bf16.mxu0 %v11824_v41  ;;  %v11906_v35 = vld [vmem:[%s12476_s28 + $0x1588] ss:$16 sps:$4 sm:$0xff]  }
 0x39b   : > { %8583 = vmatprep.subr.bf16.mxu1 %v11827_v45  ;;  %v11909_v41 = vld [vmem:[%s12476_s28 + $0x1788] ss:$16 sps:$4 sm:$0xff]   ;;  %v11914_v45 = vld [vmem:[%s12476_s28 + $0x156c] ss:$16 sps:$4 sm:$0xff]  }
 0x39d   : > { %8541 = vmatpush2.bf16.msra.mxu0 %v11822_v36  ;;  %v11917_v36 = vld [vmem:[%s12476_s28 + $0x176c] ss:$16 sps:$4 sm:$0xff]  }
 0x39e   : > { %8584 = vmatpush2.bf16.msra.mxu1 %v11825_v52  ;;  %8542 = vmatprep.subr.bf16.mxu0 %v11830_v6  ;;  %v11912_v52 = vld [vmem:[%s12476_s28 + $0x1568] ss:$16 sps:$4 sm:$0xff]  }
 0x39f   : > { %8585 = vmatprep.subr.bf16.mxu1 %v11833_v24  ;;  %v11915_v6 = vld [vmem:[%s12476_s28 + $0x1768] ss:$16 sps:$4 sm:$0xff]   ;;  %v11920_v24 = vld [vmem:[%s12476_s28 + $0x154c] ss:$16 sps:$4 sm:$0xff]  }
 0x3a1   : > { %8543 = vmatpush2.bf16.msra.mxu0 %v11828_v2  ;;  %v11923_v2 = vld [vmem:[%s12476_s28 + $0x174c] ss:$16 sps:$4 sm:$0xff]  }
 0x3a2   : > { %8586 = vmatpush2.bf16.msra.mxu1 %v11831_v50  ;;  %8544 = vmatprep.subr.bf16.mxu0 %v11836_v56  ;;  %v11918_v50 = vld [vmem:[%s12476_s28 + $0x1548] ss:$16 sps:$4 sm:$0xff]  }
 0x3a3   : > { %8587 = vmatprep.subr.bf16.mxu1 %v11839_v39  ;;  %v11921_v56 = vld [vmem:[%s12476_s28 + $0x1748] ss:$16 sps:$4 sm:$0xff]   ;;  %v11926_v39 = vld [vmem:[%s12476_s28 + $0x152c] ss:$16 sps:$4 sm:$0xff]  }
 0x3a5   : > { %8545 = vmatpush2.bf16.msra.mxu0 %v11834_v8  ;;  %v11929_v8 = vld [vmem:[%s12476_s28 + $0x172c] ss:$16 sps:$4 sm:$0xff]  }
 0x3a6   : > { %8588 = vmatpush2.bf16.msra.mxu1 %v11837_v53  ;;  %8600 = vmatprep.subr.bf16.mxu0 %v11842_v3  ;;  %v11924_v53 = vld [vmem:[%s12476_s28 + $0x1528] ss:$16 sps:$4 sm:$0xff]  }
 0x3a7   : > { %8643 = vmatprep.subr.bf16.mxu1 %v11845_v14  ;;  %v11927_v3 = vld [vmem:[%s12476_s28 + $0x1728] ss:$16 sps:$4 sm:$0xff]   ;;  %v11932_v14 = vld [vmem:[%s12476_s28 + $0x150c] ss:$16 sps:$4 sm:$0xff]  }
 0x3a8   : > { %8547 = vmatmul.mubr.bf16.vlgmr.msra.gmra.mxu0 %v12274_v46  ;;  %v11941_v46 = vld [vmem:[%s12476_s28 + $0x1aec] ss:$16 sps:$4 sm:$0xff]  }
 0x3a9   : > { %8590 = vmatmul.mubr.bf16.vlgmr.msra.gmra.mxu1 %v12275_v4  ;;  %8601 = vmatpush1.bf16.msra.mxu0 %v11840_v25  ;;  %v11935_v25 = vld [vmem:[%s12476_s28 + $0x170c] ss:$16 sps:$4 sm:$0xff]   ;;  %v11936_v4 = vld [vmem:[%s12476_s28 + $0x18e8] ss:$16 sps:$4 sm:$0xff]  }
 0x3aa   : > { %8644 = vmatpush1.bf16.msra.mxu1 %v11843_v51  ;;  %8602 = vmatprep.subr.bf16.mxu0 %v11848_v38  ;;  %v11930_v51 = vld [vmem:[%s12476_s28 + $0x1508] ss:$16 sps:$4 sm:$0xff]  }
 0x3ab   : > { %8645 = vmatprep.subr.bf16.mxu1 %v11851_v62  ;;  %8632 = vmatprep.mubr.bf16.mxu0 %v12276_v59  ;;  %v11933_v38 = vld [vmem:[%s12476_s28 + $0x1708] ss:$16 sps:$4 sm:$0xff]   ;;  %v11938_v62 = vld [vmem:[%s12476_s28 + $0x18ec] ss:$16 sps:$4 sm:$0xff]  }
 0x3ac   : > { %8675 = vmatprep.mubr.bf16.mxu1 %v12277_v60  ;;  %v12279_v59 = vld [vmem:[%s14077_s0 + $0x58] ss:$144 sps:$4 sm:$0xff]  }
 0x3ad   : > { %8603 = vmatpush1.bf16.msra.mxu0 %v11846_v54  ;;  %v11939_v54 = vld [vmem:[%s12476_s28 + $0x1ae8] ss:$16 sps:$4 sm:$0xff]  }
 0x3ae   : > { %8646 = vmatpush1.bf16.msra.mxu1 %v11849_v57  ;;  %8604 = vmatprep.subr.bf16.mxu0 %v11854_v55  ;;  %v11944_v57 = vld [vmem:[%s12476_s28 + $0x18cc] ss:$16 sps:$4 sm:$0xff]   ;;  %v11942_v60 = vld [vmem:[%s12476_s28 + $0x18c8] ss:$16 sps:$4 sm:$0xff]  }
 0x3af   : > { %8647 = vmatprep.subr.bf16.mxu1 %v11857_v58  ;;  %v11947_v55 = vld [vmem:[%s12476_s28 + $0x1acc] ss:$16 sps:$4 sm:$0xff]   ;;  %v12278_v58 = vld [vmem:[%s14077_s0 + $0x50] ss:$144 sps:$4 sm:$0xff]  }
 0x3b1   : > { %8605 = vmatpush1.bf16.msra.mxu0 %v11852_v9  ;;  %v11945_v9 = vld [vmem:[%s12476_s28 + $0x1ac8] ss:$16 sps:$4 sm:$0xff]  }
 0x3b2   : > { %8648 = vmatpush1.bf16.msra.mxu1 %v11855_v20  ;;  %8606 = vmatprep.subr.bf16.mxu0 %v11860_v12  ;;  %v11950_v20 = vld [vmem:[%s12476_s28 + $0x18ac] ss:$16 sps:$4 sm:$0xff]  }
 0x3b3   : > { %8649 = vmatprep.subr.bf16.mxu1 %v11863_v63  ;;  %v11953_v12 = vld [vmem:[%s12476_s28 + $0x1aac] ss:$16 sps:$4 sm:$0xff]   ;;  %v12280_v63 = vld [vmem:[%s14077_s0 + $0x64] ss:$144 sps:$4 sm:$0xff]  }
 0x3b5   : > { %8607 = vmatpush1.bf16.msra.mxu0 %v11858_v5  ;;  %v12281_v5 = vld [vmem:[%s14077_s0 + $0x6c] ss:$144 sps:$4 sm:$0xff]  }
 0x3b6   : > { %8650 = vmatpush1.bf16.msra.mxu1 %v11861_v27  ;;  %8608 = vmatprep.subr.bf16.mxu0 %v11866_v13  ;;  %v11948_v27 = vld [vmem:[%s12476_s28 + $0x18a8] ss:$16 sps:$4 sm:$0xff]  }
 0x3b7   : > { %8651 = vmatprep.subr.bf16.mxu1 %v11869_v15  ;;  %v11951_v13 = vld [vmem:[%s12476_s28 + $0x1aa8] ss:$16 sps:$4 sm:$0xff]   ;;  %v11956_v15 = vld [vmem:[%s12476_s28 + $0x188c] ss:$16 sps:$4 sm:$0xff]  }
 0x3b9   : > { %8609 = vmatpush1.bf16.msra.mxu0 %v11864_v42  ;;  %v11959_v42 = vld [vmem:[%s12476_s28 + $0x1a8c] ss:$16 sps:$4 sm:$0xff]  }
 0x3ba   : > { %8652 = vmatpush1.bf16.msra.mxu1 %v11867_v48  ;;  %8610 = vmatprep.subr.bf16.mxu0 %v11872_v22  ;;  %v11954_v48 = vld [vmem:[%s12476_s28 + $0x1888] ss:$16 sps:$4 sm:$0xff]  }
 0x3bb   : > { %8653 = vmatprep.subr.bf16.mxu1 %v11875_v28  ;;  %v11957_v22 = vld [vmem:[%s12476_s28 + $0x1a88] ss:$16 sps:$4 sm:$0xff]   ;;  %v11962_v28 = vld [vmem:[%s12476_s28 + $0x186c] ss:$16 sps:$4 sm:$0xff]  }
 0x3bd   : > { %8611 = vmatpush1.bf16.msra.mxu0 %v11870_v7  ;;  %v11965_v7 = vld [vmem:[%s12476_s28 + $0x1a6c] ss:$16 sps:$4 sm:$0xff]  }
 0x3be   : > { %8654 = vmatpush1.bf16.msra.mxu1 %v11873_v10  ;;  %8612 = vmatprep.subr.bf16.mxu0 %v11878_v30  ;;  %v11960_v10 = vld [vmem:[%s12476_s28 + $0x1868] ss:$16 sps:$4 sm:$0xff]  }
 0x3bf   : > { %8655 = vmatprep.subr.bf16.mxu1 %v11881_v11  ;;  %v11963_v30 = vld [vmem:[%s12476_s28 + $0x1a68] ss:$16 sps:$4 sm:$0xff]   ;;  %v11968_v11 = vld [vmem:[%s12476_s28 + $0x184c] ss:$16 sps:$4 sm:$0xff]  }
 0x3c1   : > { %8613 = vmatpush1.bf16.msra.mxu0 %v11876_v61  ;;  %v11971_v61 = vld [vmem:[%s12476_s28 + $0x1a4c] ss:$16 sps:$4 sm:$0xff]  }
 0x3c2   : > { %8656 = vmatpush1.bf16.msra.mxu1 %v11879_v49  ;;  %8614 = vmatprep.subr.bf16.mxu0 %v11884_v16  ;;  %v11966_v49 = vld [vmem:[%s12476_s28 + $0x1848] ss:$16 sps:$4 sm:$0xff]  }
 0x3c3   : > { %8657 = vmatprep.subr.bf16.mxu1 %v11887_v17  ;;  %v11969_v16 = vld [vmem:[%s12476_s28 + $0x1a48] ss:$16 sps:$4 sm:$0xff]   ;;  %v11974_v17 = vld [vmem:[%s12476_s28 + $0x182c] ss:$16 sps:$4 sm:$0xff]  }
 0x3c5   : > { %8615 = vmatpush1.bf16.msra.mxu0 %v11882_v19  ;;  %v11977_v19 = vld [vmem:[%s12476_s28 + $0x1a2c] ss:$16 sps:$4 sm:$0xff]  }
 0x3c6   : > { %8658 = vmatpush1.bf16.msra.mxu1 %v11885_v21  ;;  %8616 = vmatprep.subr.bf16.mxu0 %v11890_v23  ;;  %v11972_v21 = vld [vmem:[%s12476_s28 + $0x1828] ss:$16 sps:$4 sm:$0xff]  }
 0x3c7   : > { %8659 = vmatprep.subr.bf16.mxu1 %v11893_v29  ;;  %v11975_v23 = vld [vmem:[%s12476_s28 + $0x1a28] ss:$16 sps:$4 sm:$0xff]   ;;  %v11980_v29 = vld [vmem:[%s12476_s28 + $0x180c] ss:$16 sps:$4 sm:$0xff]  }
 0x3c9   : > { %8617 = vmatpush2.bf16.msra.mxu0 %v11888_v40  ;;  %v11983_v40 = vld [vmem:[%s12476_s28 + $0x1a0c] ss:$16 sps:$4 sm:$0xff]  }
 0x3ca   : > { %8660 = vmatpush2.bf16.msra.mxu1 %v11891_v0  ;;  %8618 = vmatprep.subr.bf16.mxu0 %v11896_v33  ;;  %v11978_v0 = vld [vmem:[%s12476_s28 + $0x1808] ss:$16 sps:$4 sm:$0xff]  }
 0x3cb   : > { %8661 = vmatprep.subr.bf16.mxu1 %v11899_v43  ;;  %v11981_v33 = vld [vmem:[%s12476_s28 + $0x1a08] ss:$16 sps:$4 sm:$0xff]   ;;  %v11986_v43 = vld [vmem:[%s12476_s28 + $0x19ec] ss:$16 sps:$4 sm:$0xff]  }
 0x3cd   : > { %8619 = vmatpush2.bf16.msra.mxu0 %v11894_v34  ;;  %v11989_v34 = vld [vmem:[%s12476_s28 + $0x1bec] ss:$16 sps:$4 sm:$0xff]  }
 0x3ce   : > { %8662 = vmatpush2.bf16.msra.mxu1 %v11897_v47  ;;  %8620 = vmatprep.subr.bf16.mxu0 %v11902_v18  ;;  %v11984_v47 = vld [vmem:[%s12476_s28 + $0x19e8] ss:$16 sps:$4 sm:$0xff]  }
 0x3cf   : > { %8663 = vmatprep.subr.bf16.mxu1 %v11905_v1  ;;  %v11987_v18 = vld [vmem:[%s12476_s28 + $0x1be8] ss:$16 sps:$4 sm:$0xff]   ;;  %v11992_v1 = vld [vmem:[%s12476_s28 + $0x19cc] ss:$16 sps:$4 sm:$0xff]  }
 0x3d1   : > { %8621 = vmatpush2.bf16.msra.mxu0 %v11900_v44  ;;  %v11995_v44 = vld [vmem:[%s12476_s28 + $0x1bcc] ss:$16 sps:$4 sm:$0xff]  }
 0x3d2   : > { %8664 = vmatpush2.bf16.msra.mxu1 %v11903_v31  ;;  %8622 = vmatprep.subr.bf16.mxu0 %v11908_v26  ;;  %v11990_v31 = vld [vmem:[%s12476_s28 + $0x19c8] ss:$16 sps:$4 sm:$0xff]  }
 0x3d3   : > { %8665 = vmatprep.subr.bf16.mxu1 %v11911_v32  ;;  %v11993_v26 = vld [vmem:[%s12476_s28 + $0x1bc8] ss:$16 sps:$4 sm:$0xff]   ;;  %v11998_v32 = vld [vmem:[%s12476_s28 + $0x19ac] ss:$16 sps:$4 sm:$0xff]  }
 0x3d5   : > { %8623 = vmatpush2.bf16.msra.mxu0 %v11906_v35  ;;  %v12001_v35 = vld [vmem:[%s12476_s28 + $0x1bac] ss:$16 sps:$4 sm:$0xff]  }
 0x3d6   : > { %8666 = vmatpush2.bf16.msra.mxu1 %v11909_v41  ;;  %8624 = vmatprep.subr.bf16.mxu0 %v11914_v45  ;;  %v11996_v41 = vld [vmem:[%s12476_s28 + $0x19a8] ss:$16 sps:$4 sm:$0xff]  }
 0x3d7   : > { %8667 = vmatprep.subr.bf16.mxu1 %v11917_v36  ;;  %v11999_v45 = vld [vmem:[%s12476_s28 + $0x1ba8] ss:$16 sps:$4 sm:$0xff]   ;;  %v12004_v36 = vld [vmem:[%s12476_s28 + $0x198c] ss:$16 sps:$4 sm:$0xff]  }
 0x3d9   : > { %8625 = vmatpush2.bf16.msra.mxu0 %v11912_v52  ;;  %v12007_v52 = vld [vmem:[%s12476_s28 + $0x1b8c] ss:$16 sps:$4 sm:$0xff]  }
 0x3da   : > { %8668 = vmatpush2.bf16.msra.mxu1 %v11915_v6  ;;  %8626 = vmatprep.subr.bf16.mxu0 %v11920_v24  ;;  %v12002_v6 = vld [vmem:[%s12476_s28 + $0x1988] ss:$16 sps:$4 sm:$0xff]  }
 0x3db   : > { %8669 = vmatprep.subr.bf16.mxu1 %v11923_v2  ;;  %v12005_v24 = vld [vmem:[%s12476_s28 + $0x1b88] ss:$16 sps:$4 sm:$0xff]   ;;  %v12010_v2 = vld [vmem:[%s12476_s28 + $0x196c] ss:$16 sps:$4 sm:$0xff]  }
 0x3dd   : > { %8627 = vmatpush2.bf16.msra.mxu0 %v11918_v50  ;;  %v12013_v50 = vld [vmem:[%s12476_s28 + $0x1b6c] ss:$16 sps:$4 sm:$0xff]  }
 0x3de   : > { %8670 = vmatpush2.bf16.msra.mxu1 %v11921_v56  ;;  %8628 = vmatprep.subr.bf16.mxu0 %v11926_v39  ;;  %v12008_v56 = vld [vmem:[%s12476_s28 + $0x1968] ss:$16 sps:$4 sm:$0xff]  }
 0x3df   : > { %8671 = vmatprep.subr.bf16.mxu1 %v11929_v8  ;;  %v12011_v39 = vld [vmem:[%s12476_s28 + $0x1b68] ss:$16 sps:$4 sm:$0xff]   ;;  %v12016_v8 = vld [vmem:[%s12476_s28 + $0x194c] ss:$16 sps:$4 sm:$0xff]  }
 0x3e1   : > { %8629 = vmatpush2.bf16.msra.mxu0 %v11924_v53  ;;  %v12019_v53 = vld [vmem:[%s12476_s28 + $0x1b4c] ss:$16 sps:$4 sm:$0xff]  }
 0x3e2   : > { %8672 = vmatpush2.bf16.msra.mxu1 %v11927_v3  ;;  %8630 = vmatprep.subr.bf16.mxu0 %v11932_v14  ;;  %v12014_v3 = vld [vmem:[%s12476_s28 + $0x1948] ss:$16 sps:$4 sm:$0xff]  }
 0x3e3   : > { %8673 = vmatprep.subr.bf16.mxu1 %v11935_v25  ;;  %v12017_v14 = vld [vmem:[%s12476_s28 + $0x1b48] ss:$16 sps:$4 sm:$0xff]   ;;  %v12022_v25 = vld [vmem:[%s12476_s28 + $0x192c] ss:$16 sps:$4 sm:$0xff]  }
 0x3e5   : > { %8631 = vmatpush2.bf16.msra.mxu0 %v11930_v51  ;;  %v12025_v51 = vld [vmem:[%s12476_s28 + $0x1b2c] ss:$16 sps:$4 sm:$0xff]  }
 0x3e6   : > { %8674 = vmatpush2.bf16.msra.mxu1 %v11933_v38  ;;  %8686 = vmatprep.subr.bf16.mxu0 %v11938_v62  ;;  %v12020_v38 = vld [vmem:[%s12476_s28 + $0x1928] ss:$16 sps:$4 sm:$0xff]  }
 0x3e7   : > { %8729 = vmatprep.subr.bf16.mxu1 %v11941_v46  ;;  %v12023_v62 = vld [vmem:[%s12476_s28 + $0x1b28] ss:$16 sps:$4 sm:$0xff]   ;;  %v12028_v46 = vld [vmem:[%s12476_s28 + $0x190c] ss:$16 sps:$4 sm:$0xff]  }
 0x3e8   : > { %8633 = vmatmul.mubr.bf16.vlgmr.msra.gmra.mxu0 %v12278_v58  ;;  %v12037_v58 = vld [vmem:[%s12476_s28 + $0x1eec] ss:$16 sps:$4 sm:$0xff]  }
 0x3e9   : > { %8676 = vmatmul.mubr.bf16.vlgmr.msra.gmra.mxu1 %v12279_v59  ;;  %8687 = vmatpush1.bf16.msra.mxu0 %v11936_v4  ;;  %v12031_v4 = vld [vmem:[%s12476_s28 + $0x1b0c] ss:$16 sps:$4 sm:$0xff]   ;;  %v12032_v59 = vld [vmem:[%s12476_s28 + $0x1ce8] ss:$16 sps:$4 sm:$0xff]  }
 0x3ea   : > { %8730 = vmatpush1.bf16.msra.mxu1 %v11939_v54  ;;  %8688 = vmatprep.subr.bf16.mxu0 %v11944_v57  ;;  %v12026_v54 = vld [vmem:[%s12476_s28 + $0x1908] ss:$16 sps:$4 sm:$0xff]  }
 0x3eb   : > { %8731 = vmatprep.subr.bf16.mxu1 %v11947_v55  ;;  %8718 = vmatprep.mubr.bf16.mxu0 %v12280_v63  ;;  %v12029_v57 = vld [vmem:[%s12476_s28 + $0x1b08] ss:$16 sps:$4 sm:$0xff]   ;;  %v12034_v55 = vld [vmem:[%s12476_s28 + $0x1cec] ss:$16 sps:$4 sm:$0xff]  }
 0x3ec   : > { %8761 = vmatprep.mubr.bf16.mxu1 %v12281_v5  ;;  %v12283_v63 = vld [vmem:[%s14077_s0 + $0x68] ss:$144 sps:$4 sm:$0xff]  }
 0x3ed   : > { %8689 = vmatpush1.bf16.msra.mxu0 %v11942_v60  ;;  %v12035_v60 = vld [vmem:[%s12476_s28 + $0x1ee8] ss:$16 sps:$4 sm:$0xff]  }
 0x3ee   : > { %8732 = vmatpush1.bf16.msra.mxu1 %v11945_v9  ;;  %8690 = vmatprep.subr.bf16.mxu0 %v11950_v20  ;;  %v12040_v9 = vld [vmem:[%s12476_s28 + $0x1ccc] ss:$16 sps:$4 sm:$0xff]   ;;  %v12038_v5 = vld [vmem:[%s12476_s28 + $0x1cc8] ss:$16 sps:$4 sm:$0xff]  }
 0x3ef   : > { %8733 = vmatprep.subr.bf16.mxu1 %v11953_v12  ;;  %v12043_v20 = vld [vmem:[%s12476_s28 + $0x1ecc] ss:$16 sps:$4 sm:$0xff]   ;;  %v12282_v12 = vld [vmem:[%s14077_s0 + $0x60] ss:$144 sps:$4 sm:$0xff]  }
 0x3f1   : > { %8691 = vmatpush1.bf16.msra.mxu0 %v11948_v27  ;;  %v12041_v27 = vld [vmem:[%s12476_s28 + $0x1ec8] ss:$16 sps:$4 sm:$0xff]  }
 0x3f2   : > { %8734 = vmatpush1.bf16.msra.mxu1 %v11951_v13  ;;  %8692 = vmatprep.subr.bf16.mxu0 %v11956_v15  ;;  %v12046_v13 = vld [vmem:[%s12476_s28 + $0x1cac] ss:$16 sps:$4 sm:$0xff]  }
 0x3f3   : > { %8735 = vmatprep.subr.bf16.mxu1 %v11959_v42  ;;  %v12049_v15 = vld [vmem:[%s12476_s28 + $0x1eac] ss:$16 sps:$4 sm:$0xff]   ;;  %v12284_v42 = vld [vmem:[%s14077_s0 + $0x74] ss:$144 sps:$4 sm:$0xff]  }
 0x3f5   : > { %8693 = vmatpush1.bf16.msra.mxu0 %v11954_v48  ;;  %v12285_v48 = vld [vmem:[%s14077_s0 + $0x7c] ss:$144 sps:$4 sm:$0xff]  }
 0x3f6   : > { %8736 = vmatpush1.bf16.msra.mxu1 %v11957_v22  ;;  %8694 = vmatprep.subr.bf16.mxu0 %v11962_v28  ;;  %v12044_v22 = vld [vmem:[%s12476_s28 + $0x1ca8] ss:$16 sps:$4 sm:$0xff]  }
 0x3f7   : > { %8737 = vmatprep.subr.bf16.mxu1 %v11965_v7  ;;  %v12047_v28 = vld [vmem:[%s12476_s28 + $0x1ea8] ss:$16 sps:$4 sm:$0xff]   ;;  %v12052_v7 = vld [vmem:[%s12476_s28 + $0x1c8c] ss:$16 sps:$4 sm:$0xff]  }
 0x3f9   : > { %8695 = vmatpush1.bf16.msra.mxu0 %v11960_v10  ;;  %v12055_v10 = vld [vmem:[%s12476_s28 + $0x1e8c] ss:$16 sps:$4 sm:$0xff]  }
 0x3fa   : > { %8738 = vmatpush1.bf16.msra.mxu1 %v11963_v30  ;;  %8696 = vmatprep.subr.bf16.mxu0 %v11968_v11  ;;  %v12050_v30 = vld [vmem:[%s12476_s28 + $0x1c88] ss:$16 sps:$4 sm:$0xff]  }
 0x3fb   : > { %8739 = vmatprep.subr.bf16.mxu1 %v11971_v61  ;;  %v12053_v11 = vld [vmem:[%s12476_s28 + $0x1e88] ss:$16 sps:$4 sm:$0xff]   ;;  %v12058_v61 = vld [vmem:[%s12476_s28 + $0x1c6c] ss:$16 sps:$4 sm:$0xff]  }
 0x3fd   : > { %8697 = vmatpush1.bf16.msra.mxu0 %v11966_v49  ;;  %v12061_v49 = vld [vmem:[%s12476_s28 + $0x1e6c] ss:$16 sps:$4 sm:$0xff]  }
 0x3fe   : > { %8740 = vmatpush1.bf16.msra.mxu1 %v11969_v16  ;;  %8698 = vmatprep.subr.bf16.mxu0 %v11974_v17  ;;  %v12056_v16 = vld [vmem:[%s12476_s28 + $0x1c68] ss:$16 sps:$4 sm:$0xff]  }
 0x3ff   : > { %8741 = vmatprep.subr.bf16.mxu1 %v11977_v19  ;;  %v12059_v17 = vld [vmem:[%s12476_s28 + $0x1e68] ss:$16 sps:$4 sm:$0xff]   ;;  %v12064_v19 = vld [vmem:[%s12476_s28 + $0x1c4c] ss:$16 sps:$4 sm:$0xff]  }
 0x401   : > { %8699 = vmatpush1.bf16.msra.mxu0 %v11972_v21  ;;  %v12067_v21 = vld [vmem:[%s12476_s28 + $0x1e4c] ss:$16 sps:$4 sm:$0xff]  }
 0x402   : > { %8742 = vmatpush1.bf16.msra.mxu1 %v11975_v23  ;;  %8700 = vmatprep.subr.bf16.mxu0 %v11980_v29  ;;  %v12062_v23 = vld [vmem:[%s12476_s28 + $0x1c48] ss:$16 sps:$4 sm:$0xff]  }
 0x403   : > { %8743 = vmatprep.subr.bf16.mxu1 %v11983_v40  ;;  %v12065_v29 = vld [vmem:[%s12476_s28 + $0x1e48] ss:$16 sps:$4 sm:$0xff]   ;;  %v12070_v40 = vld [vmem:[%s12476_s28 + $0x1c2c] ss:$16 sps:$4 sm:$0xff]  }
 0x405   : > { %8701 = vmatpush1.bf16.msra.mxu0 %v11978_v0  ;;  %v12073_v0 = vld [vmem:[%s12476_s28 + $0x1e2c] ss:$16 sps:$4 sm:$0xff]  }
 0x406   : > { %8744 = vmatpush1.bf16.msra.mxu1 %v11981_v33  ;;  %8702 = vmatprep.subr.bf16.mxu0 %v11986_v43  ;;  %v12068_v33 = vld [vmem:[%s12476_s28 + $0x1c28] ss:$16 sps:$4 sm:$0xff]  }
 0x407   : > { %8745 = vmatprep.subr.bf16.mxu1 %v11989_v34  ;;  %v12071_v43 = vld [vmem:[%s12476_s28 + $0x1e28] ss:$16 sps:$4 sm:$0xff]   ;;  %v12076_v34 = vld [vmem:[%s12476_s28 + $0x1c0c] ss:$16 sps:$4 sm:$0xff]  }
 0x409   : > { %8703 = vmatpush2.bf16.msra.mxu0 %v11984_v47  ;;  %v12079_v47 = vld [vmem:[%s12476_s28 + $0x1e0c] ss:$16 sps:$4 sm:$0xff]  }
 0x40a   : > { %8746 = vmatpush2.bf16.msra.mxu1 %v11987_v18  ;;  %8704 = vmatprep.subr.bf16.mxu0 %v11992_v1  ;;  %v12074_v18 = vld [vmem:[%s12476_s28 + $0x1c08] ss:$16 sps:$4 sm:$0xff]  }
 0x40b   : > { %8747 = vmatprep.subr.bf16.mxu1 %v11995_v44  ;;  %v12077_v1 = vld [vmem:[%s12476_s28 + $0x1e08] ss:$16 sps:$4 sm:$0xff]   ;;  %v12082_v44 = vld [vmem:[%s12476_s28 + $0x1dec] ss:$16 sps:$4 sm:$0xff]  }
 0x40d   : > { %8705 = vmatpush2.bf16.msra.mxu0 %v11990_v31  ;;  %v12085_v31 = vld [vmem:[%s12476_s28 + $0x1fec] ss:$16 sps:$4 sm:$0xff]  }
 0x40e   : > { %8748 = vmatpush2.bf16.msra.mxu1 %v11993_v26  ;;  %8706 = vmatprep.subr.bf16.mxu0 %v11998_v32  ;;  %v12080_v26 = vld [vmem:[%s12476_s28 + $0x1de8] ss:$16 sps:$4 sm:$0xff]  }
 0x40f   : > { %8749 = vmatprep.subr.bf16.mxu1 %v12001_v35  ;;  %v12083_v32 = vld [vmem:[%s12476_s28 + $0x1fe8] ss:$16 sps:$4 sm:$0xff]   ;;  %v12088_v35 = vld [vmem:[%s12476_s28 + $0x1dcc] ss:$16 sps:$4 sm:$0xff]  }
 0x411   : > { %8707 = vmatpush2.bf16.msra.mxu0 %v11996_v41  ;;  %v12091_v41 = vld [vmem:[%s12476_s28 + $0x1fcc] ss:$16 sps:$4 sm:$0xff]  }
 0x412   : > { %8750 = vmatpush2.bf16.msra.mxu1 %v11999_v45  ;;  %8708 = vmatprep.subr.bf16.mxu0 %v12004_v36  ;;  %v12086_v45 = vld [vmem:[%s12476_s28 + $0x1dc8] ss:$16 sps:$4 sm:$0xff]  }
 0x413   : > { %8751 = vmatprep.subr.bf16.mxu1 %v12007_v52  ;;  %v12089_v36 = vld [vmem:[%s12476_s28 + $0x1fc8] ss:$16 sps:$4 sm:$0xff]   ;;  %v12094_v52 = vld [vmem:[%s12476_s28 + $0x1dac] ss:$16 sps:$4 sm:$0xff]  }
 0x415   : > { %8709 = vmatpush2.bf16.msra.mxu0 %v12002_v6  ;;  %v12097_v6 = vld [vmem:[%s12476_s28 + $0x1fac] ss:$16 sps:$4 sm:$0xff]  }
 0x416   : > { %8752 = vmatpush2.bf16.msra.mxu1 %v12005_v24  ;;  %8710 = vmatprep.subr.bf16.mxu0 %v12010_v2  ;;  %v12092_v24 = vld [vmem:[%s12476_s28 + $0x1da8] ss:$16 sps:$4 sm:$0xff]  }
 0x417   : > { %8753 = vmatprep.subr.bf16.mxu1 %v12013_v50  ;;  %v12095_v2 = vld [vmem:[%s12476_s28 + $0x1fa8] ss:$16 sps:$4 sm:$0xff]   ;;  %v12100_v50 = vld [vmem:[%s12476_s28 + $0x1d8c] ss:$16 sps:$4 sm:$0xff]  }
 0x419   : > { %8711 = vmatpush2.bf16.msra.mxu0 %v12008_v56  ;;  %v12103_v56 = vld [vmem:[%s12476_s28 + $0x1f8c] ss:$16 sps:$4 sm:$0xff]  }
 0x41a   : > { %8754 = vmatpush2.bf16.msra.mxu1 %v12011_v39  ;;  %8712 = vmatprep.subr.bf16.mxu0 %v12016_v8  ;;  %v12098_v39 = vld [vmem:[%s12476_s28 + $0x1d88] ss:$16 sps:$4 sm:$0xff]  }
 0x41b   : > { %8755 = vmatprep.subr.bf16.mxu1 %v12019_v53  ;;  %v12101_v8 = vld [vmem:[%s12476_s28 + $0x1f88] ss:$16 sps:$4 sm:$0xff]   ;;  %v12106_v53 = vld [vmem:[%s12476_s28 + $0x1d6c] ss:$16 sps:$4 sm:$0xff]  }
 0x41d   : > { %8713 = vmatpush2.bf16.msra.mxu0 %v12014_v3  ;;  %v12109_v3 = vld [vmem:[%s12476_s28 + $0x1f6c] ss:$16 sps:$4 sm:$0xff]  }
 0x41e   : > { %8756 = vmatpush2.bf16.msra.mxu1 %v12017_v14  ;;  %8714 = vmatprep.subr.bf16.mxu0 %v12022_v25  ;;  %v12104_v14 = vld [vmem:[%s12476_s28 + $0x1d68] ss:$16 sps:$4 sm:$0xff]  }
 0x41f   : > { %8757 = vmatprep.subr.bf16.mxu1 %v12025_v51  ;;  %v12107_v25 = vld [vmem:[%s12476_s28 + $0x1f68] ss:$16 sps:$4 sm:$0xff]   ;;  %v12112_v51 = vld [vmem:[%s12476_s28 + $0x1d4c] ss:$16 sps:$4 sm:$0xff]  }
 0x421   : > { %8715 = vmatpush2.bf16.msra.mxu0 %v12020_v38  ;;  %v12115_v38 = vld [vmem:[%s12476_s28 + $0x1f4c] ss:$16 sps:$4 sm:$0xff]  }
 0x422   : > { %8758 = vmatpush2.bf16.msra.mxu1 %v12023_v62  ;;  %8716 = vmatprep.subr.bf16.mxu0 %v12028_v46  ;;  %v12110_v62 = vld [vmem:[%s12476_s28 + $0x1d48] ss:$16 sps:$4 sm:$0xff]  }
 0x423   : > { %8759 = vmatprep.subr.bf16.mxu1 %v12031_v4  ;;  %v12113_v46 = vld [vmem:[%s12476_s28 + $0x1f48] ss:$16 sps:$4 sm:$0xff]   ;;  %v12118_v4 = vld [vmem:[%s12476_s28 + $0x1d2c] ss:$16 sps:$4 sm:$0xff]  }
 0x425   : > { %8717 = vmatpush2.bf16.msra.mxu0 %v12026_v54  ;;  %v12121_v54 = vld [vmem:[%s12476_s28 + $0x1f2c] ss:$16 sps:$4 sm:$0xff]  }
 0x426   : > { %8760 = vmatpush2.bf16.msra.mxu1 %v12029_v57  ;;  %8772 = vmatprep.subr.bf16.mxu0 %v12034_v55  ;;  %v12116_v57 = vld [vmem:[%s12476_s28 + $0x1d28] ss:$16 sps:$4 sm:$0xff]  }
 0x427   : > { %8815 = vmatprep.subr.bf16.mxu1 %v12037_v58  ;;  %v12119_v55 = vld [vmem:[%s12476_s28 + $0x1f28] ss:$16 sps:$4 sm:$0xff]   ;;  %v12124_v58 = vld [vmem:[%s12476_s28 + $0x1d0c] ss:$16 sps:$4 sm:$0xff]  }
 0x428   : > { %8719 = vmatmul.mubr.bf16.vlgmr.msra.gmra.mxu0 %v12282_v12  ;;  %v12133_v12 = vld [vmem:[%s12476_s28 + $0x22ec] ss:$16 sps:$4 sm:$0xff]  }
 0x429   : > { %8762 = vmatmul.mubr.bf16.vlgmr.msra.gmra.mxu1 %v12283_v63  ;;  %8773 = vmatpush1.bf16.msra.mxu0 %v12032_v59  ;;  %v12127_v59 = vld [vmem:[%s12476_s28 + $0x1f0c] ss:$16 sps:$4 sm:$0xff]   ;;  %v12128_v63 = vld [vmem:[%s12476_s28 + $0x20e8] ss:$16 sps:$4 sm:$0xff]  }
 0x42a   : > { %8816 = vmatpush1.bf16.msra.mxu1 %v12035_v60  ;;  %8774 = vmatprep.subr.bf16.mxu0 %v12040_v9  ;;  %v12122_v60 = vld [vmem:[%s12476_s28 + $0x1d08] ss:$16 sps:$4 sm:$0xff]  }
 0x42b   : > { %8817 = vmatprep.subr.bf16.mxu1 %v12043_v20  ;;  %8804 = vmatprep.mubr.bf16.mxu0 %v12284_v42  ;;  %v12125_v9 = vld [vmem:[%s12476_s28 + $0x1f08] ss:$16 sps:$4 sm:$0xff]   ;;  %v12130_v20 = vld [vmem:[%s12476_s28 + $0x20ec] ss:$16 sps:$4 sm:$0xff]  }
 0x42c   : > { %8847 = vmatprep.mubr.bf16.mxu1 %v12285_v48  ;;  %v12287_v42 = vld [vmem:[%s14077_s0 + $0x78] ss:$144 sps:$4 sm:$0xff]  }
 0x42d   : > { %8775 = vmatpush1.bf16.msra.mxu0 %v12038_v5  ;;  %v12131_v5 = vld [vmem:[%s12476_s28 + $0x22e8] ss:$16 sps:$4 sm:$0xff]  }
 0x42e   : > { %8818 = vmatpush1.bf16.msra.mxu1 %v12041_v27  ;;  %8776 = vmatprep.subr.bf16.mxu0 %v12046_v13  ;;  %v12136_v27 = vld [vmem:[%s12476_s28 + $0x20cc] ss:$16 sps:$4 sm:$0xff]   ;;  %v12134_v48 = vld [vmem:[%s12476_s28 + $0x20c8] ss:$16 sps:$4 sm:$0xff]  }
 0x42f   : > { %8819 = vmatprep.subr.bf16.mxu1 %v12049_v15  ;;  %v12139_v13 = vld [vmem:[%s12476_s28 + $0x22cc] ss:$16 sps:$4 sm:$0xff]   ;;  %v12286_v15 = vld [vmem:[%s14077_s0 + $0x70] ss:$144 sps:$4 sm:$0xff]  }
 0x431   : > { %8777 = vmatpush1.bf16.msra.mxu0 %v12044_v22  ;;  %v12137_v22 = vld [vmem:[%s12476_s28 + $0x22c8] ss:$16 sps:$4 sm:$0xff]  }
 0x432   : > { %8820 = vmatpush1.bf16.msra.mxu1 %v12047_v28  ;;  %8778 = vmatprep.subr.bf16.mxu0 %v12052_v7  ;;  %v12142_v28 = vld [vmem:[%s12476_s28 + $0x20ac] ss:$16 sps:$4 sm:$0xff]  }
 0x433   : > { %8821 = vmatprep.subr.bf16.mxu1 %v12055_v10  ;;  %v12145_v7 = vld [vmem:[%s12476_s28 + $0x22ac] ss:$16 sps:$4 sm:$0xff]   ;;  %v12288_v10 = vld [vmem:[%s14077_s0 + $0x84] ss:$144 sps:$4 sm:$0xff]  }
 0x435   : > { %8779 = vmatpush1.bf16.msra.mxu0 %v12050_v30  ;;  %v12289_v30 = vld [vmem:[%s14077_s0 + $0x8c] ss:$144 sps:$4 sm:$0xff]  }
 0x436   : > { %8822 = vmatpush1.bf16.msra.mxu1 %v12053_v11  ;;  %8780 = vmatprep.subr.bf16.mxu0 %v12058_v61  ;;  %v12140_v11 = vld [vmem:[%s12476_s28 + $0x20a8] ss:$16 sps:$4 sm:$0xff]  }
 0x437   : > { %8823 = vmatprep.subr.bf16.mxu1 %v12061_v49  ;;  %v12143_v61 = vld [vmem:[%s12476_s28 + $0x22a8] ss:$16 sps:$4 sm:$0xff]   ;;  %v12148_v49 = vld [vmem:[%s12476_s28 + $0x208c] ss:$16 sps:$4 sm:$0xff]  }
 0x439   : > { %8781 = vmatpush1.bf16.msra.mxu0 %v12056_v16  ;;  %v12151_v16 = vld [vmem:[%s12476_s28 + $0x228c] ss:$16 sps:$4 sm:$0xff]  }
 0x43a   : > { %8824 = vmatpush1.bf16.msra.mxu1 %v12059_v17  ;;  %8782 = vmatprep.subr.bf16.mxu0 %v12064_v19  ;;  %v12146_v17 = vld [vmem:[%s12476_s28 + $0x2088] ss:$16 sps:$4 sm:$0xff]  }
 0x43b   : > { %8825 = vmatprep.subr.bf16.mxu1 %v12067_v21  ;;  %v12149_v19 = vld [vmem:[%s12476_s28 + $0x2288] ss:$16 sps:$4 sm:$0xff]   ;;  %v12154_v21 = vld [vmem:[%s12476_s28 + $0x206c] ss:$16 sps:$4 sm:$0xff]  }
 0x43d   : > { %8783 = vmatpush1.bf16.msra.mxu0 %v12062_v23  ;;  %v12157_v23 = vld [vmem:[%s12476_s28 + $0x226c] ss:$16 sps:$4 sm:$0xff]  }
 0x43e   : > { %8826 = vmatpush1.bf16.msra.mxu1 %v12065_v29  ;;  %8784 = vmatprep.subr.bf16.mxu0 %v12070_v40  ;;  %v12152_v29 = vld [vmem:[%s12476_s28 + $0x2068] ss:$16 sps:$4 sm:$0xff]  }
 0x43f   : > { %8827 = vmatprep.subr.bf16.mxu1 %v12073_v0  ;;  %v12155_v40 = vld [vmem:[%s12476_s28 + $0x2268] ss:$16 sps:$4 sm:$0xff]   ;;  %v12160_v0 = vld [vmem:[%s12476_s28 + $0x204c] ss:$16 sps:$4 sm:$0xff]  }
 0x441   : > { %8785 = vmatpush1.bf16.msra.mxu0 %v12068_v33  ;;  %v12163_v33 = vld [vmem:[%s12476_s28 + $0x224c] ss:$16 sps:$4 sm:$0xff]  }
 0x442   : > { %8828 = vmatpush1.bf16.msra.mxu1 %v12071_v43  ;;  %8786 = vmatprep.subr.bf16.mxu0 %v12076_v34  ;;  %v12158_v43 = vld [vmem:[%s12476_s28 + $0x2048] ss:$16 sps:$4 sm:$0xff]  }
 0x443   : > { %8829 = vmatprep.subr.bf16.mxu1 %v12079_v47  ;;  %v12161_v34 = vld [vmem:[%s12476_s28 + $0x2248] ss:$16 sps:$4 sm:$0xff]   ;;  %v12166_v47 = vld [vmem:[%s12476_s28 + $0x202c] ss:$16 sps:$4 sm:$0xff]  }
 0x445   : > { %8787 = vmatpush1.bf16.msra.mxu0 %v12074_v18  ;;  %v12169_v18 = vld [vmem:[%s12476_s28 + $0x222c] ss:$16 sps:$4 sm:$0xff]  }
 0x446   : > { %8830 = vmatpush1.bf16.msra.mxu1 %v12077_v1  ;;  %8788 = vmatprep.subr.bf16.mxu0 %v12082_v44  ;;  %v12164_v1 = vld [vmem:[%s12476_s28 + $0x2028] ss:$16 sps:$4 sm:$0xff]  }
 0x447   : > { %8831 = vmatprep.subr.bf16.mxu1 %v12085_v31  ;;  %v12167_v44 = vld [vmem:[%s12476_s28 + $0x2228] ss:$16 sps:$4 sm:$0xff]   ;;  %v12172_v31 = vld [vmem:[%s12476_s28 + $0x200c] ss:$16 sps:$4 sm:$0xff]  }
 0x449   : > { %8789 = vmatpush2.bf16.msra.mxu0 %v12080_v26  ;;  %v12175_v26 = vld [vmem:[%s12476_s28 + $0x220c] ss:$16 sps:$4 sm:$0xff]  }
 0x44a   : > { %8832 = vmatpush2.bf16.msra.mxu1 %v12083_v32  ;;  %8790 = vmatprep.subr.bf16.mxu0 %v12088_v35  ;;  %v12170_v32 = vld [vmem:[%s12476_s28 + $0x2008] ss:$16 sps:$4 sm:$0xff]  }
 0x44b   : > { %8833 = vmatprep.subr.bf16.mxu1 %v12091_v41  ;;  %v12173_v35 = vld [vmem:[%s12476_s28 + $0x2208] ss:$16 sps:$4 sm:$0xff]   ;;  %v12178_v41 = vld [vmem:[%s12476_s28 + $0x21ec] ss:$16 sps:$4 sm:$0xff]  }
 0x44d   : > { %8791 = vmatpush2.bf16.msra.mxu0 %v12086_v45  ;;  %v12181_v45 = vld [vmem:[%s12476_s28 + $0x23ec] ss:$16 sps:$4 sm:$0xff]  }
 0x44e   : > { %8834 = vmatpush2.bf16.msra.mxu1 %v12089_v36  ;;  %8792 = vmatprep.subr.bf16.mxu0 %v12094_v52  ;;  %v12176_v36 = vld [vmem:[%s12476_s28 + $0x21e8] ss:$16 sps:$4 sm:$0xff]  }
 0x44f   : > { %8835 = vmatprep.subr.bf16.mxu1 %v12097_v6  ;;  %v12179_v52 = vld [vmem:[%s12476_s28 + $0x23e8] ss:$16 sps:$4 sm:$0xff]   ;;  %v12184_v6 = vld [vmem:[%s12476_s28 + $0x21cc] ss:$16 sps:$4 sm:$0xff]  }
 0x451   : > { %8793 = vmatpush2.bf16.msra.mxu0 %v12092_v24  ;;  %v12187_v24 = vld [vmem:[%s12476_s28 + $0x23cc] ss:$16 sps:$4 sm:$0xff]  }
 0x452   : > { %8836 = vmatpush2.bf16.msra.mxu1 %v12095_v2  ;;  %8794 = vmatprep.subr.bf16.mxu0 %v12100_v50  ;;  %v12182_v2 = vld [vmem:[%s12476_s28 + $0x21c8] ss:$16 sps:$4 sm:$0xff]  }
 0x453   : > { %8837 = vmatprep.subr.bf16.mxu1 %v12103_v56  ;;  %v12185_v50 = vld [vmem:[%s12476_s28 + $0x23c8] ss:$16 sps:$4 sm:$0xff]   ;;  %v12190_v56 = vld [vmem:[%s12476_s28 + $0x21ac] ss:$16 sps:$4 sm:$0xff]  }
 0x455   : > { %8795 = vmatpush2.bf16.msra.mxu0 %v12098_v39  ;;  %v12193_v39 = vld [vmem:[%s12476_s28 + $0x23ac] ss:$16 sps:$4 sm:$0xff]  }
 0x456   : > { %8838 = vmatpush2.bf16.msra.mxu1 %v12101_v8  ;;  %8796 = vmatprep.subr.bf16.mxu0 %v12106_v53  ;;  %v12188_v8 = vld [vmem:[%s12476_s28 + $0x21a8] ss:$16 sps:$4 sm:$0xff]  }
 0x457   : > { %8839 = vmatprep.subr.bf16.mxu1 %v12109_v3  ;;  %v12191_v53 = vld [vmem:[%s12476_s28 + $0x23a8] ss:$16 sps:$4 sm:$0xff]   ;;  %v12196_v3 = vld [vmem:[%s12476_s28 + $0x218c] ss:$16 sps:$4 sm:$0xff]  }
 0x459   : > { %8797 = vmatpush2.bf16.msra.mxu0 %v12104_v14  ;;  %v12199_v14 = vld [vmem:[%s12476_s28 + $0x238c] ss:$16 sps:$4 sm:$0xff]  }
 0x45a   : > { %8840 = vmatpush2.bf16.msra.mxu1 %v12107_v25  ;;  %8798 = vmatprep.subr.bf16.mxu0 %v12112_v51  ;;  %v12194_v25 = vld [vmem:[%s12476_s28 + $0x2188] ss:$16 sps:$4 sm:$0xff]  }
 0x45b   : > { %8841 = vmatprep.subr.bf16.mxu1 %v12115_v38  ;;  %v12197_v51 = vld [vmem:[%s12476_s28 + $0x2388] ss:$16 sps:$4 sm:$0xff]   ;;  %v12202_v38 = vld [vmem:[%s12476_s28 + $0x216c] ss:$16 sps:$4 sm:$0xff]  }
 0x45d   : > { %8799 = vmatpush2.bf16.msra.mxu0 %v12110_v62  ;;  %v12205_v62 = vld [vmem:[%s12476_s28 + $0x236c] ss:$16 sps:$4 sm:$0xff]  }
 0x45e   : > { %8842 = vmatpush2.bf16.msra.mxu1 %v12113_v46  ;;  %8800 = vmatprep.subr.bf16.mxu0 %v12118_v4  ;;  %v12200_v46 = vld [vmem:[%s12476_s28 + $0x2168] ss:$16 sps:$4 sm:$0xff]  }
 0x45f   : > { %8843 = vmatprep.subr.bf16.mxu1 %v12121_v54  ;;  %v12203_v4 = vld [vmem:[%s12476_s28 + $0x2368] ss:$16 sps:$4 sm:$0xff]   ;;  %v12208_v54 = vld [vmem:[%s12476_s28 + $0x214c] ss:$16 sps:$4 sm:$0xff]  }
 0x461   : > { %8801 = vmatpush2.bf16.msra.mxu0 %v12116_v57  ;;  %v12211_v57 = vld [vmem:[%s12476_s28 + $0x234c] ss:$16 sps:$4 sm:$0xff]  }
 0x462   : > { %8844 = vmatpush2.bf16.msra.mxu1 %v12119_v55  ;;  %8802 = vmatprep.subr.bf16.mxu0 %v12124_v58  ;;  %v12206_v55 = vld [vmem:[%s12476_s28 + $0x2148] ss:$16 sps:$4 sm:$0xff]  }
 0x463   : > { %8845 = vmatprep.subr.bf16.mxu1 %v12127_v59  ;;  %v12209_v58 = vld [vmem:[%s12476_s28 + $0x2348] ss:$16 sps:$4 sm:$0xff]   ;;  %v12214_v59 = vld [vmem:[%s12476_s28 + $0x212c] ss:$16 sps:$4 sm:$0xff]  }
 0x465   : > { %8803 = vmatpush2.bf16.msra.mxu0 %v12122_v60  ;;  %v12217_v60 = vld [vmem:[%s12476_s28 + $0x232c] ss:$16 sps:$4 sm:$0xff]  }
 0x466   : > { %8846 = vmatpush2.bf16.msra.mxu1 %v12125_v9  ;;  %8858 = vmatprep.subr.bf16.mxu0 %v12130_v20  ;;  %v12212_v9 = vld [vmem:[%s12476_s28 + $0x2128] ss:$16 sps:$4 sm:$0xff]  }
 0x467   : > { %8901 = vmatprep.subr.bf16.mxu1 %v12133_v12  ;;  %v12215_v20 = vld [vmem:[%s12476_s28 + $0x2328] ss:$16 sps:$4 sm:$0xff]   ;;  %v12220_v12 = vld [vmem:[%s12476_s28 + $0x210c] ss:$16 sps:$4 sm:$0xff]  }
 0x468   : > { %8805 = vmatmul.mubr.bf16.vlgmr.msra.gmra.mxu0 %v12286_v15  ;;  %v12291_v15 = vld [vmem:[%s14077_s0 + $0x88] ss:$144 sps:$4 sm:$0xff]  }
 0x469   : > { %8848 = vmatmul.mubr.bf16.vlgmr.msra.gmra.mxu1 %v12287_v42  ;;  %8859 = vmatpush1.bf16.msra.mxu0 %v12128_v63  ;;  %v12223_v63 = vld [vmem:[%s12476_s28 + $0x230c] ss:$16 sps:$4 sm:$0xff]   ;;  %v8204_v42 = vpop.f32.mrf.mxu0 }
 0x46a   : > { %8902 = vmatpush1.bf16.msra.mxu1 %v12131_v5  ;;  %8860 = vmatprep.subr.bf16.mxu0 %v12136_v27  ;;  %v12218_v5 = vld [vmem:[%s12476_s28 + $0x2108] ss:$16 sps:$4 sm:$0xff]  }
 0x46b   : > { %8903 = vmatprep.subr.bf16.mxu1 %v12139_v13  ;;  %8890 = vmatprep.mubr.bf16.mxu0 %v12288_v10  ;;  %v12221_v27 = vld [vmem:[%s12476_s28 + $0x2308] ss:$16 sps:$4 sm:$0xff]   ;;  %v12290_v13 = vld [vmem:[%s14077_s0 + $0x80] ss:$144 sps:$4 sm:$0xff]   ;;  %s10381_s28 = sshll.u32 (%p12447_p9), %s12363_s15, 4 }
 0x46c   : > { %8933 = vmatprep.mubr.bf16.mxu1 %v12289_v30  ;;  %s9040_s29 = scalar_lea.vmem (%p12447_p9), %s14080_s3, %s10381_s28 }
 0x46d   : > { %8861 = vmatpush1.bf16.msra.mxu0 %v12134_v48  ;;  %v8247_v48 = vpop.f32.mrf.mxu1 }
 0x46e   : > { %8904 = vmatpush1.bf16.msra.mxu1 %v12137_v22  ;;  %8862 = vmatprep.subr.bf16.mxu0 %v12142_v28  ;;  %v8206_v22 = vpop.f32.mrf.mxu0 }
 0x46f   : > { %8905 = vmatprep.subr.bf16.mxu1 %v12145_v7  ;;  %v8249_v28 = vpop.f32.mrf.mxu1 }
 0x470   : > { %v8208_v7 = vpop.f32.mrf.mxu0 }
 0x471   : > { %8863 = vmatpush1.bf16.msra.mxu0 %v12140_v11  ;;  %v8251_v10 = vpop.f32.mrf.mxu1 }
 0x472   : > { %8906 = vmatpush1.bf16.msra.mxu1 %v12143_v61  ;;  %8864 = vmatprep.subr.bf16.mxu0 %v12148_v49  ;;  %v8210_v30 = vpop.f32.mrf.mxu0 }
 0x473   : > { %8907 = vmatprep.subr.bf16.mxu1 %v12151_v16  ;;  %v8253_v11 = vpop.f32.mrf.mxu1 }
 0x474   : > { %v8290_v61 = vpop.f32.mrf.mxu0 }
 0x475   : > { %8865 = vmatpush1.bf16.msra.mxu0 %v12146_v17  ;;  %v8333_v49 = vpop.f32.mrf.mxu1 }
 0x476   : > { %8908 = vmatpush1.bf16.msra.mxu1 %v12149_v19  ;;  %8866 = vmatprep.subr.bf16.mxu0 %v12154_v21  ;;  %v8292_v16 = vpop.f32.mrf.mxu0 }
 0x477   : > { %8909 = vmatprep.subr.bf16.mxu1 %v12157_v23  ;;  %v8335_v17 = vpop.f32.mrf.mxu1 }
 0x478   : > { %v8294_v19 = vpop.f32.mrf.mxu0 }
 0x479   : > { %8867 = vmatpush1.bf16.msra.mxu0 %v12152_v29  ;;  %v8337_v21 = vpop.f32.mrf.mxu1 }
 0x47a   : > { %8910 = vmatpush1.bf16.msra.mxu1 %v12155_v40  ;;  %8868 = vmatprep.subr.bf16.mxu0 %v12160_v0  ;;  %v8296_v23 = vpop.f32.mrf.mxu0 }
 0x47b   : > { %8911 = vmatprep.subr.bf16.mxu1 %v12163_v33  ;;  %v8339_v29 = vpop.f32.mrf.mxu1 }
 0x47c   : > { %v8376_v40 = vpop.f32.mrf.mxu0 }
 0x47d   : > { %8869 = vmatpush1.bf16.msra.mxu0 %v12158_v43  ;;  %v8419_v0 = vpop.f32.mrf.mxu1 }
 0x47e   : > { %8912 = vmatpush1.bf16.msra.mxu1 %v12161_v34  ;;  %8870 = vmatprep.subr.bf16.mxu0 %v12166_v47  ;;  %v8378_v33 = vpop.f32.mrf.mxu0 }
 0x47f   : > { %8913 = vmatprep.subr.bf16.mxu1 %v12169_v18  ;;  %v8421_v43 = vpop.f32.mrf.mxu1 }
 0x480   : > { %v8380_v34 = vpop.f32.mrf.mxu0 }
 0x481   : > { %8871 = vmatpush1.bf16.msra.mxu0 %v12164_v1  ;;  %v8423_v47 = vpop.f32.mrf.mxu1 }
 0x482   : > { %8914 = vmatpush1.bf16.msra.mxu1 %v12167_v44  ;;  %8872 = vmatprep.subr.bf16.mxu0 %v12172_v31  ;;  %v8382_v18 = vpop.f32.mrf.mxu0 }
 0x483   : > { %8915 = vmatprep.subr.bf16.mxu1 %v12175_v26  ;;  %v8425_v1 = vpop.f32.mrf.mxu1 }
 0x484   : > { %v8462_v44 = vpop.f32.mrf.mxu0 }
 0x485   : > { %8873 = vmatpush1.bf16.msra.mxu0 %v12170_v32  ;;  %v8505_v31 = vpop.f32.mrf.mxu1 }
 0x486   : > { %8916 = vmatpush1.bf16.msra.mxu1 %v12173_v35  ;;  %8874 = vmatprep.subr.bf16.mxu0 %v12178_v41  ;;  %v8464_v26 = vpop.f32.mrf.mxu0 }
 0x487   : > { %8917 = vmatprep.subr.bf16.mxu1 %v12181_v45  ;;  %v8507_v32 = vpop.f32.mrf.mxu1 }
 0x488   : > { %v8466_v35 = vpop.f32.mrf.mxu0 }
 0x489   : > { %8875 = vmatpush2.bf16.msra.mxu0 %v12176_v36  ;;  %v8509_v41 = vpop.f32.mrf.mxu1 }
 0x48a   : > { %8918 = vmatpush2.bf16.msra.mxu1 %v12179_v52  ;;  %8876 = vmatprep.subr.bf16.mxu0 %v12184_v6  ;;  %v8468_v45 = vpop.f32.mrf.mxu0 }
 0x48b   : > { %8919 = vmatprep.subr.bf16.mxu1 %v12187_v24  ;;  %v8511_v36 = vpop.f32.mrf.mxu1  ;;  %v1446_v24 = vsub.s32 2, %v13401_v37 }
 0x48c   : > { %v8548_v52 = vpop.f32.mrf.mxu0 }
 0x48d   : > { %8877 = vmatpush2.bf16.msra.mxu0 %v12182_v2  ;;  %v8591_v6 = vpop.f32.mrf.mxu1  ;;  %v1450_v2 = vsub.s32 3, %v13401_v37 }
 0x48e   : > { %8920 = vmatpush2.bf16.msra.mxu1 %v12185_v50  ;;  %8878 = vmatprep.subr.bf16.mxu0 %v12190_v56  ;;  %v8550_v50 = vpop.f32.mrf.mxu0 }
 0x48f   : > { %8921 = vmatprep.subr.bf16.mxu1 %v12193_v39  ;;  %v8593_v56 = vpop.f32.mrf.mxu1  ;;  %v12292_v39 = vld [vmem:[%s13414_s12] sm:$0xf] }
 0x491   : > { %8879 = vmatpush2.bf16.msra.mxu0 %v12188_v8  ;;  %v1447_v8 = vrot.slane %v12292_v39, %v1446_v24 }
 0x492   : > { %8922 = vmatpush2.bf16.msra.mxu1 %v12191_v53  ;;  %8880 = vmatprep.subr.bf16.mxu0 %v12196_v3  ;;  %v1451_v53 = vrot.slane %v12292_v39, %v1450_v2  ;;  %v8552_v3 = vpop.f32.mrf.mxu0 }
 0x493   : > { %8923 = vmatprep.subr.bf16.mxu1 %v12199_v14  ;;  %v8595_v14 = vpop.f32.mrf.mxu1 }
 0x495   : > { %8881 = vmatpush2.bf16.msra.mxu0 %v12194_v25  ;;  %v8205_v25 = vadd.f32 %v8204_v42, %v1447_v8 }
 0x496   : > { %8924 = vmatpush2.bf16.msra.mxu1 %v12197_v51  ;;  %8882 = vmatprep.subr.bf16.mxu0 %v12202_v38  ;;  %v8207_v51 = vadd.f32 %v8206_v22, %v1451_v53  ;;  %v8554_v38 = vpop.f32.mrf.mxu0 }
 0x497   : > { %8925 = vmatprep.subr.bf16.mxu1 %v12205_v62  ;;  %v8597_v62 = vpop.f32.mrf.mxu1 }
 0x499   : > { %8883 = vmatpush2.bf16.msra.mxu0 %v12200_v46  ;;  %v8248_v46 = vadd.f32 %v8247_v48, %v8205_v25 }
 0x49a   : > { %8926 = vmatpush2.bf16.msra.mxu1 %v12203_v4  ;;  %8884 = vmatprep.subr.bf16.mxu0 %v12208_v54  ;;  %v8209_v4 = vadd.f32 %v8208_v7, %v1447_v8 }
 0x49b   : > { %8927 = vmatprep.subr.bf16.mxu1 %v12211_v57 }
 0x49d   : > { %8885 = vmatpush2.bf16.msra.mxu0 %v12206_v55  ;;  %v8250_v55 = vadd.f32 %v8249_v28, %v8207_v51 }
 0x49e   : > { %8928 = vmatpush2.bf16.msra.mxu1 %v12209_v58  ;;  %8886 = vmatprep.subr.bf16.mxu0 %v12214_v59  ;;  %v8211_v58 = vadd.f32 %v8210_v30, %v1451_v53  ;;  %v8291_v59 = vadd.f32 %v8290_v61, %v8248_v46 }
 0x49f   : > { %8929 = vmatprep.subr.bf16.mxu1 %v12217_v60  ;;  %v8252_v60 = vadd.f32 %v8251_v10, %v8209_v4  ;;  %v8293_v37 = vadd.f32 %v8292_v16, %v8250_v55 }
 0x4a1   : > { %8887 = vmatpush2.bf16.msra.mxu0 %v12212_v9 }
 0x4a2   : > { %8930 = vmatpush2.bf16.msra.mxu1 %v12215_v20  ;;  %8888 = vmatprep.subr.bf16.mxu0 %v12220_v12  ;;  %v8254_v12 = vadd.f32 %v8253_v11, %v8211_v58 }
 0x4a3   : > { %8931 = vmatprep.subr.bf16.mxu1 %v12223_v63  ;;  %v8334_v63 = vadd.f32 %v8333_v49, %v8291_v59 }
 0x4a5   : > { %8889 = vmatpush2.bf16.msra.mxu0 %v12218_v5  ;;  %v8295_v5 = vadd.f32 %v8294_v19, %v8252_v60 }
 0x4a6   : > { %8932 = vmatpush2.bf16.msra.mxu1 %v12221_v27  ;;  %v8336_v27 = vadd.f32 %v8335_v17, %v8293_v37 }
 0x4a7   : > { %v8338_v24 = vadd.f32 %v8337_v21, %v8295_v5 }
 0x4a8   : > { %8891 = vmatmul.mubr.bf16.vlgmr.msra.gmra.mxu0 %v12290_v13  ;;  %v8634_v54 = vpop.f32.mrf.mxu0  ;;  %v8297_v13 = vadd.f32 %v8296_v23, %v8254_v12  ;;  %v8379_v48 = vadd.f32 %v8378_v33, %v8336_v27 }
 0x4a9   : > { %8934 = vmatmul.mubr.bf16.vlgmr.msra.gmra.mxu1 %v12291_v15  ;;  %v8677_v57 = vpop.f32.mrf.mxu1  ;;  %v8377_v15 = vadd.f32 %v8376_v40, %v8334_v63  ;;  %v8381_v39 = vadd.f32 %v8380_v34, %v8338_v24 }
 0x4aa   : > { %v8636_v9 = vpop.f32.mrf.mxu0  ;;  %v8340_v7 = vadd.f32 %v8339_v29, %v8297_v13  ;;  %v8422_v61 = vadd.f32 %v8421_v43, %v8379_v48 }
 0x4ab   : > { %v8679_v20 = vpop.f32.mrf.mxu1  ;;  %v8420_v2 = vadd.f32 %v8419_v0, %v8377_v15  ;;  %v8424_v11 = vadd.f32 %v8423_v47, %v8381_v39 }
 0x4ac   : > { %v8638_v42 = vpop.f32.mrf.mxu0  ;;  %v8383_v10 = vadd.f32 %v8382_v18, %v8340_v7  ;;  %v8465_v49 = vadd.f32 %v8464_v26, %v8422_v61 }
 0x4ad   : > { %v8681_v22 = vpop.f32.mrf.mxu1  ;;  %v8463_v16 = vadd.f32 %v8462_v44, %v8420_v2  ;;  %v8467_v23 = vadd.f32 %v8466_v35, %v8424_v11 }
 0x4ae   : > { %v8640_v28 = vpop.f32.mrf.mxu0  ;;  %v8426_v19 = vadd.f32 %v8425_v1, %v8383_v10  ;;  %v8508_v51 = vadd.f32 %v8507_v32, %v8465_v49 }
 0x4af   : > { %v8683_v30 = vpop.f32.mrf.mxu1  ;;  %v8506_v17 = vadd.f32 %v8505_v31, %v8463_v16  ;;  %v8510_v29 = vadd.f32 %v8509_v41, %v8467_v23 }
 0x4b0   : > { %v8469_v21 = vadd.f32 %v8468_v45, %v8426_v19  ;;  %v8551_v0 = vadd.f32 %v8550_v50, %v8508_v51 }
 0x4b1   : > { %v8549_v33 = vadd.f32 %v8548_v52, %v8506_v17  ;;  %v8553_v18 = vadd.f32 %v8552_v3, %v8510_v29 }
 0x4b2   : > { %v8512_v4 = vadd.f32 %v8511_v36, %v8469_v21  ;;  %v8594_v44 = vadd.f32 %v8593_v56, %v8551_v0 }
 0x4b3   : > { %v8592_v43 = vadd.f32 %v8591_v6, %v8549_v33  ;;  %v8596_v1 = vadd.f32 %v8595_v14, %v8553_v18 }
 0x4b4   : > { %v8555_v55 = vadd.f32 %v8554_v38, %v8512_v4  ;;  %v8637_v31 = vadd.f32 %v8636_v9, %v8594_v44 }
 0x4b5   : > { %v8635_v58 = vadd.f32 %v8634_v54, %v8592_v43  ;;  %v8639_v45 = vadd.f32 %v8638_v42, %v8596_v1 }
 0x4b6   : > { %v8598_v60 = vadd.f32 %v8597_v62, %v8555_v55  ;;  %v8680_v52 = vadd.f32 %v8679_v20, %v8637_v31 }
 0x4b7   : > { %v8678_v32 = vadd.f32 %v8677_v57, %v8635_v58  ;;  %v8682_v36 = vadd.f32 %v8681_v22, %v8639_v45 }
 0x4b8   : > { %v8641_v41 = vadd.f32 %v8640_v28, %v8598_v60 }
 0x4ba   : > { %v8684_v3 = vadd.f32 %v8683_v30, %v8641_v41 }
 0x4e8   : > { %v8720_v8 = vpop.f32.mrf.mxu0 }
 0x4e9   : > { %v8763_v53 = vpop.f32.mrf.mxu1  ;;  %v8721_v50 = vadd.f32 %v8720_v8, %v8678_v32 }
 0x4ea   : > { %v8722_v40 = vpop.f32.mrf.mxu0 }
 0x4eb   : > { %v8765_v25 = vpop.f32.mrf.mxu1  ;;  %v8723_v6 = vadd.f32 %v8722_v40, %v8680_v52  ;;  %v8764_v56 = vadd.f32 %v8763_v53, %v8721_v50  ;;  %v9053_v52 = vld [vmem:[%s13638_s22] sm:$0xff] (%p12447_p9)  ;;  %v9057_v50 = vld [vmem:[%s13638_s22 + $0x10] sm:$0xff] (%p12447_p9) }
 0x4ec   : > { %v8724_v34 = vpop.f32.mrf.mxu0  ;;  %9054 = vst [vmem:[%s9040_s29] sm:$0xff] (%p12447_p9), %v9053_v52  ;;  %9058 = vst [vmem:[%s9040_s29 + $0x20] sm:$0xff] (%p12447_p9), %v9057_v50 }
 0x4ed   : > { %v8767_v46 = vpop.f32.mrf.mxu1  ;;  %v8725_v38 = vadd.f32 %v8724_v34, %v8682_v36  ;;  %v8766_v5 = vadd.f32 %v8765_v25, %v8723_v6 }
 0x4ee   : > { %v8726_v47 = vpop.f32.mrf.mxu0 }
 0x4ef   : > { %v8769_v26 = vpop.f32.mrf.mxu1  ;;  %v8727_v14 = vadd.f32 %v8726_v47, %v8684_v3  ;;  %v8768_v27 = vadd.f32 %v8767_v46, %v8725_v38 }
 0x4f1   : > { %v8770_v15 = vadd.f32 %v8769_v26, %v8727_v14 }
 0x528   : > { %v8806_v35 = vpop.f32.mrf.mxu0 }
 0x529   : > { %v8849_v59 = vpop.f32.mrf.mxu1  ;;  %v8807_v9 = vadd.f32 %v8806_v35, %v8764_v56 }
 0x52a   : > { %v8808_v37 = vpop.f32.mrf.mxu0 }
 0x52b   : > { %v8851_v12 = vpop.f32.mrf.mxu1  ;;  %v8809_v13 = vadd.f32 %v8808_v37, %v8766_v5  ;;  %v8850_v20 = vadd.f32 %v8849_v59, %v8807_v9 }
 0x52c   : > { %v8810_v54 = vpop.f32.mrf.mxu0 }
 0x52d   : > { %v8853_v63 = vpop.f32.mrf.mxu1  ;;  %v8811_v42 = vadd.f32 %v8810_v54, %v8768_v27  ;;  %v8852_v7 = vadd.f32 %v8851_v12, %v8809_v13 }
 0x52e   : > { %v8812_v62 = vpop.f32.mrf.mxu0 }
 0x52f   : > { %v8855_v57 = vpop.f32.mrf.mxu1  ;;  %v8813_v22 = vadd.f32 %v8812_v62, %v8770_v15  ;;  %v8854_v30 = vadd.f32 %v8853_v63, %v8811_v42 }
 0x531   : > { %v8856_v53 = vadd.f32 %v8855_v57, %v8813_v22 }
 0x568   : > { %v8892_v24 = vpop.f32.mrf.mxu0 }
 0x569   : > { %v8935_v48 = vpop.f32.mrf.mxu1  ;;  %v8893_v2 = vadd.f32 %v8892_v24, %v8850_v20 }
 0x56a   : > { %v8894_v39 = vpop.f32.mrf.mxu0 }
 0x56b   : > { %v8937_v28 = vpop.f32.mrf.mxu1  ;;  %v8936_v61 = vadd.f32 %v8935_v48, %v8893_v2  ;;  %v8895_v10 = vadd.f32 %v8894_v39, %v8852_v7 }
 0x56c   : > { %v8896_v16 = vpop.f32.mrf.mxu0 }
 0x56d   : > { %v8939_v8 = vpop.f32.mrf.mxu1  ;;  %v10361_v11 = vmul.f32 -1.442695, %v8936_v61  ;;  %v8938_v49 = vadd.f32 %v8937_v28, %v8895_v10  ;;  %v8897_v19 = vadd.f32 %v8896_v16, %v8854_v30 }
 0x56e   : > { %v8898_v17 = vpop.f32.mrf.mxu0 }
 0x56f   : > { %12240 = vpow2.f32 %v10361_v11  ;;  %v10362_v23 = vmul.f32 -1.442695, %v8938_v49  ;;  %v8940_v40 = vadd.f32 %v8939_v8, %v8897_v19  ;;  %v8899_v25 = vadd.f32 %v8898_v17, %v8856_v53  ;;  %v8941_v51 = vpop.f32.mrf.mxu1 }
 0x571   : > { %12242 = vpow2.f32 %v10362_v23  ;;  %v10365_v21 = vmul.f32 -1.442695, %v8940_v40  ;;  %v8942_v33 = vadd.f32 %v8941_v51, %v8899_v25 }
 0x573   : > { %12244 = vpow2.f32 %v10365_v21  ;;  %v10366_v29 = vmul.f32 -1.442695, %v8942_v33 }
 0x575   : > { %12246 = vpow2.f32 %v10366_v29 }
 0x57c   : > { %v12241_v0 = vpop.eup %12240 }
 0x57d   : > { %v8970_v34 = vadd.f32 1.0, %v12241_v0 }
 0x57e   : > { %v12243_v46 = vpop.eup %12242 }
 0x57f   : > { %12248 = vrcp.f32 %v8970_v34  ;;  %v8971_v4 = vadd.f32 1.0, %v12243_v46 }
 0x580   : > { %v12245_v43 = vpop.eup %12244 }
 0x581   : > { %12250 = vrcp.f32 %v8971_v4  ;;  %v8974_v18 = vadd.f32 1.0, %v12245_v43 }
 0x582   : > { %v12247_v44 = vpop.eup %12246 }
 0x583   : > { %12252 = vrcp.f32 %v8974_v18  ;;  %v8975_v55 = vadd.f32 1.0, %v12247_v44 }
 0x585   : > { %12254 = vrcp.f32 %v8975_v55 }
 0x58c   : > { %v12249_v58 = vpop.eup %12248 }
 0x58d   : > { %v8994_v26 = vmul.f32 %v12249_v58, %v8936_v61 }
 0x58e   : > { %v12251_v47 = vpop.eup %12250 }
 0x58f   : > { %v8995_v1 = vmul.f32 %v12251_v47, %v8938_v49 }
 0x590   : > { %v12253_v31 = vpop.eup %12252 }
 0x591   : > { %v10378_v35 = vpack.c.bf16 %v8995_v1, %v8994_v26  ;;  %v8998_v60 = vmul.f32 %v12253_v31, %v8940_v40 }
 0x592   : > { %v12255_v59 = vpop.eup %12254 }
 0x593   : > { %9025 = vst [vmem:[%s13638_s22 + $0x8] sm:$0xff] %v10378_v35  ;;  %v8999_v32 = vmul.f32 %v12255_v59, %v8942_v33  ;;  %9034 = sbr.rel (!%p12447_p9) target bundleno = 1440 (0x5a0), region = 40 }
 0x595   : > { %v10380_v45 = vpack.c.bf16 %v8999_v32, %v8998_v60 }
 0x597   : > { %9027 = vst [vmem:[%s13638_s22 + $0x18] sm:$0xff] %v10380_v45 }
 0x59a   : > { %v9055_v41 = vld [vmem:[%s13638_s22 + $0x8] sm:$0xff] }
 0x59b   : > { %9056 = vst [vmem:[%s9040_s29 + $0x8] sm:$0xff] %v9055_v41 }
 0x59e   : > { %v9059_v37 = vld [vmem:[%s13638_s22 + $0x18] sm:$0xff] }
 0x59f   : > { %9060 = vst [vmem:[%s9040_s29 + $0x28] sm:$0xff] %v9059_v37 }
 0x5a0 PF: > { %s16_s17 = sadd.s32 1, %s12371_s17   ;;  %s14086_s12 = smov %s12355_s13 }
 0x5a1   : > { %p13_p9 = scmp.ge.s32.totalorder %s16_s17, 4   ;;  %s14087_s13 = smov %s12359_s14 }
 0x5a2   : > { %s14088_s14 = smov %s12445_s24  ;;  %s14089_s15 = smov %s12367_s16 }
 0x5a3   : > { %s14090_s16 = smov %s14092_s19  ;;  %15 = sbr.rel (!%p13_p9) target bundleno = 4 (0x4), region = 101 }
 0x5a8   :  { %9076 = vsyncpa [#allocation3], 1 }
 0x5a9   :  { %9078 = vsyncpa [#allocation3 + $0x1], 1 }

</bundles_post_ra>
